<compile_context>
chip_gen: v7x
topology: tpu7x:2x2x1
jax: 0.10.0
libtpu: 0.0.40
codegen_flags: <defaults>
</compile_context>

<pallas_src>
import functools
import math

import numpy as np
import jax
import jax.numpy as jnp
from jax import lax
from jax.experimental import pallas as pl
from jax.experimental.pallas import tpu as pltpu


# --------------------------- static network planning ------------------------ #

def _plan_network(model, in_channel, H, W):
    """Walk the model spec and derive the static shapes for the fused kernel.

    Inside the kernel an activation is a flat matrix [R, C]: row r = h*pitch + w
    holds the NHWC value at spatial (h, w).  Rows with w >= w_valid are junk that
    later stages never select (they stay finite, so the 0-weighted selection
    matmuls used for pooling compaction are exact).
    """
    plan = []
    C = in_channel
    h_valid, w_valid = H, W
    pitch = W                 # row pitch of the flat representation
    rows = H * W              # rows materialized; invariant rows >= (h-1)*pitch + w

    for module in model:
        name = str(module[0]).lower()
        if name == "conv2":
            oc, k = int(module[1]), int(module[2])
            defaults = (1, 0, 1, 1)            # stride, padding, dilation, groups
            for v, d in zip(list(module[3:7]), defaults):
                if v is not None and v != d:
                    # TODO(synk): non-default stride/padding/dilation/groups not wired up.
                    raise NotImplementedError("conv2 with non-default conv params")
            if len(module) >= 8 and module[7] is False:
                # TODO(synk): bias=False conv not wired up.
                raise NotImplementedError("conv2 without bias")
            max_off = (k - 1) * pitch + (k - 1)
            r_out = rows - max_off
            plan.append(dict(kind="conv", k=k, c_in=C, oc=oc,
                             pitch=pitch, r_out=r_out))
            C = oc
            h_valid, w_valid = h_valid - k + 1, w_valid - k + 1
            rows = r_out
        elif name in ("max2", "avg2"):
            k = int(module[1]) if len(module) > 1 and module[1] is not None else 2
            ph_rows = rows - (k - 1) * pitch - (k - 1)
            h2, w2 = h_valid // k, w_valid // k
            # 0/1 selection matrix that picks the stride-k pooling window origins.
            sel = np.zeros((h2 * w2, ph_rows), np.float32)
            for i in range(h2 * w2):
                sel[i, k * (i // w2) * pitch + k * (i % w2)] = 1.0
            plan.append(dict(kind="pool", mode="max" if name == "max2" else "avg",
                             k=k, pitch=pitch, ph_rows=ph_rows, sel=sel))
            h_valid, w_valid = h2, w2
            pitch = w2
            rows = h2 * w2
        elif name == "afun":
            plan.append(dict(kind="act", fn=str(module[1]).lower()))
        else:
            # TODO(synk): conv1/conv3 and 1-D/3-D pooling modules not implemented.
            raise Exception("Unknown module!")
    return plan, dict(rows=rows, pitch=pitch, h=h_valid, w=w_valid, c=C)


# ------------------------------ fused TPU kernel ---------------------------- #

def _make_fused_kernel(plan):
    """Build the kernel body (per batch element) from the static plan."""

    def kernel(x_ref, *refs):
        o_ref = refs[-1]
        params = refs[:-1]
        pi = 0
        act = x_ref[0]                              # [R0, C0], channels on lanes

        for lp in plan:
            if lp["kind"] == "conv":
                w_ref, b_ref = params[pi], params[pi + 1]
                pi += 2
                k, pitch, r_out = lp["k"], lp["pitch"], lp["r_out"]
                acc = None
                for kh in range(k):
                    for kw in range(k):
                        off = kh * pitch + kw
                        tap = act[off:off + r_out]              # shifted row slice
                        part = jnp.dot(tap, w_ref[kh * k + kw],
                                       precision=lax.Precision.HIGHEST,
                                       preferred_element_type=jnp.float32)
                        acc = part if acc is None else acc + part
                act = acc + b_ref[...]                          # fused bias add

            elif lp["kind"] == "pool":
                sel_ref = params[pi]
                pi += 1
                k, pitch, ph_rows = lp["k"], lp["pitch"], lp["ph_rows"]
                red = None
                for di in range(k):
                    for dj in range(k):
                        off = di * pitch + dj
                        tap = act[off:off + ph_rows]
                        if red is None:
                            red = tap
                        elif lp["mode"] == "max":
                            red = jnp.maximum(red, tap)
                        else:
                            red = red + tap
                if lp["mode"] == "avg":
                    red = red * jnp.float32(1.0 / (k * k))
                # Compact the stride-k window origins with a 0/1 selection matmul
                # (MXU is idle here; exact since weights are 0.0 / 1.0).
                act = jnp.dot(sel_ref[...], red,
                              precision=lax.Precision.HIGHEST,
                              preferred_element_type=jnp.float32)

            else:                                               # activation
                fn = lp["fn"]
                if fn == "relu":
                    act = jnp.maximum(act, 0.0)
                elif fn == "sigmoid":
                    act = jax.nn.sigmoid(act)
                elif fn == "tanh":
                    act = jnp.tanh(act)
                elif fn == "softmax":      # legacy implicit dim=1 == channel axis
                    act = jax.nn.softmax(act, axis=-1)
                elif fn == "softmin":
                    act = jax.nn.softmax(-act, axis=-1)
                else:
                    raise NotImplementedError(fn)

        o_ref[0] = act.astype(o_ref.dtype)

    return kernel


# ------------------------------ forward builder ----------------------------- #

def make_forward(model, in_channel, x_shape):
    N, C_in, H, W = x_shape
    assert C_in == in_channel
    plan, fin = _plan_network(model, in_channel, H, W)

    # Operand specs: x first, then per-layer params in spec order (all weights /
    # bias / selection matrices are whole-array VMEM blocks reused every grid step).
    in_specs = [pl.BlockSpec((1, H * W, in_channel), lambda n: (n, 0, 0))]
    for lp in plan:
        if lp["kind"] == "conv":
            in_specs.append(pl.BlockSpec((lp["k"] * lp["k"], lp["c_in"], lp["oc"]),
                                         lambda n: (0, 0, 0)))
            in_specs.append(pl.BlockSpec((1, lp["oc"]), lambda n: (0, 0)))
        elif lp["kind"] == "pool":
            in_specs.append(pl.BlockSpec(lp["sel"].shape, lambda n: (0, 0)))

    fused = pl.pallas_call(
        _make_fused_kernel(plan),
        out_shape=jax.ShapeDtypeStruct((N, fin["rows"], fin["c"]), jnp.float32),
        grid=(N,),
        in_specs=in_specs,
        out_specs=pl.BlockSpec((1, fin["rows"], fin["c"]), lambda n: (n, 0, 0)),
        compiler_params=pltpu.CompilerParams(
            dimension_semantics=("parallel",),   # batch shards across TCs (v7x)
            vmem_limit_bytes=32 * 1024 * 1024,
        ),
    )

    # Final un-flatten: gather valid rows (identity when the net ends in a pool).
    valid_rows = (np.arange(fin["h"])[:, None] * fin["pitch"]
                  + np.arange(fin["w"])[None, :]).reshape(-1)

    def forward(x, params):
        ops = [x.transpose(0, 2, 3, 1).reshape(N, H * W, in_channel)
                .astype(jnp.float32)]
        for lp, p in zip(plan, params):
            if lp["kind"] == "conv":
                w, b = p
                k = lp["k"]
                wt = jnp.transpose(w, (2, 3, 1, 0)).reshape(k * k, lp["c_in"], lp["oc"])
                ops += [wt.astype(jnp.float32),
                        b.reshape(1, lp["oc"]).astype(jnp.float32)]
            elif lp["kind"] == "pool":
                ops.append(jnp.asarray(lp["sel"]))
        raw = fused(*ops)                              # [N, rows, C] flat NHWC
        out = raw[:, valid_rows, :]
        out = out.reshape(N, fin["h"], fin["w"], fin["c"]).transpose(0, 3, 1, 2)
        return out                                     # NCHW, like the PyTorch module

    return jax.jit(forward)


# --------------------------------- params ----------------------------------- #

def init_params(model, in_channel, key):
    """Mirror nn.Conv2d default init (uniform +-1/sqrt(fan_in))."""
    params = []
    c = in_channel
    for module in model:
        if str(module[0]).lower() == "conv2":
            oc, k = int(module[1]), int(module[2])
            bound = 1.0 / math.sqrt(c * k * k)
            key, kw_key, kb_key = jax.random.split(key, 3)
            w = jax.random.uniform(kw_key, (oc, c, k, k), jnp.float32, -bound, bound)
            b = jax.random.uniform(kb_key, (oc,), jnp.float32, -bound, bound)
            params.append((w, b))
            c = oc
        else:
            params.append(None)
    return params


# ----------------------------- pure-JAX reference ---------------------------- #

def cnn_forward_ref(x, model, params):
    for module, p in zip(model, params):
        name = str(module[0]).lower()
        if name == "conv2":
            w, b = p
            x = lax.conv_general_dilated(
                x, w, (1, 1), "VALID",
                dimension_numbers=("NCHW", "OIHW", "NCHW"),
                precision=lax.Precision.HIGHEST) + b[None, :, None, None]
        elif name == "max2":
            k = int(module[1])
            x = lax.reduce_window(x, -jnp.inf, lax.max,
                                  (1, 1, k, k), (1, 1, k, k), "VALID")
        elif name == "avg2":
            k = int(module[1])
            x = lax.reduce_window(x, 0.0, lax.add,
                                  (1, 1, k, k), (1, 1, k, k), "VALID") / float(k * k)
        elif name == "afun":
            act = str(module[1]).lower()
            x = {"relu": jax.nn.relu, "sigmoid": jax.nn.sigmoid, "tanh": jnp.tanh,
                 "softmax": functools.partial(jax.nn.softmax, axis=1),
                 "softmin": lambda v: jax.nn.softmax(-v, axis=1)}[act](x)
    return x


# ----------------------------------- main ------------------------------------ #

if __name__ == "__main__":
    # Representative model spec in the same format CNN.__init__ consumes.
    model = [
        ["conv2", 8, 3],
        ["afun", "relu"],
        ["max2", 2],
        ["conv2", 16, 3],
        ["afun", "tanh"],
        ["avg2", 2],
    ]
    in_channel = 4

    key = jax.random.PRNGKey(0)
    key, xkey = jax.random.split(key)
    x = jax.random.normal(xkey, (2, in_channel, 16, 16), jnp.float32)   # NCHW

    params = init_params(model, in_channel, key)
    forward = make_forward(model, in_channel, x.shape)

    out = jax.block_until_ready(forward(x, params))

    ref = cnn_forward_ref(x, model, params)
    assert out.shape == ref.shape == (2, 16, 2, 2), out.shape
    assert jnp.allclose(out, ref, rtol=1e-4, atol=1e-4), \
        float(jnp.max(jnp.abs(out - ref)))

    print("KERNEL_OK")
</pallas_src>

<mosaic_0001>
module attributes {stable_mosaic.version = 11 : i64} {
  func.func @kernel(%arg0: i32, %arg1: memref<1x256x4xf32, #tpu.memory_space<vmem>>, %arg2: memref<9x4x8xf32, #tpu.memory_space<vmem>>, %arg3: memref<1x8xf32, #tpu.memory_space<vmem>>, %arg4: memref<49x205xf32, #tpu.memory_space<vmem>>, %arg5: memref<9x8x16xf32, #tpu.memory_space<vmem>>, %arg6: memref<1x16xf32, #tpu.memory_space<vmem>>, %arg7: memref<4x25xf32, #tpu.memory_space<vmem>>, %arg8: memref<1x4x16xf32, #tpu.memory_space<vmem>>) attributes {dimension_semantics = [#tpu.dimension_semantics<parallel>], iteration_bounds = array<i64: 2>, scalar_prefetch = 0 : i64, scratch_operands = 0 : i64, tpu.core_type = #tpu.core_type<tc>, window_params = [{transform_indices = @transform_0, window_bounds = array<i64: 1, 256, 4>}, {pipeline_mode = #tpu.pipeline_mode<synchronous>, transform_indices = @transform_1, window_bounds = array<i64: 9, 4, 8>}, {pipeline_mode = #tpu.pipeline_mode<synchronous>, transform_indices = @transform_2, window_bounds = array<i64: 1, 8>}, {pipeline_mode = #tpu.pipeline_mode<synchronous>, transform_indices = @transform_3, window_bounds = array<i64: 49, 205>}, {pipeline_mode = #tpu.pipeline_mode<synchronous>, transform_indices = @transform_4, window_bounds = array<i64: 9, 8, 16>}, {pipeline_mode = #tpu.pipeline_mode<synchronous>, transform_indices = @transform_5, window_bounds = array<i64: 1, 16>}, {pipeline_mode = #tpu.pipeline_mode<synchronous>, transform_indices = @transform_6, window_bounds = array<i64: 4, 25>}, {transform_indices = @transform_7, window_bounds = array<i64: 1, 4, 16>}]} {
    %c0 = arith.constant 0 : index
    %c0_0 = arith.constant 0 : index
    %c0_1 = arith.constant 0 : index
    %0 = vector.load %arg1[%c0, %c0_0, %c0_1] : memref<1x256x4xf32, #tpu.memory_space<vmem>>, vector<1x256x4xf32>
    %1 = vector.shape_cast %0 : vector<1x256x4xf32> to vector<256x4xf32>
    %2 = vector.extract_strided_slice %1 {offsets = [0, 0], sizes = [222, 4], strides = [1, 1]} : vector<256x4xf32> to vector<222x4xf32>
    %c0_2 = arith.constant 0 : index
    %c0_3 = arith.constant 0 : index
    %c0_4 = arith.constant 0 : index
    %3 = vector.load %arg2[%c0_2, %c0_3, %c0_4] : memref<9x4x8xf32, #tpu.memory_space<vmem>>, vector<1x4x8xf32>
    %4 = vector.shape_cast %3 : vector<1x4x8xf32> to vector<4x8xf32>
    %cst = arith.constant dense<0.000000e+00> : vector<222x8xf32>
    %5 = tpu.matmul %2, %4, %cst {dimension_numbers = #tpu.dot_dimension_numbers<[1], [0], [0], [1], [0, 0, 1, 1], [], []>, precision = #tpu.contract_precision<fp32>} : vector<222x4xf32>, vector<4x8xf32>, vector<222x8xf32> -> vector<222x8xf32>
    %6 = vector.extract_strided_slice %1 {offsets = [1, 0], sizes = [222, 4], strides = [1, 1]} : vector<256x4xf32> to vector<222x4xf32>
    %c1 = arith.constant 1 : index
    %c0_5 = arith.constant 0 : index
    %c0_6 = arith.constant 0 : index
    %7 = vector.load %arg2[%c1, %c0_5, %c0_6] : memref<9x4x8xf32, #tpu.memory_space<vmem>>, vector<1x4x8xf32>
    %8 = vector.shape_cast %7 : vector<1x4x8xf32> to vector<4x8xf32>
    %cst_7 = arith.constant dense<0.000000e+00> : vector<222x8xf32>
    %9 = tpu.matmul %6, %8, %cst_7 {dimension_numbers = #tpu.dot_dimension_numbers<[1], [0], [0], [1], [0, 0, 1, 1], [], []>, precision = #tpu.contract_precision<fp32>} : vector<222x4xf32>, vector<4x8xf32>, vector<222x8xf32> -> vector<222x8xf32>
    %10 = arith.addf %5, %9 : vector<222x8xf32>
    %11 = vector.extract_strided_slice %1 {offsets = [2, 0], sizes = [222, 4], strides = [1, 1]} : vector<256x4xf32> to vector<222x4xf32>
    %c2 = arith.constant 2 : index
    %c0_8 = arith.constant 0 : index
    %c0_9 = arith.constant 0 : index
    %12 = vector.load %arg2[%c2, %c0_8, %c0_9] : memref<9x4x8xf32, #tpu.memory_space<vmem>>, vector<1x4x8xf32>
    %13 = vector.shape_cast %12 : vector<1x4x8xf32> to vector<4x8xf32>
    %cst_10 = arith.constant dense<0.000000e+00> : vector<222x8xf32>
    %14 = tpu.matmul %11, %13, %cst_10 {dimension_numbers = #tpu.dot_dimension_numbers<[1], [0], [0], [1], [0, 0, 1, 1], [], []>, precision = #tpu.contract_precision<fp32>} : vector<222x4xf32>, vector<4x8xf32>, vector<222x8xf32> -> vector<222x8xf32>
    %15 = arith.addf %10, %14 : vector<222x8xf32>
    %16 = vector.extract_strided_slice %1 {offsets = [16, 0], sizes = [222, 4], strides = [1, 1]} : vector<256x4xf32> to vector<222x4xf32>
    %c3 = arith.constant 3 : index
    %c0_11 = arith.constant 0 : index
    %c0_12 = arith.constant 0 : index
    %17 = vector.load %arg2[%c3, %c0_11, %c0_12] : memref<9x4x8xf32, #tpu.memory_space<vmem>>, vector<1x4x8xf32>
    %18 = vector.shape_cast %17 : vector<1x4x8xf32> to vector<4x8xf32>
    %cst_13 = arith.constant dense<0.000000e+00> : vector<222x8xf32>
    %19 = tpu.matmul %16, %18, %cst_13 {dimension_numbers = #tpu.dot_dimension_numbers<[1], [0], [0], [1], [0, 0, 1, 1], [], []>, precision = #tpu.contract_precision<fp32>} : vector<222x4xf32>, vector<4x8xf32>, vector<222x8xf32> -> vector<222x8xf32>
    %20 = arith.addf %15, %19 : vector<222x8xf32>
    %21 = vector.extract_strided_slice %1 {offsets = [17, 0], sizes = [222, 4], strides = [1, 1]} : vector<256x4xf32> to vector<222x4xf32>
    %c4 = arith.constant 4 : index
    %c0_14 = arith.constant 0 : index
    %c0_15 = arith.constant 0 : index
    %22 = vector.load %arg2[%c4, %c0_14, %c0_15] : memref<9x4x8xf32, #tpu.memory_space<vmem>>, vector<1x4x8xf32>
    %23 = vector.shape_cast %22 : vector<1x4x8xf32> to vector<4x8xf32>
    %cst_16 = arith.constant dense<0.000000e+00> : vector<222x8xf32>
    %24 = tpu.matmul %21, %23, %cst_16 {dimension_numbers = #tpu.dot_dimension_numbers<[1], [0], [0], [1], [0, 0, 1, 1], [], []>, precision = #tpu.contract_precision<fp32>} : vector<222x4xf32>, vector<4x8xf32>, vector<222x8xf32> -> vector<222x8xf32>
    %25 = arith.addf %20, %24 : vector<222x8xf32>
    %26 = vector.extract_strided_slice %1 {offsets = [18, 0], sizes = [222, 4], strides = [1, 1]} : vector<256x4xf32> to vector<222x4xf32>
    %c5 = arith.constant 5 : index
    %c0_17 = arith.constant 0 : index
    %c0_18 = arith.constant 0 : index
    %27 = vector.load %arg2[%c5, %c0_17, %c0_18] : memref<9x4x8xf32, #tpu.memory_space<vmem>>, vector<1x4x8xf32>
    %28 = vector.shape_cast %27 : vector<1x4x8xf32> to vector<4x8xf32>
    %cst_19 = arith.constant dense<0.000000e+00> : vector<222x8xf32>
    %29 = tpu.matmul %26, %28, %cst_19 {dimension_numbers = #tpu.dot_dimension_numbers<[1], [0], [0], [1], [0, 0, 1, 1], [], []>, precision = #tpu.contract_precision<fp32>} : vector<222x4xf32>, vector<4x8xf32>, vector<222x8xf32> -> vector<222x8xf32>
    %30 = arith.addf %25, %29 : vector<222x8xf32>
    %31 = vector.extract_strided_slice %1 {offsets = [32, 0], sizes = [222, 4], strides = [1, 1]} : vector<256x4xf32> to vector<222x4xf32>
    %c6 = arith.constant 6 : index
    %c0_20 = arith.constant 0 : index
    %c0_21 = arith.constant 0 : index
    %32 = vector.load %arg2[%c6, %c0_20, %c0_21] : memref<9x4x8xf32, #tpu.memory_space<vmem>>, vector<1x4x8xf32>
    %33 = vector.shape_cast %32 : vector<1x4x8xf32> to vector<4x8xf32>
    %cst_22 = arith.constant dense<0.000000e+00> : vector<222x8xf32>
    %34 = tpu.matmul %31, %33, %cst_22 {dimension_numbers = #tpu.dot_dimension_numbers<[1], [0], [0], [1], [0, 0, 1, 1], [], []>, precision = #tpu.contract_precision<fp32>} : vector<222x4xf32>, vector<4x8xf32>, vector<222x8xf32> -> vector<222x8xf32>
    %35 = arith.addf %30, %34 : vector<222x8xf32>
    %36 = vector.extract_strided_slice %1 {offsets = [33, 0], sizes = [222, 4], strides = [1, 1]} : vector<256x4xf32> to vector<222x4xf32>
    %c7 = arith.constant 7 : index
    %c0_23 = arith.constant 0 : index
    %c0_24 = arith.constant 0 : index
    %37 = vector.load %arg2[%c7, %c0_23, %c0_24] : memref<9x4x8xf32, #tpu.memory_space<vmem>>, vector<1x4x8xf32>
    %38 = vector.shape_cast %37 : vector<1x4x8xf32> to vector<4x8xf32>
    %cst_25 = arith.constant dense<0.000000e+00> : vector<222x8xf32>
    %39 = tpu.matmul %36, %38, %cst_25 {dimension_numbers = #tpu.dot_dimension_numbers<[1], [0], [0], [1], [0, 0, 1, 1], [], []>, precision = #tpu.contract_precision<fp32>} : vector<222x4xf32>, vector<4x8xf32>, vector<222x8xf32> -> vector<222x8xf32>
    %40 = arith.addf %35, %39 : vector<222x8xf32>
    %41 = vector.extract_strided_slice %1 {offsets = [34, 0], sizes = [222, 4], strides = [1, 1]} : vector<256x4xf32> to vector<222x4xf32>
    %c8 = arith.constant 8 : index
    %c0_26 = arith.constant 0 : index
    %c0_27 = arith.constant 0 : index
    %42 = vector.load %arg2[%c8, %c0_26, %c0_27] : memref<9x4x8xf32, #tpu.memory_space<vmem>>, vector<1x4x8xf32>
    %43 = vector.shape_cast %42 : vector<1x4x8xf32> to vector<4x8xf32>
    %cst_28 = arith.constant dense<0.000000e+00> : vector<222x8xf32>
    %44 = tpu.matmul %41, %43, %cst_28 {dimension_numbers = #tpu.dot_dimension_numbers<[1], [0], [0], [1], [0, 0, 1, 1], [], []>, precision = #tpu.contract_precision<fp32>} : vector<222x4xf32>, vector<4x8xf32>, vector<222x8xf32> -> vector<222x8xf32>
    %45 = arith.addf %40, %44 : vector<222x8xf32>
    %c0_29 = arith.constant 0 : index
    %c0_30 = arith.constant 0 : index
    %46 = vector.load %arg3[%c0_29, %c0_30] : memref<1x8xf32, #tpu.memory_space<vmem>>, vector<1x8xf32>
    %47 = vector.broadcast %46 : vector<1x8xf32> to vector<222x8xf32>
    %48 = arith.addf %45, %47 : vector<222x8xf32>
    %cst_31 = arith.constant 0.000000e+00 : f32
    %49 = vector.broadcast %cst_31 : f32 to vector<222x8xf32>
    %50 = arith.maximumf %48, %49 : vector<222x8xf32>
    %51 = vector.extract_strided_slice %50 {offsets = [0, 0], sizes = [205, 8], strides = [1, 1]} : vector<222x8xf32> to vector<205x8xf32>
    %52 = vector.extract_strided_slice %50 {offsets = [1, 0], sizes = [205, 8], strides = [1, 1]} : vector<222x8xf32> to vector<205x8xf32>
    %53 = arith.maximumf %51, %52 : vector<205x8xf32>
    %54 = vector.extract_strided_slice %50 {offsets = [16, 0], sizes = [205, 8], strides = [1, 1]} : vector<222x8xf32> to vector<205x8xf32>
    %55 = arith.maximumf %53, %54 : vector<205x8xf32>
    %56 = vector.extract_strided_slice %50 {offsets = [17, 0], sizes = [205, 8], strides = [1, 1]} : vector<222x8xf32> to vector<205x8xf32>
    %57 = arith.maximumf %55, %56 : vector<205x8xf32>
    %c0_32 = arith.constant 0 : index
    %c0_33 = arith.constant 0 : index
    %58 = vector.load %arg4[%c0_32, %c0_33] : memref<49x205xf32, #tpu.memory_space<vmem>>, vector<49x205xf32>
    %cst_34 = arith.constant dense<0.000000e+00> : vector<49x8xf32>
    %59 = tpu.matmul %58, %57, %cst_34 {dimension_numbers = #tpu.dot_dimension_numbers<[1], [0], [0], [1], [0, 0, 1, 1], [], []>, precision = #tpu.contract_precision<fp32>} : vector<49x205xf32>, vector<205x8xf32>, vector<49x8xf32> -> vector<49x8xf32>
    %60 = vector.extract_strided_slice %59 {offsets = [0, 0], sizes = [33, 8], strides = [1, 1]} : vector<49x8xf32> to vector<33x8xf32>
    %c0_35 = arith.constant 0 : index
    %c0_36 = arith.constant 0 : index
    %c0_37 = arith.constant 0 : index
    %61 = vector.load %arg5[%c0_35, %c0_36, %c0_37] : memref<9x8x16xf32, #tpu.memory_space<vmem>>, vector<1x8x16xf32>
    %62 = vector.shape_cast %61 : vector<1x8x16xf32> to vector<8x16xf32>
    %cst_38 = arith.constant dense<0.000000e+00> : vector<33x16xf32>
    %63 = tpu.matmul %60, %62, %cst_38 {dimension_numbers = #tpu.dot_dimension_numbers<[1], [0], [0], [1], [0, 0, 1, 1], [], []>, precision = #tpu.contract_precision<fp32>} : vector<33x8xf32>, vector<8x16xf32>, vector<33x16xf32> -> vector<33x16xf32>
    %64 = vector.extract_strided_slice %59 {offsets = [1, 0], sizes = [33, 8], strides = [1, 1]} : vector<49x8xf32> to vector<33x8xf32>
    %c1_39 = arith.constant 1 : index
    %c0_40 = arith.constant 0 : index
    %c0_41 = arith.constant 0 : index
    %65 = vector.load %arg5[%c1_39, %c0_40, %c0_41] : memref<9x8x16xf32, #tpu.memory_space<vmem>>, vector<1x8x16xf32>
    %66 = vector.shape_cast %65 : vector<1x8x16xf32> to vector<8x16xf32>
    %cst_42 = arith.constant dense<0.000000e+00> : vector<33x16xf32>
    %67 = tpu.matmul %64, %66, %cst_42 {dimension_numbers = #tpu.dot_dimension_numbers<[1], [0], [0], [1], [0, 0, 1, 1], [], []>, precision = #tpu.contract_precision<fp32>} : vector<33x8xf32>, vector<8x16xf32>, vector<33x16xf32> -> vector<33x16xf32>
    %68 = arith.addf %63, %67 : vector<33x16xf32>
    %69 = vector.extract_strided_slice %59 {offsets = [2, 0], sizes = [33, 8], strides = [1, 1]} : vector<49x8xf32> to vector<33x8xf32>
    %c2_43 = arith.constant 2 : index
    %c0_44 = arith.constant 0 : index
    %c0_45 = arith.constant 0 : index
    %70 = vector.load %arg5[%c2_43, %c0_44, %c0_45] : memref<9x8x16xf32, #tpu.memory_space<vmem>>, vector<1x8x16xf32>
    %71 = vector.shape_cast %70 : vector<1x8x16xf32> to vector<8x16xf32>
    %cst_46 = arith.constant dense<0.000000e+00> : vector<33x16xf32>
    %72 = tpu.matmul %69, %71, %cst_46 {dimension_numbers = #tpu.dot_dimension_numbers<[1], [0], [0], [1], [0, 0, 1, 1], [], []>, precision = #tpu.contract_precision<fp32>} : vector<33x8xf32>, vector<8x16xf32>, vector<33x16xf32> -> vector<33x16xf32>
    %73 = arith.addf %68, %72 : vector<33x16xf32>
    %74 = vector.extract_strided_slice %59 {offsets = [7, 0], sizes = [33, 8], strides = [1, 1]} : vector<49x8xf32> to vector<33x8xf32>
    %c3_47 = arith.constant 3 : index
    %c0_48 = arith.constant 0 : index
    %c0_49 = arith.constant 0 : index
    %75 = vector.load %arg5[%c3_47, %c0_48, %c0_49] : memref<9x8x16xf32, #tpu.memory_space<vmem>>, vector<1x8x16xf32>
    %76 = vector.shape_cast %75 : vector<1x8x16xf32> to vector<8x16xf32>
    %cst_50 = arith.constant dense<0.000000e+00> : vector<33x16xf32>
    %77 = tpu.matmul %74, %76, %cst_50 {dimension_numbers = #tpu.dot_dimension_numbers<[1], [0], [0], [1], [0, 0, 1, 1], [], []>, precision = #tpu.contract_precision<fp32>} : vector<33x8xf32>, vector<8x16xf32>, vector<33x16xf32> -> vector<33x16xf32>
    %78 = arith.addf %73, %77 : vector<33x16xf32>
    %79 = vector.extract_strided_slice %59 {offsets = [8, 0], sizes = [33, 8], strides = [1, 1]} : vector<49x8xf32> to vector<33x8xf32>
    %c4_51 = arith.constant 4 : index
    %c0_52 = arith.constant 0 : index
    %c0_53 = arith.constant 0 : index
    %80 = vector.load %arg5[%c4_51, %c0_52, %c0_53] : memref<9x8x16xf32, #tpu.memory_space<vmem>>, vector<1x8x16xf32>
    %81 = vector.shape_cast %80 : vector<1x8x16xf32> to vector<8x16xf32>
    %cst_54 = arith.constant dense<0.000000e+00> : vector<33x16xf32>
    %82 = tpu.matmul %79, %81, %cst_54 {dimension_numbers = #tpu.dot_dimension_numbers<[1], [0], [0], [1], [0, 0, 1, 1], [], []>, precision = #tpu.contract_precision<fp32>} : vector<33x8xf32>, vector<8x16xf32>, vector<33x16xf32> -> vector<33x16xf32>
    %83 = arith.addf %78, %82 : vector<33x16xf32>
    %84 = vector.extract_strided_slice %59 {offsets = [9, 0], sizes = [33, 8], strides = [1, 1]} : vector<49x8xf32> to vector<33x8xf32>
    %c5_55 = arith.constant 5 : index
    %c0_56 = arith.constant 0 : index
    %c0_57 = arith.constant 0 : index
    %85 = vector.load %arg5[%c5_55, %c0_56, %c0_57] : memref<9x8x16xf32, #tpu.memory_space<vmem>>, vector<1x8x16xf32>
    %86 = vector.shape_cast %85 : vector<1x8x16xf32> to vector<8x16xf32>
    %cst_58 = arith.constant dense<0.000000e+00> : vector<33x16xf32>
    %87 = tpu.matmul %84, %86, %cst_58 {dimension_numbers = #tpu.dot_dimension_numbers<[1], [0], [0], [1], [0, 0, 1, 1], [], []>, precision = #tpu.contract_precision<fp32>} : vector<33x8xf32>, vector<8x16xf32>, vector<33x16xf32> -> vector<33x16xf32>
    %88 = arith.addf %83, %87 : vector<33x16xf32>
    %89 = vector.extract_strided_slice %59 {offsets = [14, 0], sizes = [33, 8], strides = [1, 1]} : vector<49x8xf32> to vector<33x8xf32>
    %c6_59 = arith.constant 6 : index
    %c0_60 = arith.constant 0 : index
    %c0_61 = arith.constant 0 : index
    %90 = vector.load %arg5[%c6_59, %c0_60, %c0_61] : memref<9x8x16xf32, #tpu.memory_space<vmem>>, vector<1x8x16xf32>
    %91 = vector.shape_cast %90 : vector<1x8x16xf32> to vector<8x16xf32>
    %cst_62 = arith.constant dense<0.000000e+00> : vector<33x16xf32>
    %92 = tpu.matmul %89, %91, %cst_62 {dimension_numbers = #tpu.dot_dimension_numbers<[1], [0], [0], [1], [0, 0, 1, 1], [], []>, precision = #tpu.contract_precision<fp32>} : vector<33x8xf32>, vector<8x16xf32>, vector<33x16xf32> -> vector<33x16xf32>
    %93 = arith.addf %88, %92 : vector<33x16xf32>
    %94 = vector.extract_strided_slice %59 {offsets = [15, 0], sizes = [33, 8], strides = [1, 1]} : vector<49x8xf32> to vector<33x8xf32>
    %c7_63 = arith.constant 7 : index
    %c0_64 = arith.constant 0 : index
    %c0_65 = arith.constant 0 : index
    %95 = vector.load %arg5[%c7_63, %c0_64, %c0_65] : memref<9x8x16xf32, #tpu.memory_space<vmem>>, vector<1x8x16xf32>
    %96 = vector.shape_cast %95 : vector<1x8x16xf32> to vector<8x16xf32>
    %cst_66 = arith.constant dense<0.000000e+00> : vector<33x16xf32>
    %97 = tpu.matmul %94, %96, %cst_66 {dimension_numbers = #tpu.dot_dimension_numbers<[1], [0], [0], [1], [0, 0, 1, 1], [], []>, precision = #tpu.contract_precision<fp32>} : vector<33x8xf32>, vector<8x16xf32>, vector<33x16xf32> -> vector<33x16xf32>
    %98 = arith.addf %93, %97 : vector<33x16xf32>
    %99 = vector.extract_strided_slice %59 {offsets = [16, 0], sizes = [33, 8], strides = [1, 1]} : vector<49x8xf32> to vector<33x8xf32>
    %c8_67 = arith.constant 8 : index
    %c0_68 = arith.constant 0 : index
    %c0_69 = arith.constant 0 : index
    %100 = vector.load %arg5[%c8_67, %c0_68, %c0_69] : memref<9x8x16xf32, #tpu.memory_space<vmem>>, vector<1x8x16xf32>
    %101 = vector.shape_cast %100 : vector<1x8x16xf32> to vector<8x16xf32>
    %cst_70 = arith.constant dense<0.000000e+00> : vector<33x16xf32>
    %102 = tpu.matmul %99, %101, %cst_70 {dimension_numbers = #tpu.dot_dimension_numbers<[1], [0], [0], [1], [0, 0, 1, 1], [], []>, precision = #tpu.contract_precision<fp32>} : vector<33x8xf32>, vector<8x16xf32>, vector<33x16xf32> -> vector<33x16xf32>
    %103 = arith.addf %98, %102 : vector<33x16xf32>
    %c0_71 = arith.constant 0 : index
    %c0_72 = arith.constant 0 : index
    %104 = vector.load %arg6[%c0_71, %c0_72] : memref<1x16xf32, #tpu.memory_space<vmem>>, vector<1x16xf32>
    %105 = vector.broadcast %104 : vector<1x16xf32> to vector<33x16xf32>
    %106 = arith.addf %103, %105 : vector<33x16xf32>
    %107 = math.tanh %106 : vector<33x16xf32>
    %108 = vector.extract_strided_slice %107 {offsets = [0, 0], sizes = [25, 16], strides = [1, 1]} : vector<33x16xf32> to vector<25x16xf32>
    %109 = vector.extract_strided_slice %107 {offsets = [1, 0], sizes = [25, 16], strides = [1, 1]} : vector<33x16xf32> to vector<25x16xf32>
    %110 = arith.addf %108, %109 : vector<25x16xf32>
    %111 = vector.extract_strided_slice %107 {offsets = [7, 0], sizes = [25, 16], strides = [1, 1]} : vector<33x16xf32> to vector<25x16xf32>
    %112 = arith.addf %110, %111 : vector<25x16xf32>
    %113 = vector.extract_strided_slice %107 {offsets = [8, 0], sizes = [25, 16], strides = [1, 1]} : vector<33x16xf32> to vector<25x16xf32>
    %114 = arith.addf %112, %113 : vector<25x16xf32>
    %cst_73 = arith.constant 2.500000e-01 : f32
    %115 = vector.broadcast %cst_73 : f32 to vector<25x16xf32>
    %116 = arith.mulf %114, %115 : vector<25x16xf32>
    %c0_74 = arith.constant 0 : index
    %c0_75 = arith.constant 0 : index
    %117 = vector.load %arg7[%c0_74, %c0_75] : memref<4x25xf32, #tpu.memory_space<vmem>>, vector<4x25xf32>
    %cst_76 = arith.constant dense<0.000000e+00> : vector<4x16xf32>
    %118 = tpu.matmul %117, %116, %cst_76 {dimension_numbers = #tpu.dot_dimension_numbers<[1], [0], [0], [1], [0, 0, 1, 1], [], []>, precision = #tpu.contract_precision<fp32>} : vector<4x25xf32>, vector<25x16xf32>, vector<4x16xf32> -> vector<4x16xf32>
    %c0_77 = arith.constant 0 : index
    %c0_78 = arith.constant 0 : index
    %c0_79 = arith.constant 0 : index
    %119 = vector.load %arg8[%c0_77, %c0_78, %c0_79] : memref<1x4x16xf32, #tpu.memory_space<vmem>>, vector<1x4x16xf32>
    %120 = vector.shape_cast %119 : vector<1x4x16xf32> to vector<4x16xf32>
    %121 = vector.shape_cast %118 : vector<4x16xf32> to vector<1x4x16xf32>
    tpu.vector_store %arg8[%c0_77, %c0_78, %c0_79], %121 {strides = array<i32>} : memref<1x4x16xf32, #tpu.memory_space<vmem>>, vector<1x4x16xf32>,
    return
  }
  func.func @transform_0(%arg0: i32) -> (i32, i32, i32) {
    %c0_i32 = arith.constant 0 : i32
    %c0_i32_0 = arith.constant 0 : i32
    %c0_i32_1 = arith.constant 0 : i32
    return %arg0, %c0_i32, %c0_i32_0 : i32, i32, i32
  }
  func.func @transform_1(%arg0: i32) -> (i32, i32, i32) {
    %c0_i32 = arith.constant 0 : i32
    %c0_i32_0 = arith.constant 0 : i32
    %c0_i32_1 = arith.constant 0 : i32
    %c0_i32_2 = arith.constant 0 : i32
    return %c0_i32, %c0_i32_0, %c0_i32_1 : i32, i32, i32
  }
  func.func @transform_2(%arg0: i32) -> (i32, i32) {
    %c0_i32 = arith.constant 0 : i32
    %c0_i32_0 = arith.constant 0 : i32
    %c0_i32_1 = arith.constant 0 : i32
    return %c0_i32, %c0_i32_0 : i32, i32
  }
  func.func @transform_3(%arg0: i32) -> (i32, i32) {
    %c0_i32 = arith.constant 0 : i32
    %c0_i32_0 = arith.constant 0 : i32
    %c0_i32_1 = arith.constant 0 : i32
    return %c0_i32, %c0_i32_0 : i32, i32
  }
  func.func @transform_4(%arg0: i32) -> (i32, i32, i32) {
    %c0_i32 = arith.constant 0 : i32
    %c0_i32_0 = arith.constant 0 : i32
    %c0_i32_1 = arith.constant 0 : i32
    %c0_i32_2 = arith.constant 0 : i32
    return %c0_i32, %c0_i32_0, %c0_i32_1 : i32, i32, i32
  }
  func.func @transform_5(%arg0: i32) -> (i32, i32) {
    %c0_i32 = arith.constant 0 : i32
    %c0_i32_0 = arith.constant 0 : i32
    %c0_i32_1 = arith.constant 0 : i32
    return %c0_i32, %c0_i32_0 : i32, i32
  }
  func.func @transform_6(%arg0: i32) -> (i32, i32) {
    %c0_i32 = arith.constant 0 : i32
    %c0_i32_0 = arith.constant 0 : i32
    %c0_i32_1 = arith.constant 0 : i32
    return %c0_i32, %c0_i32_0 : i32, i32
  }
  func.func @transform_7(%arg0: i32) -> (i32, i32, i32) {
    %c0_i32 = arith.constant 0 : i32
    %c0_i32_0 = arith.constant 0 : i32
    %c0_i32_1 = arith.constant 0 : i32
    return %arg0, %c0_i32, %c0_i32_0 : i32, i32, i32
  }
}

</mosaic_0001>

<bundles_post_ra>
// kernel: forward.1
= control target key start
LH: loop header
LB: loop body
LE: loop exit
PB: predicated region body
PF: predicated region fallthrough
CT: control target
= control target key end

     0   :  { %s30365_s24 = smov 0   ;;  %s36457_s0 = inlined_call_operand.vmem [shape: f32[2,256,4], index: 0, kind: input, shape index: {}]   ;;  %s36458_s1 = inlined_call_operand.vmem [shape: f32[9,4,8], index: 1, kind: input, shape index: {}]   ;;  %s36459_s2 = inlined_call_operand.vmem [shape: f32[1,8], index: 2, kind: input, shape index: {}]   ;;  %s36460_s3 = inlined_call_operand.vmem [shape: f32[49,205], index: 3, kind: input, shape index: {}]   ;;  %s36461_s4 = inlined_call_operand.vmem [shape: f32[9,8,16], index: 4, kind: input, shape index: {}]   ;;  %s36462_s5 = inlined_call_operand.vmem [shape: f32[1,16], index: 5, kind: input, shape index: {}]   ;;  %s36463_s6 = inlined_call_operand.vmem [shape: f32[4,25], index: 6, kind: input, shape index: {}]   ;;  %s36464_s7 = inlined_call_operand.vmem [shape: f32[2,4,16], index: 7, kind: output, shape index: {}]  }
   0x1 LB: > { %s23120_s25 = sadd.s32 4294967295, %s30320_s24   ;;  %p23124_p0 = scmp.ge.s32.totalorder %s30320_s24, 1  ;;  %s30320_s24 = sphi %s30365_s24, %s17_s24  }
   0x2   : > { %p237_p1 = scmp.lt.s32.totalorder %s30320_s24, 3 }
   0x4   : > { %p238_p2 = pnand %p23124_p0, %p237_p1 }
   0x6   : > { %241 = sbr.rel (%p238_p2) target bundleno = 4585 (0x11e9), region = 48 }
   0xd   : > { %vm453_vm0 = vcmask 1043456   ;;  %v23129_v0 = vld [vmem:[%s36458_s1 + $0x8] sm:$0xf]  ;;  %p268_p3 = scmp.lt.s32.totalorder %s23120_s25, 1  ;;  %vm3732_vm1 = vcmask 1045504   ;;  %vm396_vm2 = vcmask 31744  }
   0xe   : > { %v3845_v1 = vsel %vm453_vm0, %v23129_v0, 0  ;;  %vm340_vm3 = vcmask 1046528   ;;  %vm15641_vm4 = vcmask 629760   ;;  %vm15663_vm5 = vcmask 1044480  }
   0xf   : > { %v30377_v2 = vand.u32 4294901760, %v3845_v1  ;;  %s38654_s25 = smov (!%p268_p3, %s23120_s25), 1  ;;  %vm30324_vm6 = vmmov 0   ;;  %vm16804_vm7 = vcmask 64512   ;;  %vm18707_vm8 = vcmask 1040384  }
  0x10   : > { %s23148_s28 = sshll.u32 %s38654_s25, 8  ;;  %vm20611_vm9 = vcmask 1041408   ;;  %vm22573_vm10 = vcmask 203776   ;;  %s23127_s14 = sshll.u32 %s38654_s25, 2  ;;  %vm23065_vm11 = vcmask 125952  }
  0x11   : > { %37369 = vst [vmem:[#allocation2_spill] sm:$0xff] %v30377_v2  ;;  %v30382_v3 = vsub.f32 %v3845_v1, %v30377_v2  ;;  %s30388_s8 = scalar_lea.vmem %s36457_s0, %s23148_s28  ;;  %s276_s17 = scalar_lea.vmem %s36464_s7, %s23127_s14 }
  0x12   : > { %v277_v4 = vld [vmem:[%s30388_s8] sm:$0xff]  ;;  %v278_v5 = vld [vmem:[%s30388_s8 + $0x8] sm:$0xff]  ;;  %v30394_v6 = vld [vmem:[%s30388_s8 + $0x10] sm:$0xff] }
  0x13   : > { %37370 = vst [vmem:[#allocation3_spill] sm:$0xff] %v30382_v3  ;;  %25685 = vmatprep.subr.mxu0 %v30382_v3  ;;  %v3733_v7 = vrot.slane %v277_v4, 2  ;;  %v3734_v8 = vrot.slane %v278_v5, 2  ;;  %v30398_v9 = vld [vmem:[%s30388_s8 + $0x18] sm:$0xff]  ;;  %v30401_v10 = vld [vmem:[%s30388_s8 + $0x20] sm:$0xff]  ;;  %v3736_v11 = vrot.slane %v30394_v6, 2 }
  0x14   : > { %25686 = vmatpush3.msra.mxu0 %v30382_v3  ;;  %37371 = vst [vmem:[#allocation4_spill] sm:$0xff] %v30398_v9  ;;  %37372 = vst [vmem:[#allocation5_spill] sm:$0xff] %v30401_v10  ;;  %v3738_v13 = vrot.slane %v30398_v9, 2  ;;  %v3740_v16 = vrot.slane %v30401_v10, 2  ;;  %v30411_v17 = vld [vmem:[%s30388_s8 + $0x28] sm:$0xff]  ;;  %v30418_v21 = vld [vmem:[%s30388_s8 + $0x30] sm:$0xff] }
  0x15   : > { %25729 = vmatprep.subr.mxu0 %v30377_v2  ;;  %v3735_v12 = vsel %vm3732_vm1, %v3733_v7, %v3734_v8  ;;  %v3737_v15 = vsel %vm3732_vm1, %v3734_v8, %v3736_v11  ;;  %37373 = vst [vmem:[#allocation6_spill] sm:$0xff] %v30411_v17  ;;  %37375 = vst [vmem:[#allocation8_spill] sm:$0xff] %v30418_v21  ;;  %v30425_v25 = vld [vmem:[%s30388_s8 + $0x38] sm:$0xff]  ;;  %v3742_v29 = vrot.slane %v30411_v17, 2  ;;  %v3744_v32 = vrot.slane %v30418_v21, 2  ;;  %v30450_v37 = vld [vmem:[%s30388_s8 + $0x40] sm:$0xff] }
  0x16   : > { %v3788_v14 = vsel %vm396_vm2, %v3735_v12, 0  ;;  %v3790_v19 = vsel %vm396_vm2, %v3737_v15, 0  ;;  %v3739_v20 = vsel %vm3732_vm1, %v3736_v11, %v3738_v13  ;;  %v3741_v24 = vsel %vm3732_vm1, %v3738_v13, %v3740_v16  ;;  %37377 = vst [vmem:[#allocation10_spill] sm:$0xff] %v30425_v25  ;;  %37383 = vst [vmem:[#allocation16_spill] sm:$0xff] %v30450_v37  ;;  %v30460_v42 = vld [vmem:[%s30388_s8 + $0x48] sm:$0xff]  ;;  %v30478_v50 = vld [vmem:[%s30388_s8 + $0x50] sm:$0xff] }
  0x17   : > { %v30413_v18 = vand.u32 4294901760, %v3788_v14  ;;  %v30420_v22 = vand.u32 4294901760, %v3790_v19  ;;  %v3792_v23 = vsel %vm396_vm2, %v3739_v20, 0  ;;  %v3794_v28 = vsel %vm396_vm2, %v3741_v24, 0  ;;  %37385 = vst [vmem:[#allocation18_spill] sm:$0xff] %v30460_v42  ;;  %37389 = vst [vmem:[#allocation22_spill] sm:$0xff] %v30478_v50 }
  0x18   : > { %v30430_v27 = vand.u32 4294901760, %v3792_v23  ;;  %v30437_v31 = vand.u32 4294901760, %v3794_v28  ;;  %v30441_v33 = vand.u32 4294901760, %v30382_v3  ;;  %v3743_v35 = vsel %vm3732_vm1, %v3740_v16, %v3742_v29  ;;  %v30488_v54 = vld [vmem:[%s30388_s8 + $0x58] sm:$0xff]  ;;  %v30496_v57 = vld [vmem:[%s30388_s8 + $0x60] sm:$0xff]  ;;  %v30514_v7 = vld [vmem:[%s30388_s8 + $0x68] sm:$0xff] }
  0x19   : > { %37374 = vst [vmem:[#allocation7_spill] sm:$0xff] %v30413_v18  ;;  %37376 = vst [vmem:[#allocation9_spill] sm:$0xff] %v30420_v22  ;;  %v30428_v26 = vsub.f32 %v3788_v14, %v30413_v18  ;;  %v30435_v30 = vsub.f32 %v3790_v19, %v30420_v22  ;;  %v3746_v36 = vrot.slane %v30425_v25, 2  ;;  %v3796_v40 = vsel %vm396_vm2, %v3743_v35, 0  ;;  %v30523_v13 = vld [vmem:[%s30388_s8 + $0x70] sm:$0xff]  ;;  %v30534_v20 = vld [vmem:[%s30388_s8 + $0x78] sm:$0xff] }
  0x1a   : > { %37379 = vst [vmem:[#allocation12_spill] sm:$0xff] %v30430_v27  ;;  %37380 = vst [vmem:[#allocation13_spill] sm:$0xff] %v30437_v31  ;;  %v30445_v34 = vsub.f32 %v3792_v23, %v30430_v27  ;;  %v30455_v39 = vsub.f32 %v3794_v28, %v30437_v31  ;;  %v3745_v41 = vsel %vm3732_vm1, %v3742_v29, %v3744_v32  ;;  %v30463_v43 = vand.u32 4294901760, %v3796_v40  ;;  %v30541_v29 = vld [vmem:[%s30388_s8 + $0x80] sm:$0xff] }
  0x1b   : > { %37378 = vst [vmem:[#allocation11_spill] sm:$0xff] %v30428_v26  ;;  %37381 = vst [vmem:[#allocation14_spill] sm:$0xff] %v30441_v33  ;;  %25687 = vmatprep.mubr.f32.mxu0 %v30428_v26  ;;  %v36465_v38 = vand.u32 4294901760, %v30435_v30  ;;  %v3798_v44 = vsel %vm396_vm2, %v3745_v41, 0  ;;  %v3747_v45 = vsel %vm3732_vm1, %v3744_v32, %v3746_v36  ;;  %v3748_v49 = vrot.slane %v30450_v37, 2 }
  0x1c   : > { %37382 = vst [vmem:[#allocation15_spill] sm:$0xff] %v30445_v34  ;;  %25688 = vmatmul.mubr.f32.vlgmr.msra.gmra.mrb[0].mxu0 %v30435_v30  ;;  %37384 = vst [vmem:[#allocation17_spill] sm:$0xff] %v30455_v39  ;;  %v30473_v47 = vand.u32 4294901760, %v3798_v44  ;;  %v3800_v48 = vsel %vm396_vm2, %v3747_v45, 0  ;;  %v30482_v51 = vsub.f32 %v3796_v40, %v30463_v43  ;;  %v3750_v53 = vrot.slane %v30460_v42, 2 }
  0x1d   : > { %25690 = vmatprep.mubr.f32.mxu0 %v30445_v34  ;;  %37386 = vst [vmem:[#allocation19_spill] sm:$0xff] %v30463_v43  ;;  %25730 = vmatpush3.msra.mxu0 %v30377_v2  ;;  %v30471_v46 = vsub.f32 %v30435_v30, %v36465_v38  ;;  %v30484_v52 = vand.u32 4294901760, %v3800_v48  ;;  %37392 = vst [vmem:[#allocation25_spill] sm:$0xff] %v30488_v54  ;;  %v3749_v56 = vsel %vm3732_vm1, %v3746_v36, %v3748_v49  ;;  %v30600_v38 = vld [vmem:[%s30388_s8 + $0xb0] sm:$0xff] }
  0x1e   : > { %37388 = vst [vmem:[#allocation21_spill] sm:$0xff] %v30473_v47  ;;  %25773 = vmatprep.subr.mxu0 %v30441_v33  ;;  %37390 = vst [vmem:[#allocation23_spill] sm:$0xff] %v30482_v51  ;;  %v30492_v55 = vsub.f32 %v3798_v44, %v30473_v47  ;;  %v3802_v59 = vsel %vm396_vm2, %v3749_v56, 0  ;;  %v3751_v60 = vsel %vm3732_vm1, %v3748_v49, %v3750_v53  ;;  %v3752_v61 = vrot.slane %v30478_v50, 2  ;;  %v30553_v44 = vld [vmem:[%s30388_s8 + $0x88] sm:$0xff]  ;;  %v30651_v50 = vld [vmem:[%s30388_s8 + $0xd0] sm:$0xff] }
  0x1f   : > { %37387 = vst [vmem:[#allocation20_spill] sm:$0xff] %v30471_v46  ;;  %37391 = vst [vmem:[#allocation24_spill] sm:$0xff] %v30484_v52  ;;  %v30500_v58 = vsub.f32 %v3800_v48, %v30484_v52  ;;  %v30505_v62 = vand.u32 4294901760, %v3802_v59  ;;  %v3804_v63 = vsel %vm396_vm2, %v3751_v60, 0  ;;  %v3754_v0 = vrot.slane %v30488_v54, 2 }
  0x20   : > { %25691 = vmatmul.mubr.f32.gmra.mrb[2].mxu0 %v30455_v39  ;;  %37393 = vst [vmem:[#allocation26_spill] sm:$0xff] %v30492_v55  ;;  %37394 = vst [vmem:[#allocation27_spill] sm:$0xff] %v30496_v57  ;;  %v30509_v1 = vand.u32 4294901760, %v3804_v63  ;;  %v3753_v4 = vsel %vm3732_vm1, %v3750_v53, %v3752_v61  ;;  %v3756_v5 = vrot.slane %v30496_v57, 2  ;;  %v3758_v28 = vrot.slane %v30514_v7, 2 }
  0x21   : > { %25693 = vmatprep.mubr.f32.mxu0 %v30482_v51  ;;  %37395 = vst [vmem:[#allocation28_spill] sm:$0xff] %v30500_v58  ;;  %37396 = vst [vmem:[#allocation29_spill] sm:$0xff] %v30505_v62  ;;  %v30518_v8 = vsub.f32 %v3802_v59, %v30505_v62  ;;  %v3806_v11 = vsel %vm396_vm2, %v3753_v4, 0  ;;  %v3755_v12 = vsel %vm3732_vm1, %v3752_v61, %v3754_v0  ;;  %v3760_v32 = vrot.slane %v30523_v13, 2  ;;  %v30567_v61 = vld [vmem:[%s30388_s8 + $0x90] sm:$0xff] }
  0x22   : > { %37397 = vst [vmem:[#allocation30_spill] sm:$0xff] %v30509_v1  ;;  %37398 = vst [vmem:[#allocation31_spill] sm:$0xff] %v30514_v7  ;;  %v30527_v14 = vsub.f32 %v3804_v63, %v30509_v1  ;;  %v30529_v15 = vand.u32 4294901760, %v3806_v11  ;;  %v3808_v16 = vsel %vm396_vm2, %v3755_v12, 0  ;;  %v3757_v19 = vsel %vm3732_vm1, %v3754_v0, %v3756_v5 }
  0x23   : > { %37399 = vst [vmem:[#allocation32_spill] sm:$0xff] %v30518_v8  ;;  %37400 = vst [vmem:[#allocation33_spill] sm:$0xff] %v30523_v13  ;;  %v30536_v23 = vand.u32 4294901760, %v3808_v16  ;;  %v3810_v24 = vsel %vm396_vm2, %v3757_v19, 0  ;;  %v3759_v40 = vsel %vm3732_vm1, %v3756_v5, %v3758_v28  ;;  %v3762_v41 = vrot.slane %v30534_v20, 2  ;;  %v30573_v5 = vld [vmem:[%s30388_s8 + $0x98] sm:$0xff] }
  0x24   : > { %25694 = vmatmul.mubr.f32.gmra.mrb[4].mxu0 %v30492_v55  ;;  %37401 = vst [vmem:[#allocation34_spill] sm:$0xff] %v30527_v14  ;;  %37402 = vst [vmem:[#allocation35_spill] sm:$0xff] %v30529_v15  ;;  %v30546_v35 = vsub.f32 %v3806_v11, %v30529_v15  ;;  %v30548_v36 = vand.u32 4294901760, %v3810_v24  ;;  %v3812_v48 = vsel %vm396_vm2, %v3759_v40, 0  ;;  %v3761_v49 = vsel %vm3732_vm1, %v3758_v28, %v3760_v32 }
  0x25   : > { %25696 = vmatprep.mubr.f32.mxu0 %v30500_v58  ;;  %37403 = vst [vmem:[#allocation36_spill] sm:$0xff] %v30534_v20  ;;  %37404 = vst [vmem:[#allocation37_spill] sm:$0xff] %v30536_v23  ;;  %v30557_v45 = vsub.f32 %v3808_v16, %v30536_v23  ;;  %v3764_v53 = vrot.slane %v30541_v29, 2  ;;  %v30562_v56 = vand.u32 4294901760, %v3812_v48  ;;  %v3814_v59 = vsel %vm396_vm2, %v3761_v49, 0  ;;  %v30626_v20 = vld [vmem:[%s30388_s8 + $0xc0] sm:$0xff] }
  0x26   : > { %37405 = vst [vmem:[#allocation38_spill] sm:$0xff] %v30541_v29  ;;  %37406 = vst [vmem:[#allocation39_spill] sm:$0xff] %v30546_v35  ;;  %v3763_v60 = vsel %vm3732_vm1, %v3760_v32, %v3762_v41  ;;  %v3766_v4 = vrot.slane %v30553_v44, 2  ;;  %v30577_v11 = vsub.f32 %v3810_v24, %v30548_v36  ;;  %v30582_v16 = vand.u32 4294901760, %v3814_v59  ;;  %v30622_v29 = vld [vmem:[%s30388_s8 + $0xb8] sm:$0xff] }
  0x27   : > { %37407 = vst [vmem:[#allocation40_spill] sm:$0xff] %v30548_v36  ;;  %37408 = vst [vmem:[#allocation41_spill] sm:$0xff] %v30553_v44  ;;  %v3816_v63 = vsel %vm396_vm2, %v3763_v60, 0  ;;  %v3765_v0 = vsel %vm3732_vm1, %v3762_v41, %v3764_v53  ;;  %v30580_v12 = vsub.f32 %v3812_v48, %v30562_v56  ;;  %v3768_v40 = vrot.slane %v30567_v61, 2  ;;  %v30591_v41 = vld [vmem:[%s30388_s8 + $0xa0] sm:$0xff]  ;;  %v30596_v48 = vld [vmem:[%s30388_s8 + $0xa8] sm:$0xff] }
  0x28   : > { %25697 = vmatmul.mubr.f32.gmra.mrb[6].mxu0 %v30518_v8  ;;  %37409 = vst [vmem:[#allocation42_spill] sm:$0xff] %v30557_v45  ;;  %37410 = vst [vmem:[#allocation43_spill] sm:$0xff] %v30562_v56  ;;  %v30585_v19 = vand.u32 4294901760, %v3816_v63  ;;  %v3818_v28 = vsel %vm396_vm2, %v3765_v0, 0  ;;  %v3767_v32 = vsel %vm3732_vm1, %v3764_v53, %v3766_v4  ;;  %v3770_v49 = vrot.slane %v30573_v5, 2 }
  0x29   : > { %25699 = vmatprep.mubr.f32.mxu0 %v30527_v14  ;;  %37411 = vst [vmem:[#allocation44_spill] sm:$0xff] %v30567_v61  ;;  %37412 = vst [vmem:[#allocation45_spill] sm:$0xff] %v30573_v5  ;;  %v3820_v24 = vsel %vm396_vm2, %v3767_v32, 0  ;;  %v3769_v60 = vsel %vm3732_vm1, %v3766_v4, %v3768_v40  ;;  %v30604_v53 = vsub.f32 %v3814_v59, %v30582_v16  ;;  %v30606_v0 = vand.u32 4294901760, %v3818_v28 }
  0x2a   : > { %37413 = vst [vmem:[#allocation46_spill] sm:$0xff] %v30577_v11  ;;  %37414 = vst [vmem:[#allocation47_spill] sm:$0xff] %v30580_v12  ;;  %v3771_v3 = vsel %vm3732_vm1, %v3768_v40, %v3770_v49  ;;  %v3772_v32 = vrot.slane %v30591_v41, 2  ;;  %v30612_v46 = vsub.f32 %v3816_v63, %v30585_v19  ;;  %v30614_v4 = vand.u32 4294901760, %v3820_v24 }
  0x2b   : > { %37415 = vst [vmem:[#allocation48_spill] sm:$0xff] %v30582_v16  ;;  %37416 = vst [vmem:[#allocation49_spill] sm:$0xff] %v30585_v19  ;;  %v3822_v5 = vsel %vm396_vm2, %v3769_v60, 0  ;;  %v3774_v61 = vrot.slane %v30596_v48, 2  ;;  %v3824_v59 = vsel %vm396_vm2, %v3771_v3, 0  ;;  %v3776_v40 = vrot.slane %v30600_v38, 2 }
  0x2c   : > { %25700 = vmatmul.mubr.f32.gmra.mrb[8].mxu0 %v30546_v35  ;;  %37417 = vst [vmem:[#allocation50_spill] sm:$0xff] %v30591_v41  ;;  %37418 = vst [vmem:[#allocation51_spill] sm:$0xff] %v30596_v48  ;;  %v3773_v44 = vsel %vm3732_vm1, %v3770_v49, %v3772_v32  ;;  %v30630_v63 = vsub.f32 %v3818_v28, %v30606_v0  ;;  %v30632_v60 = vand.u32 4294901760, %v3822_v5  ;;  %v30635_v3 = vld [vmem:[%s30388_s8 + $0xc8] sm:$0xff]  ;;  %v3778_v48 = vrot.slane %v30622_v29, 2 }
  0x2d   : > { %25702 = vmatprep.mubr.f32.mxu0 %v30557_v45  ;;  %37419 = vst [vmem:[#allocation52_spill] sm:$0xff] %v30600_v38  ;;  %37420 = vst [vmem:[#allocation53_spill] sm:$0xff] %v30604_v53  ;;  %v3775_v41 = vsel %vm3732_vm1, %v3772_v32, %v3774_v61  ;;  %v30639_v49 = vsub.f32 %v3820_v24, %v30614_v4  ;;  %v30641_v38 = vand.u32 4294901760, %v3824_v59  ;;  %v3826_v32 = vsel %vm396_vm2, %v3773_v44, 0 }
  0x2e   : > { %37421 = vst [vmem:[#allocation54_spill] sm:$0xff] %v30606_v0  ;;  %37422 = vst [vmem:[#allocation55_spill] sm:$0xff] %v30612_v46  ;;  %v3828_v13 = vsel %vm396_vm2, %v3775_v41, 0  ;;  %v3777_v28 = vsel %vm3732_vm1, %v3774_v61, %v3776_v40  ;;  %v3780_v7 = vrot.slane %v30626_v20, 2  ;;  %v3779_v57 = vsel %vm3732_vm1, %v3776_v40, %v3778_v48 }
  0x2f   : > { %37423 = vst [vmem:[#allocation56_spill] sm:$0xff] %v30614_v4  ;;  %37424 = vst [vmem:[#allocation57_spill] sm:$0xff] %v30622_v29  ;;  %v3782_v54 = vrot.slane %v30635_v3, 2  ;;  %v30655_v24 = vsub.f32 %v3822_v5, %v30632_v60  ;;  %v30657_v44 = vand.u32 4294901760, %v3826_v32  ;;  %v30660_v29 = vld [vmem:[%s30388_s8 + $0xd8] sm:$0xff]  ;;  %v30664_v61 = vsub.f32 %v3824_v59, %v30641_v38 }
  0x30   : > { %25703 = vmatmul.mubr.f32.gmra.mrb[10].mxu0 %v30577_v11  ;;  %37425 = vst [vmem:[#allocation58_spill] sm:$0xff] %v30626_v20  ;;  %37426 = vst [vmem:[#allocation59_spill] sm:$0xff] %v30630_v63  ;;  %v30666_v41 = vand.u32 4294901760, %v3828_v13  ;;  %v3830_v40 = vsel %vm396_vm2, %v3777_v28, 0  ;;  %v3781_v20 = vsel %vm3732_vm1, %v3778_v48, %v3780_v7  ;;  %v3784_v5 = vrot.slane %v30651_v50, 2 }
  0x31   : > { %25705 = vmatprep.mubr.f32.mxu0 %v30580_v12  ;;  %37427 = vst [vmem:[#allocation60_spill] sm:$0xff] %v30632_v60  ;;  %37428 = vst [vmem:[#allocation61_spill] sm:$0xff] %v30635_v3  ;;  %v3832_v3 = vsel %vm396_vm2, %v3779_v57, 0  ;;  %v3783_v42 = vsel %vm3732_vm1, %v3780_v7, %v3782_v54  ;;  %v30674_v37 = vrot.slane %v30660_v29, 2  ;;  %v30678_v59 = vsub.f32 %v3826_v32, %v30657_v44 }
  0x32   : > { %37429 = vst [vmem:[#allocation62_spill] sm:$0xff] %v30639_v49  ;;  %37430 = vst [vmem:[#allocation63_spill] sm:$0xff] %v30641_v38  ;;  %v30680_v25 = vand.u32 4294901760, %v3830_v40  ;;  %v30684_v57 = vsub.f32 %v3828_v13, %v30666_v41  ;;  %v30686_v48 = vand.u32 4294901760, %v3832_v3  ;;  %v3834_v28 = vsel %vm396_vm2, %v3781_v20, 0 }
  0x33   : > { %37431 = vst [vmem:[#allocation64_spill] sm:$0xff] %v30651_v50  ;;  %37432 = vst [vmem:[#allocation65_spill] sm:$0xff] %v30655_v24  ;;  %v3836_v7 = vsel %vm396_vm2, %v3783_v42, 0  ;;  %v3787_v50 = vsel %vm3732_vm1, %v3784_v5, %v30674_v37  ;;  %v30697_v21 = vand.u32 4294901760, %v3834_v28  ;;  %v3842_v10 = vsel %vm396_vm2, %v30674_v37, 0 }
  0x34   : > { %25706 = vmatmul.mubr.f32.gmra.mrb[12].mxu0 %v30604_v53  ;;  %37433 = vst [vmem:[#allocation66_spill] sm:$0xff] %v30657_v44  ;;  %37434 = vst [vmem:[#allocation67_spill] sm:$0xff] %v30660_v29  ;;  %v3785_v29 = vsel %vm3732_vm1, %v3782_v54, %v3784_v5  ;;  %v30695_v32 = vsub.f32 %v3830_v40, %v30680_v25  ;;  %v30701_v13 = vsub.f32 %v3832_v3, %v30686_v48 }
  0x35   : > { %25708 = vmatprep.mubr.f32.mxu0 %v30612_v46  ;;  %37435 = vst [vmem:[#allocation68_spill] sm:$0xff] %v30664_v61  ;;  %37436 = vst [vmem:[#allocation69_spill] sm:$0xff] %v30666_v41  ;;  %v30703_v20 = vand.u32 4294901760, %v3836_v7  ;;  %v3838_v42 = vsel %vm396_vm2, %v3785_v29, 0  ;;  %v3840_v54 = vsel %vm396_vm2, %v3787_v50, 0  ;;  %v30709_v5 = vsub.f32 %v3834_v28, %v30697_v21 }
  0x36   : > { %37437 = vst [vmem:[#allocation70_spill] sm:$0xff] %v30674_v37  ;;  %37438 = vst [vmem:[#allocation71_spill] sm:$0xff] %v30678_v59  ;;  %v30711_v40 = vand.u32 4294901760, %v3838_v42  ;;  %v30717_v3 = vand.u32 4294901760, %v3840_v54  ;;  %v30725_v29 = vand.u32 4294901760, %v3842_v10  ;;  %v36493_v37 = vand.u32 4294901760, %v30428_v26 }
  0x37   : > { %37439 = vst [vmem:[#allocation72_spill] sm:$0xff] %v30680_v25  ;;  %37440 = vst [vmem:[#allocation73_spill] sm:$0xff] %v30684_v57  ;;  %v30715_v17 = vsub.f32 %v3836_v7, %v30703_v20  ;;  %v30746_v9 = vand.u32 4294901760, %v30455_v39  ;;  %v30772_v26 = vand.u32 4294901760, %v30546_v35  ;;  %v30788_v35 = vand.u32 4294901760, %v30604_v53 }
  0x38   : > { %25709 = vmatmul.mubr.f32.gmra.mrb[14].mxu0 %v30630_v63  ;;  %37441 = vst [vmem:[#allocation74_spill] sm:$0xff] %v30686_v48  ;;  %37442 = vst [vmem:[#allocation75_spill] sm:$0xff] %v30695_v32  ;;  %v30723_v50 = vsub.f32 %v3838_v42, %v30711_v40  ;;  %v30729_v28 = vsub.f32 %v3840_v54, %v30717_v3  ;;  %v30733_v7 = vsub.f32 %v3842_v10, %v30725_v29 }
  0x39   : > { %25711 = vmatprep.mubr.f32.mxu0 %v30639_v49  ;;  %37443 = vst [vmem:[#allocation76_spill] sm:$0xff] %v30697_v21  ;;  %37444 = vst [vmem:[#allocation77_spill] sm:$0xff] %v30701_v13  ;;  %v30741_v42 = vand.u32 4294901760, %v30445_v34  ;;  %v37455_v54 = vand.u32 4294901760, %v30435_v30  ;;  %v30750_v10 = vand.u32 4294901760, %v30482_v51  ;;  %v30760_v30 = vand.u32 4294901760, %v30500_v58 }
  0x3a   : > { %37445 = vst [vmem:[#allocation78_spill] sm:$0xff] %v30703_v20  ;;  %37446 = vst [vmem:[#allocation79_spill] sm:$0xff] %v30709_v5  ;;  %v30776_v58 = vand.u32 4294901760, %v30557_v45  ;;  %v30792_v45 = vand.u32 4294901760, %v30612_v46  ;;  %v30804_v53 = vand.u32 4294901760, %v30655_v24  ;;  %v30808_v46 = vand.u32 4294901760, %v30664_v61 }
  0x3b   : > { %37447 = vst [vmem:[#allocation80_spill] sm:$0xff] %v30711_v40  ;;  %37448 = vst [vmem:[#allocation81_spill] sm:$0xff] %v30715_v17 }
  0x3c   : > { %25712 = vmatmul.mubr.f32.gmra.mrb[16].mxu0 %v30655_v24  ;;  %37449 = vst [vmem:[#allocation82_spill] sm:$0xff] %v30717_v3  ;;  %37450 = vst [vmem:[#allocation83_spill] sm:$0xff] %v30723_v50  ;;  %v30820_v24 = vand.u32 4294901760, %v30695_v32 }
  0x3d   : > { %25714 = vmatprep.mubr.f32.mxu0 %v30664_v61  ;;  %37451 = vst [vmem:[#allocation84_spill] sm:$0xff] %v30725_v29  ;;  %37452 = vst [vmem:[#allocation85_spill] sm:$0xff] %v30729_v28  ;;  %v30824_v61 = vand.u32 4294901760, %v30701_v13 }
  0x3e   : > { %37453 = vst [vmem:[#allocation86_spill] sm:$0xff] %v30733_v7  ;;  %37454 = vst [vmem:[#allocation87_spill] sm:$0xff] %v30741_v42 }
  0x3f   : > { %37456 = vst [vmem:[#allocation88_spill] sm:$0xff] %v30746_v9  ;;  %37457 = vst [vmem:[#allocation89_spill] sm:$0xff] %v30750_v10 }
  0x40   : > { %25715 = vmatmul.mubr.f32.gmra.mrb[18].mxu0 %v30678_v59  ;;  %37459 = vst [vmem:[#allocation91_spill] sm:$0xff] %v30760_v30  ;;  %37462 = vst [vmem:[#allocation94_spill] sm:$0xff] %v30772_v26 }
  0x41   : > { %25717 = vmatprep.mubr.f32.mxu0 %v30684_v57  ;;  %37463 = vst [vmem:[#allocation95_spill] sm:$0xff] %v30776_v58  ;;  %37466 = vst [vmem:[#allocation98_spill] sm:$0xff] %v30788_v35 }
  0x42   : > { %37467 = vst [vmem:[#allocation99_spill] sm:$0xff] %v30792_v45  ;;  %37470 = vst [vmem:[#allocation102_spill] sm:$0xff] %v30804_v53 }
  0x43   : > { %37471 = vst [vmem:[#allocation103_spill] sm:$0xff] %v30808_v46  ;;  %37474 = vst [vmem:[#allocation106_spill] sm:$0xff] %v30820_v24 }
  0x44   : > { %25718 = vmatmul.mubr.f32.gmra.mrb[20].mxu0 %v30695_v32  ;;  %37475 = vst [vmem:[#allocation107_spill] sm:$0xff] %v30824_v61  ;;  %v30836_v32 = vand.u32 4294901760, %v30723_v50 }
  0x45   : > { %25720 = vmatprep.mubr.f32.mxu0 %v30701_v13  ;;  %v30840_v13 = vand.u32 4294901760, %v30729_v28 }
  0x46   : > { %37478 = vst [vmem:[#allocation110_spill] sm:$0xff] %v30836_v32 }
  0x47   : > { %37479 = vst [vmem:[#allocation111_spill] sm:$0xff] %v30840_v13 }
  0x48   : > { %25721 = vmatmul.mubr.f32.gmra.mrb[22].mxu0 %v30709_v5 }
  0x49   : > { %25723 = vmatprep.mubr.f32.mxu0 %v30715_v17 }
  0x4c   : > { %25724 = vmatmul.mubr.f32.gmra.mrb[24].mxu0 %v30723_v50 }
  0x4d   : > { %25726 = vmatprep.mubr.f32.mxu0 %v30729_v28 }
  0x50   : > { %25727 = vmatmul.mubr.f32.gmra.mrb[26].mxu0 %v30733_v7 }
  0x51   : > { %25731 = vmatprep.mubr.f32.mxu0 %v36493_v37  ;;  %v30756_v37 = vand.u32 4294901760, %v30492_v55 }
  0x53   : > { %37458 = vst [vmem:[#allocation90_spill] sm:$0xff] %v30756_v37 }
  0x54   : > { %25732 = vmatmul.mubr.f32.vlgmr.msra.gmra.mrb[0].mxu0 %v37455_v54  ;;  %v30764_v54 = vand.u32 4294901760, %v30518_v8  ;;  %v30780_v8 = vand.u32 4294901760, %v30577_v11  ;;  %v30796_v11 = vand.u32 4294901760, %v30630_v63  ;;  %v30812_v63 = vand.u32 4294901760, %v30678_v59 }
  0x55   : > { %25734 = vmatprep.mubr.f32.mxu0 %v30741_v42  ;;  %25774 = vmatpush3.msra.mxu0 %v30441_v33  ;;  %v30768_v33 = vand.u32 4294901760, %v30527_v14  ;;  %v30784_v14 = vand.u32 4294901760, %v30580_v12  ;;  %v30800_v12 = vand.u32 4294901760, %v30639_v49  ;;  %v30816_v49 = vand.u32 4294901760, %v30684_v57  ;;  %v37558_v42 = vld [vmem:[#allocation51_spill] sm:$0xff] }
  0x56   : > { %25817 = vmatprep.subr.mxu0 %v30377_v2  ;;  %37460 = vst [vmem:[#allocation92_spill] sm:$0xff] %v30764_v54  ;;  %37464 = vst [vmem:[#allocation96_spill] sm:$0xff] %v30780_v8  ;;  %v30828_v59 = vand.u32 4294901760, %v30709_v5  ;;  %v30832_v57 = vand.u32 4294901760, %v30715_v17  ;;  %v36539_v5 = vand.u32 4294901760, %v30733_v7 }
  0x57   : > { %37461 = vst [vmem:[#allocation93_spill] sm:$0xff] %v30768_v33  ;;  %37465 = vst [vmem:[#allocation97_spill] sm:$0xff] %v30784_v14 }
  0x58   : > { %25735 = vmatmul.mubr.f32.gmra.mrb[2].mxu0 %v30746_v9  ;;  %37468 = vst [vmem:[#allocation100_spill] sm:$0xff] %v30796_v11  ;;  %37469 = vst [vmem:[#allocation101_spill] sm:$0xff] %v30800_v12 }
  0x59   : > { %25737 = vmatprep.mubr.f32.mxu0 %v30750_v10  ;;  %37472 = vst [vmem:[#allocation104_spill] sm:$0xff] %v30812_v63  ;;  %37473 = vst [vmem:[#allocation105_spill] sm:$0xff] %v30816_v49 }
  0x5a   : > { %37476 = vst [vmem:[#allocation108_spill] sm:$0xff] %v30828_v59  ;;  %37477 = vst [vmem:[#allocation109_spill] sm:$0xff] %v30832_v57 }
  0x5c   : > { %25738 = vmatmul.mubr.f32.gmra.mrb[4].mxu0 %v30756_v37  ;;  %v37546_v37 = vld [vmem:[#allocation45_spill] sm:$0xff] }
  0x5d   : > { %25740 = vmatprep.mubr.f32.mxu0 %v30760_v30 }
  0x60   : > { %25741 = vmatmul.mubr.f32.gmra.mrb[6].mxu0 %v30764_v54 }
  0x61   : > { %25743 = vmatprep.mubr.f32.mxu0 %v30768_v33 }
  0x64   : > { %25744 = vmatmul.mubr.f32.gmra.mrb[8].mxu0 %v30772_v26 }
  0x65   : > { %25746 = vmatprep.mubr.f32.mxu0 %v30776_v58 }
  0x68   : > { %25747 = vmatmul.mubr.f32.gmra.mrb[10].mxu0 %v30780_v8 }
  0x69   : > { %25749 = vmatprep.mubr.f32.mxu0 %v30784_v14 }
  0x6c   : > { %25750 = vmatmul.mubr.f32.gmra.mrb[12].mxu0 %v30788_v35 }
  0x6d   : > { %25752 = vmatprep.mubr.f32.mxu0 %v30792_v45  ;;  %v37531_v45 = vld [vmem:[#allocation38_spill] sm:$0xff] }
  0x6e   : > { %v2096_v35 = vsel %vm396_vm2, %v37531_v45, 0 }
  0x6f   : > { %v31092_v33 = vand.u32 4294901760, %v2096_v35 }
  0x70   : > { %25753 = vmatmul.mubr.f32.gmra.mrb[14].mxu0 %v30796_v11 }
  0x71   : > { %25755 = vmatprep.mubr.f32.mxu0 %v30800_v12  ;;  %37539 = vst [vmem:[#allocation143_spill] sm:$0xff] %v31092_v33 }
  0x74   : > { %25756 = vmatmul.mubr.f32.gmra.mrb[16].mxu0 %v30804_v53 }
  0x75   : > { %25758 = vmatprep.mubr.f32.mxu0 %v30808_v46 }
  0x78   : > { %25759 = vmatmul.mubr.f32.gmra.mrb[18].mxu0 %v30812_v63  ;;  %v37521_v63 = vld [vmem:[#allocation33_spill] sm:$0xff] }
  0x79   : > { %25761 = vmatprep.mubr.f32.mxu0 %v30816_v49  ;;  %v2092_v46 = vsel %vm396_vm2, %v37521_v63, 0 }
  0x7c   : > { %25762 = vmatmul.mubr.f32.gmra.mrb[20].mxu0 %v30820_v24 }
  0x7d   : > { %25764 = vmatprep.mubr.f32.mxu0 %v30824_v61  ;;  %v23130_v61 = vld [vmem:[%s36458_s1 + $0xc] sm:$0xf] }
  0x7e   : > { %v5491_v17 = vsel %vm453_vm0, %v23130_v61, 0 }
  0x7f   : > { %v30852_v50 = vand.u32 4294901760, %v5491_v17 }
  0x80   : > { %25765 = vmatmul.mubr.f32.gmra.mrb[22].mxu0 %v30828_v59 }
  0x81   : > { %25767 = vmatprep.mubr.f32.mxu0 %v30832_v57  ;;  %v30879_v61 = vsub.f32 %v5491_v17, %v30852_v50 }
  0x84   : > { %25768 = vmatmul.mubr.f32.gmra.mrb[24].mxu0 %v30836_v32 }
  0x85   : > { %25770 = vmatprep.mubr.f32.mxu0 %v30840_v13 }
  0x88   : > { %25771 = vmatmul.mubr.f32.gmra.mrb[26].mxu0 %v36539_v5  ;;  %v30884_v5 = vand.u32 4294901760, %v30879_v61 }
  0x89   : > { %25775 = vmatprep.mubr.f32.mxu0 %v30413_v18 }
  0x8a   : > { %v5843_v7 = vsub.f32 %v30879_v61, %v30884_v5 }
  0x8c   : > { %25776 = vmatmul.mubr.f32.vlgmr.msra.gmra.mrb[0].mxu0 %v30420_v22  ;;  %v30892_v17 = vand.u32 4294901760, %v5843_v7  ;;  %v2068_v7 = vsel %vm396_vm2, %v30394_v6, 0  ;;  %v37485_v6 = vld [vmem:[#allocation6_spill] sm:$0xff] }
  0x8d   : > { %25778 = vmatprep.mubr.f32.mxu0 %v30430_v27  ;;  %25818 = vmatpush3.msra.mxu0 %v30377_v2  ;;  %v30917_v2 = vand.u32 4294901760, %v2068_v7 }
  0x8e   : > { %25861 = vmatprep.subr.mxu0 %v30852_v50 }
  0x90   : > { %25779 = vmatmul.mubr.f32.gmra.mrb[2].mxu0 %v30437_v31 }
  0x91   : > { %25781 = vmatprep.mubr.f32.mxu0 %v30463_v43 }
  0x94   : > { %25782 = vmatmul.mubr.f32.gmra.mrb[4].mxu0 %v30473_v47 }
  0x95   : > { %25784 = vmatprep.mubr.f32.mxu0 %v30484_v52 }
  0x98   : > { %25785 = vmatmul.mubr.f32.gmra.mrb[6].mxu0 %v30505_v62 }
  0x99   : > { %25787 = vmatprep.mubr.f32.mxu0 %v30509_v1 }
  0x9c   : > { %25788 = vmatmul.mubr.f32.gmra.mrb[8].mxu0 %v30529_v15 }
  0x9d   : > { %25790 = vmatprep.mubr.f32.mxu0 %v30536_v23 }
  0xa0   : > { %25791 = vmatmul.mubr.f32.gmra.mrb[10].mxu0 %v30548_v36 }
  0xa1   : > { %25793 = vmatprep.mubr.f32.mxu0 %v30562_v56 }
  0xa4   : > { %25794 = vmatmul.mubr.f32.gmra.mrb[12].mxu0 %v30582_v16 }
  0xa5   : > { %25796 = vmatprep.mubr.f32.mxu0 %v30585_v19 }
  0xa8   : > { %25797 = vmatmul.mubr.f32.gmra.mrb[14].mxu0 %v30606_v0 }
  0xa9   : > { %25799 = vmatprep.mubr.f32.mxu0 %v30614_v4 }
  0xac   : > { %25800 = vmatmul.mubr.f32.gmra.mrb[16].mxu0 %v30632_v60 }
  0xad   : > { %25802 = vmatprep.mubr.f32.mxu0 %v30641_v38 }
  0xb0   : > { %25803 = vmatmul.mubr.f32.gmra.mrb[18].mxu0 %v30657_v44 }
  0xb1   : > { %25805 = vmatprep.mubr.f32.mxu0 %v30666_v41 }
  0xb4   : > { %25806 = vmatmul.mubr.f32.gmra.mrb[20].mxu0 %v30680_v25 }
  0xb5   : > { %25808 = vmatprep.mubr.f32.mxu0 %v30686_v48 }
  0xb8   : > { %25809 = vmatmul.mubr.f32.gmra.mrb[22].mxu0 %v30697_v21 }
  0xb9   : > { %25811 = vmatprep.mubr.f32.mxu0 %v30703_v20 }
  0xbc   : > { %25812 = vmatmul.mubr.f32.gmra.mrb[24].mxu0 %v30711_v40 }
  0xbd   : > { %25814 = vmatprep.mubr.f32.mxu0 %v30717_v3 }
  0xc0   : > { %25815 = vmatmul.mubr.f32.gmra.mrb[26].mxu0 %v30725_v29 }
  0xc1   : > { %25819 = vmatprep.mubr.f32.mxu0 %v30413_v18 }
  0xc4   : > { %25820 = vmatmul.mubr.f32.vlgmr.msra.gmra.mrb[0].mxu0 %v30420_v22  ;;  %v37480_v22 = vld [vmem:[#allocation4_spill] sm:$0xff] }
  0xc5   : > { %25822 = vmatprep.mubr.f32.mxu0 %v30430_v27  ;;  %25862 = vmatpush3.msra.mxu0 %v30852_v50  ;;  %v2070_v18 = vsel %vm396_vm2, %v37480_v22, 0  ;;  %37481 = vst [vmem:[#allocation4_spill] sm:$0xff] %v30917_v2 }
  0xc6   : > { %25905 = vmatprep.subr.mxu0 %v30892_v17 }
  0xc8   : > { %25823 = vmatmul.mubr.f32.gmra.mrb[2].mxu0 %v30437_v31 }
  0xc9   : > { %25825 = vmatprep.mubr.f32.mxu0 %v30463_v43 }
  0xcc   : > { %25826 = vmatmul.mubr.f32.gmra.mrb[4].mxu0 %v30473_v47 }
  0xcd   : > { %25828 = vmatprep.mubr.f32.mxu0 %v30484_v52  ;;  %v37502_v52 = vld [vmem:[#allocation22_spill] sm:$0xff] }
  0xd0   : > { %25829 = vmatmul.mubr.f32.gmra.mrb[6].mxu0 %v30505_v62 }
  0xd1   : > { %25831 = vmatprep.mubr.f32.mxu0 %v30509_v1  ;;  %v37499_v1 = vld [vmem:[#allocation18_spill] sm:$0xff] }
  0xd2   : > { %v2082_v62 = vsel %vm396_vm2, %v37499_v1, 0 }
  0xd3   : > { %v30983_v1 = vand.u32 4294901760, %v2082_v62 }
  0xd4   : > { %25832 = vmatmul.mubr.f32.gmra.mrb[8].mxu0 %v30529_v15 }
  0xd5   : > { %25834 = vmatprep.mubr.f32.mxu0 %v30536_v23  ;;  %v37494_v23 = vld [vmem:[#allocation16_spill] sm:$0xff]  ;;  %37504 = vst [vmem:[#allocation120_spill] sm:$0xff] %v30983_v1  ;;  %v31009_v57 = vsub.f32 %v2082_v62, %v30983_v1 }
  0xd7   : > { %37513 = vst [vmem:[#allocation125_spill] sm:$0xff] %v31009_v57  ;;  %v31037_v53 = vand.u32 4294901760, %v31009_v57 }
  0xd8   : > { %25835 = vmatmul.mubr.f32.gmra.mrb[10].mxu0 %v30548_v36 }
  0xd9   : > { %25837 = vmatprep.mubr.f32.mxu0 %v30562_v56  ;;  %v37482_v56 = vld [vmem:[#allocation5_spill] sm:$0xff]  ;;  %37522 = vst [vmem:[#allocation33_spill] sm:$0xff] %v31037_v53 }
  0xdc   : > { %25838 = vmatmul.mubr.f32.gmra.mrb[12].mxu0 %v30582_v16  ;;  %v2072_v16 = vsel %vm396_vm2, %v37482_v56, 0 }
  0xdd   : > { %25840 = vmatprep.mubr.f32.mxu0 %v30585_v19  ;;  %v30922_v19 = vand.u32 4294901760, %v2070_v18  ;;  %v30931_v22 = vand.u32 4294901760, %v2072_v16 }
  0xdf   : > { %37483 = vst [vmem:[#allocation5_spill] sm:$0xff] %v30922_v19  ;;  %37486 = vst [vmem:[#allocation6_spill] sm:$0xff] %v30931_v22  ;;  %v30936_v36 = vsub.f32 %v2070_v18, %v30922_v19  ;;  %v2080_v18 = vsel %vm396_vm2, %v37494_v23, 0 }
  0xe0   : > { %25841 = vmatmul.mubr.f32.gmra.mrb[14].mxu0 %v30606_v0  ;;  %v2074_v0 = vsel %vm396_vm2, %v37485_v6, 0  ;;  %v30946_v6 = vsub.f32 %v2072_v16, %v30931_v22  ;;  %v30963_v16 = vand.u32 4294901760, %v2080_v18 }
  0xe1   : > { %25843 = vmatprep.mubr.f32.mxu0 %v30614_v4  ;;  %v30926_v4 = vsub.f32 %v2068_v7, %v30917_v2  ;;  %v30938_v56 = vand.u32 4294901760, %v2074_v0  ;;  %v30955_v15 = vand.u32 4294901760, %v30936_v36 }
  0xe2   : > { %37491 = vst [vmem:[#allocation115_spill] sm:$0xff] %v30946_v6  ;;  %37498 = vst [vmem:[#allocation118_spill] sm:$0xff] %v30963_v16  ;;  %v30990_v31 = vsub.f32 %v2080_v18, %v30963_v16 }
  0xe3   : > { %37484 = vst [vmem:[#allocation112_spill] sm:$0xff] %v30926_v4  ;;  %37489 = vst [vmem:[#allocation113_spill] sm:$0xff] %v30938_v56  ;;  %v30942_v7 = vand.u32 4294901760, %v30926_v4  ;;  %v2222_v47 = vsub.f32 %v30936_v36, %v30955_v15 }
  0xe4   : > { %25844 = vmatmul.mubr.f32.gmra.mrb[16].mxu0 %v30632_v60  ;;  %v37487_v60 = vld [vmem:[#allocation8_spill] sm:$0xff]  ;;  %37506 = vst [vmem:[#allocation122_spill] sm:$0xff] %v30990_v31  ;;  %v31022_v59 = vand.u32 4294901760, %v30990_v31 }
  0xe5   : > { %25846 = vmatprep.mubr.f32.mxu0 %v30641_v38  ;;  %v2076_v38 = vsel %vm396_vm2, %v37487_v60, 0  ;;  %37488 = vst [vmem:[#allocation8_spill] sm:$0xff] %v30936_v36  ;;  %37490 = vst [vmem:[#allocation114_spill] sm:$0xff] %v30942_v7  ;;  %v2212_v23 = vsub.f32 %v30926_v4, %v30942_v7  ;;  %v31006_v18 = vand.u32 4294901760, %v2222_v47  ;;  %v37518_v47 = vld [vmem:[#allocation31_spill] sm:$0xff]  ;;  %v31226_v7 = vld [vmem:[%s30388_s8 + $0xe0] sm:$0xff] }
  0xe6   : > { %37517 = vst [vmem:[#allocation129_spill] sm:$0xff] %v31022_v59  ;;  %v2090_v24 = vsel %vm396_vm2, %v37518_v47, 0  ;;  %v2272_v63 = vsub.f32 %v30990_v31, %v31022_v59  ;;  %v37571_v59 = vld [vmem:[#allocation58_spill] sm:$0xff] }
  0xe7   : > { %v30997_v13 = vand.u32 4294901760, %v2212_v23  ;;  %37512 = vst [vmem:[#allocation124_spill] sm:$0xff] %v31006_v18 }
  0xe8   : > { %25847 = vmatmul.mubr.f32.gmra.mrb[18].mxu0 %v30657_v44  ;;  %v37493_v44 = vld [vmem:[#allocation10_spill] sm:$0xff]  ;;  %v31082_v8 = vand.u32 4294901760, %v2272_v63 }
  0xe9   : > { %25849 = vmatprep.mubr.f32.mxu0 %v30666_v41  ;;  %v30948_v41 = vand.u32 4294901760, %v2076_v38  ;;  %v2078_v60 = vsel %vm396_vm2, %v37493_v44, 0  ;;  %37495 = vst [vmem:[#allocation10_spill] sm:$0xff] %v30955_v15  ;;  %v30971_v44 = vand.u32 4294901760, %v30946_v6  ;;  %v37581_v15 = vld [vmem:[#allocation64_spill] sm:$0xff] }
  0xea   : > { %37536 = vst [vmem:[#allocation140_spill] sm:$0xff] %v31082_v8  ;;  %37583 = vst [vmem:[#allocation64_spill] sm:$0xff] %v31226_v7 }
  0xeb   : > { %37492 = vst [vmem:[#allocation116_spill] sm:$0xff] %v30948_v41  ;;  %37500 = vst [vmem:[#allocation18_spill] sm:$0xff] %v30971_v44  ;;  %v2232_v32 = vsub.f32 %v30946_v6, %v30971_v44 }
  0xec   : > { %25850 = vmatmul.mubr.f32.gmra.mrb[20].mxu0 %v30680_v25  ;;  %v30958_v25 = vsub.f32 %v2074_v0, %v30938_v56  ;;  %v30974_v0 = vsub.f32 %v2076_v38, %v30948_v41  ;;  %v37507_v38 = vld [vmem:[#allocation25_spill] sm:$0xff] }
  0xed   : > { %25852 = vmatprep.mubr.f32.mxu0 %v30686_v48  ;;  %v30961_v48 = vand.u32 4294901760, %v2078_v60  ;;  %v2086_v27 = vsel %vm396_vm2, %v37507_v38, 0  ;;  %37509 = vst [vmem:[#allocation25_spill] sm:$0xff] %v30997_v13  ;;  %v31027_v62 = vand.u32 4294901760, %v2232_v32  ;;  %v31045_v32 = vand.u32 4294901760, %v2090_v24 }
  0xee   : > { %37496 = vst [vmem:[#allocation16_spill] sm:$0xff] %v30958_v25  ;;  %37501 = vst [vmem:[#allocation119_spill] sm:$0xff] %v30974_v0  ;;  %v30981_v43 = vand.u32 4294901760, %v30958_v25  ;;  %v31011_v38 = vand.u32 4294901760, %v2086_v27 }
  0xef   : > { %37497 = vst [vmem:[#allocation117_spill] sm:$0xff] %v30961_v48  ;;  %37519 = vst [vmem:[#allocation31_spill] sm:$0xff] %v31027_v62  ;;  %v31077_v14 = vsub.f32 %v2090_v24, %v31045_v32  ;;  %v37540_v24 = vld [vmem:[#allocation41_spill] sm:$0xff] }
  0xf0   : > { %25853 = vmatmul.mubr.f32.gmra.mrb[22].mxu0 %v30697_v21  ;;  %v2084_v21 = vsel %vm396_vm2, %v37502_v52, 0  ;;  %37503 = vst [vmem:[#allocation22_spill] sm:$0xff] %v30981_v43  ;;  %v37508_v52 = vld [vmem:[#allocation27_spill] sm:$0xff]  ;;  %37514 = vst [vmem:[#allocation126_spill] sm:$0xff] %v31011_v38  ;;  %v2242_v23 = vsub.f32 %v30958_v25, %v30981_v43  ;;  %v31040_v12 = vsub.f32 %v2086_v27, %v31011_v38  ;;  %v2098_v54 = vsel %vm396_vm2, %v37540_v24, 0 }
  0xf1   : > { %25855 = vmatprep.mubr.f32.mxu0 %v30703_v20  ;;  %v30987_v20 = vsub.f32 %v2078_v60, %v30961_v48  ;;  %v2088_v28 = vsel %vm396_vm2, %v37508_v52, 0  ;;  %v31004_v60 = vand.u32 4294901760, %v2084_v21  ;;  %37525 = vst [vmem:[#allocation133_spill] sm:$0xff] %v31045_v32  ;;  %37534 = vst [vmem:[#allocation138_spill] sm:$0xff] %v31077_v14  ;;  %v31105_v55 = vand.u32 4294901760, %v31077_v14 }
  0xf2   : > { %v31013_v52 = vand.u32 4294901760, %v2088_v28  ;;  %37523 = vst [vmem:[#allocation131_spill] sm:$0xff] %v31040_v12  ;;  %v31111_v24 = vand.u32 4294901760, %v2098_v54 }
  0xf3   : > { %37505 = vst [vmem:[#allocation121_spill] sm:$0xff] %v30987_v20  ;;  %37511 = vst [vmem:[#allocation123_spill] sm:$0xff] %v31004_v60 }
  0xf4   : > { %25856 = vmatmul.mubr.f32.gmra.mrb[24].mxu0 %v30711_v40  ;;  %v31002_v40 = vand.u32 4294901760, %v30974_v0  ;;  %37515 = vst [vmem:[#allocation127_spill] sm:$0xff] %v31013_v52  ;;  %v31043_v47 = vsub.f32 %v2088_v28, %v31013_v52  ;;  %v31061_v28 = vand.u32 4294901760, %v2092_v46  ;;  %37545 = vst [vmem:[#allocation145_spill] sm:$0xff] %v31111_v24 }
  0xf5   : > { %25858 = vmatprep.mubr.f32.mxu0 %v30717_v3  ;;  %v31019_v3 = vand.u32 4294901760, %v30987_v20 }
  0xf6   : > { %37510 = vst [vmem:[#allocation27_spill] sm:$0xff] %v31002_v40  ;;  %v2252_v49 = vsub.f32 %v30974_v0, %v31002_v40  ;;  %37524 = vst [vmem:[#allocation132_spill] sm:$0xff] %v31043_v47  ;;  %v31090_v26 = vsub.f32 %v2092_v46, %v31061_v28 }
  0xf7   : > { %37516 = vst [vmem:[#allocation128_spill] sm:$0xff] %v31019_v3  ;;  %37529 = vst [vmem:[#allocation137_spill] sm:$0xff] %v31061_v28 }
  0xf8   : > { %25859 = vmatmul.mubr.f32.gmra.mrb[26].mxu0 %v30725_v29  ;;  %v31032_v29 = vsub.f32 %v2084_v21, %v31004_v60  ;;  %v2262_v21 = vsub.f32 %v30987_v20, %v31019_v3  ;;  %v31055_v11 = vand.u32 4294901760, %v2252_v49  ;;  %v31071_v49 = vand.u32 4294901760, %v31040_v12  ;;  %37538 = vst [vmem:[#allocation142_spill] sm:$0xff] %v31090_v26 }
  0xf9   : > { %25863 = vmatprep.mubr.f32.mxu0 %v30997_v13  ;;  %v31048_v13 = vand.u32 4294901760, %v2242_v23  ;;  %v31121_v39 = vand.u32 4294901760, %v31090_v26 }
  0xfa   : > { %37520 = vst [vmem:[#allocation130_spill] sm:$0xff] %v31032_v29  ;;  %37527 = vst [vmem:[#allocation135_spill] sm:$0xff] %v31055_v11  ;;  %v31059_v27 = vand.u32 4294901760, %v31032_v29  ;;  %v2302_v30 = vsub.f32 %v31040_v12, %v31071_v49 }
  0xfb   : > { %37526 = vst [vmem:[#allocation134_spill] sm:$0xff] %v31048_v13 }
  0xfc   : > { %25864 = vmatmul.mubr.f32.vlgmr.msra.gmra.mrb[0].mxu0 %v31006_v18  ;;  %37528 = vst [vmem:[#allocation136_spill] sm:$0xff] %v31059_v27  ;;  %v37530_v18 = vld [vmem:[#allocation36_spill] sm:$0xff]  ;;  %v2292_v58 = vsub.f32 %v31032_v29, %v31059_v27  ;;  %v31128_v9 = vand.u32 4294901760, %v2302_v30  ;;  %v2106_v30 = vsel %vm396_vm2, %v37558_v42, 0 }
  0xfd   : > { %25866 = vmatprep.mubr.f32.mxu0 %v31027_v62  ;;  %25906 = vmatpush3.msra.mxu0 %v30892_v17  ;;  %v2094_v23 = vsel %vm396_vm2, %v37530_v18, 0  ;;  %v2282_v62 = vsub.f32 %v31009_v57, %v31037_v53  ;;  %37532 = vst [vmem:[#allocation36_spill] sm:$0xff] %v31071_v49  ;;  %v31074_v17 = vand.u32 4294901760, %v31043_v47  ;;  %v31080_v18 = vand.u32 4294901760, %v2262_v21 }
  0xfe   : > { %25949 = vmatprep.subr.mxu0 %v30879_v61  ;;  %v31084_v45 = vand.u32 4294901760, %v2094_v23  ;;  %v31118_v10 = vand.u32 4294901760, %v2292_v58  ;;  %37552 = vst [vmem:[#allocation148_spill] sm:$0xff] %v31128_v9  ;;  %v31164_v42 = vand.u32 4294901760, %v2106_v30 }
  0xff   : > { %37533 = vst [vmem:[#allocation38_spill] sm:$0xff] %v31074_v17  ;;  %37535 = vst [vmem:[#allocation139_spill] sm:$0xff] %v31080_v18  ;;  %v31098_v63 = vand.u32 4294901760, %v2282_v62  ;;  %v37547_v62 = vld [vmem:[#allocation50_spill] sm:$0xff] }
 0x100   : > { %25867 = vmatmul.mubr.f32.gmra.mrb[2].mxu0 %v31048_v13  ;;  %37537 = vst [vmem:[#allocation141_spill] sm:$0xff] %v31084_v45  ;;  %v37541_v13 = vld [vmem:[#allocation44_spill] sm:$0xff]  ;;  %v31109_v46 = vsub.f32 %v2094_v23, %v31084_v45  ;;  %v2104_v51 = vsel %vm396_vm2, %v37547_v62, 0  ;;  %37548 = vst [vmem:[#allocation45_spill] sm:$0xff] %v31118_v10 }
 0x101   : > { %25869 = vmatprep.mubr.f32.mxu0 %v31055_v11  ;;  %v2100_v21 = vsel %vm396_vm2, %v37541_v13, 0  ;;  %37542 = vst [vmem:[#allocation41_spill] sm:$0xff] %v31098_v63  ;;  %v2312_v11 = vsub.f32 %v31043_v47, %v31074_v17  ;;  %37543 = vst [vmem:[#allocation44_spill] sm:$0xff] %v31105_v55  ;;  %v2102_v13 = vsel %vm396_vm2, %v37546_v37, 0  ;;  %v2322_v37 = vsub.f32 %v31077_v14, %v31105_v55 }
 0x102   : > { %37544 = vst [vmem:[#allocation144_spill] sm:$0xff] %v31109_v46  ;;  %37549 = vst [vmem:[#allocation50_spill] sm:$0xff] %v31121_v39  ;;  %v31126_v23 = vand.u32 4294901760, %v2100_v21  ;;  %v31132_v34 = vand.u32 4294901760, %v2102_v13  ;;  %v31134_v62 = vand.u32 4294901760, %v2104_v51  ;;  %v2332_v55 = vsub.f32 %v31090_v26, %v31121_v39 }
 0x103   : > { %v31137_v58 = vand.u32 4294901760, %v2312_v11  ;;  %37564 = vst [vmem:[#allocation156_spill] sm:$0xff] %v31164_v42 }
 0x104   : > { %25870 = vmatmul.mubr.f32.gmra.mrb[4].mxu0 %v31080_v18  ;;  %v31124_v18 = vsub.f32 %v2096_v35, %v31092_v33  ;;  %37551 = vst [vmem:[#allocation147_spill] sm:$0xff] %v31126_v23  ;;  %37553 = vst [vmem:[#allocation149_spill] sm:$0xff] %v31132_v34  ;;  %v31143_v35 = vsub.f32 %v2098_v54, %v31111_v24  ;;  %v31154_v11 = vsub.f32 %v2100_v21, %v31126_v23 }
 0x105   : > { %25872 = vmatprep.mubr.f32.mxu0 %v31082_v8  ;;  %37554 = vst [vmem:[#allocation150_spill] sm:$0xff] %v31134_v62  ;;  %37555 = vst [vmem:[#allocation151_spill] sm:$0xff] %v31137_v58  ;;  %v31140_v8 = vand.u32 4294901760, %v31109_v46  ;;  %v31159_v54 = vsub.f32 %v2102_v13, %v31132_v34  ;;  %v31162_v27 = vsub.f32 %v2104_v51, %v31134_v62 }
 0x106   : > { %37550 = vst [vmem:[#allocation146_spill] sm:$0xff] %v31124_v18  ;;  %37557 = vst [vmem:[#allocation153_spill] sm:$0xff] %v31143_v35  ;;  %v31151_v17 = vand.u32 4294901760, %v31124_v18  ;;  %v31172_v21 = vand.u32 4294901760, %v31143_v35  ;;  %v31182_v13 = vand.u32 4294901760, %v31154_v11 }
 0x107   : > { %37556 = vst [vmem:[#allocation152_spill] sm:$0xff] %v31140_v8  ;;  %37560 = vst [vmem:[#allocation154_spill] sm:$0xff] %v31154_v11  ;;  %v2342_v39 = vsub.f32 %v31109_v46, %v31140_v8  ;;  %v2112_v8 = vsel %vm396_vm2, %v37571_v59, 0  ;;  %v31189_v3 = vand.u32 4294901760, %v31159_v54  ;;  %v31192_v40 = vand.u32 4294901760, %v31162_v27 }
 0x108   : > { %25873 = vmatmul.mubr.f32.gmra.mrb[6].mxu0 %v31098_v63  ;;  %37559 = vst [vmem:[#allocation51_spill] sm:$0xff] %v31151_v17  ;;  %v37561_v63 = vld [vmem:[#allocation52_spill] sm:$0xff]  ;;  %37563 = vst [vmem:[#allocation155_spill] sm:$0xff] %v31162_v27  ;;  %v2352_v51 = vsub.f32 %v31124_v18, %v31151_v17  ;;  %v31212_v44 = vand.u32 4294901760, %v2112_v8 }
 0x109   : > { %25875 = vmatprep.mubr.f32.mxu0 %v31118_v10  ;;  %v2108_v49 = vsel %vm396_vm2, %v37561_v63, 0  ;;  %37562 = vst [vmem:[#allocation52_spill] sm:$0xff] %v31159_v54  ;;  %v31167_v10 = vand.u32 4294901760, %v2322_v37  ;;  %37566 = vst [vmem:[#allocation158_spill] sm:$0xff] %v31172_v21  ;;  %v31177_v63 = vand.u32 4294901760, %v2332_v55  ;;  %v37570_v37 = vld [vmem:[#allocation57_spill] sm:$0xff]  ;;  %v31195_v55 = vsub.f32 %v2106_v30, %v31164_v42 }
 0x10a   : > { %v31174_v53 = vand.u32 4294901760, %v2108_v49  ;;  %37569 = vst [vmem:[#allocation161_spill] sm:$0xff] %v31182_v13  ;;  %37572 = vst [vmem:[#allocation57_spill] sm:$0xff] %v31189_v3  ;;  %v31208_v43 = vand.u32 4294901760, %v2352_v51  ;;  %v2372_v30 = vsub.f32 %v31154_v11, %v31182_v13 }
 0x10b   : > { %37565 = vst [vmem:[#allocation157_spill] sm:$0xff] %v31167_v10  ;;  %37568 = vst [vmem:[#allocation160_spill] sm:$0xff] %v31177_v63  ;;  %v31223_v51 = vand.u32 4294901760, %v31195_v55 }
 0x10c   : > { %25876 = vmatmul.mubr.f32.gmra.mrb[8].mxu0 %v31128_v9  ;;  %37567 = vst [vmem:[#allocation159_spill] sm:$0xff] %v31174_v53  ;;  %v2110_v9 = vsel %vm396_vm2, %v37570_v37, 0  ;;  %37573 = vst [vmem:[#allocation58_spill] sm:$0xff] %v31192_v40  ;;  %v2362_v37 = vsub.f32 %v31143_v35, %v31172_v21  ;;  %v31203_v17 = vsub.f32 %v2108_v49, %v31174_v53  ;;  %v2116_v21 = vsel %vm396_vm2, %v37581_v15, 0  ;;  %v31252_v35 = vld [vmem:[%s30388_s8 + $0xe8] sm:$0xff] }
 0x10d   : > { %25878 = vmatprep.mubr.f32.mxu0 %v31137_v58  ;;  %37574 = vst [vmem:[#allocation162_spill] sm:$0xff] %v31195_v55  ;;  %v31198_v58 = vand.u32 4294901760, %v2342_v39  ;;  %v31205_v59 = vand.u32 4294901760, %v2110_v9  ;;  %37578 = vst [vmem:[#allocation166_spill] sm:$0xff] %v31208_v43  ;;  %v2382_v49 = vsub.f32 %v31159_v54, %v31189_v3  ;;  %v31243_v3 = vsub.f32 %v2112_v8, %v31212_v44 }
 0x10e   : > { %37576 = vst [vmem:[#allocation164_spill] sm:$0xff] %v31203_v17  ;;  %37579 = vst [vmem:[#allocation167_spill] sm:$0xff] %v31212_v44  ;;  %v31229_v13 = vand.u32 4294901760, %v2362_v37  ;;  %v5485_v54 = vsel %vm396_vm2, %v31226_v7, 0 }
 0x10f   : > { %37575 = vst [vmem:[#allocation163_spill] sm:$0xff] %v31198_v58  ;;  %37577 = vst [vmem:[#allocation165_spill] sm:$0xff] %v31205_v59  ;;  %v31235_v15 = vsub.f32 %v2110_v9, %v31205_v59  ;;  %v31254_v9 = vand.u32 4294901760, %v2382_v49 }
 0x110   : > { %25879 = vmatmul.mubr.f32.gmra.mrb[10].mxu0 %v31167_v10  ;;  %v37580_v10 = vld [vmem:[#allocation61_spill] sm:$0xff]  ;;  %37584 = vst [vmem:[#allocation168_spill] sm:$0xff] %v31229_v13  ;;  %37589 = vst [vmem:[#allocation173_spill] sm:$0xff] %v31243_v3 }
 0x111   : > { %25881 = vmatprep.mubr.f32.mxu0 %v31177_v63  ;;  %v2114_v39 = vsel %vm396_vm2, %v37580_v10, 0  ;;  %v2392_v63 = vsub.f32 %v31162_v27, %v31192_v40  ;;  %37582 = vst [vmem:[#allocation61_spill] sm:$0xff] %v31223_v51  ;;  %v31232_v10 = vand.u32 4294901760, %v31203_v17  ;;  %37586 = vst [vmem:[#allocation170_spill] sm:$0xff] %v31235_v15  ;;  %v31240_v40 = vand.u32 4294901760, %v2372_v30 }
 0x112   : > { %v31237_v11 = vand.u32 4294901760, %v2114_v39  ;;  %v31245_v27 = vand.u32 4294901760, %v2116_v21  ;;  %37593 = vst [vmem:[#allocation175_spill] sm:$0xff] %v31254_v9  ;;  %v2402_v30 = vsub.f32 %v31195_v55, %v31223_v51 }
 0x113   : > { %37585 = vst [vmem:[#allocation169_spill] sm:$0xff] %v31232_v10  ;;  %37588 = vst [vmem:[#allocation172_spill] sm:$0xff] %v31240_v40  ;;  %v31256_v18 = vand.u32 4294901760, %v2392_v63  ;;  %v2412_v8 = vsub.f32 %v31203_v17, %v31232_v10  ;;  %v31273_v63 = vand.u32 4294901760, %v31243_v3  ;;  %v5488_v10 = vsel %vm396_vm2, %v31252_v35, 0 }
 0x114   : > { %25882 = vmatmul.mubr.f32.gmra.mrb[12].mxu0 %v31198_v58  ;;  %37587 = vst [vmem:[#allocation171_spill] sm:$0xff] %v31237_v11  ;;  %37590 = vst [vmem:[#allocation174_spill] sm:$0xff] %v31245_v27  ;;  %v37591_v58 = vld [vmem:[#allocation67_spill] sm:$0xff]  ;;  %v31276_v49 = vsub.f32 %v2116_v21, %v31245_v27  ;;  %v31282_v51 = vand.u32 4294901760, %v2402_v30  ;;  %v31293_v21 = vand.u32 4294901760, %v5488_v10 }
 0x115   : > { %25884 = vmatprep.mubr.f32.mxu0 %v31208_v43  ;;  %v2118_v37 = vsel %vm396_vm2, %v37591_v58, 0  ;;  %37592 = vst [vmem:[#allocation67_spill] sm:$0xff] %v31252_v35  ;;  %37594 = vst [vmem:[#allocation176_spill] sm:$0xff] %v31256_v18  ;;  %v31264_v43 = vand.u32 4294901760, %v31235_v15  ;;  %v31267_v58 = vsub.f32 %v2114_v39, %v31237_v11  ;;  %v31296_v55 = vand.u32 4294901760, %v2412_v8 }
 0x116   : > { %v31269_v7 = vand.u32 4294901760, %v2118_v37  ;;  %37598 = vst [vmem:[#allocation180_spill] sm:$0xff] %v31273_v63  ;;  %37599 = vst [vmem:[#allocation181_spill] sm:$0xff] %v31276_v49  ;;  %v2432_v30 = vsub.f32 %v31243_v3, %v31273_v63  ;;  %v31315_v8 = vsub.f32 %v5488_v10, %v31293_v21 }
 0x117   : > { %37595 = vst [vmem:[#allocation177_spill] sm:$0xff] %v31264_v43  ;;  %37596 = vst [vmem:[#allocation178_spill] sm:$0xff] %v31267_v58  ;;  %v2422_v39 = vsub.f32 %v31235_v15, %v31264_v43 }
 0x118   : > { %25885 = vmatmul.mubr.f32.gmra.mrb[14].mxu0 %v31229_v13  ;;  %37597 = vst [vmem:[#allocation179_spill] sm:$0xff] %v31269_v7  ;;  %v31278_v13 = vand.u32 4294901760, %v5485_v54  ;;  %37601 = vst [vmem:[#allocation183_spill] sm:$0xff] %v31282_v51  ;;  %v31291_v17 = vsub.f32 %v2118_v37, %v31269_v7  ;;  %v31318_v63 = vand.u32 4294901760, %v2432_v30  ;;  %v31331_v10 = vand.u32 4294901760, %v31315_v8 }
 0x119   : > { %25887 = vmatprep.mubr.f32.mxu0 %v31240_v40  ;;  %v31288_v40 = vand.u32 4294901760, %v31267_v58  ;;  %37604 = vst [vmem:[#allocation186_spill] sm:$0xff] %v31293_v21  ;;  %37605 = vst [vmem:[#allocation187_spill] sm:$0xff] %v31296_v55  ;;  %v31307_v43 = vand.u32 4294901760, %v2422_v39 }
 0x11a   : > { %37600 = vst [vmem:[#allocation182_spill] sm:$0xff] %v31278_v13  ;;  %37603 = vst [vmem:[#allocation185_spill] sm:$0xff] %v31291_v17  ;;  %v31304_v35 = vsub.f32 %v5485_v54, %v31278_v13 }
 0x11b   : > { %37602 = vst [vmem:[#allocation184_spill] sm:$0xff] %v31288_v40  ;;  %37608 = vst [vmem:[#allocation190_spill] sm:$0xff] %v31307_v43  ;;  %v2442_v37 = vsub.f32 %v31267_v58, %v31288_v40 }
 0x11c   : > { %25888 = vmatmul.mubr.f32.gmra.mrb[16].mxu0 %v31254_v9  ;;  %v31301_v9 = vand.u32 4294901760, %v31276_v49  ;;  %37607 = vst [vmem:[#allocation189_spill] sm:$0xff] %v31304_v35  ;;  %37610 = vst [vmem:[#allocation192_spill] sm:$0xff] %v31315_v8 }
 0x11d   : > { %25890 = vmatprep.mubr.f32.mxu0 %v31256_v18  ;;  %v31312_v18 = vand.u32 4294901760, %v31291_v17  ;;  %37611 = vst [vmem:[#allocation193_spill] sm:$0xff] %v31318_v63  ;;  %v31326_v39 = vand.u32 4294901760, %v2442_v37  ;;  %37614 = vst [vmem:[#allocation196_spill] sm:$0xff] %v31331_v10  ;;  %v5832_v37 = vsub.f32 %v31315_v8, %v31331_v10 }
 0x11e   : > { %37606 = vst [vmem:[#allocation188_spill] sm:$0xff] %v31301_v9  ;;  %v2452_v54 = vsub.f32 %v31276_v49, %v31301_v9 }
 0x11f   : > { %37609 = vst [vmem:[#allocation191_spill] sm:$0xff] %v31312_v18  ;;  %37613 = vst [vmem:[#allocation195_spill] sm:$0xff] %v31326_v39  ;;  %v2462_v40 = vsub.f32 %v31291_v17, %v31312_v18  ;;  %v31347_v18 = vand.u32 4294901760, %v5832_v37  ;;  %v37623_v37 = vld [vmem:[#allocation155_spill] sm:$0xff] }
 0x120   : > { %25891 = vmatmul.mubr.f32.gmra.mrb[18].mxu0 %v31282_v51  ;;  %v31323_v51 = vand.u32 4294901760, %v31304_v35  ;;  %v31334_v30 = vand.u32 4294901760, %v2452_v54  ;;  %v37622_v54 = vld [vmem:[#allocation52_spill] sm:$0xff] }
 0x121   : > { %25893 = vmatprep.mubr.f32.mxu0 %v31296_v55  ;;  %v31339_v9 = vand.u32 4294901760, %v2462_v40  ;;  %37618 = vst [vmem:[#allocation200_spill] sm:$0xff] %v31347_v18  ;;  %v37619_v40 = vld [vmem:[#allocation146_spill] sm:$0xff] }
 0x122   : > { %37612 = vst [vmem:[#allocation194_spill] sm:$0xff] %v31323_v51  ;;  %37615 = vst [vmem:[#allocation197_spill] sm:$0xff] %v31334_v30  ;;  %v5822_v55 = vsub.f32 %v31304_v35, %v31323_v51 }
 0x123   : > { %37616 = vst [vmem:[#allocation198_spill] sm:$0xff] %v31339_v9 }
 0x124   : > { %25894 = vmatmul.mubr.f32.gmra.mrb[20].mxu0 %v31307_v43  ;;  %v31344_v43 = vand.u32 4294901760, %v5822_v55  ;;  %v37621_v55 = vld [vmem:[#allocation154_spill] sm:$0xff] }
 0x125   : > { %25896 = vmatprep.mubr.f32.mxu0 %v31318_v63 }
 0x126   : > { %37617 = vst [vmem:[#allocation199_spill] sm:$0xff] %v31344_v43 }
 0x128   : > { %25897 = vmatmul.mubr.f32.gmra.mrb[22].mxu0 %v31326_v39  ;;  %v30306_v39 = vld [vmem:[%s30388_s8 + $0xc0] sm:$0xff] }
 0x129   : > { %25899 = vmatprep.mubr.f32.mxu0 %v31334_v30  ;;  %v388_v63 = vrot.slane %v30306_v39, 1 }
 0x12c   : > { %25900 = vmatmul.mubr.f32.gmra.mrb[24].mxu0 %v31339_v9 }
 0x12d   : > { %25902 = vmatprep.mubr.f32.mxu0 %v31344_v43  ;;  %v37625_v43 = vld [vmem:[#allocation164_spill] sm:$0xff] }
 0x130   : > { %25903 = vmatmul.mubr.f32.gmra.mrb[26].mxu0 %v31347_v18  ;;  %v37624_v18 = vld [vmem:[#allocation162_spill] sm:$0xff] }
 0x131   : > { %25907 = vmatprep.mubr.f32.mxu0 %v30917_v2 }
 0x134   : > { %25908 = vmatmul.mubr.f32.vlgmr.msra.gmra.mrb[0].mxu0 %v30922_v19 }
 0x135   : > { %25910 = vmatprep.mubr.f32.mxu0 %v30931_v22  ;;  %25950 = vmatpush3.msra.mxu0 %v30879_v61  ;;  %v37620_v61 = vld [vmem:[#allocation153_spill] sm:$0xff] }
 0x136   : > { %25993 = vmatprep.subr.mxu0 %v30852_v50 }
 0x138   : > { %25911 = vmatmul.mubr.f32.gmra.mrb[2].mxu0 %v30938_v56 }
 0x139   : > { %25913 = vmatprep.mubr.f32.mxu0 %v30948_v41 }
 0x13c   : > { %25914 = vmatmul.mubr.f32.gmra.mrb[4].mxu0 %v30961_v48 }
 0x13d   : > { %25916 = vmatprep.mubr.f32.mxu0 %v30963_v16 }
 0x140   : > { %25917 = vmatmul.mubr.f32.gmra.mrb[6].mxu0 %v30983_v1 }
 0x141   : > { %25919 = vmatprep.mubr.f32.mxu0 %v31004_v60 }
 0x144   : > { %25920 = vmatmul.mubr.f32.gmra.mrb[8].mxu0 %v31011_v38 }
 0x145   : > { %25922 = vmatprep.mubr.f32.mxu0 %v31013_v52 }
 0x148   : > { %25923 = vmatmul.mubr.f32.gmra.mrb[10].mxu0 %v31045_v32 }
 0x149   : > { %25925 = vmatprep.mubr.f32.mxu0 %v31061_v28 }
 0x14c   : > { %25926 = vmatmul.mubr.f32.gmra.mrb[12].mxu0 %v31084_v45 }
 0x14d   : > { %25928 = vmatprep.mubr.f32.mxu0 %v31092_v33 }
 0x150   : > { %25929 = vmatmul.mubr.f32.gmra.mrb[14].mxu0 %v31111_v24 }
 0x151   : > { %25931 = vmatprep.mubr.f32.mxu0 %v31126_v23 }
 0x154   : > { %25932 = vmatmul.mubr.f32.gmra.mrb[16].mxu0 %v31132_v34 }
 0x155   : > { %25934 = vmatprep.mubr.f32.mxu0 %v31134_v62 }
 0x158   : > { %25935 = vmatmul.mubr.f32.gmra.mrb[18].mxu0 %v31164_v42 }
 0x159   : > { %25937 = vmatprep.mubr.f32.mxu0 %v31174_v53 }
 0x15c   : > { %25938 = vmatmul.mubr.f32.gmra.mrb[20].mxu0 %v31205_v59 }
 0x15d   : > { %25940 = vmatprep.mubr.f32.mxu0 %v31212_v44 }
 0x160   : > { %25941 = vmatmul.mubr.f32.gmra.mrb[22].mxu0 %v31237_v11 }
 0x161   : > { %25943 = vmatprep.mubr.f32.mxu0 %v31245_v27 }
 0x164   : > { %25944 = vmatmul.mubr.f32.gmra.mrb[24].mxu0 %v31269_v7 }
 0x165   : > { %25946 = vmatprep.mubr.f32.mxu0 %v31278_v13 }
 0x168   : > { %25947 = vmatmul.mubr.f32.gmra.mrb[26].mxu0 %v31293_v21 }
 0x169   : > { %25951 = vmatprep.mubr.f32.mxu0 %v30926_v4 }
 0x16c   : > { %25952 = vmatmul.mubr.f32.vlgmr.msra.gmra.mrb[0].mxu0 %v30936_v36 }
 0x16d   : > { %25954 = vmatprep.mubr.f32.mxu0 %v30946_v6  ;;  %25994 = vmatpush3.msra.mxu0 %v30852_v50 }
 0x16e   : > { %26037 = vmatprep.subr.mxu0 %v30884_v5 }
 0x170   : > { %25955 = vmatmul.mubr.f32.gmra.mrb[2].mxu0 %v30958_v25 }
 0x171   : > { %25957 = vmatprep.mubr.f32.mxu0 %v30974_v0 }
 0x174   : > { %25958 = vmatmul.mubr.f32.gmra.mrb[4].mxu0 %v30987_v20 }
 0x175   : > { %25960 = vmatprep.mubr.f32.mxu0 %v30990_v31  ;;  %v30294_v31 = vld [vmem:[%s30388_s8 + $0x60] sm:$0xff] }
 0x176   : > { %v364_v20 = vrot.slane %v30294_v31, 1 }
 0x178   : > { %25961 = vmatmul.mubr.f32.gmra.mrb[6].mxu0 %v31009_v57  ;;  %v30293_v57 = vld [vmem:[%s30388_s8 + $0x58] sm:$0xff] }
 0x179   : > { %25963 = vmatprep.mubr.f32.mxu0 %v31032_v29 }
 0x17c   : > { %25964 = vmatmul.mubr.f32.gmra.mrb[8].mxu0 %v31040_v12 }
 0x17d   : > { %25966 = vmatprep.mubr.f32.mxu0 %v31043_v47  ;;  %v30292_v47 = vld [vmem:[%s30388_s8 + $0x50] sm:$0xff] }
 0x17e   : > { %v360_v12 = vrot.slane %v30292_v47, 1 }
 0x180   : > { %25967 = vmatmul.mubr.f32.gmra.mrb[10].mxu0 %v31077_v14 }
 0x181   : > { %25969 = vmatprep.mubr.f32.mxu0 %v31090_v26  ;;  %v30291_v26 = vld [vmem:[%s30388_s8 + $0x48] sm:$0xff] }
 0x182   : > { %v358_v14 = vrot.slane %v30291_v26, 1 }
 0x184   : > { %25970 = vmatmul.mubr.f32.gmra.mrb[12].mxu0 %v31109_v46 }
 0x185   : > { %25972 = vmatprep.mubr.f32.mxu0 %v37619_v40 }
 0x188   : > { %25973 = vmatmul.mubr.f32.gmra.mrb[14].mxu0 %v37620_v61 }
 0x189   : > { %25975 = vmatprep.mubr.f32.mxu0 %v37621_v55  ;;  %v30289_v55 = vld [vmem:[%s30388_s8 + $0x38] sm:$0xff] }
 0x18a   : > { %v354_v61 = vrot.slane %v30289_v55, 1 }
 0x18c   : > { %25976 = vmatmul.mubr.f32.gmra.mrb[16].mxu0 %v37622_v54  ;;  %v37626_v54 = vld [vmem:[#allocation114_spill] sm:$0xff] }
 0x18d   : > { %25978 = vmatprep.mubr.f32.mxu0 %v37623_v37  ;;  %v37627_v37 = vld [vmem:[#allocation10_spill] sm:$0xff] }
 0x190   : > { %25979 = vmatmul.mubr.f32.gmra.mrb[18].mxu0 %v37624_v18  ;;  %v37628_v18 = vld [vmem:[#allocation18_spill] sm:$0xff] }
 0x191   : > { %25981 = vmatprep.mubr.f32.mxu0 %v37625_v43  ;;  %v30288_v43 = vld [vmem:[%s30388_s8 + $0x30] sm:$0xff] }
 0x194   : > { %25982 = vmatmul.mubr.f32.gmra.mrb[20].mxu0 %v31235_v15  ;;  %v37639_v15 = vld [vmem:[#allocation152_spill] sm:$0xff] }
 0x195   : > { %25984 = vmatprep.mubr.f32.mxu0 %v31243_v3  ;;  %v37629_v3 = vld [vmem:[#allocation22_spill] sm:$0xff] }
 0x198   : > { %25985 = vmatmul.mubr.f32.gmra.mrb[22].mxu0 %v31267_v58  ;;  %v37630_v58 = vld [vmem:[#allocation27_spill] sm:$0xff] }
 0x199   : > { %25987 = vmatprep.mubr.f32.mxu0 %v31276_v49  ;;  %v37631_v49 = vld [vmem:[#allocation128_spill] sm:$0xff] }
 0x19c   : > { %25988 = vmatmul.mubr.f32.gmra.mrb[24].mxu0 %v31291_v17  ;;  %v37632_v17 = vld [vmem:[#allocation129_spill] sm:$0xff] }
 0x19d   : > { %25990 = vmatprep.mubr.f32.mxu0 %v31304_v35  ;;  %v37633_v35 = vld [vmem:[#allocation33_spill] sm:$0xff] }
 0x1a0   : > { %25991 = vmatmul.mubr.f32.gmra.mrb[26].mxu0 %v31315_v8  ;;  %v37634_v8 = vld [vmem:[#allocation136_spill] sm:$0xff] }
 0x1a1   : > { %25995 = vmatprep.mubr.f32.mxu0 %v37626_v54  ;;  %v37635_v54 = vld [vmem:[#allocation36_spill] sm:$0xff] }
 0x1a4   : > { %25996 = vmatmul.mubr.f32.vlgmr.msra.gmra.mrb[0].mxu0 %v37627_v37  ;;  %v37636_v37 = vld [vmem:[#allocation38_spill] sm:$0xff] }
 0x1a5   : > { %25998 = vmatprep.mubr.f32.mxu0 %v37628_v18  ;;  %26038 = vmatpush3.msra.mxu0 %v30884_v5  ;;  %v37637_v18 = vld [vmem:[#allocation44_spill] sm:$0xff]  ;;  %v37638_v5 = vld [vmem:[#allocation50_spill] sm:$0xff] }
 0x1a6   : > { %26081 = vmatprep.subr.mxu0 %v30852_v50 }
 0x1a8   : > { %25999 = vmatmul.mubr.f32.gmra.mrb[2].mxu0 %v37629_v3  ;;  %v37640_v3 = vld [vmem:[#allocation51_spill] sm:$0xff] }
 0x1a9   : > { %26001 = vmatprep.mubr.f32.mxu0 %v37630_v58  ;;  %v37641_v58 = vld [vmem:[#allocation158_spill] sm:$0xff] }
 0x1ac   : > { %26002 = vmatmul.mubr.f32.gmra.mrb[4].mxu0 %v37631_v49  ;;  %v37642_v49 = vld [vmem:[#allocation161_spill] sm:$0xff] }
 0x1ad   : > { %26004 = vmatprep.mubr.f32.mxu0 %v37632_v17  ;;  %v37643_v17 = vld [vmem:[#allocation57_spill] sm:$0xff] }
 0x1b0   : > { %26005 = vmatmul.mubr.f32.gmra.mrb[6].mxu0 %v37633_v35  ;;  %v37644_v35 = vld [vmem:[#allocation58_spill] sm:$0xff] }
 0x1b1   : > { %26007 = vmatprep.mubr.f32.mxu0 %v37634_v8  ;;  %v37645_v8 = vld [vmem:[#allocation61_spill] sm:$0xff] }
 0x1b4   : > { %26008 = vmatmul.mubr.f32.gmra.mrb[8].mxu0 %v37635_v54  ;;  %v37646_v54 = vld [vmem:[#allocation169_spill] sm:$0xff] }
 0x1b5   : > { %26010 = vmatprep.mubr.f32.mxu0 %v37636_v37  ;;  %v37647_v37 = vld [vmem:[#allocation177_spill] sm:$0xff] }
 0x1b8   : > { %26011 = vmatmul.mubr.f32.gmra.mrb[10].mxu0 %v37637_v18  ;;  %v37648_v18 = vld [vmem:[#allocation180_spill] sm:$0xff] }
 0x1b9   : > { %26013 = vmatprep.mubr.f32.mxu0 %v37638_v5  ;;  %v37649_v5 = vld [vmem:[#allocation184_spill] sm:$0xff] }
 0x1bc   : > { %26014 = vmatmul.mubr.f32.gmra.mrb[12].mxu0 %v37639_v15  ;;  %v37650_v15 = vld [vmem:[#allocation188_spill] sm:$0xff] }
 0x1bd   : > { %26016 = vmatprep.mubr.f32.mxu0 %v37640_v3  ;;  %v37651_v3 = vld [vmem:[#allocation191_spill] sm:$0xff] }
 0x1c0   : > { %26017 = vmatmul.mubr.f32.gmra.mrb[14].mxu0 %v37641_v58 }
 0x1c1   : > { %26019 = vmatprep.mubr.f32.mxu0 %v37642_v49 }
 0x1c4   : > { %26020 = vmatmul.mubr.f32.gmra.mrb[16].mxu0 %v37643_v17  ;;  %v23131_v17 = vld [vmem:[%s36458_s1 + $0x10] sm:$0xf] }
 0x1c5   : > { %26022 = vmatprep.mubr.f32.mxu0 %v37644_v35  ;;  %v30287_v35 = vld [vmem:[%s30388_s8 + $0x28] sm:$0xff] }
 0x1c8   : > { %26023 = vmatmul.mubr.f32.gmra.mrb[18].mxu0 %v37645_v8  ;;  %v7141_v8 = vsel %vm453_vm0, %v23131_v17, 0 }
 0x1c9   : > { %26025 = vmatprep.mubr.f32.mxu0 %v37646_v54 }
 0x1cc   : > { %26026 = vmatmul.mubr.f32.gmra.mrb[20].mxu0 %v37647_v37  ;;  %v31446_v37 = vand.u32 4294901760, %v7141_v8 }
 0x1cd   : > { %26028 = vmatprep.mubr.f32.mxu0 %v37648_v18 }
 0x1d0   : > { %26029 = vmatmul.mubr.f32.gmra.mrb[22].mxu0 %v37649_v5  ;;  %v30286_v5 = vld [vmem:[%s30388_s8 + $0x20] sm:$0xff] }
 0x1d1   : > { %26031 = vmatprep.mubr.f32.mxu0 %v37650_v15  ;;  %v348_v18 = vrot.slane %v30286_v5, 1  ;;  %v352_v5 = vrot.slane %v30288_v43, 1 }
 0x1d4   : > { %26032 = vmatmul.mubr.f32.gmra.mrb[24].mxu0 %v37651_v3  ;;  %v30285_v3 = vld [vmem:[%s30388_s8 + $0x18] sm:$0xff] }
 0x1d5   : > { %26034 = vmatprep.mubr.f32.mxu0 %v31323_v51  ;;  %v346_v15 = vrot.slane %v30285_v3, 1  ;;  %v350_v3 = vrot.slane %v30287_v35, 1  ;;  %v30290_v35 = vld [vmem:[%s30388_s8 + $0x40] sm:$0xff] }
 0x1d7   : > { %v349_v58 = vsel %vm340_vm3, %v346_v15, %v348_v18  ;;  %v351_v46 = vsel %vm340_vm3, %v348_v18, %v350_v3  ;;  %v353_v43 = vsel %vm340_vm3, %v350_v3, %v352_v5 }
 0x1d8   : > { %26035 = vmatmul.mubr.f32.gmra.mrb[26].mxu0 %v31331_v10  ;;  %v405_v18 = vsel %vm396_vm2, %v351_v46, 0  ;;  %v407_v26 = vsel %vm396_vm2, %v353_v43, 0  ;;  %v362_v43 = vrot.slane %v30293_v57, 1 }
 0x1d9   : > { %26039 = vmatprep.mubr.f32.mxu0 %v30917_v2  ;;  %v31553_v0 = vand.u32 4294901760, %v407_v26 }
 0x1da   : > { %v365_v36 = vsel %vm340_vm3, %v362_v43, %v364_v20 }
 0x1db   : > { %37657 = vst [vmem:[#allocation206_spill] sm:$0xff] %v31553_v0  ;;  %v31572_v6 = vsub.f32 %v407_v26, %v31553_v0  ;;  %v30297_v26 = vld [vmem:[%s30388_s8 + $0x78] sm:$0xff] }
 0x1dc   : > { %26040 = vmatmul.mubr.f32.vlgmr.msra.gmra.mrb[0].mxu0 %v30922_v19 }
 0x1dd   : > { %26042 = vmatprep.mubr.f32.mxu0 %v30931_v22  ;;  %26082 = vmatpush3.msra.mxu0 %v30852_v50  ;;  %v31473_v50 = vsub.f32 %v7141_v8, %v31446_v37  ;;  %37661 = vst [vmem:[#allocation210_spill] sm:$0xff] %v31572_v6 }
 0x1de   : > { %26125 = vmatprep.subr.mxu0 %v31446_v37 }
 0x1df   : > { %v31478_v17 = vand.u32 4294901760, %v31473_v50 }
 0x1e0   : > { %26043 = vmatmul.mubr.f32.gmra.mrb[2].mxu0 %v30938_v56 }
 0x1e1   : > { %26045 = vmatprep.mubr.f32.mxu0 %v30948_v41  ;;  %37652 = vst [vmem:[#allocation201_spill] sm:$0xff] %v31478_v17  ;;  %v7493_v10 = vsub.f32 %v31473_v50, %v31478_v17 }
 0x1e3   : > { %v31486_v8 = vand.u32 4294901760, %v7493_v10  ;;  %v31501_v10 = vld [vmem:[%s30388_s8 + $0x10] sm:$0xff] }
 0x1e4   : > { %26046 = vmatmul.mubr.f32.gmra.mrb[4].mxu0 %v30961_v48  ;;  %v36781_v51 = vrot.slane %v31501_v10, 1 }
 0x1e5   : > { %26048 = vmatprep.mubr.f32.mxu0 %v30963_v16 }
 0x1e6   : > { %v347_v54 = vsel %vm340_vm3, %v36781_v51, %v346_v15  ;;  %v403_v51 = vsel %vm396_vm2, %v349_v58, 0  ;;  %v355_v58 = vsel %vm340_vm3, %v352_v5, %v354_v61 }
 0x1e7   : > { %v401_v49 = vsel %vm396_vm2, %v347_v54, 0  ;;  %v356_v54 = vrot.slane %v30290_v35, 1  ;;  %v31532_v55 = vand.u32 4294901760, %v403_v51  ;;  %v31539_v35 = vand.u32 4294901760, %v405_v18 }
 0x1e8   : > { %26049 = vmatmul.mubr.f32.gmra.mrb[6].mxu0 %v30983_v1  ;;  %v31520_v40 = vand.u32 4294901760, %v401_v49  ;;  %v409_v3 = vsel %vm396_vm2, %v355_v58, 0  ;;  %v30295_v58 = vld [vmem:[%s30388_s8 + $0x68] sm:$0xff] }
 0x1e9   : > { %26051 = vmatprep.mubr.f32.mxu0 %v31004_v60  ;;  %37654 = vst [vmem:[#allocation203_spill] sm:$0xff] %v31539_v35  ;;  %v31548_v46 = vsub.f32 %v403_v51, %v31532_v55  ;;  %v359_v5 = vsel %vm340_vm3, %v356_v54, %v358_v14  ;;  %v366_v25 = vrot.slane %v30295_v58, 1  ;;  %v31557_v47 = vand.u32 4294901760, %v409_v3 }
 0x1ea   : > { %v31530_v15 = vsub.f32 %v401_v49, %v31520_v40  ;;  %v357_v49 = vsel %vm340_vm3, %v354_v61, %v356_v54  ;;  %v31562_v51 = vsub.f32 %v405_v18, %v31539_v35  ;;  %v413_v57 = vsel %vm396_vm2, %v359_v5, 0  ;;  %v30296_v5 = vld [vmem:[%s30388_s8 + $0x70] sm:$0xff] }
 0x1eb   : > { %37656 = vst [vmem:[#allocation205_spill] sm:$0xff] %v31548_v46  ;;  %37658 = vst [vmem:[#allocation207_spill] sm:$0xff] %v31557_v47  ;;  %v411_v61 = vsel %vm396_vm2, %v357_v49, 0  ;;  %v31568_v54 = vand.u32 4294901760, %v31548_v46  ;;  %v361_v58 = vsel %vm340_vm3, %v358_v14, %v360_v12  ;;  %v363_v18 = vsel %vm340_vm3, %v360_v12, %v362_v43 }
 0x1ec   : > { %26052 = vmatmul.mubr.f32.gmra.mrb[8].mxu0 %v31011_v38  ;;  %37653 = vst [vmem:[#allocation202_spill] sm:$0xff] %v31530_v15  ;;  %v31545_v29 = vand.u32 4294901760, %v31530_v15  ;;  %37659 = vst [vmem:[#allocation208_spill] sm:$0xff] %v31562_v51  ;;  %v31574_v49 = vand.u32 4294901760, %v411_v61  ;;  %v368_v4 = vrot.slane %v30296_v5, 1  ;;  %v367_v14 = vsel %vm340_vm3, %v364_v20, %v366_v25  ;;  %v31594_v5 = vld [vmem:[%s30388_s8 + $0x88] sm:$0xff] }
 0x1ed   : > { %26054 = vmatprep.mubr.f32.mxu0 %v31013_v52  ;;  %37660 = vst [vmem:[#allocation209_spill] sm:$0xff] %v31568_v54  ;;  %v31590_v12 = vand.u32 4294901760, %v31562_v51  ;;  %v415_v43 = vsel %vm396_vm2, %v361_v58, 0  ;;  %v417_v20 = vsel %vm396_vm2, %v363_v18, 0 }
 0x1ee   : > { %37655 = vst [vmem:[#allocation204_spill] sm:$0xff] %v31545_v29  ;;  %v546_v31 = vsub.f32 %v31530_v15, %v31545_v29  ;;  %37662 = vst [vmem:[#allocation211_spill] sm:$0xff] %v31574_v49  ;;  %v31607_v58 = vsub.f32 %v411_v61, %v31574_v49 }
 0x1ef   : > { %37665 = vst [vmem:[#allocation214_spill] sm:$0xff] %v31590_v12  ;;  %v566_v61 = vsub.f32 %v31562_v51, %v31590_v12  ;;  %v30307_v12 = vld [vmem:[%s30388_s8 + $0xc8] sm:$0xff] }
 0x1f0   : > { %26055 = vmatmul.mubr.f32.gmra.mrb[10].mxu0 %v31045_v32  ;;  %37667 = vst [vmem:[#allocation216_spill] sm:$0xff] %v31607_v58  ;;  %v37724_v51 = vld [vmem:[#allocation67_spill] sm:$0xff] }
 0x1f1   : > { %26057 = vmatprep.mubr.f32.mxu0 %v31061_v28 }
 0x1f4   : > { %26058 = vmatmul.mubr.f32.gmra.mrb[12].mxu0 %v31084_v45 }
 0x1f5   : > { %26060 = vmatprep.mubr.f32.mxu0 %v31092_v33 }
 0x1f8   : > { %26061 = vmatmul.mubr.f32.gmra.mrb[14].mxu0 %v31111_v24 }
 0x1f9   : > { %26063 = vmatprep.mubr.f32.mxu0 %v31126_v23 }
 0x1fc   : > { %26064 = vmatmul.mubr.f32.gmra.mrb[16].mxu0 %v31132_v34 }
 0x1fd   : > { %26066 = vmatprep.mubr.f32.mxu0 %v31134_v62 }
 0x200   : > { %26067 = vmatmul.mubr.f32.gmra.mrb[18].mxu0 %v31164_v42 }
 0x201   : > { %26069 = vmatprep.mubr.f32.mxu0 %v31174_v53 }
 0x204   : > { %26070 = vmatmul.mubr.f32.gmra.mrb[20].mxu0 %v31205_v59 }
 0x205   : > { %26072 = vmatprep.mubr.f32.mxu0 %v31212_v44 }
 0x208   : > { %26073 = vmatmul.mubr.f32.gmra.mrb[22].mxu0 %v31237_v11 }
 0x209   : > { %26075 = vmatprep.mubr.f32.mxu0 %v31245_v27 }
 0x20c   : > { %26076 = vmatmul.mubr.f32.gmra.mrb[24].mxu0 %v31269_v7 }
 0x20d   : > { %26078 = vmatprep.mubr.f32.mxu0 %v31278_v13 }
 0x210   : > { %26079 = vmatmul.mubr.f32.gmra.mrb[26].mxu0 %v31293_v21 }
 0x211   : > { %26083 = vmatprep.mubr.f32.mxu0 %v30917_v2 }
 0x214   : > { %26084 = vmatmul.mubr.f32.vlgmr.msra.gmra.mrb[0].mxu0 %v30922_v19 }
 0x215   : > { %26086 = vmatprep.mubr.f32.mxu0 %v30931_v22  ;;  %26126 = vmatpush3.msra.mxu0 %v31446_v37 }
 0x216   : > { %26169 = vmatprep.subr.mxu0 %v31486_v8 }
 0x218   : > { %26087 = vmatmul.mubr.f32.gmra.mrb[2].mxu0 %v30938_v56 }
 0x219   : > { %26089 = vmatprep.mubr.f32.mxu0 %v30948_v41 }
 0x21c   : > { %26090 = vmatmul.mubr.f32.gmra.mrb[4].mxu0 %v30961_v48  ;;  %v30304_v48 = vld [vmem:[%s30388_s8 + $0xb0] sm:$0xff] }
 0x21d   : > { %26092 = vmatprep.mubr.f32.mxu0 %v30963_v16  ;;  %v31653_v16 = vand.u32 4294901760, %v566_v61  ;;  %v384_v41 = vrot.slane %v30304_v48, 1 }
 0x21f   : > { %37677 = vst [vmem:[#allocation226_spill] sm:$0xff] %v31653_v16 }
 0x220   : > { %26093 = vmatmul.mubr.f32.gmra.mrb[6].mxu0 %v30983_v1 }
 0x221   : > { %26095 = vmatprep.mubr.f32.mxu0 %v31004_v60  ;;  %v30303_v60 = vld [vmem:[%s30388_s8 + $0xa8] sm:$0xff] }
 0x222   : > { %v382_v1 = vrot.slane %v30303_v60, 1  ;;  %v31669_v60 = vld [vmem:[%s30388_s8 + $0xb8] sm:$0xff] }
 0x224   : > { %26096 = vmatmul.mubr.f32.gmra.mrb[8].mxu0 %v31011_v38  ;;  %v31638_v38 = vand.u32 4294901760, %v31607_v58 }
 0x225   : > { %26098 = vmatprep.mubr.f32.mxu0 %v31013_v52 }
 0x226   : > { %37674 = vst [vmem:[#allocation223_spill] sm:$0xff] %v31638_v38 }
 0x228   : > { %26099 = vmatmul.mubr.f32.gmra.mrb[10].mxu0 %v31045_v32 }
 0x229   : > { %26101 = vmatprep.mubr.f32.mxu0 %v31061_v28  ;;  %v30302_v28 = vld [vmem:[%s30388_s8 + $0xa0] sm:$0xff] }
 0x22a   : > { %v380_v32 = vrot.slane %v30302_v28, 1 }
 0x22c   : > { %26102 = vmatmul.mubr.f32.gmra.mrb[12].mxu0 %v31084_v45 }
 0x22d   : > { %26104 = vmatprep.mubr.f32.mxu0 %v31092_v33 }
 0x230   : > { %26105 = vmatmul.mubr.f32.gmra.mrb[14].mxu0 %v31111_v24  ;;  %v30300_v24 = vld [vmem:[%s30388_s8 + $0x90] sm:$0xff] }
 0x231   : > { %26107 = vmatprep.mubr.f32.mxu0 %v31126_v23  ;;  %v31623_v23 = vand.u32 4294901760, %v417_v20  ;;  %v376_v33 = vrot.slane %v30300_v24, 1 }
 0x233   : > { %37671 = vst [vmem:[#allocation220_spill] sm:$0xff] %v31623_v23 }
 0x234   : > { %26108 = vmatmul.mubr.f32.gmra.mrb[16].mxu0 %v31132_v34 }
 0x235   : > { %26110 = vmatprep.mubr.f32.mxu0 %v31134_v62 }
 0x238   : > { %26111 = vmatmul.mubr.f32.gmra.mrb[18].mxu0 %v31164_v42  ;;  %v30298_v42 = vld [vmem:[%s30388_s8 + $0x80] sm:$0xff] }
 0x239   : > { %26113 = vmatprep.mubr.f32.mxu0 %v31174_v53  ;;  %v370_v53 = vrot.slane %v30297_v26, 1  ;;  %v372_v62 = vrot.slane %v30298_v42, 1  ;;  %v419_v26 = vsel %vm396_vm2, %v365_v36, 0  ;;  %v31601_v42 = vand.u32 4294901760, %v546_v31 }
 0x23a   : > { %v31617_v36 = vand.u32 4294901760, %v415_v43  ;;  %v369_v31 = vsel %vm340_vm3, %v366_v25, %v368_v4 }
 0x23c   : > { %26114 = vmatmul.mubr.f32.gmra.mrb[20].mxu0 %v31205_v59  ;;  %v31583_v59 = vand.u32 4294901760, %v413_v57  ;;  %37670 = vst [vmem:[#allocation219_spill] sm:$0xff] %v31617_v36 }
 0x23d   : > { %26116 = vmatprep.mubr.f32.mxu0 %v31212_v44  ;;  %v31581_v44 = vsub.f32 %v409_v3, %v31557_v47  ;;  %v374_v3 = vrot.slane %v31594_v5, 1  ;;  %v421_v5 = vsel %vm396_vm2, %v367_v14, 0  ;;  %v31625_v14 = vand.u32 4294901760, %v419_v26 }
 0x23e   : > { %37664 = vst [vmem:[#allocation213_spill] sm:$0xff] %v31583_v59  ;;  %v31615_v18 = vsub.f32 %v413_v57, %v31583_v59  ;;  %v30301_v57 = vld [vmem:[%s30388_s8 + $0x98] sm:$0xff]  ;;  %v31631_v52 = vand.u32 4294901760, %v421_v5 }
 0x23f   : > { %37663 = vst [vmem:[#allocation212_spill] sm:$0xff] %v31581_v44  ;;  %v31612_v34 = vand.u32 4294901760, %v31581_v44  ;;  %37672 = vst [vmem:[#allocation221_spill] sm:$0xff] %v31625_v14  ;;  %v378_v45 = vrot.slane %v30301_v57, 1 }
 0x240   : > { %26117 = vmatmul.mubr.f32.gmra.mrb[22].mxu0 %v31237_v11  ;;  %v556_v11 = vsub.f32 %v31548_v46, %v31568_v54  ;;  %37669 = vst [vmem:[#allocation218_spill] sm:$0xff] %v31615_v18  ;;  %37673 = vst [vmem:[#allocation222_spill] sm:$0xff] %v31631_v52  ;;  %v31645_v28 = vand.u32 4294901760, %v31615_v18  ;;  %v31663_v56 = vsub.f32 %v421_v5, %v31631_v52  ;;  %v390_v54 = vrot.slane %v30307_v12, 1 }
 0x241   : > { %26119 = vmatprep.mubr.f32.mxu0 %v31245_v27  ;;  %v31604_v27 = vand.u32 4294901760, %v31572_v6  ;;  %37668 = vst [vmem:[#allocation217_spill] sm:$0xff] %v31612_v34  ;;  %v586_v24 = vsub.f32 %v31581_v44, %v31612_v34 }
 0x242   : > { %v31633_v25 = vand.u32 4294901760, %v556_v11  ;;  %37675 = vst [vmem:[#allocation224_spill] sm:$0xff] %v31645_v28  ;;  %v31648_v11 = vsub.f32 %v415_v43, %v31617_v36  ;;  %37680 = vst [vmem:[#allocation229_spill] sm:$0xff] %v31663_v56  ;;  %v31698_v2 = vand.u32 4294901760, %v31663_v56 }
 0x243   : > { %37666 = vst [vmem:[#allocation215_spill] sm:$0xff] %v31604_v27  ;;  %v31680_v5 = vand.u32 4294901760, %v586_v24  ;;  %v377_v24 = vsel %vm340_vm3, %v374_v3, %v376_v33 }
 0x244   : > { %26120 = vmatmul.mubr.f32.gmra.mrb[24].mxu0 %v31269_v7  ;;  %v371_v7 = vsel %vm340_vm3, %v368_v4, %v370_v53  ;;  %v423_v4 = vsel %vm396_vm2, %v369_v31, 0  ;;  %37676 = vst [vmem:[#allocation225_spill] sm:$0xff] %v31648_v11  ;;  %v31656_v31 = vsub.f32 %v417_v20, %v31623_v23  ;;  %v596_v20 = vsub.f32 %v31607_v58, %v31638_v38 }
 0x245   : > { %26122 = vmatprep.mubr.f32.mxu0 %v31278_v13  ;;  %v576_v13 = vsub.f32 %v31572_v6, %v31604_v27  ;;  %v425_v57 = vsel %vm396_vm2, %v371_v7, 0  ;;  %v31665_v43 = vand.u32 4294901760, %v423_v4  ;;  %v373_v7 = vsel %vm340_vm3, %v370_v53, %v372_v62  ;;  %37684 = vst [vmem:[#allocation233_spill] sm:$0xff] %v31680_v5  ;;  %37688 = vst [vmem:[#allocation237_spill] sm:$0xff] %v31698_v2 }
 0x246   : > { %37678 = vst [vmem:[#allocation227_spill] sm:$0xff] %v31656_v31  ;;  %v31674_v22 = vand.u32 4294901760, %v425_v57  ;;  %v606_v53 = vsub.f32 %v31615_v18, %v31645_v28  ;;  %v31685_v19 = vand.u32 4294901760, %v31648_v11  ;;  %v31690_v61 = vand.u32 4294901760, %v31656_v31  ;;  %v30309_v18 = vld [vmem:[%s30388_s8 + $0xd8] sm:$0xff] }
 0x247   : > { %37681 = vst [vmem:[#allocation230_spill] sm:$0xff] %v31665_v43  ;;  %v31678_v48 = vand.u32 4294901760, %v576_v13  ;;  %v427_v13 = vsel %vm396_vm2, %v373_v7, 0  ;;  %v31701_v9 = vsub.f32 %v423_v4, %v31665_v43  ;;  %v31707_v28 = vand.u32 4294901760, %v596_v20 }
 0x248   : > { %26123 = vmatmul.mubr.f32.gmra.mrb[26].mxu0 %v31293_v21  ;;  %v31659_v21 = vsub.f32 %v419_v26, %v31625_v14  ;;  %37682 = vst [vmem:[#allocation231_spill] sm:$0xff] %v31674_v22  ;;  %v375_v26 = vsel %vm340_vm3, %v372_v62, %v374_v3  ;;  %37685 = vst [vmem:[#allocation234_spill] sm:$0xff] %v31685_v19  ;;  %v31710_v7 = vsub.f32 %v425_v57, %v31674_v22 }
 0x249   : > { %26127 = vmatprep.mubr.f32.mxu0 %v31601_v42  ;;  %37683 = vst [vmem:[#allocation232_spill] sm:$0xff] %v31678_v48  ;;  %37686 = vst [vmem:[#allocation235_spill] sm:$0xff] %v31690_v61  ;;  %v429_v30 = vsel %vm396_vm2, %v375_v26, 0  ;;  %v381_v3 = vsel %vm340_vm3, %v378_v45, %v380_v32  ;;  %v616_v4 = vsub.f32 %v31648_v11, %v31685_v19  ;;  %v31716_v38 = vand.u32 4294901760, %v427_v13 }
 0x24a   : > { %37679 = vst [vmem:[#allocation228_spill] sm:$0xff] %v31659_v21  ;;  %v31693_v62 = vand.u32 4294901760, %v31659_v21  ;;  %37689 = vst [vmem:[#allocation238_spill] sm:$0xff] %v31701_v9  ;;  %v383_v26 = vsel %vm340_vm3, %v380_v32, %v382_v1  ;;  %v31721_v39 = vand.u32 4294901760, %v606_v53  ;;  %v626_v57 = vsub.f32 %v31656_v31, %v31690_v61 }
 0x24b   : > { %37690 = vst [vmem:[#allocation239_spill] sm:$0xff] %v31707_v28  ;;  %37691 = vst [vmem:[#allocation240_spill] sm:$0xff] %v31710_v7  ;;  %v646_v34 = vsub.f32 %v31663_v56, %v31698_v2  ;;  %v435_v32 = vsel %vm396_vm2, %v381_v3, 0  ;;  %v31737_v53 = vand.u32 4294901760, %v31710_v7  ;;  %v437_v61 = vsel %vm396_vm2, %v383_v26, 0 }
 0x24c   : > { %26128 = vmatmul.mubr.f32.vlgmr.msra.gmra.mrb[0].mxu0 %v31633_v25  ;;  %37687 = vst [vmem:[#allocation236_spill] sm:$0xff] %v31693_v62  ;;  %37692 = vst [vmem:[#allocation241_spill] sm:$0xff] %v31716_v38  ;;  %v636_v19 = vsub.f32 %v31659_v21, %v31693_v62  ;;  %v31745_v62 = vand.u32 4294901760, %v616_v4  ;;  %v31748_v2 = vsub.f32 %v427_v13, %v31716_v38  ;;  %v31753_v3 = vand.u32 4294901760, %v626_v57 }
 0x24d   : > { %26130 = vmatprep.mubr.f32.mxu0 %v31653_v16  ;;  %26170 = vmatpush3.msra.mxu0 %v31486_v8  ;;  %v379_v8 = vsel %vm340_vm3, %v376_v33, %v378_v45  ;;  %v431_v33 = vsel %vm396_vm2, %v377_v24, 0  ;;  %37693 = vst [vmem:[#allocation242_spill] sm:$0xff] %v31721_v39  ;;  %v31725_v45 = vand.u32 4294901760, %v429_v30  ;;  %v31733_v24 = vand.u32 4294901760, %v31701_v9  ;;  %37696 = vst [vmem:[#allocation245_spill] sm:$0xff] %v31737_v53 }
 0x24e   : > { %26213 = vmatprep.subr.mxu0 %v31473_v50  ;;  %v433_v20 = vsel %vm396_vm2, %v379_v8, 0  ;;  %v31739_v27 = vand.u32 4294901760, %v431_v33  ;;  %v385_v8 = vsel %vm340_vm3, %v382_v1, %v384_v41  ;;  %37698 = vst [vmem:[#allocation247_spill] sm:$0xff] %v31745_v62  ;;  %37699 = vst [vmem:[#allocation248_spill] sm:$0xff] %v31748_v2  ;;  %v31758_v26 = vand.u32 4294901760, %v435_v32 }
 0x24f   : > { %37694 = vst [vmem:[#allocation243_spill] sm:$0xff] %v31725_v45  ;;  %37695 = vst [vmem:[#allocation244_spill] sm:$0xff] %v31733_v24  ;;  %v31750_v29 = vand.u32 4294901760, %v433_v20  ;;  %v31756_v56 = vsub.f32 %v429_v30, %v31725_v45  ;;  %v37704_v1 = vrot.slane %v31669_v60, 1  ;;  %v31763_v4 = vand.u32 4294901760, %v636_v19 }
 0x250   : > { %26131 = vmatmul.mubr.f32.gmra.mrb[2].mxu0 %v31678_v48  ;;  %37697 = vst [vmem:[#allocation246_spill] sm:$0xff] %v31739_v27  ;;  %37701 = vst [vmem:[#allocation250_spill] sm:$0xff] %v31753_v3  ;;  %v31765_v21 = vand.u32 4294901760, %v437_v61  ;;  %v439_v13 = vsel %vm396_vm2, %v385_v8, 0  ;;  %v31768_v31 = vand.u32 4294901760, %v646_v34  ;;  %v656_v30 = vsub.f32 %v31701_v9, %v31733_v24 }
 0x251   : > { %26133 = vmatprep.mubr.f32.mxu0 %v31680_v5  ;;  %37700 = vst [vmem:[#allocation249_spill] sm:$0xff] %v31750_v29  ;;  %37702 = vst [vmem:[#allocation251_spill] sm:$0xff] %v31756_v56  ;;  %v387_v12 = vsel %vm340_vm3, %v384_v41, %v37704_v1  ;;  %v666_v57 = vsub.f32 %v31710_v7, %v31737_v53  ;;  %v31775_v11 = vsub.f32 %v431_v33, %v31739_v27 }
 0x252   : > { %37703 = vst [vmem:[#allocation252_spill] sm:$0xff] %v31758_v26  ;;  %37705 = vst [vmem:[#allocation253_spill] sm:$0xff] %v31763_v4  ;;  %v31779_v19 = vand.u32 4294901760, %v31748_v2  ;;  %v31782_v41 = vsub.f32 %v433_v20, %v31750_v29  ;;  %v441_v34 = vsel %vm396_vm2, %v387_v12, 0  ;;  %v37711_v8 = vmov %v37704_v1  ;;  %v30308_v20 = vld [vmem:[%s30388_s8 + $0xd0] sm:$0xff] }
 0x253   : > { %37706 = vst [vmem:[#allocation254_spill] sm:$0xff] %v31765_v21  ;;  %37707 = vst [vmem:[#allocation255_spill] sm:$0xff] %v31768_v31  ;;  %v389_v1 = vsel %vm340_vm3, %v37711_v8, %v388_v63  ;;  %v31790_v53 = vand.u32 4294901760, %v31756_v56  ;;  %v31793_v33 = vsub.f32 %v435_v32, %v31758_v26  ;;  %v31795_v24 = vand.u32 4294901760, %v439_v13  ;;  %v37716_v8 = vld [vmem:[#allocation64_spill] sm:$0xff] }
 0x254   : > { %26134 = vmatmul.mubr.f32.gmra.mrb[4].mxu0 %v31707_v28  ;;  %37708 = vst [vmem:[#allocation256_spill] sm:$0xff] %v31775_v11  ;;  %37709 = vst [vmem:[#allocation257_spill] sm:$0xff] %v31779_v19  ;;  %v391_v7 = vsel %vm340_vm3, %v388_v63, %v390_v54  ;;  %v392_v9 = vrot.slane %v30308_v20, 1  ;;  %v31800_v12 = vrot.slane %v30309_v18, 1  ;;  %v31803_v60 = vsub.f32 %v437_v61, %v31765_v21 }
 0x255   : > { %26136 = vmatprep.mubr.f32.mxu0 %v31721_v39  ;;  %37710 = vst [vmem:[#allocation258_spill] sm:$0xff] %v31782_v41  ;;  %37712 = vst [vmem:[#allocation259_spill] sm:$0xff] %v31790_v53  ;;  %v7130_v58 = vrot.slane %v37716_v8, 1  ;;  %v31807_v44 = vand.u32 4294901760, %v31775_v11  ;;  %v31809_v6 = vand.u32 4294901760, %v441_v34  ;;  %v443_v32 = vsel %vm396_vm2, %v389_v1, 0 }
 0x256   : > { %37713 = vst [vmem:[#allocation260_spill] sm:$0xff] %v31793_v33  ;;  %37714 = vst [vmem:[#allocation261_spill] sm:$0xff] %v31795_v24  ;;  %v31813_v63 = vand.u32 4294901760, %v656_v30  ;;  %v676_v18 = vsub.f32 %v31748_v2, %v31779_v19  ;;  %v31818_v20 = vand.u32 4294901760, %v31782_v41  ;;  %v445_v61 = vsel %vm396_vm2, %v391_v7, 0 }
 0x257   : > { %37715 = vst [vmem:[#allocation262_spill] sm:$0xff] %v31803_v60  ;;  %37717 = vst [vmem:[#allocation64_spill] sm:$0xff] %v31807_v44  ;;  %v31822_v8 = vand.u32 4294901760, %v666_v57  ;;  %v686_v17 = vsub.f32 %v31756_v56, %v31790_v53  ;;  %v31827_v1 = vand.u32 4294901760, %v31793_v33  ;;  %v31830_v30 = vsub.f32 %v439_v13, %v31795_v24 }
 0x258   : > { %26137 = vmatmul.mubr.f32.gmra.mrb[6].mxu0 %v31745_v62  ;;  %37718 = vst [vmem:[#allocation263_spill] sm:$0xff] %v31809_v6  ;;  %37719 = vst [vmem:[#allocation264_spill] sm:$0xff] %v31813_v63  ;;  %v31833_v19 = vrot.slane %v37724_v51, 1  ;;  %v31836_v2 = vand.u32 4294901760, %v31803_v60  ;;  %v31838_v7 = vand.u32 4294901760, %v443_v32  ;;  %v393_v57 = vsel %vm340_vm3, %v390_v54, %v392_v9 }
 0x259   : > { %26139 = vmatprep.mubr.f32.mxu0 %v31753_v3  ;;  %37720 = vst [vmem:[#allocation265_spill] sm:$0xff] %v31818_v20  ;;  %37721 = vst [vmem:[#allocation266_spill] sm:$0xff] %v31822_v8  ;;  %v696_v46 = vsub.f32 %v31775_v11, %v31807_v44  ;;  %v31844_v53 = vsub.f32 %v441_v34, %v31809_v6  ;;  %v31846_v56 = vand.u32 4294901760, %v445_v61  ;;  %v31851_v51 = vand.u32 4294901760, %v676_v18 }
 0x25a   : > { %37722 = vst [vmem:[#allocation267_spill] sm:$0xff] %v31827_v1  ;;  %37723 = vst [vmem:[#allocation268_spill] sm:$0xff] %v31830_v30  ;;  %v395_v13 = vsel %vm340_vm3, %v392_v9, %v31800_v12  ;;  %v706_v15 = vsub.f32 %v31782_v41, %v31818_v20  ;;  %v31856_v54 = vand.u32 4294901760, %v686_v17  ;;  %v716_v34 = vsub.f32 %v31793_v33, %v31827_v1 }
 0x25b   : > { %37725 = vst [vmem:[#allocation67_spill] sm:$0xff] %v31833_v19  ;;  %37726 = vst [vmem:[#allocation269_spill] sm:$0xff] %v31836_v2  ;;  %v31861_v44 = vand.u32 4294901760, %v31830_v30  ;;  %v447_v9 = vsel %vm396_vm2, %v393_v57, 0  ;;  %v726_v18 = vsub.f32 %v31803_v60, %v31836_v2  ;;  %v31867_v11 = vsub.f32 %v443_v32, %v31838_v7  ;;  %v31892_v60 = vld [vmem:[%s30388_s8 + $0x8] sm:$0xff] }
 0x25c   : > { %26140 = vmatmul.mubr.f32.gmra.mrb[8].mxu0 %v31763_v4  ;;  %37727 = vst [vmem:[#allocation270_spill] sm:$0xff] %v31838_v7  ;;  %37728 = vst [vmem:[#allocation271_spill] sm:$0xff] %v31844_v53  ;;  %v449_v20 = vsel %vm396_vm2, %v395_v13, 0  ;;  %v7131_v17 = vsel %vm340_vm3, %v31800_v12, %v7130_v58  ;;  %v31872_v41 = vand.u32 4294901760, %v696_v46  ;;  %v31875_v1 = vand.u32 4294901760, %v31844_v53  ;;  %v31888_v13 = vld [vmem:[%s30388_s8] sm:$0xff] }
 0x25d   : > { %26142 = vmatprep.mubr.f32.mxu0 %v31768_v31  ;;  %37729 = vst [vmem:[#allocation272_spill] sm:$0xff] %v31846_v56  ;;  %37730 = vst [vmem:[#allocation273_spill] sm:$0xff] %v31851_v51  ;;  %v31878_v33 = vsub.f32 %v445_v61, %v31846_v56  ;;  %v7133_v57 = vsel %vm340_vm3, %v7130_v58, %v31833_v19  ;;  %v31883_v32 = vand.u32 4294901760, %v706_v15  ;;  %v31885_v2 = vand.u32 4294901760, %v447_v9 }
 0x25e   : > { %37731 = vst [vmem:[#allocation274_spill] sm:$0xff] %v31856_v54  ;;  %37732 = vst [vmem:[#allocation275_spill] sm:$0xff] %v31861_v44  ;;  %v341_v46 = vrot.slane %v31888_v13, 1  ;;  %v342_v7 = vrot.slane %v31892_v60, 1  ;;  %v31896_v61 = vand.u32 4294901760, %v716_v34  ;;  %v736_v58 = vsub.f32 %v31830_v30, %v31861_v44 }
 0x25f   : > { %37733 = vst [vmem:[#allocation276_spill] sm:$0xff] %v31867_v11  ;;  %37734 = vst [vmem:[#allocation277_spill] sm:$0xff] %v31872_v41  ;;  %v31900_v56 = vand.u32 4294901760, %v449_v20  ;;  %v7134_v15 = vsel %vm396_vm2, %v7131_v17, 0  ;;  %v31903_v6 = vand.u32 4294901760, %v726_v18  ;;  %v31906_v24 = vand.u32 4294901760, %v31867_v11 }
 0x260   : > { %26143 = vmatmul.mubr.f32.gmra.mrb[10].mxu0 %v31813_v63  ;;  %37735 = vst [vmem:[#allocation278_spill] sm:$0xff] %v31875_v1  ;;  %37736 = vst [vmem:[#allocation279_spill] sm:$0xff] %v31878_v33  ;;  %v746_v34 = vsub.f32 %v31844_v53, %v31875_v1  ;;  %v31913_v21 = vand.u32 4294901760, %v31878_v33  ;;  %v37746_v30 = vrot.slane %v31501_v10, 1  ;;  %v31921_v17 = vsub.f32 %v447_v9, %v31885_v2 }
 0x261   : > { %26145 = vmatprep.mubr.f32.mxu0 %v31822_v8  ;;  %37737 = vst [vmem:[#allocation280_spill] sm:$0xff] %v31883_v32  ;;  %37738 = vst [vmem:[#allocation281_spill] sm:$0xff] %v31885_v2  ;;  %v31930_v53 = vsub.f32 %v449_v20, %v31900_v56  ;;  %v7138_v10 = vsel %vm396_vm2, %v31833_v19, 0  ;;  %v31941_v9 = vand.u32 4294901760, %v736_v58 }
 0x262   : > { %37739 = vst [vmem:[#allocation282_spill] sm:$0xff] %v31888_v13  ;;  %37740 = vst [vmem:[#allocation283_spill] sm:$0xff] %v31892_v60  ;;  %v7136_v13 = vsel %vm396_vm2, %v7133_v57, 0  ;;  %v343_v60 = vsel %vm340_vm3, %v341_v46, %v342_v7  ;;  %v345_v18 = vsel %vm340_vm3, %v342_v7, %v37746_v30  ;;  %v31923_v57 = vand.u32 4294901760, %v7134_v15 }
 0x263   : > { %37741 = vst [vmem:[#allocation284_spill] sm:$0xff] %v31896_v61  ;;  %37742 = vst [vmem:[#allocation285_spill] sm:$0xff] %v31900_v56  ;;  %v397_v44 = vsel %vm396_vm2, %v343_v60, 0  ;;  %v399_v1 = vsel %vm396_vm2, %v345_v18, 0  ;;  %v31932_v60 = vand.u32 4294901760, %v7136_v13  ;;  %v31943_v2 = vand.u32 4294901760, %v746_v34 }
 0x264   : > { %26146 = vmatmul.mubr.f32.gmra.mrb[12].mxu0 %v31851_v51  ;;  %37743 = vst [vmem:[#allocation286_spill] sm:$0xff] %v31903_v6  ;;  %37744 = vst [vmem:[#allocation287_spill] sm:$0xff] %v31906_v24  ;;  %v31925_v46 = vand.u32 4294901760, %v397_v44  ;;  %v31936_v30 = vand.u32 4294901760, %v399_v1  ;;  %v756_v18 = vsub.f32 %v31867_v11, %v31906_v24  ;;  %v31952_v56 = vand.u32 4294901760, %v31921_v17 }
 0x265   : > { %26148 = vmatprep.mubr.f32.mxu0 %v31856_v54  ;;  %37745 = vst [vmem:[#allocation288_spill] sm:$0xff] %v31913_v21  ;;  %37747 = vst [vmem:[#allocation289_spill] sm:$0xff] %v31921_v17  ;;  %v31955_v19 = vsub.f32 %v7134_v15, %v31923_v57  ;;  %v766_v34 = vsub.f32 %v31878_v33, %v31913_v21  ;;  %v31967_v24 = vsub.f32 %v7136_v13, %v31932_v60  ;;  %v23128_v15 = vld [vmem:[%s36458_s1 + $0x4] sm:$0xf] }
 0x266   : > { %37748 = vst [vmem:[#allocation290_spill] sm:$0xff] %v31923_v57  ;;  %37749 = vst [vmem:[#allocation291_spill] sm:$0xff] %v31925_v46  ;;  %v31939_v7 = vsub.f32 %v397_v44, %v31925_v46  ;;  %v31948_v20 = vsub.f32 %v399_v1, %v31936_v30  ;;  %v31957_v44 = vand.u32 4294901760, %v7138_v10  ;;  %v31964_v1 = vand.u32 4294901760, %v31930_v53 }
 0x267   : > { %37750 = vst [vmem:[#allocation292_spill] sm:$0xff] %v31930_v53  ;;  %37751 = vst [vmem:[#allocation293_spill] sm:$0xff] %v31932_v60  ;;  %v31974_v57 = vsel %vm453_vm0, %v23128_v15, 0  ;;  %v31979_v21 = vand.u32 4294901760, %v756_v18  ;;  %v776_v60 = vsub.f32 %v31921_v17, %v31952_v56  ;;  %v31991_v15 = vand.u32 4294901760, %v31955_v19 }
 0x268   : > { %26149 = vmatmul.mubr.f32.gmra.mrb[14].mxu0 %v31872_v41  ;;  %37752 = vst [vmem:[#allocation294_spill] sm:$0xff] %v31936_v30  ;;  %37753 = vst [vmem:[#allocation295_spill] sm:$0xff] %v31939_v7  ;;  %v36991_v58 = vand.u32 4294901760, %v31939_v7  ;;  %v36994_v11 = vand.u32 4294901760, %v31948_v20  ;;  %v31982_v33 = vand.u32 4294901760, %v31974_v57  ;;  %v31994_v46 = vsub.f32 %v7138_v10, %v31957_v44 }
 0x269   : > { %26151 = vmatprep.mubr.f32.mxu0 %v31883_v32  ;;  %37754 = vst [vmem:[#allocation296_spill] sm:$0xff] %v31941_v9  ;;  %37755 = vst [vmem:[#allocation297_spill] sm:$0xff] %v31943_v2  ;;  %v32007_v10 = vand.u32 4294901760, %v776_v60 }
 0x26a   : > { %37756 = vst [vmem:[#allocation298_spill] sm:$0xff] %v31952_v56  ;;  %37757 = vst [vmem:[#allocation299_spill] sm:$0xff] %v31955_v19  ;;  %v526_v30 = vsub.f32 %v31939_v7, %v36991_v58  ;;  %v536_v13 = vsub.f32 %v31948_v20, %v36994_v11  ;;  %v31997_v58 = vand.u32 4294901760, %v766_v34  ;;  %v786_v7 = vsub.f32 %v31930_v53, %v31964_v1 }
 0x26b   : > { %37758 = vst [vmem:[#allocation300_spill] sm:$0xff] %v31957_v44  ;;  %37759 = vst [vmem:[#allocation301_spill] sm:$0xff] %v31964_v1  ;;  %v32002_v11 = vand.u32 4294901760, %v31967_v24  ;;  %25069 = vmatprep.subr.mxu1 %v31982_v33  ;;  %v36999_v34 = vand.u32 4294901760, %v31994_v46 }
 0x26c   : > { %26152 = vmatmul.mubr.f32.gmra.mrb[16].mxu0 %v31896_v61  ;;  %37760 = vst [vmem:[#allocation302_spill] sm:$0xff] %v31967_v24  ;;  %37761 = vst [vmem:[#allocation303_spill] sm:$0xff] %v31979_v21  ;;  %v527_v18 = vand.u32 4294901760, %v526_v30  ;;  %v537_v56 = vand.u32 4294901760, %v536_v13  ;;  %25070 = vmatpush3.msra.mxu1 %v31982_v33  ;;  %v7462_v30 = vsub.f32 %v31955_v19, %v31991_v15  ;;  %v32014_v1 = vand.u32 4294901760, %v786_v7 }
 0x26d   : > { %26154 = vmatprep.mubr.f32.mxu0 %v31903_v6  ;;  %37762 = vst [vmem:[#allocation304_spill] sm:$0xff] %v31991_v15  ;;  %37763 = vst [vmem:[#allocation305_spill] sm:$0xff] %v31997_v58  ;;  %v7472_v13 = vsub.f32 %v31967_v24, %v32002_v11  ;;  %v7482_v60 = vsub.f32 %v31994_v46, %v36999_v34 }
 0x26e   : > { %37764 = vst [vmem:[#allocation306_spill] sm:$0xff] %v32002_v11  ;;  %25071 = vmatprep.mubr.f32.mxu1 %v527_v18  ;;  %37765 = vst [vmem:[#allocation307_spill] sm:$0xff] %v32007_v10 }
 0x26f   : > { %25072 = vmatmul.mubr.f32.vlgmr.msra.gmra.mrb[0].mxu1 %v537_v56  ;;  %37766 = vst [vmem:[#allocation308_spill] sm:$0xff] %v32014_v1  ;;  %v32020_v56 = vand.u32 4294901760, %v7462_v30  ;;  %v7483_v7 = vand.u32 4294901760, %v7482_v60 }
 0x270   : > { %26155 = vmatmul.mubr.f32.gmra.mrb[18].mxu0 %v31941_v9  ;;  %25074 = vmatprep.mubr.f32.mxu1 %v31601_v42  ;;  %v32027_v42 = vand.u32 4294901760, %v7472_v13 }
 0x271   : > { %26157 = vmatprep.mubr.f32.mxu0 %v31943_v2  ;;  %37767 = vst [vmem:[#allocation309_spill] sm:$0xff] %v32020_v56 }
 0x272   : > { %37768 = vst [vmem:[#allocation310_spill] sm:$0xff] %v32027_v42 }
 0x273   : > { %25075 = vmatmul.mubr.f32.gmra.mrb[2].mxu1 %v31633_v25 }
 0x274   : > { %26158 = vmatmul.mubr.f32.gmra.mrb[20].mxu0 %v31979_v21  ;;  %25077 = vmatprep.mubr.f32.mxu1 %v31653_v16  ;;  %v37800_v16 = vld [vmem:[#allocation268_spill] sm:$0xff] }
 0x275   : > { %26160 = vmatprep.mubr.f32.mxu0 %v31997_v58 }
 0x277   : > { %25078 = vmatmul.mubr.f32.gmra.mrb[4].mxu1 %v31678_v48  ;;  %v37799_v48 = vld [vmem:[#allocation262_spill] sm:$0xff] }
 0x278   : > { %26161 = vmatmul.mubr.f32.gmra.mrb[22].mxu0 %v32007_v10  ;;  %25080 = vmatprep.mubr.f32.mxu1 %v31680_v5  ;;  %v37798_v5 = vld [vmem:[#allocation260_spill] sm:$0xff] }
 0x279   : > { %26163 = vmatprep.mubr.f32.mxu0 %v32014_v1 }
 0x27b   : > { %25081 = vmatmul.mubr.f32.gmra.mrb[6].mxu1 %v31707_v28  ;;  %v37797_v28 = vld [vmem:[#allocation258_spill] sm:$0xff] }
 0x27c   : > { %26164 = vmatmul.mubr.f32.gmra.mrb[24].mxu0 %v32020_v56  ;;  %25083 = vmatprep.mubr.f32.mxu1 %v31721_v39  ;;  %v37771_v56 = vld [vmem:[#allocation291_spill] sm:$0xff]  ;;  %v37796_v39 = vld [vmem:[#allocation256_spill] sm:$0xff] }
 0x27d   : > { %26166 = vmatprep.mubr.f32.mxu0 %v32027_v42 }
 0x27f   : > { %25084 = vmatmul.mubr.f32.gmra.mrb[8].mxu1 %v31745_v62  ;;  %v37795_v62 = vld [vmem:[#allocation251_spill] sm:$0xff] }
 0x280   : > { %26167 = vmatmul.mubr.f32.gmra.mrb[26].mxu0 %v7483_v7  ;;  %25086 = vmatprep.mubr.f32.mxu1 %v31753_v3  ;;  %v37769_v7 = vld [vmem:[#allocation254_spill] sm:$0xff]  ;;  %v37794_v3 = vld [vmem:[#allocation248_spill] sm:$0xff] }
 0x281   : > { %26171 = vmatprep.mubr.f32.mxu0 %v31520_v40 }
 0x283   : > { %25087 = vmatmul.mubr.f32.gmra.mrb[10].mxu1 %v31763_v4  ;;  %v37793_v4 = vld [vmem:[#allocation240_spill] sm:$0xff] }
 0x284   : > { %26172 = vmatmul.mubr.f32.vlgmr.msra.gmra.mrb[0].mxu0 %v31532_v55  ;;  %25089 = vmatprep.mubr.f32.mxu1 %v31768_v31  ;;  %v37792_v31 = vld [vmem:[#allocation238_spill] sm:$0xff] }
 0x285   : > { %26174 = vmatprep.mubr.f32.mxu0 %v31539_v35  ;;  %26214 = vmatpush3.msra.mxu0 %v31473_v50  ;;  %v451_v50 = vsel %vm396_vm2, %v31800_v12, 0  ;;  %v805_v12 = vsub.f32 %v31974_v57, %v31982_v33  ;;  %v37770_v57 = vld [vmem:[#allocation261_spill] sm:$0xff] }
 0x286   : > { %26257 = vmatprep.subr.mxu0 %v31446_v37  ;;  %v32068_v25 = vand.u32 4294901760, %v451_v50 }
 0x287   : > { %25090 = vmatmul.mubr.f32.gmra.mrb[12].mxu1 %v31813_v63  ;;  %v32084_v60 = vand.u32 4294901760, %v805_v12  ;;  %v37791_v63 = vld [vmem:[#allocation229_spill] sm:$0xff] }
 0x288   : > { %26175 = vmatmul.mubr.f32.gmra.mrb[2].mxu0 %v31553_v0  ;;  %25092 = vmatprep.mubr.f32.mxu1 %v31822_v8  ;;  %v32072_v18 = vsub.f32 %v451_v50, %v32068_v25  ;;  %v37790_v8 = vld [vmem:[#allocation228_spill] sm:$0xff] }
 0x289   : > { %26177 = vmatprep.mubr.f32.mxu0 %v31557_v47  ;;  %v807_v34 = vsub.f32 %v805_v12, %v32084_v60 }
 0x28a   : > { %v37003_v30 = vand.u32 4294901760, %v32072_v18 }
 0x28b   : > { %25093 = vmatmul.mubr.f32.gmra.mrb[14].mxu1 %v31851_v51  ;;  %v808_v42 = vand.u32 4294901760, %v807_v34  ;;  %v37776_v34 = vld [vmem:[#allocation281_spill] sm:$0xff]  ;;  %v37789_v51 = vld [vmem:[#allocation227_spill] sm:$0xff] }
 0x28c   : > { %26178 = vmatmul.mubr.f32.gmra.mrb[4].mxu0 %v31574_v49  ;;  %25095 = vmatprep.mubr.f32.mxu1 %v31856_v54  ;;  %v796_v13 = vsub.f32 %v32072_v18, %v37003_v30  ;;  %v37773_v30 = vld [vmem:[#allocation294_spill] sm:$0xff]  ;;  %v37788_v54 = vld [vmem:[#allocation225_spill] sm:$0xff] }
 0x28d   : > { %26180 = vmatprep.mubr.f32.mxu0 %v31583_v59  ;;  %25113 = vmatprep.subr.mxu1 %v808_v42 }
 0x28e   : > { %v797_v50 = vand.u32 4294901760, %v796_v13  ;;  %25114 = vmatpush3.msra.mxu1 %v808_v42  ;;  %v37775_v13 = vld [vmem:[#allocation272_spill] sm:$0xff]  ;;  %v37778_v42 = vld [vmem:[#allocation290_spill] sm:$0xff] }
 0x28f   : > { %25096 = vmatmul.mubr.f32.gmra.mrb[16].mxu1 %v31872_v41  ;;  %25157 = vmatprep.subr.mxu1 %v805_v12  ;;  %v37787_v41 = vld [vmem:[#allocation218_spill] sm:$0xff] }
 0x290   : > { %26181 = vmatmul.mubr.f32.gmra.mrb[6].mxu0 %v31617_v36  ;;  %25098 = vmatprep.mubr.f32.mxu1 %v31883_v32  ;;  %v37786_v32 = vld [vmem:[#allocation216_spill] sm:$0xff] }
 0x291   : > { %26183 = vmatprep.mubr.f32.mxu0 %v31623_v23 }
 0x293   : > { %25099 = vmatmul.mubr.f32.gmra.mrb[18].mxu1 %v31896_v61  ;;  %v37785_v61 = vld [vmem:[#allocation212_spill] sm:$0xff] }
 0x294   : > { %26184 = vmatmul.mubr.f32.gmra.mrb[8].mxu0 %v31625_v14  ;;  %25101 = vmatprep.mubr.f32.mxu1 %v31903_v6  ;;  %v37784_v6 = vld [vmem:[#allocation210_spill] sm:$0xff] }
 0x295   : > { %26186 = vmatprep.mubr.f32.mxu0 %v31631_v52 }
 0x297   : > { %25102 = vmatmul.mubr.f32.gmra.mrb[20].mxu1 %v31941_v9  ;;  %v37783_v9 = vld [vmem:[#allocation201_spill] sm:$0xff] }
 0x298   : > { %26187 = vmatmul.mubr.f32.gmra.mrb[10].mxu0 %v31665_v43  ;;  %25104 = vmatprep.mubr.f32.mxu1 %v31943_v2  ;;  %v37782_v2 = vld [vmem:[#allocation208_spill] sm:$0xff] }
 0x299   : > { %26189 = vmatprep.mubr.f32.mxu0 %v31674_v22 }
 0x29b   : > { %25105 = vmatmul.mubr.f32.gmra.mrb[22].mxu1 %v31979_v21  ;;  %v37781_v21 = vld [vmem:[#allocation205_spill] sm:$0xff] }
 0x29c   : > { %26190 = vmatmul.mubr.f32.gmra.mrb[12].mxu0 %v31716_v38  ;;  %25107 = vmatprep.mubr.f32.mxu1 %v31997_v58  ;;  %v37774_v58 = vld [vmem:[#allocation270_spill] sm:$0xff] }
 0x29d   : > { %26192 = vmatprep.mubr.f32.mxu0 %v31725_v45 }
 0x29f   : > { %25108 = vmatmul.mubr.f32.gmra.mrb[24].mxu1 %v32007_v10  ;;  %v37772_v10 = vld [vmem:[#allocation263_spill] sm:$0xff] }
 0x2a0   : > { %26193 = vmatmul.mubr.f32.gmra.mrb[14].mxu0 %v31739_v27  ;;  %25110 = vmatprep.mubr.f32.mxu1 %v32014_v1  ;;  %v37779_v1 = vld [vmem:[#allocation293_spill] sm:$0xff] }
 0x2a1   : > { %26195 = vmatprep.mubr.f32.mxu0 %v31750_v29 }
 0x2a3   : > { %25111 = vmatmul.mubr.f32.gmra.mrb[26].mxu1 %v797_v50  ;;  %v37777_v50 = vld [vmem:[#allocation285_spill] sm:$0xff] }
 0x2a4   : > { %26196 = vmatmul.mubr.f32.gmra.mrb[16].mxu0 %v31758_v26  ;;  %25115 = vmatprep.mubr.f32.mxu1 %v37771_v56 }
 0x2a5   : > { %26198 = vmatprep.mubr.f32.mxu0 %v37769_v7 }
 0x2a7   : > { %25116 = vmatmul.mubr.f32.vlgmr.msra.gmra.mrb[0].mxu1 %v37773_v30 }
 0x2a8   : > { %26199 = vmatmul.mubr.f32.gmra.mrb[18].mxu0 %v37770_v57  ;;  %25118 = vmatprep.mubr.f32.mxu1 %v31520_v40 }
 0x2a9   : > { %26201 = vmatprep.mubr.f32.mxu0 %v37772_v10  ;;  %25158 = vmatpush3.msra.mxu1 %v805_v12  ;;  %v37780_v12 = vld [vmem:[#allocation202_spill] sm:$0xff] }
 0x2aa   : > { %25201 = vmatprep.subr.mxu1 %v31982_v33 }
 0x2ab   : > { %25119 = vmatmul.mubr.f32.gmra.mrb[2].mxu1 %v31532_v55 }
 0x2ac   : > { %26202 = vmatmul.mubr.f32.gmra.mrb[20].mxu0 %v37774_v58  ;;  %25121 = vmatprep.mubr.f32.mxu1 %v31539_v35 }
 0x2ad   : > { %26204 = vmatprep.mubr.f32.mxu0 %v37775_v13 }
 0x2af   : > { %25122 = vmatmul.mubr.f32.gmra.mrb[4].mxu1 %v31553_v0 }
 0x2b0   : > { %26205 = vmatmul.mubr.f32.gmra.mrb[22].mxu0 %v37776_v34  ;;  %25124 = vmatprep.mubr.f32.mxu1 %v31557_v47 }
 0x2b1   : > { %26207 = vmatprep.mubr.f32.mxu0 %v37777_v50 }
 0x2b3   : > { %25125 = vmatmul.mubr.f32.gmra.mrb[6].mxu1 %v31574_v49 }
 0x2b4   : > { %26208 = vmatmul.mubr.f32.gmra.mrb[24].mxu0 %v37778_v42  ;;  %25127 = vmatprep.mubr.f32.mxu1 %v31583_v59  ;;  %v37803_v42 = vld [vmem:[#allocation276_spill] sm:$0xff] }
 0x2b5   : > { %26210 = vmatprep.mubr.f32.mxu0 %v37779_v1  ;;  %v37802_v1 = vld [vmem:[#allocation271_spill] sm:$0xff] }
 0x2b7   : > { %25128 = vmatmul.mubr.f32.gmra.mrb[8].mxu1 %v31617_v36 }
 0x2b8   : > { %26211 = vmatmul.mubr.f32.gmra.mrb[26].mxu0 %v31957_v44  ;;  %25130 = vmatprep.mubr.f32.mxu1 %v31623_v23  ;;  %v37801_v44 = vld [vmem:[#allocation295_spill] sm:$0xff] }
 0x2b9   : > { %26215 = vmatprep.mubr.f32.mxu0 %v37780_v12 }
 0x2bb   : > { %25131 = vmatmul.mubr.f32.gmra.mrb[10].mxu1 %v31625_v14 }
 0x2bc   : > { %26216 = vmatmul.mubr.f32.vlgmr.msra.gmra.mrb[0].mxu0 %v37781_v21  ;;  %25133 = vmatprep.mubr.f32.mxu1 %v31631_v52 }
 0x2bd   : > { %26218 = vmatprep.mubr.f32.mxu0 %v37782_v2  ;;  %26258 = vmatpush3.msra.mxu0 %v31446_v37 }
 0x2be   : > { %26301 = vmatprep.subr.mxu0 %v37783_v9 }
 0x2bf   : > { %25134 = vmatmul.mubr.f32.gmra.mrb[12].mxu1 %v31665_v43 }
 0x2c0   : > { %26219 = vmatmul.mubr.f32.gmra.mrb[2].mxu0 %v37784_v6  ;;  %25136 = vmatprep.mubr.f32.mxu1 %v31674_v22 }
 0x2c1   : > { %26221 = vmatprep.mubr.f32.mxu0 %v37785_v61 }
 0x2c3   : > { %25137 = vmatmul.mubr.f32.gmra.mrb[14].mxu1 %v31716_v38 }
 0x2c4   : > { %26222 = vmatmul.mubr.f32.gmra.mrb[4].mxu0 %v37786_v32  ;;  %25139 = vmatprep.mubr.f32.mxu1 %v31725_v45 }
 0x2c5   : > { %26224 = vmatprep.mubr.f32.mxu0 %v37787_v41 }
 0x2c7   : > { %25140 = vmatmul.mubr.f32.gmra.mrb[16].mxu1 %v31739_v27 }
 0x2c8   : > { %26225 = vmatmul.mubr.f32.gmra.mrb[6].mxu0 %v37788_v54  ;;  %25142 = vmatprep.mubr.f32.mxu1 %v31750_v29 }
 0x2c9   : > { %26227 = vmatprep.mubr.f32.mxu0 %v37789_v51 }
 0x2cb   : > { %25143 = vmatmul.mubr.f32.gmra.mrb[18].mxu1 %v31758_v26 }
 0x2cc   : > { %26228 = vmatmul.mubr.f32.gmra.mrb[8].mxu0 %v37790_v8  ;;  %25145 = vmatprep.mubr.f32.mxu1 %v37769_v7 }
 0x2cd   : > { %26230 = vmatprep.mubr.f32.mxu0 %v37791_v63 }
 0x2cf   : > { %25146 = vmatmul.mubr.f32.gmra.mrb[20].mxu1 %v37770_v57 }
 0x2d0   : > { %26231 = vmatmul.mubr.f32.gmra.mrb[10].mxu0 %v37792_v31  ;;  %25148 = vmatprep.mubr.f32.mxu1 %v37772_v10 }
 0x2d1   : > { %26233 = vmatprep.mubr.f32.mxu0 %v37793_v4 }
 0x2d3   : > { %25149 = vmatmul.mubr.f32.gmra.mrb[22].mxu1 %v37774_v58 }
 0x2d4   : > { %26234 = vmatmul.mubr.f32.gmra.mrb[12].mxu0 %v37794_v3  ;;  %25151 = vmatprep.mubr.f32.mxu1 %v37775_v13 }
 0x2d5   : > { %26236 = vmatprep.mubr.f32.mxu0 %v37795_v62 }
 0x2d7   : > { %25152 = vmatmul.mubr.f32.gmra.mrb[24].mxu1 %v37776_v34  ;;  %v37804_v34 = vld [vmem:[#allocation279_spill] sm:$0xff] }
 0x2d8   : > { %26237 = vmatmul.mubr.f32.gmra.mrb[14].mxu0 %v37796_v39  ;;  %25154 = vmatprep.mubr.f32.mxu1 %v37777_v50 }
 0x2d9   : > { %26239 = vmatprep.mubr.f32.mxu0 %v37797_v28 }
 0x2db   : > { %25155 = vmatmul.mubr.f32.gmra.mrb[26].mxu1 %v32068_v25 }
 0x2dc   : > { %26240 = vmatmul.mubr.f32.gmra.mrb[16].mxu0 %v37798_v5  ;;  %25159 = vmatprep.mubr.f32.mxu1 %v37801_v44 }
 0x2dd   : > { %26242 = vmatprep.mubr.f32.mxu0 %v37799_v48 }
 0x2df   : > { %25160 = vmatmul.mubr.f32.vlgmr.msra.gmra.mrb[0].mxu1 %v31948_v20 }
 0x2e0   : > { %26243 = vmatmul.mubr.f32.gmra.mrb[18].mxu0 %v37800_v16  ;;  %25162 = vmatprep.mubr.f32.mxu1 %v37780_v12  ;;  %v37806_v12 = vld [vmem:[#allocation209_spill] sm:$0xff] }
 0x2e1   : > { %26245 = vmatprep.mubr.f32.mxu0 %v37802_v1  ;;  %25202 = vmatpush3.msra.mxu1 %v31982_v33 }
 0x2e2   : > { %25245 = vmatprep.subr.mxu1 %v32084_v60 }
 0x2e3   : > { %25163 = vmatmul.mubr.f32.gmra.mrb[2].mxu1 %v37781_v21  ;;  %v37805_v21 = vld [vmem:[#allocation204_spill] sm:$0xff] }
 0x2e4   : > { %26246 = vmatmul.mubr.f32.gmra.mrb[20].mxu0 %v37803_v42  ;;  %25165 = vmatprep.mubr.f32.mxu1 %v37782_v2 }
 0x2e5   : > { %26248 = vmatprep.mubr.f32.mxu0 %v37804_v34 }
 0x2e7   : > { %25166 = vmatmul.mubr.f32.gmra.mrb[4].mxu1 %v37784_v6  ;;  %v37807_v6 = vld [vmem:[#allocation214_spill] sm:$0xff] }
 0x2e8   : > { %26249 = vmatmul.mubr.f32.gmra.mrb[22].mxu0 %v31921_v17  ;;  %25168 = vmatprep.mubr.f32.mxu1 %v37785_v61  ;;  %v37868_v61 = vld [vmem:[#allocation47_spill] sm:$0xff] }
 0x2e9   : > { %26251 = vmatprep.mubr.f32.mxu0 %v31930_v53 }
 0x2eb   : > { %25169 = vmatmul.mubr.f32.gmra.mrb[6].mxu1 %v37786_v32  ;;  %v37828_v32 = vld [vmem:[#allocation287_spill] sm:$0xff] }
 0x2ec   : > { %26252 = vmatmul.mubr.f32.gmra.mrb[24].mxu0 %v31955_v19  ;;  %25171 = vmatprep.mubr.f32.mxu1 %v37787_v41  ;;  %v37809_v19 = vld [vmem:[#allocation217_spill] sm:$0xff]  ;;  %v37826_v41 = vld [vmem:[#allocation278_spill] sm:$0xff] }
 0x2ed   : > { %26254 = vmatprep.mubr.f32.mxu0 %v31967_v24  ;;  %v37808_v24 = vld [vmem:[#allocation215_spill] sm:$0xff] }
 0x2ef   : > { %25172 = vmatmul.mubr.f32.gmra.mrb[8].mxu1 %v37788_v54  ;;  %v37810_v54 = vld [vmem:[#allocation223_spill] sm:$0xff] }
 0x2f0   : > { %26255 = vmatmul.mubr.f32.gmra.mrb[26].mxu0 %v31994_v46  ;;  %25174 = vmatprep.mubr.f32.mxu1 %v37789_v51  ;;  %v37811_v51 = vld [vmem:[#allocation224_spill] sm:$0xff] }
 0x2f1   : > { %26259 = vmatprep.mubr.f32.mxu0 %v37805_v21 }
 0x2f3   : > { %25175 = vmatmul.mubr.f32.gmra.mrb[10].mxu1 %v37790_v8  ;;  %v37813_v8 = vld [vmem:[#allocation235_spill] sm:$0xff] }
 0x2f4   : > { %26260 = vmatmul.mubr.f32.vlgmr.msra.gmra.mrb[0].mxu0 %v37806_v12  ;;  %25177 = vmatprep.mubr.f32.mxu1 %v37791_v63  ;;  %v37814_v63 = vld [vmem:[#allocation236_spill] sm:$0xff] }
 0x2f5   : > { %26262 = vmatprep.mubr.f32.mxu0 %v37807_v6  ;;  %26302 = vmatpush3.msra.mxu0 %v37783_v9  ;;  %v37812_v9 = vld [vmem:[#allocation234_spill] sm:$0xff] }
 0x2f6   : > { %26345 = vmatprep.subr.mxu0 %v31446_v37 }
 0x2f7   : > { %25178 = vmatmul.mubr.f32.gmra.mrb[12].mxu1 %v37792_v31  ;;  %v37815_v31 = vld [vmem:[#allocation237_spill] sm:$0xff] }
 0x2f8   : > { %26263 = vmatmul.mubr.f32.gmra.mrb[2].mxu0 %v37808_v24  ;;  %25180 = vmatprep.mubr.f32.mxu1 %v37793_v4  ;;  %v37816_v4 = vld [vmem:[#allocation244_spill] sm:$0xff] }
 0x2f9   : > { %26265 = vmatprep.mubr.f32.mxu0 %v37809_v19 }
 0x2fb   : > { %25181 = vmatmul.mubr.f32.gmra.mrb[14].mxu1 %v37794_v3  ;;  %v37817_v3 = vld [vmem:[#allocation245_spill] sm:$0xff] }
 0x2fc   : > { %26266 = vmatmul.mubr.f32.gmra.mrb[4].mxu0 %v37810_v54  ;;  %25183 = vmatprep.mubr.f32.mxu1 %v37795_v62  ;;  %v37818_v62 = vld [vmem:[#allocation257_spill] sm:$0xff] }
 0x2fd   : > { %26268 = vmatprep.mubr.f32.mxu0 %v37811_v51 }
 0x2ff   : > { %25184 = vmatmul.mubr.f32.gmra.mrb[16].mxu1 %v37796_v39  ;;  %v37819_v39 = vld [vmem:[#allocation259_spill] sm:$0xff] }
 0x300   : > { %26269 = vmatmul.mubr.f32.gmra.mrb[6].mxu0 %v37812_v9  ;;  %25186 = vmatprep.mubr.f32.mxu1 %v37797_v28  ;;  %v37820_v28 = vld [vmem:[#allocation64_spill] sm:$0xff] }
 0x301   : > { %26271 = vmatprep.mubr.f32.mxu0 %v37813_v8 }
 0x303   : > { %25187 = vmatmul.mubr.f32.gmra.mrb[18].mxu1 %v37798_v5  ;;  %v37821_v5 = vld [vmem:[#allocation265_spill] sm:$0xff] }
 0x304   : > { %26272 = vmatmul.mubr.f32.gmra.mrb[8].mxu0 %v37814_v63  ;;  %25189 = vmatprep.mubr.f32.mxu1 %v37799_v48  ;;  %v37822_v48 = vld [vmem:[#allocation267_spill] sm:$0xff] }
 0x305   : > { %26274 = vmatprep.mubr.f32.mxu0 %v37815_v31 }
 0x307   : > { %25190 = vmatmul.mubr.f32.gmra.mrb[20].mxu1 %v37800_v16  ;;  %v37823_v16 = vld [vmem:[#allocation269_spill] sm:$0xff] }
 0x308   : > { %26275 = vmatmul.mubr.f32.gmra.mrb[10].mxu0 %v37816_v4  ;;  %25192 = vmatprep.mubr.f32.mxu1 %v37802_v1  ;;  %v37824_v1 = vld [vmem:[#allocation275_spill] sm:$0xff] }
 0x309   : > { %26277 = vmatprep.mubr.f32.mxu0 %v37817_v3 }
 0x30b   : > { %25193 = vmatmul.mubr.f32.gmra.mrb[22].mxu1 %v37803_v42  ;;  %v37825_v42 = vand.u32 4294901760, %v37801_v44  ;;  %v37831_v44 = vld [vmem:[#allocation301_spill] sm:$0xff] }
 0x30c   : > { %26278 = vmatmul.mubr.f32.gmra.mrb[12].mxu0 %v37818_v62  ;;  %25195 = vmatprep.mubr.f32.mxu1 %v37804_v34  ;;  %v37827_v34 = vand.u32 4294901760, %v31948_v20  ;;  %v23132_v20 = vld [vmem:[%s36458_s1 + $0x14] sm:$0xf] }
 0x30d   : > { %26280 = vmatprep.mubr.f32.mxu0 %v37819_v39 }
 0x30f   : > { %25196 = vmatmul.mubr.f32.gmra.mrb[24].mxu1 %v31921_v17  ;;  %v37829_v17 = vld [vmem:[#allocation288_spill] sm:$0xff] }
 0x310   : > { %26281 = vmatmul.mubr.f32.gmra.mrb[14].mxu0 %v37820_v28  ;;  %25198 = vmatprep.mubr.f32.mxu1 %v31930_v53  ;;  %v37830_v53 = vld [vmem:[#allocation298_spill] sm:$0xff] }
 0x311   : > { %26283 = vmatprep.mubr.f32.mxu0 %v37821_v5 }
 0x313   : > { %25199 = vmatmul.mubr.f32.gmra.mrb[26].mxu1 %v32072_v18 }
 0x314   : > { %26284 = vmatmul.mubr.f32.gmra.mrb[16].mxu0 %v37822_v48  ;;  %25203 = vmatprep.mubr.f32.mxu1 %v37825_v42 }
 0x315   : > { %26286 = vmatprep.mubr.f32.mxu0 %v37823_v16 }
 0x317   : > { %25204 = vmatmul.mubr.f32.vlgmr.msra.gmra.mrb[0].mxu1 %v37827_v34  ;;  %v37832_v34 = vand.u32 4294901760, %v31994_v46 }
 0x318   : > { %26287 = vmatmul.mubr.f32.gmra.mrb[18].mxu0 %v37824_v1  ;;  %25206 = vmatprep.mubr.f32.mxu1 %v37805_v21 }
 0x319   : > { %26289 = vmatprep.mubr.f32.mxu0 %v37826_v41  ;;  %25246 = vmatpush3.msra.mxu1 %v32084_v60  ;;  %v8791_v60 = vsel %vm453_vm0, %v23132_v20, 0 }
 0x31a   : > { %25289 = vmatprep.subr.mxu1 %v31982_v33  ;;  %v32237_v42 = vand.u32 4294901760, %v8791_v60 }
 0x31b   : > { %25207 = vmatmul.mubr.f32.gmra.mrb[2].mxu1 %v37806_v12  ;;  %v37835_v12 = vld [vmem:[#allocation290_spill] sm:$0xff] }
 0x31c   : > { %26290 = vmatmul.mubr.f32.gmra.mrb[20].mxu0 %v37828_v32  ;;  %25209 = vmatprep.mubr.f32.mxu1 %v37807_v6  ;;  %v32288_v46 = vsub.f32 %v8791_v60, %v32237_v42  ;;  %v37837_v60 = vld [vmem:[#allocation300_spill] sm:$0xff] }
 0x31d   : > { %26292 = vmatprep.mubr.f32.mxu0 %v37829_v17 }
 0x31e   : > { %v32295_v21 = vand.u32 4294901760, %v32288_v46 }
 0x31f   : > { %25210 = vmatmul.mubr.f32.gmra.mrb[4].mxu1 %v37808_v24 }
 0x320   : > { %26293 = vmatmul.mubr.f32.gmra.mrb[22].mxu0 %v37830_v53  ;;  %25212 = vmatprep.mubr.f32.mxu1 %v37809_v19  ;;  %v9143_v20 = vsub.f32 %v32288_v46, %v32295_v21  ;;  %v37865_v19 = vld [vmem:[#allocation46_spill] sm:$0xff] }
 0x321   : > { %26295 = vmatprep.mubr.f32.mxu0 %v37831_v44 }
 0x323   : > { %25213 = vmatmul.mubr.f32.gmra.mrb[6].mxu1 %v37810_v54 }
 0x324   : > { %26296 = vmatmul.mubr.f32.gmra.mrb[24].mxu0 %v31991_v15  ;;  %25215 = vmatprep.mubr.f32.mxu1 %v37811_v51  ;;  %v37862_v51 = vld [vmem:[#allocation42_spill] sm:$0xff] }
 0x325   : > { %26298 = vmatprep.mubr.f32.mxu0 %v32002_v11  ;;  %v37841_v11 = vld [vmem:[#allocation17_spill] sm:$0xff] }
 0x327   : > { %25216 = vmatmul.mubr.f32.gmra.mrb[8].mxu1 %v37812_v9  ;;  %v37861_v9 = vld [vmem:[#allocation95_spill] sm:$0xff] }
 0x328   : > { %26299 = vmatmul.mubr.f32.gmra.mrb[26].mxu0 %v37832_v34  ;;  %25218 = vmatprep.mubr.f32.mxu1 %v37813_v8  ;;  %v32307_v34 = vand.u32 4294901760, %v9143_v20 }
 0x329   : > { %26303 = vmatprep.mubr.f32.mxu0 %v31520_v40 }
 0x32b   : > { %25219 = vmatmul.mubr.f32.gmra.mrb[10].mxu1 %v37814_v63  ;;  %v37859_v63 = vld [vmem:[#allocation39_spill] sm:$0xff] }
 0x32c   : > { %26304 = vmatmul.mubr.f32.vlgmr.msra.gmra.mrb[0].mxu0 %v31532_v55  ;;  %25221 = vmatprep.mubr.f32.mxu1 %v37815_v31  ;;  %v37858_v31 = vld [vmem:[#allocation94_spill] sm:$0xff] }
 0x32d   : > { %26306 = vmatprep.mubr.f32.mxu0 %v31539_v35  ;;  %26346 = vmatpush3.msra.mxu0 %v31446_v37  ;;  %v37833_v37 = vand.u32 4294901760, %v32072_v18  ;;  %v37834_v18 = vld [vmem:[#allocation281_spill] sm:$0xff]  ;;  %v4006_v8 = vsub.f32 %v37859_v63, %v37858_v31 }
 0x32e   : > { %26389 = vmatprep.subr.mxu0 %v32237_v42 }
 0x32f   : > { %25222 = vmatmul.mubr.f32.gmra.mrb[12].mxu1 %v37816_v4  ;;  %v32411_v54 = vand.u32 4294901760, %v4006_v8  ;;  %v37870_v8 = vld [vmem:[#allocation98_spill] sm:$0xff] }
 0x330   : > { %26307 = vmatmul.mubr.f32.gmra.mrb[2].mxu0 %v31553_v0  ;;  %25224 = vmatprep.mubr.f32.mxu1 %v37817_v3  ;;  %v37856_v3 = vld [vmem:[#allocation34_spill] sm:$0xff] }
 0x331   : > { %26309 = vmatprep.mubr.f32.mxu0 %v31557_v47  ;;  %37863 = vst [vmem:[#allocation209_spill] sm:$0xff] %v32411_v54 }
 0x333   : > { %25225 = vmatmul.mubr.f32.gmra.mrb[14].mxu1 %v37818_v62 }
 0x334   : > { %26310 = vmatmul.mubr.f32.gmra.mrb[4].mxu0 %v31574_v49  ;;  %25227 = vmatprep.mubr.f32.mxu1 %v37819_v39 }
 0x335   : > { %26312 = vmatprep.mubr.f32.mxu0 %v31583_v59 }
 0x337   : > { %25228 = vmatmul.mubr.f32.gmra.mrb[16].mxu1 %v37820_v28  ;;  %v37852_v28 = vld [vmem:[#allocation92_spill] sm:$0xff] }
 0x338   : > { %26313 = vmatmul.mubr.f32.gmra.mrb[6].mxu0 %v31617_v36  ;;  %25230 = vmatprep.mubr.f32.mxu1 %v37821_v5 }
 0x339   : > { %26315 = vmatprep.mubr.f32.mxu0 %v31623_v23 }
 0x33b   : > { %25231 = vmatmul.mubr.f32.gmra.mrb[18].mxu1 %v37822_v48  ;;  %v37850_v48 = vld [vmem:[#allocation28_spill] sm:$0xff] }
 0x33c   : > { %26316 = vmatmul.mubr.f32.gmra.mrb[8].mxu0 %v31625_v14  ;;  %25233 = vmatprep.mubr.f32.mxu1 %v37823_v16 }
 0x33d   : > { %26318 = vmatprep.mubr.f32.mxu0 %v31631_v52 }
 0x33f   : > { %25234 = vmatmul.mubr.f32.gmra.mrb[20].mxu1 %v37824_v1 }
 0x340   : > { %26319 = vmatmul.mubr.f32.gmra.mrb[10].mxu0 %v31665_v43  ;;  %25236 = vmatprep.mubr.f32.mxu1 %v37826_v41  ;;  %v37847_v41 = vld [vmem:[#allocation26_spill] sm:$0xff] }
 0x341   : > { %26321 = vmatprep.mubr.f32.mxu0 %v31674_v22 }
 0x343   : > { %25237 = vmatmul.mubr.f32.gmra.mrb[22].mxu1 %v37828_v32  ;;  %v37846_v32 = vld [vmem:[#allocation90_spill] sm:$0xff] }
 0x344   : > { %26322 = vmatmul.mubr.f32.gmra.mrb[12].mxu0 %v31716_v38  ;;  %25239 = vmatprep.mubr.f32.mxu1 %v37829_v17  ;;  %v3966_v1 = vsub.f32 %v37847_v41, %v37846_v32 }
 0x345   : > { %26324 = vmatprep.mubr.f32.mxu0 %v31725_v45 }
 0x347   : > { %25240 = vmatmul.mubr.f32.gmra.mrb[24].mxu1 %v37830_v53 }
 0x348   : > { %26325 = vmatmul.mubr.f32.gmra.mrb[14].mxu0 %v31739_v27  ;;  %25242 = vmatprep.mubr.f32.mxu1 %v37831_v44  ;;  %v37844_v44 = vld [vmem:[#allocation23_spill] sm:$0xff] }
 0x349   : > { %26327 = vmatprep.mubr.f32.mxu0 %v31750_v29 }
 0x34b   : > { %25243 = vmatmul.mubr.f32.gmra.mrb[26].mxu1 %v37833_v37  ;;  %v37838_v37 = vld [vmem:[#allocation87_spill] sm:$0xff] }
 0x34c   : > { %26328 = vmatmul.mubr.f32.gmra.mrb[16].mxu0 %v31758_v26  ;;  %25247 = vmatprep.mubr.f32.mxu1 %v37771_v56 }
 0x34d   : > { %26330 = vmatprep.mubr.f32.mxu0 %v37769_v7 }
 0x34f   : > { %25248 = vmatmul.mubr.f32.vlgmr.msra.gmra.mrb[0].mxu1 %v37773_v30 }
 0x350   : > { %26331 = vmatmul.mubr.f32.gmra.mrb[18].mxu0 %v37770_v57  ;;  %25250 = vmatprep.mubr.f32.mxu1 %v31520_v40 }
 0x351   : > { %26333 = vmatprep.mubr.f32.mxu0 %v37772_v10  ;;  %25290 = vmatpush3.msra.mxu1 %v31982_v33  ;;  %v37836_v33 = vld [vmem:[#allocation293_spill] sm:$0xff] }
 0x353   : > { %25251 = vmatmul.mubr.f32.gmra.mrb[2].mxu1 %v31532_v55 }
 0x354   : > { %26334 = vmatmul.mubr.f32.gmra.mrb[20].mxu0 %v37774_v58  ;;  %25253 = vmatprep.mubr.f32.mxu1 %v31539_v35 }
 0x355   : > { %26336 = vmatprep.mubr.f32.mxu0 %v37775_v13 }
 0x357   : > { %25254 = vmatmul.mubr.f32.gmra.mrb[4].mxu1 %v31553_v0 }
 0x358   : > { %26337 = vmatmul.mubr.f32.gmra.mrb[22].mxu0 %v37834_v18  ;;  %25256 = vmatprep.mubr.f32.mxu1 %v31557_v47 }
 0x359   : > { %26339 = vmatprep.mubr.f32.mxu0 %v37777_v50 }
 0x35b   : > { %25257 = vmatmul.mubr.f32.gmra.mrb[6].mxu1 %v31574_v49 }
 0x35c   : > { %26340 = vmatmul.mubr.f32.gmra.mrb[24].mxu0 %v37835_v12  ;;  %25259 = vmatprep.mubr.f32.mxu1 %v31583_v59 }
 0x35d   : > { %26342 = vmatprep.mubr.f32.mxu0 %v37836_v33 }
 0x35f   : > { %25260 = vmatmul.mubr.f32.gmra.mrb[8].mxu1 %v31617_v36 }
 0x360   : > { %26343 = vmatmul.mubr.f32.gmra.mrb[26].mxu0 %v37837_v60  ;;  %25262 = vmatprep.mubr.f32.mxu1 %v31623_v23 }
 0x361   : > { %26347 = vmatprep.mubr.f32.mxu0 %v31520_v40 }
 0x363   : > { %25263 = vmatmul.mubr.f32.gmra.mrb[10].mxu1 %v31625_v14 }
 0x364   : > { %26348 = vmatmul.mubr.f32.vlgmr.msra.gmra.mrb[0].mxu0 %v31532_v55  ;;  %25265 = vmatprep.mubr.f32.mxu1 %v31631_v52 }
 0x365   : > { %26350 = vmatprep.mubr.f32.mxu0 %v31539_v35  ;;  %26390 = vmatpush3.msra.mxu0 %v32237_v42 }
 0x366   : > { %26433 = vmatprep.subr.mxu0 %v32307_v34 }
 0x367   : > { %25266 = vmatmul.mubr.f32.gmra.mrb[12].mxu1 %v31665_v43 }
 0x368   : > { %26351 = vmatmul.mubr.f32.gmra.mrb[2].mxu0 %v31553_v0  ;;  %25268 = vmatprep.mubr.f32.mxu1 %v31674_v22 }
 0x369   : > { %26353 = vmatprep.mubr.f32.mxu0 %v31557_v47 }
 0x36b   : > { %25269 = vmatmul.mubr.f32.gmra.mrb[14].mxu1 %v31716_v38 }
 0x36c   : > { %26354 = vmatmul.mubr.f32.gmra.mrb[4].mxu0 %v31574_v49  ;;  %25271 = vmatprep.mubr.f32.mxu1 %v31725_v45 }
 0x36d   : > { %26356 = vmatprep.mubr.f32.mxu0 %v31583_v59 }
 0x36f   : > { %25272 = vmatmul.mubr.f32.gmra.mrb[16].mxu1 %v31739_v27 }
 0x370   : > { %26357 = vmatmul.mubr.f32.gmra.mrb[6].mxu0 %v31617_v36  ;;  %25274 = vmatprep.mubr.f32.mxu1 %v31750_v29 }
 0x371   : > { %26359 = vmatprep.mubr.f32.mxu0 %v31623_v23 }
 0x373   : > { %25275 = vmatmul.mubr.f32.gmra.mrb[18].mxu1 %v31758_v26 }
 0x374   : > { %26360 = vmatmul.mubr.f32.gmra.mrb[8].mxu0 %v31625_v14  ;;  %25277 = vmatprep.mubr.f32.mxu1 %v37769_v7 }
 0x375   : > { %26362 = vmatprep.mubr.f32.mxu0 %v31631_v52 }
 0x377   : > { %25278 = vmatmul.mubr.f32.gmra.mrb[20].mxu1 %v37770_v57 }
 0x378   : > { %26363 = vmatmul.mubr.f32.gmra.mrb[10].mxu0 %v31665_v43  ;;  %25280 = vmatprep.mubr.f32.mxu1 %v37772_v10 }
 0x379   : > { %26365 = vmatprep.mubr.f32.mxu0 %v31674_v22 }
 0x37b   : > { %25281 = vmatmul.mubr.f32.gmra.mrb[22].mxu1 %v37774_v58 }
 0x37c   : > { %26366 = vmatmul.mubr.f32.gmra.mrb[12].mxu0 %v31716_v38  ;;  %25283 = vmatprep.mubr.f32.mxu1 %v37775_v13 }
 0x37d   : > { %26368 = vmatprep.mubr.f32.mxu0 %v31725_v45 }
 0x37f   : > { %25284 = vmatmul.mubr.f32.gmra.mrb[24].mxu1 %v37834_v18 }
 0x380   : > { %26369 = vmatmul.mubr.f32.gmra.mrb[14].mxu0 %v31739_v27  ;;  %25286 = vmatprep.mubr.f32.mxu1 %v37777_v50 }
 0x381   : > { %26371 = vmatprep.mubr.f32.mxu0 %v31750_v29 }
 0x383   : > { %25287 = vmatmul.mubr.f32.gmra.mrb[26].mxu1 %v32068_v25 }
 0x384   : > { %26372 = vmatmul.mubr.f32.gmra.mrb[16].mxu0 %v31758_v26  ;;  %25291 = vmatprep.mubr.f32.mxu1 %v37771_v56  ;;  %v37839_v56 = vld [vmem:[#allocation15_spill] sm:$0xff] }
 0x385   : > { %26374 = vmatprep.mubr.f32.mxu0 %v37769_v7  ;;  %v3936_v20 = vsub.f32 %v37839_v56, %v37838_v37 }
 0x387   : > { %25292 = vmatmul.mubr.f32.vlgmr.msra.gmra.mrb[0].mxu1 %v37773_v30  ;;  %v37840_v30 = vld [vmem:[#allocation88_spill] sm:$0xff] }
 0x388   : > { %26375 = vmatmul.mubr.f32.gmra.mrb[18].mxu0 %v37770_v57  ;;  %25294 = vmatprep.mubr.f32.mxu1 %v31520_v40  ;;  %v3946_v15 = vsub.f32 %v37841_v11, %v37840_v30  ;;  %v32367_v40 = vand.u32 4294901760, %v3936_v20  ;;  %v37849_v20 = vld [vmem:[#allocation91_spill] sm:$0xff] }
 0x389   : > { %26377 = vmatprep.mubr.f32.mxu0 %v37772_v10  ;;  %v3976_v5 = vsub.f32 %v37850_v48, %v37849_v20 }
 0x38a   : > { %37842 = vst [vmem:[#allocation291_spill] sm:$0xff] %v32367_v40  ;;  %v32372_v17 = vand.u32 4294901760, %v3946_v15  ;;  %v32385_v15 = vand.u32 4294901760, %v3966_v1 }
 0x38b   : > { %25295 = vmatmul.mubr.f32.gmra.mrb[2].mxu1 %v31532_v55  ;;  %v37843_v55 = vld [vmem:[#allocation89_spill] sm:$0xff]  ;;  %v32391_v62 = vand.u32 4294901760, %v3976_v5 }
 0x38c   : > { %26378 = vmatmul.mubr.f32.gmra.mrb[20].mxu0 %v37774_v58  ;;  %25297 = vmatprep.mubr.f32.mxu1 %v31539_v35  ;;  %v3956_v53 = vsub.f32 %v37844_v44, %v37843_v55  ;;  %37845 = vst [vmem:[#allocation294_spill] sm:$0xff] %v32372_v17  ;;  %37851 = vst [vmem:[#allocation205_spill] sm:$0xff] %v32385_v15  ;;  %v30313_v35 = vld [vmem:[%s30388_s8 + $0xe8] sm:$0xff] }
 0x38d   : > { %26380 = vmatprep.mubr.f32.mxu0 %v37775_v13  ;;  %37854 = vst [vmem:[#allocation201_spill] sm:$0xff] %v32391_v62 }
 0x38e   : > { %v32379_v16 = vand.u32 4294901760, %v3956_v53  ;;  %v37855_v53 = vld [vmem:[#allocation93_spill] sm:$0xff] }
 0x38f   : > { %25298 = vmatmul.mubr.f32.gmra.mrb[4].mxu1 %v31553_v0  ;;  %v3996_v4 = vsub.f32 %v37856_v3, %v37855_v53 }
 0x390   : > { %26381 = vmatmul.mubr.f32.gmra.mrb[22].mxu0 %v37834_v18  ;;  %25300 = vmatprep.mubr.f32.mxu1 %v31557_v47  ;;  %37848 = vst [vmem:[#allocation202_spill] sm:$0xff] %v32379_v16  ;;  %v30312_v47 = vld [vmem:[%s30388_s8 + $0xe0] sm:$0xff] }
 0x391   : > { %26383 = vmatprep.mubr.f32.mxu0 %v37777_v50  ;;  %v32405_v5 = vand.u32 4294901760, %v3996_v4  ;;  %v37867_v4 = vld [vmem:[#allocation97_spill] sm:$0xff]  ;;  %v8780_v0 = vrot.slane %v30312_v47, 2 }
 0x392   : > { %v4036_v2 = vsub.f32 %v37868_v61, %v37867_v4  ;;  %v37921_v4 = vld [vmem:[#allocation85_spill] sm:$0xff] }
 0x393   : > { %25301 = vmatmul.mubr.f32.gmra.mrb[6].mxu1 %v31574_v49  ;;  %37860 = vst [vmem:[#allocation204_spill] sm:$0xff] %v32405_v5 }
 0x394   : > { %26384 = vmatmul.mubr.f32.gmra.mrb[24].mxu0 %v37835_v12  ;;  %25303 = vmatprep.mubr.f32.mxu1 %v31583_v59  ;;  %v37871_v12 = vld [vmem:[#allocation53_spill] sm:$0xff]  ;;  %v37880_v59 = vld [vmem:[#allocation62_spill] sm:$0xff] }
 0x395   : > { %26386 = vmatprep.mubr.f32.mxu0 %v37836_v33 }
 0x397   : > { %25304 = vmatmul.mubr.f32.gmra.mrb[8].mxu1 %v31617_v36 }
 0x398   : > { %26387 = vmatmul.mubr.f32.gmra.mrb[26].mxu0 %v37837_v60  ;;  %v37853_v60 = vld [vmem:[#allocation32_spill] sm:$0xff]  ;;  %25306 = vmatprep.mubr.f32.mxu1 %v31623_v23  ;;  %v37877_v23 = vld [vmem:[#allocation59_spill] sm:$0xff] }
 0x399   : > { %26391 = vmatprep.mubr.f32.mxu0 %v32367_v40  ;;  %v3986_v39 = vsub.f32 %v37853_v60, %v37852_v28 }
 0x39b   : > { %25307 = vmatmul.mubr.f32.gmra.mrb[10].mxu1 %v31625_v14  ;;  %v32399_v1 = vand.u32 4294901760, %v3986_v39  ;;  %v37864_v39 = vld [vmem:[#allocation96_spill] sm:$0xff] }
 0x39c   : > { %26392 = vmatmul.mubr.f32.vlgmr.msra.gmra.mrb[0].mxu0 %v32372_v17  ;;  %25309 = vmatprep.mubr.f32.mxu1 %v31631_v52  ;;  %v4026_v24 = vsub.f32 %v37865_v19, %v37864_v39  ;;  %v37874_v52 = vld [vmem:[#allocation55_spill] sm:$0xff] }
 0x39d   : > { %26394 = vmatprep.mubr.f32.mxu0 %v32379_v16  ;;  %26434 = vmatpush3.msra.mxu0 %v32307_v34  ;;  %37857 = vst [vmem:[#allocation295_spill] sm:$0xff] %v32399_v1  ;;  %v4016_v34 = vsub.f32 %v37862_v51, %v37861_v9 }
 0x39e   : > { %26477 = vmatprep.subr.mxu0 %v32288_v46  ;;  %v32423_v33 = vand.u32 4294901760, %v4026_v24  ;;  %v37876_v24 = vld [vmem:[#allocation100_spill] sm:$0xff] }
 0x39f   : > { %25310 = vmatmul.mubr.f32.gmra.mrb[12].mxu1 %v31665_v43  ;;  %v32417_v6 = vand.u32 4294901760, %v4016_v34  ;;  %v4046_v43 = vsub.f32 %v37871_v12, %v37870_v8  ;;  %v32429_v34 = vand.u32 4294901760, %v4036_v2  ;;  %v4066_v36 = vsub.f32 %v37877_v23, %v37876_v24  ;;  %v37879_v2 = vld [vmem:[#allocation101_spill] sm:$0xff]  ;;  %v37920_v8 = vld [vmem:[#allocation111_spill] sm:$0xff] }
 0x3a0   : > { %26395 = vmatmul.mubr.f32.gmra.mrb[2].mxu0 %v32385_v15  ;;  %25312 = vmatprep.mubr.f32.mxu1 %v31674_v22  ;;  %37869 = vst [vmem:[#allocation87_spill] sm:$0xff] %v32423_v33  ;;  %v37873_v22 = vld [vmem:[#allocation99_spill] sm:$0xff]  ;;  %v4076_v49 = vsub.f32 %v37880_v59, %v37879_v2  ;;  %v37895_v15 = vld [vmem:[#allocation73_spill] sm:$0xff]  ;;  %v37916_v2 = vld [vmem:[#allocation110_spill] sm:$0xff]  ;;  %v4176_v39 = vsub.f32 %v37921_v4, %v37920_v8 }
 0x3a1   : > { %26397 = vmatprep.mubr.f32.mxu0 %v32391_v62  ;;  %37866 = vst [vmem:[#allocation300_spill] sm:$0xff] %v32417_v6  ;;  %37872 = vst [vmem:[#allocation15_spill] sm:$0xff] %v32429_v34  ;;  %v4056_v14 = vsub.f32 %v37874_v52, %v37873_v22 }
 0x3a2   : > { %v32459_v47 = vand.u32 4294901760, %v4076_v49  ;;  %v37892_v49 = vld [vmem:[#allocation71_spill] sm:$0xff]  ;;  %v32578_v8 = vand.u32 4294901760, %v4176_v39  ;;  %v37930_v39 = vld [vmem:[#allocation134_spill] sm:$0xff] }
 0x3a3   : > { %25313 = vmatmul.mubr.f32.gmra.mrb[14].mxu1 %v31716_v38  ;;  %v32435_v38 = vand.u32 4294901760, %v4046_v43  ;;  %v37882_v43 = vld [vmem:[#allocation283_spill] sm:$0xff] }
 0x3a4   : > { %26398 = vmatmul.mubr.f32.gmra.mrb[4].mxu0 %v32399_v1  ;;  %25315 = vmatprep.mubr.f32.mxu1 %v31725_v45  ;;  %v32441_v45 = vand.u32 4294901760, %v4056_v14  ;;  %v37885_v14 = vld [vmem:[#allocation65_spill] sm:$0xff]  ;;  %37886 = vst [vmem:[#allocation312_spill] sm:$0xff] %v32459_v47 }
 0x3a5   : > { %26400 = vmatprep.mubr.f32.mxu0 %v32405_v5  ;;  %37875 = vst [vmem:[#allocation88_spill] sm:$0xff] %v32435_v38 }
 0x3a6   : > { %37878 = vst [vmem:[#allocation17_spill] sm:$0xff] %v32441_v45 }
 0x3a7   : > { %25316 = vmatmul.mubr.f32.gmra.mrb[16].mxu1 %v31739_v27  ;;  %v32447_v27 = vrot.slane %v30313_v35, 2  ;;  %v37887_v35 = vld [vmem:[#allocation103_spill] sm:$0xff] }
 0x3a8   : > { %26401 = vmatmul.mubr.f32.gmra.mrb[6].mxu0 %v32411_v54  ;;  %25318 = vmatprep.mubr.f32.mxu1 %v31750_v29  ;;  %v32453_v29 = vand.u32 4294901760, %v4066_v36  ;;  %v37888_v54 = vld [vmem:[#allocation68_spill] sm:$0xff] }
 0x3a9   : > { %26403 = vmatprep.mubr.f32.mxu0 %v32417_v6  ;;  %37881 = vst [vmem:[#allocation311_spill] sm:$0xff] %v32447_v27  ;;  %v4096_v5 = vsub.f32 %v37888_v54, %v37887_v35  ;;  %v8783_v36 = vsel %vm3732_vm1, %v8780_v0, %v32447_v27  ;;  %v37907_v35 = vld [vmem:[#allocation79_spill] sm:$0xff] }
 0x3aa   : > { %37883 = vst [vmem:[#allocation283_spill] sm:$0xff] %v32453_v29 }
 0x3ab   : > { %25319 = vmatmul.mubr.f32.gmra.mrb[18].mxu1 %v31758_v26  ;;  %v37889_v26 = vld [vmem:[#allocation70_spill] sm:$0xff]  ;;  %v32477_v62 = vand.u32 4294901760, %v4096_v5 }
 0x3ac   : > { %26404 = vmatmul.mubr.f32.gmra.mrb[8].mxu0 %v32423_v33  ;;  %v2066_v33 = vsel %vm396_vm2, %v37882_v43, 0  ;;  %25321 = vmatprep.mubr.f32.mxu1 %v37769_v7  ;;  %v8781_v1 = vsel %vm3732_vm1, %v37889_v26, %v8780_v0  ;;  %v37894_v26 = vld [vmem:[#allocation105_spill] sm:$0xff]  ;;  %v37898_v5 = vld [vmem:[#allocation106_spill] sm:$0xff] }
 0x3ad   : > { %26406 = vmatprep.mubr.f32.mxu0 %v32429_v34  ;;  %v37884_v34 = vld [vmem:[#allocation102_spill] sm:$0xff]  ;;  %v32465_v43 = vand.u32 4294901760, %v2066_v33  ;;  %37893 = vst [vmem:[#allocation313_spill] sm:$0xff] %v32477_v62  ;;  %v4116_v16 = vsub.f32 %v37895_v15, %v37894_v26  ;;  %v8784_v0 = vsel %vm396_vm2, %v8781_v1, 0 }
 0x3ae   : > { %v4086_v6 = vsub.f32 %v37885_v14, %v37884_v34  ;;  %v32494_v26 = vand.u32 4294901760, %v8784_v0  ;;  %v37913_v34 = vld [vmem:[#allocation81_spill] sm:$0xff] }
 0x3af   : > { %25322 = vmatmul.mubr.f32.gmra.mrb[20].mxu1 %v37770_v57  ;;  %v8786_v57 = vsel %vm396_vm2, %v8783_v36, 0  ;;  %v37903_v36 = vld [vmem:[#allocation107_spill] sm:$0xff] }
 0x3b0   : > { %26407 = vmatmul.mubr.f32.gmra.mrb[10].mxu0 %v32435_v38  ;;  %v32471_v7 = vand.u32 4294901760, %v4086_v6  ;;  %25324 = vmatprep.mubr.f32.mxu1 %v37772_v10  ;;  %v37896_v6 = vld [vmem:[#allocation282_spill] sm:$0xff]  ;;  %37900 = vst [vmem:[#allocation314_spill] sm:$0xff] %v32494_v26 }
 0x3b1   : > { %26409 = vmatprep.mubr.f32.mxu0 %v32441_v45  ;;  %v37891_v45 = vld [vmem:[#allocation104_spill] sm:$0xff]  ;;  %v2064_v17 = vsel %vm396_vm2, %v37896_v6, 0 }
 0x3b2   : > { %37890 = vst [vmem:[#allocation70_spill] sm:$0xff] %v32471_v7  ;;  %v4106_v38 = vsub.f32 %v37892_v49, %v37891_v45  ;;  %v32497_v1 = vand.u32 4294901760, %v2064_v17  ;;  %v32504_v45 = vand.u32 4294901760, %v8786_v57 }
 0x3b3   : > { %25325 = vmatmul.mubr.f32.gmra.mrb[22].mxu1 %v37774_v58  ;;  %v37904_v58 = vld [vmem:[#allocation77_spill] sm:$0xff] }
 0x3b4   : > { %26410 = vmatmul.mubr.f32.gmra.mrb[12].mxu0 %v32453_v29  ;;  %v32484_v29 = vsub.f32 %v2066_v33, %v32465_v43  ;;  %v32490_v10 = vand.u32 4294901760, %v4106_v38  ;;  %25327 = vmatprep.mubr.f32.mxu1 %v37775_v13  ;;  %37901 = vst [vmem:[#allocation315_spill] sm:$0xff] %v32497_v1  ;;  %v32500_v33 = vand.u32 4294901760, %v4116_v16  ;;  %v4136_v6 = vsub.f32 %v37904_v58, %v37903_v36 }
 0x3b5   : > { %26412 = vmatprep.mubr.f32.mxu0 %v32459_v47  ;;  %v37899_v47 = vld [vmem:[#allocation75_spill] sm:$0xff]  ;;  %37905 = vst [vmem:[#allocation317_spill] sm:$0xff] %v32504_v45  ;;  %v8788_v38 = vsel %vm396_vm2, %v32447_v27, 0 }
 0x3b6   : > { %37897 = vst [vmem:[#allocation282_spill] sm:$0xff] %v32490_v10  ;;  %v4126_v40 = vsub.f32 %v37899_v47, %v37898_v5  ;;  %37902 = vst [vmem:[#allocation316_spill] sm:$0xff] %v32500_v33  ;;  %v37906_v5 = vld [vmem:[#allocation108_spill] sm:$0xff]  ;;  %v32520_v36 = vand.u32 4294901760, %v8788_v38 }
 0x3b7   : > { %v4146_v13 = vsub.f32 %v37907_v35, %v37906_v5  ;;  %25328 = vmatmul.mubr.f32.gmra.mrb[24].mxu1 %v37834_v18  ;;  %v37912_v5 = vld [vmem:[#allocation109_spill] sm:$0xff] }
 0x3b8   : > { %26413 = vmatmul.mubr.f32.gmra.mrb[14].mxu0 %v32471_v7  ;;  %v32509_v7 = vsub.f32 %v2064_v17, %v32497_v1  ;;  %v32515_v16 = vand.u32 4294901760, %v4126_v40  ;;  %37910 = vst [vmem:[#allocation320_spill] sm:$0xff] %v32520_v36  ;;  %25330 = vmatprep.mubr.f32.mxu1 %v37777_v50  ;;  %v32525_v17 = vand.u32 4294901760, %v4136_v6  ;;  %v4156_v18 = vsub.f32 %v37913_v34, %v37912_v5  ;;  %v309_v40 = vld [vmem:[%s36458_s1] sm:$0xf] }
 0x3b9   : > { %26415 = vmatprep.mubr.f32.mxu0 %v32477_v62  ;;  %v32518_v62 = vsub.f32 %v8784_v0, %v32494_v26  ;;  %v37158_v0 = vand.u32 4294901760, %v32484_v29  ;;  %v32537_v50 = vsel %vm453_vm0, %v309_v40, 0  ;;  %v37917_v40 = vld [vmem:[#allocation83_spill] sm:$0xff] }
 0x3ba   : > { %37908 = vst [vmem:[#allocation318_spill] sm:$0xff] %v32515_v16  ;;  %v37157_v27 = vand.u32 4294901760, %v32509_v7  ;;  %37911 = vst [vmem:[#allocation321_spill] sm:$0xff] %v32525_v17  ;;  %v4166_v24 = vsub.f32 %v37917_v40, %v37916_v2 }
 0x3bb   : > { %37909 = vst [vmem:[#allocation319_spill] sm:$0xff] %v32518_v62  ;;  %25331 = vmatmul.mubr.f32.gmra.mrb[26].mxu1 %v32068_v25  ;;  %v2202_v5 = vsub.f32 %v32484_v29, %v37158_v0  ;;  %v32555_v22 = vand.u32 4294901760, %v32518_v62  ;;  %v32561_v25 = vand.u32 4294901760, %v4156_v18 }
 0x3bc   : > { %26416 = vmatmul.mubr.f32.gmra.mrb[16].mxu0 %v32490_v10  ;;  %v32530_v10 = vsub.f32 %v8786_v57, %v32504_v45  ;;  %v2192_v6 = vsub.f32 %v32509_v7, %v37157_v27  ;;  %v32546_v57 = vand.u32 4294901760, %v32537_v50 }
 0x3bd   : > { %26418 = vmatprep.mubr.f32.mxu0 %v32500_v33  ;;  %v32542_v33 = vand.u32 4294901760, %v4146_v13  ;;  %37918 = vst [vmem:[#allocation324_spill] sm:$0xff] %v32555_v22  ;;  %v32558_v13 = vsub.f32 %v8788_v38, %v32520_v36  ;;  %37919 = vst [vmem:[#allocation325_spill] sm:$0xff] %v32561_v25  ;;  %v32571_v38 = vand.u32 4294901760, %v4166_v24  ;;  %v9112_v18 = vsub.f32 %v32518_v62, %v32555_v22 }
 0x3be   : > { %37914 = vst [vmem:[#allocation322_spill] sm:$0xff] %v32530_v10  ;;  %v2193_v27 = vand.u32 4294901760, %v2192_v6  ;;  %v32566_v0 = vand.u32 4294901760, %v32530_v10  ;;  %25333 = vmatprep.subr.mxu1 %v32546_v57 }
 0x3bf   : > { %37915 = vst [vmem:[#allocation323_spill] sm:$0xff] %v32542_v33  ;;  %25334 = vmatpush3.msra.mxu1 %v32546_v57  ;;  %37923 = vst [vmem:[#allocation327_spill] sm:$0xff] %v32571_v38  ;;  %v37169_v6 = vand.u32 4294901760, %v32558_v13  ;;  %v32584_v24 = vand.u32 4294901760, %v9112_v18  ;;  %v37932_v18 = vld [vmem:[#allocation139_spill] sm:$0xff] }
 0x3c0   : > { %26419 = vmatmul.mubr.f32.gmra.mrb[18].mxu0 %v32515_v16  ;;  %37922 = vst [vmem:[#allocation326_spill] sm:$0xff] %v32566_v0  ;;  %v2203_v16 = vand.u32 4294901760, %v2202_v5  ;;  %25335 = vmatprep.mubr.f32.mxu1 %v2193_v27  ;;  %v9122_v5 = vsub.f32 %v32530_v10, %v32566_v0  ;;  %v37926_v27 = vld [vmem:[#allocation124_spill] sm:$0xff] }
 0x3c1   : > { %26421 = vmatprep.mubr.f32.mxu0 %v32525_v17  ;;  %v37924_v17 = vld [vmem:[#allocation25_spill] sm:$0xff]  ;;  %37927 = vst [vmem:[#allocation124_spill] sm:$0xff] %v32584_v24 }
 0x3c2   : > { %25336 = vmatmul.mubr.f32.vlgmr.msra.gmra.mrb[0].mxu1 %v2203_v16  ;;  %37925 = vst [vmem:[#allocation25_spill] sm:$0xff] %v32578_v8  ;;  %v9132_v16 = vsub.f32 %v32558_v13, %v37169_v6  ;;  %v37934_v6 = vld [vmem:[#allocation12_spill] sm:$0xff] }
 0x3c3   : > { %25338 = vmatprep.mubr.f32.mxu1 %v37924_v17  ;;  %v32591_v17 = vand.u32 4294901760, %v9122_v5  ;;  %v37936_v5 = vld [vmem:[#allocation13_spill] sm:$0xff] }
 0x3c4   : > { %26422 = vmatmul.mubr.f32.gmra.mrb[20].mxu0 %v32542_v33  ;;  %v37928_v33 = vld [vmem:[#allocation31_spill] sm:$0xff] }
 0x3c5   : > { %26424 = vmatprep.mubr.f32.mxu0 %v32561_v25  ;;  %37929 = vst [vmem:[#allocation328_spill] sm:$0xff] %v32591_v17  ;;  %v9133_v25 = vand.u32 4294901760, %v9132_v16  ;;  %v37939_v16 = vld [vmem:[#allocation148_spill] sm:$0xff] }
 0x3c6   : > { %25339 = vmatmul.mubr.f32.gmra.mrb[2].mxu1 %v37926_v27  ;;  %v37931_v27 = vld [vmem:[#allocation135_spill] sm:$0xff] }
 0x3c7   : > { %25341 = vmatprep.mubr.f32.mxu1 %v37928_v33  ;;  %v37935_v33 = vld [vmem:[#allocation41_spill] sm:$0xff] }
 0x3c8   : > { %26425 = vmatmul.mubr.f32.gmra.mrb[22].mxu0 %v32571_v38  ;;  %v37933_v38 = vld [vmem:[#allocation140_spill] sm:$0xff] }
 0x3c9   : > { %26427 = vmatprep.mubr.f32.mxu0 %v32578_v8  ;;  %v37937_v8 = vld [vmem:[#allocation45_spill] sm:$0xff] }
 0x3ca   : > { %25342 = vmatmul.mubr.f32.gmra.mrb[4].mxu1 %v37930_v39  ;;  %v37938_v39 = vld [vmem:[#allocation19_spill] sm:$0xff] }
 0x3cb   : > { %25344 = vmatprep.mubr.f32.mxu1 %v37931_v27  ;;  %v37947_v27 = vld [vmem:[#allocation163_spill] sm:$0xff] }
 0x3cc   : > { %26428 = vmatmul.mubr.f32.gmra.mrb[24].mxu0 %v32584_v24  ;;  %v37942_v24 = vld [vmem:[#allocation24_spill] sm:$0xff] }
 0x3cd   : > { %26430 = vmatprep.mubr.f32.mxu0 %v32591_v17  ;;  %v37940_v17 = vld [vmem:[#allocation21_spill] sm:$0xff] }
 0x3ce   : > { %25345 = vmatmul.mubr.f32.gmra.mrb[6].mxu1 %v37932_v18  ;;  %v37945_v18 = vld [vmem:[#allocation160_spill] sm:$0xff] }
 0x3cf   : > { %25347 = vmatprep.mubr.f32.mxu1 %v37933_v38  ;;  %v37943_v38 = vld [vmem:[#allocation157_spill] sm:$0xff] }
 0x3d0   : > { %26431 = vmatmul.mubr.f32.gmra.mrb[26].mxu0 %v9133_v25  ;;  %v37941_v25 = vld [vmem:[#allocation151_spill] sm:$0xff] }
 0x3d1   : > { %26435 = vmatprep.mubr.f32.mxu0 %v37934_v6 }
 0x3d2   : > { %25348 = vmatmul.mubr.f32.gmra.mrb[8].mxu1 %v37935_v33  ;;  %v37944_v33 = vld [vmem:[#allocation29_spill] sm:$0xff] }
 0x3d3   : > { %25350 = vmatprep.mubr.f32.mxu1 %v37937_v8  ;;  %v37946_v8 = vld [vmem:[#allocation30_spill] sm:$0xff] }
 0x3d4   : > { %26436 = vmatmul.mubr.f32.vlgmr.msra.gmra.mrb[0].mxu0 %v37936_v5 }
 0x3d5   : > { %26438 = vmatprep.mubr.f32.mxu0 %v37938_v39  ;;  %26478 = vmatpush3.msra.mxu0 %v32288_v46  ;;  %v37948_v46 = vld [vmem:[#allocation35_spill] sm:$0xff]  ;;  %v37949_v39 = vld [vmem:[#allocation166_spill] sm:$0xff] }
 0x3d6   : > { %26521 = vmatprep.subr.mxu0 %v32237_v42  ;;  %25351 = vmatmul.mubr.f32.gmra.mrb[10].mxu1 %v37939_v16  ;;  %v37950_v16 = vld [vmem:[#allocation37_spill] sm:$0xff] }
 0x3d7   : > { %25353 = vmatprep.mubr.f32.mxu1 %v37941_v25  ;;  %v37952_v25 = vld [vmem:[#allocation40_spill] sm:$0xff] }
 0x3d8   : > { %26439 = vmatmul.mubr.f32.gmra.mrb[2].mxu0 %v37940_v17  ;;  %v37951_v17 = vld [vmem:[#allocation168_spill] sm:$0xff] }
 0x3d9   : > { %26441 = vmatprep.mubr.f32.mxu0 %v37942_v24  ;;  %v37953_v24 = vld [vmem:[#allocation172_spill] sm:$0xff] }
 0x3da   : > { %25354 = vmatmul.mubr.f32.gmra.mrb[12].mxu1 %v37943_v38  ;;  %v37954_v38 = vld [vmem:[#allocation43_spill] sm:$0xff] }
 0x3db   : > { %25356 = vmatprep.mubr.f32.mxu1 %v37945_v18  ;;  %v37956_v18 = vld [vmem:[#allocation48_spill] sm:$0xff] }
 0x3dc   : > { %26442 = vmatmul.mubr.f32.gmra.mrb[4].mxu0 %v37944_v33  ;;  %v37955_v33 = vld [vmem:[#allocation175_spill] sm:$0xff] }
 0x3dd   : > { %26444 = vmatprep.mubr.f32.mxu0 %v37946_v8  ;;  %v37957_v8 = vld [vmem:[#allocation176_spill] sm:$0xff] }
 0x3de   : > { %25357 = vmatmul.mubr.f32.gmra.mrb[14].mxu1 %v37947_v27  ;;  %v37958_v27 = vld [vmem:[#allocation49_spill] sm:$0xff] }
 0x3df   : > { %25359 = vmatprep.mubr.f32.mxu1 %v37949_v39  ;;  %v37960_v39 = vld [vmem:[#allocation54_spill] sm:$0xff] }
 0x3e0   : > { %26445 = vmatmul.mubr.f32.gmra.mrb[6].mxu0 %v37948_v46  ;;  %v37959_v46 = vld [vmem:[#allocation183_spill] sm:$0xff] }
 0x3e1   : > { %26447 = vmatprep.mubr.f32.mxu0 %v37950_v16  ;;  %v37961_v16 = vld [vmem:[#allocation187_spill] sm:$0xff] }
 0x3e2   : > { %25360 = vmatmul.mubr.f32.gmra.mrb[16].mxu1 %v37951_v17  ;;  %v37962_v17 = vld [vmem:[#allocation56_spill] sm:$0xff] }
 0x3e3   : > { %25362 = vmatprep.mubr.f32.mxu1 %v37953_v24  ;;  %v37964_v24 = vld [vmem:[#allocation60_spill] sm:$0xff] }
 0x3e4   : > { %26448 = vmatmul.mubr.f32.gmra.mrb[8].mxu0 %v37952_v25  ;;  %v37963_v25 = vld [vmem:[#allocation190_spill] sm:$0xff] }
 0x3e5   : > { %26450 = vmatprep.mubr.f32.mxu0 %v37954_v38  ;;  %v37965_v38 = vld [vmem:[#allocation193_spill] sm:$0xff] }
 0x3e6   : > { %25363 = vmatmul.mubr.f32.gmra.mrb[18].mxu1 %v37955_v33  ;;  %v37966_v33 = vld [vmem:[#allocation63_spill] sm:$0xff] }
 0x3e7   : > { %25365 = vmatprep.mubr.f32.mxu1 %v37957_v8  ;;  %v2471_v8 = vsub.f32 %v32537_v50, %v32546_v57  ;;  %v37973_v50 = vld [vmem:[#allocation74_spill] sm:$0xff] }
 0x3e8   : > { %26451 = vmatmul.mubr.f32.gmra.mrb[10].mxu0 %v37956_v18  ;;  %v37972_v18 = vld [vmem:[#allocation72_spill] sm:$0xff] }
 0x3e9   : > { %26453 = vmatprep.mubr.f32.mxu0 %v37958_v27  ;;  %v37967_v27 = vld [vmem:[#allocation195_spill] sm:$0xff] }
 0x3ea   : > { %25366 = vmatmul.mubr.f32.gmra.mrb[20].mxu1 %v37959_v46  ;;  %v32637_v46 = vand.u32 4294901760, %v2471_v8 }
 0x3eb   : > { %25368 = vmatprep.mubr.f32.mxu1 %v37961_v16  ;;  %v37969_v16 = vld [vmem:[#allocation197_spill] sm:$0xff] }
 0x3ec   : > { %26454 = vmatmul.mubr.f32.gmra.mrb[12].mxu0 %v37960_v39  ;;  %v37968_v39 = vld [vmem:[#allocation66_spill] sm:$0xff] }
 0x3ed   : > { %26456 = vmatprep.mubr.f32.mxu0 %v37962_v17  ;;  %v37970_v17 = vld [vmem:[#allocation69_spill] sm:$0xff] }
 0x3ee   : > { %25369 = vmatmul.mubr.f32.gmra.mrb[22].mxu1 %v37963_v25  ;;  %v2473_v25 = vsub.f32 %v2471_v8, %v32637_v46 }
 0x3ef   : > { %25371 = vmatprep.mubr.f32.mxu1 %v37965_v38 }
 0x3f0   : > { %26457 = vmatmul.mubr.f32.gmra.mrb[14].mxu0 %v37964_v24  ;;  %v37971_v24 = vld [vmem:[#allocation198_spill] sm:$0xff]  ;;  %v2474_v38 = vand.u32 4294901760, %v2473_v25  ;;  %v37977_v25 = vld [vmem:[#allocation5_spill] sm:$0xff] }
 0x3f1   : > { %26459 = vmatprep.mubr.f32.mxu0 %v37966_v33 }
 0x3f2   : > { %25372 = vmatmul.mubr.f32.gmra.mrb[24].mxu1 %v37967_v27  ;;  %25377 = vmatprep.subr.mxu1 %v2474_v38  ;;  %v37974_v27 = vld [vmem:[#allocation76_spill] sm:$0xff] }
 0x3f3   : > { %25374 = vmatprep.mubr.f32.mxu1 %v37969_v16  ;;  %25378 = vmatpush3.msra.mxu1 %v2474_v38  ;;  %v37975_v16 = vld [vmem:[#allocation4_spill] sm:$0xff]  ;;  %v37981_v38 = vld [vmem:[#allocation113_spill] sm:$0xff] }
 0x3f4   : > { %26460 = vmatmul.mubr.f32.gmra.mrb[16].mxu0 %v37968_v39  ;;  %25421 = vmatprep.subr.mxu1 %v2471_v8 }
 0x3f5   : > { %26462 = vmatprep.mubr.f32.mxu0 %v37970_v17  ;;  %v37976_v17 = vld [vmem:[#allocation78_spill] sm:$0xff] }
 0x3f6   : > { %25375 = vmatmul.mubr.f32.gmra.mrb[26].mxu1 %v37971_v24  ;;  %v37978_v24 = vld [vmem:[#allocation80_spill] sm:$0xff] }
 0x3f7   : > { %25379 = vmatprep.mubr.f32.mxu1 %v32497_v1  ;;  %v37979_v1 = vld [vmem:[#allocation6_spill] sm:$0xff] }
 0x3f8   : > { %26463 = vmatmul.mubr.f32.gmra.mrb[18].mxu0 %v37972_v18 }
 0x3f9   : > { %26465 = vmatprep.mubr.f32.mxu0 %v37973_v50  ;;  %v37980_v50 = vld [vmem:[#allocation82_spill] sm:$0xff] }
 0x3fa   : > { %25380 = vmatmul.mubr.f32.vlgmr.msra.gmra.mrb[0].mxu1 %v32465_v43 }
 0x3fb   : > { %25382 = vmatprep.mubr.f32.mxu1 %v37975_v16  ;;  %25422 = vmatpush3.msra.mxu1 %v2471_v8  ;;  %v37984_v8 = vld [vmem:[#allocation118_spill] sm:$0xff] }
 0x3fc   : > { %26466 = vmatmul.mubr.f32.gmra.mrb[20].mxu0 %v37974_v27  ;;  %25465 = vmatprep.subr.mxu1 %v32546_v57  ;;  %v37982_v27 = vld [vmem:[#allocation116_spill] sm:$0xff] }
 0x3fd   : > { %26468 = vmatprep.mubr.f32.mxu0 %v37976_v17  ;;  %v37983_v17 = vld [vmem:[#allocation117_spill] sm:$0xff] }
 0x3fe   : > { %25383 = vmatmul.mubr.f32.gmra.mrb[2].mxu1 %v37977_v25 }
 0x3ff   : > { %25385 = vmatprep.mubr.f32.mxu1 %v37979_v1 }
 0x400   : > { %26469 = vmatmul.mubr.f32.gmra.mrb[22].mxu0 %v37978_v24  ;;  %v37985_v24 = vld [vmem:[#allocation120_spill] sm:$0xff] }
 0x401   : > { %26471 = vmatprep.mubr.f32.mxu0 %v37980_v50  ;;  %v37986_v50 = vld [vmem:[#allocation123_spill] sm:$0xff] }
 0x402   : > { %25386 = vmatmul.mubr.f32.gmra.mrb[4].mxu1 %v37981_v38 }
 0x403   : > { %25388 = vmatprep.mubr.f32.mxu1 %v37982_v27 }
 0x404   : > { %26472 = vmatmul.mubr.f32.gmra.mrb[24].mxu0 %v32494_v26 }
 0x405   : > { %26474 = vmatprep.mubr.f32.mxu0 %v32504_v45  ;;  %v37987_v45 = vld [vmem:[#allocation126_spill] sm:$0xff] }
 0x406   : > { %25389 = vmatmul.mubr.f32.gmra.mrb[6].mxu1 %v37983_v17 }
 0x407   : > { %25391 = vmatprep.mubr.f32.mxu1 %v37984_v8 }
 0x408   : > { %26475 = vmatmul.mubr.f32.gmra.mrb[26].mxu0 %v32520_v36  ;;  %v37988_v36 = vld [vmem:[#allocation127_spill] sm:$0xff] }
 0x409   : > { %26479 = vmatprep.mubr.f32.mxu0 %v37839_v56  ;;  %v37989_v56 = vld [vmem:[#allocation133_spill] sm:$0xff] }
 0x40a   : > { %25392 = vmatmul.mubr.f32.gmra.mrb[8].mxu1 %v37985_v24 }
 0x40b   : > { %25394 = vmatprep.mubr.f32.mxu1 %v37986_v50  ;;  %v37992_v50 = vld [vmem:[#allocation143_spill] sm:$0xff] }
 0x40c   : > { %26480 = vmatmul.mubr.f32.vlgmr.msra.gmra.mrb[0].mxu0 %v37841_v11  ;;  %v37990_v11 = vld [vmem:[#allocation137_spill] sm:$0xff] }
 0x40d   : > { %26482 = vmatprep.mubr.f32.mxu0 %v37844_v44  ;;  %26522 = vmatpush3.msra.mxu0 %v32237_v42  ;;  %v37991_v44 = vld [vmem:[#allocation141_spill] sm:$0xff] }
 0x40e   : > { %26565 = vmatprep.subr.mxu0 %v32295_v21  ;;  %25395 = vmatmul.mubr.f32.gmra.mrb[10].mxu1 %v37987_v45 }
 0x40f   : > { %25397 = vmatprep.mubr.f32.mxu1 %v37988_v36 }
 0x410   : > { %26483 = vmatmul.mubr.f32.gmra.mrb[2].mxu0 %v37847_v41  ;;  %v37993_v41 = vld [vmem:[#allocation145_spill] sm:$0xff] }
 0x411   : > { %26485 = vmatprep.mubr.f32.mxu0 %v37850_v48  ;;  %v37994_v48 = vld [vmem:[#allocation147_spill] sm:$0xff] }
 0x412   : > { %25398 = vmatmul.mubr.f32.gmra.mrb[12].mxu1 %v37989_v56 }
 0x413   : > { %25400 = vmatprep.mubr.f32.mxu1 %v37990_v11 }
 0x414   : > { %26486 = vmatmul.mubr.f32.gmra.mrb[4].mxu0 %v37853_v60  ;;  %v37995_v60 = vld [vmem:[#allocation149_spill] sm:$0xff] }
 0x415   : > { %26488 = vmatprep.mubr.f32.mxu0 %v37856_v3  ;;  %v37996_v3 = vld [vmem:[#allocation150_spill] sm:$0xff] }
 0x416   : > { %25401 = vmatmul.mubr.f32.gmra.mrb[14].mxu1 %v37991_v44 }
 0x417   : > { %25403 = vmatprep.mubr.f32.mxu1 %v37992_v50 }
 0x418   : > { %26489 = vmatmul.mubr.f32.gmra.mrb[6].mxu0 %v37859_v63  ;;  %v37997_v63 = vld [vmem:[#allocation156_spill] sm:$0xff] }
 0x419   : > { %26491 = vmatprep.mubr.f32.mxu0 %v37862_v51  ;;  %v37998_v51 = vld [vmem:[#allocation159_spill] sm:$0xff] }
 0x41a   : > { %25404 = vmatmul.mubr.f32.gmra.mrb[16].mxu1 %v37993_v41 }
 0x41b   : > { %25406 = vmatprep.mubr.f32.mxu1 %v37994_v48 }
 0x41c   : > { %26492 = vmatmul.mubr.f32.gmra.mrb[8].mxu0 %v37865_v19  ;;  %v37999_v19 = vld [vmem:[#allocation165_spill] sm:$0xff] }
 0x41d   : > { %26494 = vmatprep.mubr.f32.mxu0 %v37868_v61  ;;  %v38000_v61 = vld [vmem:[#allocation167_spill] sm:$0xff] }
 0x41e   : > { %25407 = vmatmul.mubr.f32.gmra.mrb[18].mxu1 %v37995_v60 }
 0x41f   : > { %25409 = vmatprep.mubr.f32.mxu1 %v37996_v3 }
 0x420   : > { %26495 = vmatmul.mubr.f32.gmra.mrb[10].mxu0 %v37871_v12  ;;  %v38001_v12 = vld [vmem:[#allocation171_spill] sm:$0xff] }
 0x421   : > { %26497 = vmatprep.mubr.f32.mxu0 %v37874_v52  ;;  %v38002_v52 = vld [vmem:[#allocation174_spill] sm:$0xff] }
 0x422   : > { %25410 = vmatmul.mubr.f32.gmra.mrb[20].mxu1 %v37997_v63 }
 0x423   : > { %25412 = vmatprep.mubr.f32.mxu1 %v37998_v51 }
 0x424   : > { %26498 = vmatmul.mubr.f32.gmra.mrb[12].mxu0 %v37877_v23  ;;  %v38003_v23 = vld [vmem:[#allocation179_spill] sm:$0xff] }
 0x425   : > { %26500 = vmatprep.mubr.f32.mxu0 %v37880_v59  ;;  %v38026_v59 = vld [vmem:[#allocation99_spill] sm:$0xff] }
 0x426   : > { %25413 = vmatmul.mubr.f32.gmra.mrb[22].mxu1 %v37999_v19 }
 0x427   : > { %25415 = vmatprep.mubr.f32.mxu1 %v38000_v61 }
 0x428   : > { %26501 = vmatmul.mubr.f32.gmra.mrb[14].mxu0 %v37885_v14  ;;  %v38024_v14 = vld [vmem:[#allocation98_spill] sm:$0xff] }
 0x429   : > { %26503 = vmatprep.mubr.f32.mxu0 %v37888_v54  ;;  %v38004_v54 = vld [vmem:[#allocation112_spill] sm:$0xff] }
 0x42a   : > { %25416 = vmatmul.mubr.f32.gmra.mrb[24].mxu1 %v38001_v12 }
 0x42b   : > { %25418 = vmatprep.mubr.f32.mxu1 %v38002_v52 }
 0x42c   : > { %26504 = vmatmul.mubr.f32.gmra.mrb[16].mxu0 %v37892_v49  ;;  %v38022_v49 = vld [vmem:[#allocation97_spill] sm:$0xff] }
 0x42d   : > { %26506 = vmatprep.mubr.f32.mxu0 %v37895_v15  ;;  %v38005_v15 = vld [vmem:[#allocation8_spill] sm:$0xff] }
 0x42e   : > { %25419 = vmatmul.mubr.f32.gmra.mrb[26].mxu1 %v38003_v23 }
 0x42f   : > { %25423 = vmatprep.mubr.f32.mxu1 %v32509_v7 }
 0x430   : > { %26507 = vmatmul.mubr.f32.gmra.mrb[18].mxu0 %v37899_v47  ;;  %v38006_v47 = vld [vmem:[#allocation115_spill] sm:$0xff] }
 0x431   : > { %26509 = vmatprep.mubr.f32.mxu0 %v37904_v58  ;;  %v38007_v58 = vld [vmem:[#allocation16_spill] sm:$0xff] }
 0x432   : > { %25424 = vmatmul.mubr.f32.vlgmr.msra.gmra.mrb[0].mxu1 %v32484_v29 }
 0x433   : > { %25426 = vmatprep.mubr.f32.mxu1 %v38004_v54  ;;  %25466 = vmatpush3.msra.mxu1 %v32546_v57  ;;  %v38009_v54 = vld [vmem:[#allocation121_spill] sm:$0xff] }
 0x434   : > { %26510 = vmatmul.mubr.f32.gmra.mrb[20].mxu0 %v37907_v35  ;;  %25509 = vmatprep.subr.mxu1 %v32637_v46  ;;  %v38008_v35 = vld [vmem:[#allocation119_spill] sm:$0xff] }
 0x435   : > { %26512 = vmatprep.mubr.f32.mxu0 %v37913_v34  ;;  %v38010_v34 = vld [vmem:[#allocation122_spill] sm:$0xff] }
 0x436   : > { %25427 = vmatmul.mubr.f32.gmra.mrb[2].mxu1 %v38005_v15  ;;  %v38011_v15 = vld [vmem:[#allocation125_spill] sm:$0xff] }
 0x437   : > { %25429 = vmatprep.mubr.f32.mxu1 %v38006_v47 }
 0x438   : > { %26513 = vmatmul.mubr.f32.gmra.mrb[22].mxu0 %v37917_v40  ;;  %v38020_v40 = vld [vmem:[#allocation96_spill] sm:$0xff] }
 0x439   : > { %26515 = vmatprep.mubr.f32.mxu0 %v37921_v4  ;;  %v38012_v4 = vld [vmem:[#allocation130_spill] sm:$0xff] }
 0x43a   : > { %25430 = vmatmul.mubr.f32.gmra.mrb[4].mxu1 %v38007_v58 }
 0x43b   : > { %25432 = vmatprep.mubr.f32.mxu1 %v38008_v35  ;;  %v38098_v35 = vld [vmem:[#allocation123_spill] sm:$0xff] }
 0x43c   : > { %26516 = vmatmul.mubr.f32.gmra.mrb[24].mxu0 %v32518_v62  ;;  %v38014_v62 = vld [vmem:[#allocation132_spill] sm:$0xff] }
 0x43d   : > { %26518 = vmatprep.mubr.f32.mxu0 %v32530_v10  ;;  %v38013_v10 = vld [vmem:[#allocation131_spill] sm:$0xff] }
 0x43e   : > { %25433 = vmatmul.mubr.f32.gmra.mrb[6].mxu1 %v38009_v54 }
 0x43f   : > { %25435 = vmatprep.mubr.f32.mxu1 %v38010_v34  ;;  %v38097_v34 = vld [vmem:[#allocation320_spill] sm:$0xff] }
 0x440   : > { %26519 = vmatmul.mubr.f32.gmra.mrb[26].mxu0 %v32558_v13 }
 0x441   : > { %26523 = vmatprep.mubr.f32.mxu0 %v37838_v37  ;;  %v38015_v37 = vld [vmem:[#allocation138_spill] sm:$0xff] }
 0x442   : > { %25436 = vmatmul.mubr.f32.gmra.mrb[8].mxu1 %v38011_v15 }
 0x443   : > { %25438 = vmatprep.mubr.f32.mxu1 %v38012_v4  ;;  %v38095_v4 = vld [vmem:[#allocation82_spill] sm:$0xff] }
 0x444   : > { %26524 = vmatmul.mubr.f32.vlgmr.msra.gmra.mrb[0].mxu0 %v37840_v30  ;;  %v38016_v30 = vld [vmem:[#allocation142_spill] sm:$0xff] }
 0x445   : > { %26526 = vmatprep.mubr.f32.mxu0 %v37843_v55  ;;  %26566 = vmatpush3.msra.mxu0 %v32295_v21  ;;  %v38017_v55 = vld [vmem:[#allocation144_spill] sm:$0xff]  ;;  %v38018_v21 = vld [vmem:[#allocation146_spill] sm:$0xff] }
 0x446   : > { %26609 = vmatprep.subr.mxu0 %v32237_v42  ;;  %25439 = vmatmul.mubr.f32.gmra.mrb[10].mxu1 %v38013_v10  ;;  %v38094_v10 = vld [vmem:[#allocation80_spill] sm:$0xff] }
 0x447   : > { %25441 = vmatprep.mubr.f32.mxu1 %v38014_v62  ;;  %v38088_v62 = vld [vmem:[#allocation191_spill] sm:$0xff] }
 0x448   : > { %26527 = vmatmul.mubr.f32.gmra.mrb[2].mxu0 %v37846_v32  ;;  %v38019_v32 = vld [vmem:[#allocation153_spill] sm:$0xff] }
 0x449   : > { %26529 = vmatprep.mubr.f32.mxu0 %v37849_v20  ;;  %v38021_v20 = vld [vmem:[#allocation154_spill] sm:$0xff] }
 0x44a   : > { %25442 = vmatmul.mubr.f32.gmra.mrb[12].mxu1 %v38015_v37  ;;  %v38084_v37 = vld [vmem:[#allocation180_spill] sm:$0xff] }
 0x44b   : > { %25444 = vmatprep.mubr.f32.mxu1 %v38016_v30  ;;  %v38082_v30 = vld [vmem:[#allocation177_spill] sm:$0xff] }
 0x44c   : > { %26530 = vmatmul.mubr.f32.gmra.mrb[4].mxu0 %v37852_v28  ;;  %v38023_v28 = vld [vmem:[#allocation52_spill] sm:$0xff] }
 0x44d   : > { %26532 = vmatprep.mubr.f32.mxu0 %v37855_v53  ;;  %v38025_v53 = vld [vmem:[#allocation155_spill] sm:$0xff] }
 0x44e   : > { %25445 = vmatmul.mubr.f32.gmra.mrb[14].mxu1 %v38017_v55  ;;  %v38080_v55 = vld [vmem:[#allocation169_spill] sm:$0xff] }
 0x44f   : > { %25447 = vmatprep.mubr.f32.mxu1 %v38018_v21  ;;  %v38028_v21 = vld [vmem:[#allocation100_spill] sm:$0xff] }
 0x450   : > { %26533 = vmatmul.mubr.f32.gmra.mrb[6].mxu0 %v37858_v31  ;;  %v38027_v31 = vld [vmem:[#allocation162_spill] sm:$0xff] }
 0x451   : > { %26535 = vmatprep.mubr.f32.mxu0 %v37861_v9  ;;  %v38029_v9 = vld [vmem:[#allocation164_spill] sm:$0xff] }
 0x452   : > { %25448 = vmatmul.mubr.f32.gmra.mrb[16].mxu1 %v38019_v32  ;;  %v38030_v32 = vld [vmem:[#allocation101_spill] sm:$0xff] }
 0x453   : > { %25450 = vmatprep.mubr.f32.mxu1 %v38021_v20  ;;  %v38032_v20 = vld [vmem:[#allocation102_spill] sm:$0xff] }
 0x454   : > { %26536 = vmatmul.mubr.f32.gmra.mrb[8].mxu0 %v38020_v40  ;;  %v38031_v40 = vld [vmem:[#allocation170_spill] sm:$0xff] }
 0x455   : > { %26538 = vmatprep.mubr.f32.mxu0 %v38022_v49  ;;  %v38033_v49 = vld [vmem:[#allocation173_spill] sm:$0xff] }
 0x456   : > { %25451 = vmatmul.mubr.f32.gmra.mrb[18].mxu1 %v38023_v28  ;;  %v38034_v28 = vld [vmem:[#allocation103_spill] sm:$0xff] }
 0x457   : > { %25453 = vmatprep.mubr.f32.mxu1 %v38025_v53  ;;  %v38036_v53 = vld [vmem:[#allocation104_spill] sm:$0xff] }
 0x458   : > { %26539 = vmatmul.mubr.f32.gmra.mrb[10].mxu0 %v38024_v14  ;;  %v38035_v14 = vld [vmem:[#allocation178_spill] sm:$0xff] }
 0x459   : > { %26541 = vmatprep.mubr.f32.mxu0 %v38026_v59  ;;  %v38037_v59 = vld [vmem:[#allocation181_spill] sm:$0xff] }
 0x45a   : > { %25454 = vmatmul.mubr.f32.gmra.mrb[20].mxu1 %v38027_v31  ;;  %v38038_v31 = vld [vmem:[#allocation105_spill] sm:$0xff] }
 0x45b   : > { %25456 = vmatprep.mubr.f32.mxu1 %v38029_v9  ;;  %v38040_v9 = vld [vmem:[#allocation106_spill] sm:$0xff] }
 0x45c   : > { %26542 = vmatmul.mubr.f32.gmra.mrb[12].mxu0 %v38028_v21  ;;  %v38039_v21 = vld [vmem:[#allocation185_spill] sm:$0xff] }
 0x45d   : > { %26544 = vmatprep.mubr.f32.mxu0 %v38030_v32  ;;  %v38041_v32 = vand.u32 4294901760, %v32509_v7  ;;  %v38049_v7 = vld [vmem:[#allocation111_spill] sm:$0xff] }
 0x45e   : > { %25457 = vmatmul.mubr.f32.gmra.mrb[22].mxu1 %v38031_v40  ;;  %v38078_v40 = vld [vmem:[#allocation61_spill] sm:$0xff] }
 0x45f   : > { %25459 = vmatprep.mubr.f32.mxu1 %v38033_v49  ;;  %v38043_v49 = vand.u32 4294901760, %v32484_v29  ;;  %v38050_v29 = vld [vmem:[#allocation22_spill] sm:$0xff] }
 0x460   : > { %26545 = vmatmul.mubr.f32.gmra.mrb[14].mxu0 %v38032_v20  ;;  %v38042_v20 = vld [vmem:[#allocation107_spill] sm:$0xff] }
 0x461   : > { %26547 = vmatprep.mubr.f32.mxu0 %v38034_v28  ;;  %v38044_v28 = vld [vmem:[#allocation108_spill] sm:$0xff] }
 0x462   : > { %25460 = vmatmul.mubr.f32.gmra.mrb[24].mxu1 %v38035_v14  ;;  %v38045_v14 = vld [vmem:[#allocation114_spill] sm:$0xff] }
 0x463   : > { %25462 = vmatprep.mubr.f32.mxu1 %v38037_v59  ;;  %v38076_v59 = vld [vmem:[#allocation58_spill] sm:$0xff] }
 0x464   : > { %26548 = vmatmul.mubr.f32.gmra.mrb[16].mxu0 %v38036_v53  ;;  %v38046_v53 = vld [vmem:[#allocation109_spill] sm:$0xff] }
 0x465   : > { %26550 = vmatprep.mubr.f32.mxu0 %v38038_v31  ;;  %v38047_v31 = vld [vmem:[#allocation10_spill] sm:$0xff] }
 0x466   : > { %25463 = vmatmul.mubr.f32.gmra.mrb[26].mxu1 %v38039_v21  ;;  %v38074_v21 = vld [vmem:[#allocation57_spill] sm:$0xff] }
 0x467   : > { %25467 = vmatprep.mubr.f32.mxu1 %v38041_v32  ;;  %v38048_v32 = vld [vmem:[#allocation18_spill] sm:$0xff] }
 0x468   : > { %26551 = vmatmul.mubr.f32.gmra.mrb[18].mxu0 %v38040_v9  ;;  %v38062_v9 = vld [vmem:[#allocation44_spill] sm:$0xff] }
 0x469   : > { %26553 = vmatprep.mubr.f32.mxu0 %v38042_v20  ;;  %v38061_v20 = vld [vmem:[#allocation24_spill] sm:$0xff] }
 0x46a   : > { %25468 = vmatmul.mubr.f32.vlgmr.msra.gmra.mrb[0].mxu1 %v38043_v49  ;;  %v38051_v49 = vld [vmem:[#allocation27_spill] sm:$0xff] }
 0x46b   : > { %25470 = vmatprep.mubr.f32.mxu1 %v38045_v14  ;;  %25510 = vmatpush3.msra.mxu1 %v32637_v46  ;;  %v23133_v14 = vld [vmem:[%s36458_s1 + $0x18] sm:$0xf]  ;;  %v38052_v46 = vld [vmem:[#allocation128_spill] sm:$0xff] }
 0x46c   : > { %26554 = vmatmul.mubr.f32.gmra.mrb[20].mxu0 %v38044_v28  ;;  %25553 = vmatprep.subr.mxu1 %v32546_v57  ;;  %v38056_v28 = vld [vmem:[#allocation136_spill] sm:$0xff] }
 0x46d   : > { %26556 = vmatprep.mubr.f32.mxu0 %v38046_v53  ;;  %v38055_v53 = vld [vmem:[#allocation33_spill] sm:$0xff] }
 0x46e   : > { %25471 = vmatmul.mubr.f32.gmra.mrb[2].mxu1 %v38047_v31  ;;  %v10437_v31 = vsel %vm453_vm0, %v23133_v14, 0  ;;  %v38060_v14 = vld [vmem:[#allocation38_spill] sm:$0xff] }
 0x46f   : > { %25473 = vmatprep.mubr.f32.mxu1 %v38048_v32  ;;  %v38072_v32 = vld [vmem:[#allocation161_spill] sm:$0xff] }
 0x470   : > { %26557 = vmatmul.mubr.f32.gmra.mrb[22].mxu0 %v37916_v2  ;;  %v38053_v2 = vand.u32 4294901760, %v32558_v13  ;;  %v38058_v13 = vld [vmem:[#allocation36_spill] sm:$0xff] }
 0x471   : > { %26559 = vmatprep.mubr.f32.mxu0 %v38049_v7  ;;  %v38054_v7 = vld [vmem:[#allocation129_spill] sm:$0xff] }
 0x472   : > { %25474 = vmatmul.mubr.f32.gmra.mrb[4].mxu1 %v38050_v29  ;;  %v38070_v29 = vld [vmem:[#allocation158_spill] sm:$0xff] }
 0x473   : > { %25476 = vmatprep.mubr.f32.mxu1 %v38051_v49  ;;  %v38068_v49 = vld [vmem:[#allocation51_spill] sm:$0xff] }
 0x474   : > { %26560 = vmatmul.mubr.f32.gmra.mrb[24].mxu0 %v32555_v22  ;;  %v32791_v22 = vand.u32 4294901760, %v10437_v31 }
 0x475   : > { %26562 = vmatprep.mubr.f32.mxu0 %v32566_v0  ;;  %v38057_v0 = vld [vmem:[#allocation19_spill] sm:$0xff] }
 0x476   : > { %25477 = vmatmul.mubr.f32.gmra.mrb[6].mxu1 %v38052_v46  ;;  %v38066_v46 = vld [vmem:[#allocation152_spill] sm:$0xff] }
 0x477   : > { %25479 = vmatprep.mubr.f32.mxu1 %v38054_v7  ;;  %v38064_v7 = vld [vmem:[#allocation50_spill] sm:$0xff] }
 0x478   : > { %26563 = vmatmul.mubr.f32.gmra.mrb[26].mxu0 %v38053_v2  ;;  %v38059_v2 = vld [vmem:[#allocation21_spill] sm:$0xff] }
 0x479   : > { %26567 = vmatprep.mubr.f32.mxu0 %v37934_v6 }
 0x47a   : > { %25480 = vmatmul.mubr.f32.gmra.mrb[8].mxu1 %v38055_v53  ;;  %v38063_v53 = vld [vmem:[#allocation29_spill] sm:$0xff] }
 0x47b   : > { %25482 = vmatprep.mubr.f32.mxu1 %v38056_v28  ;;  %v38065_v28 = vld [vmem:[#allocation30_spill] sm:$0xff] }
 0x47c   : > { %26568 = vmatmul.mubr.f32.vlgmr.msra.gmra.mrb[0].mxu0 %v37936_v5 }
 0x47d   : > { %26570 = vmatprep.mubr.f32.mxu0 %v38057_v0  ;;  %26610 = vmatpush3.msra.mxu0 %v32237_v42  ;;  %v38067_v42 = vld [vmem:[#allocation35_spill] sm:$0xff] }
 0x47e   : > { %26653 = vmatprep.subr.mxu0 %v32791_v22  ;;  %25483 = vmatmul.mubr.f32.gmra.mrb[10].mxu1 %v38058_v13  ;;  %v38069_v13 = vld [vmem:[#allocation37_spill] sm:$0xff] }
 0x47f   : > { %25485 = vmatprep.mubr.f32.mxu1 %v38060_v14  ;;  %v38071_v14 = vld [vmem:[#allocation40_spill] sm:$0xff] }
 0x480   : > { %26571 = vmatmul.mubr.f32.gmra.mrb[2].mxu0 %v38059_v2 }
 0x481   : > { %26573 = vmatprep.mubr.f32.mxu0 %v38061_v20 }
 0x482   : > { %25486 = vmatmul.mubr.f32.gmra.mrb[12].mxu1 %v38062_v9  ;;  %v38073_v9 = vld [vmem:[#allocation43_spill] sm:$0xff] }
 0x483   : > { %25488 = vmatprep.mubr.f32.mxu1 %v38064_v7  ;;  %v38075_v7 = vld [vmem:[#allocation48_spill] sm:$0xff] }
 0x484   : > { %26574 = vmatmul.mubr.f32.gmra.mrb[4].mxu0 %v38063_v53 }
 0x485   : > { %26576 = vmatprep.mubr.f32.mxu0 %v38065_v28 }
 0x486   : > { %25489 = vmatmul.mubr.f32.gmra.mrb[14].mxu1 %v38066_v46  ;;  %v38077_v46 = vld [vmem:[#allocation49_spill] sm:$0xff] }
 0x487   : > { %25491 = vmatprep.mubr.f32.mxu1 %v38068_v49  ;;  %v38079_v49 = vld [vmem:[#allocation54_spill] sm:$0xff] }
 0x488   : > { %26577 = vmatmul.mubr.f32.gmra.mrb[6].mxu0 %v38067_v42 }
 0x489   : > { %26579 = vmatprep.mubr.f32.mxu0 %v38069_v13 }
 0x48a   : > { %25492 = vmatmul.mubr.f32.gmra.mrb[16].mxu1 %v38070_v29  ;;  %v38081_v29 = vld [vmem:[#allocation56_spill] sm:$0xff] }
 0x48b   : > { %25494 = vmatprep.mubr.f32.mxu1 %v38072_v32  ;;  %v38083_v32 = vld [vmem:[#allocation60_spill] sm:$0xff] }
 0x48c   : > { %26580 = vmatmul.mubr.f32.gmra.mrb[8].mxu0 %v38071_v14 }
 0x48d   : > { %26582 = vmatprep.mubr.f32.mxu0 %v38073_v9 }
 0x48e   : > { %25495 = vmatmul.mubr.f32.gmra.mrb[18].mxu1 %v38074_v21  ;;  %v38085_v21 = vld [vmem:[#allocation184_spill] sm:$0xff] }
 0x48f   : > { %25497 = vmatprep.mubr.f32.mxu1 %v38076_v59  ;;  %v38086_v59 = vld [vmem:[#allocation188_spill] sm:$0xff] }
 0x490   : > { %26583 = vmatmul.mubr.f32.gmra.mrb[10].mxu0 %v38075_v7 }
 0x491   : > { %26585 = vmatprep.mubr.f32.mxu0 %v38077_v46 }
 0x492   : > { %25498 = vmatmul.mubr.f32.gmra.mrb[20].mxu1 %v38078_v40  ;;  %v38087_v40 = vld [vmem:[#allocation69_spill] sm:$0xff] }
 0x493   : > { %25500 = vmatprep.mubr.f32.mxu1 %v38080_v55  ;;  %v38089_v55 = vld [vmem:[#allocation315_spill] sm:$0xff] }
 0x494   : > { %26586 = vmatmul.mubr.f32.gmra.mrb[12].mxu0 %v38079_v49 }
 0x495   : > { %26588 = vmatprep.mubr.f32.mxu0 %v38081_v29 }
 0x496   : > { %25501 = vmatmul.mubr.f32.gmra.mrb[22].mxu1 %v38082_v30  ;;  %v38090_v30 = vld [vmem:[#allocation74_spill] sm:$0xff] }
 0x497   : > { %25503 = vmatprep.mubr.f32.mxu1 %v38084_v37  ;;  %v38091_v37 = vld [vmem:[#allocation76_spill] sm:$0xff] }
 0x498   : > { %26589 = vmatmul.mubr.f32.gmra.mrb[14].mxu0 %v38083_v32 }
 0x499   : > { %26591 = vmatprep.mubr.f32.mxu0 %v37966_v33 }
 0x49a   : > { %25504 = vmatmul.mubr.f32.gmra.mrb[24].mxu1 %v38085_v21  ;;  %v38092_v21 = vld [vmem:[#allocation78_spill] sm:$0xff] }
 0x49b   : > { %25506 = vmatprep.mubr.f32.mxu1 %v38086_v59  ;;  %v32841_v59 = vsub.f32 %v10437_v31, %v32791_v22 }
 0x49c   : > { %26592 = vmatmul.mubr.f32.gmra.mrb[16].mxu0 %v37968_v39 }
 0x49d   : > { %26594 = vmatprep.mubr.f32.mxu0 %v38087_v40  ;;  %v32849_v15 = vand.u32 4294901760, %v32841_v59 }
 0x49e   : > { %25507 = vmatmul.mubr.f32.gmra.mrb[26].mxu1 %v38088_v62  ;;  %v38093_v62 = vld [vmem:[#allocation2_spill] sm:$0xff] }
 0x49f   : > { %25511 = vmatprep.mubr.f32.mxu1 %v38089_v55  ;;  %v10789_v31 = vsub.f32 %v32841_v59, %v32849_v15 }
 0x4a0   : > { %26595 = vmatmul.mubr.f32.gmra.mrb[18].mxu0 %v37972_v18 }
 0x4a1   : > { %26597 = vmatprep.mubr.f32.mxu0 %v38090_v30  ;;  %v32861_v54 = vand.u32 4294901760, %v10789_v31  ;;  %v38105_v31 = vld [vmem:[#allocation45_spill] sm:$0xff] }
 0x4a2   : > { %25512 = vmatmul.mubr.f32.vlgmr.msra.gmra.mrb[0].mxu1 %v32465_v43 }
 0x4a3   : > { %25514 = vmatprep.mubr.f32.mxu1 %v37975_v16  ;;  %25554 = vmatpush3.msra.mxu1 %v32546_v57  ;;  %v38096_v57 = vld [vmem:[#allocation317_spill] sm:$0xff] }
 0x4a4   : > { %26598 = vmatmul.mubr.f32.gmra.mrb[20].mxu0 %v38091_v37  ;;  %25597 = vmatprep.subr.mxu1 %v38093_v62 }
 0x4a5   : > { %26600 = vmatprep.mubr.f32.mxu0 %v38092_v21 }
 0x4a6   : > { %25515 = vmatmul.mubr.f32.gmra.mrb[2].mxu1 %v37977_v25 }
 0x4a7   : > { %25517 = vmatprep.mubr.f32.mxu1 %v37979_v1 }
 0x4a8   : > { %26601 = vmatmul.mubr.f32.gmra.mrb[22].mxu0 %v38094_v10 }
 0x4a9   : > { %26603 = vmatprep.mubr.f32.mxu0 %v38095_v4 }
 0x4aa   : > { %25518 = vmatmul.mubr.f32.gmra.mrb[4].mxu1 %v37981_v38 }
 0x4ab   : > { %25520 = vmatprep.mubr.f32.mxu1 %v37982_v27 }
 0x4ac   : > { %26604 = vmatmul.mubr.f32.gmra.mrb[24].mxu0 %v32494_v26 }
 0x4ad   : > { %26606 = vmatprep.mubr.f32.mxu0 %v38096_v57 }
 0x4ae   : > { %25521 = vmatmul.mubr.f32.gmra.mrb[6].mxu1 %v37983_v17 }
 0x4af   : > { %25523 = vmatprep.mubr.f32.mxu1 %v37984_v8 }
 0x4b0   : > { %26607 = vmatmul.mubr.f32.gmra.mrb[26].mxu0 %v38097_v34 }
 0x4b1   : > { %26611 = vmatprep.mubr.f32.mxu0 %v37934_v6 }
 0x4b2   : > { %25524 = vmatmul.mubr.f32.gmra.mrb[8].mxu1 %v37985_v24 }
 0x4b3   : > { %25526 = vmatprep.mubr.f32.mxu1 %v38098_v35 }
 0x4b4   : > { %26612 = vmatmul.mubr.f32.vlgmr.msra.gmra.mrb[0].mxu0 %v37936_v5 }
 0x4b5   : > { %26614 = vmatprep.mubr.f32.mxu0 %v38057_v0  ;;  %26654 = vmatpush3.msra.mxu0 %v32791_v22 }
 0x4b6   : > { %26697 = vmatprep.subr.mxu0 %v32861_v54  ;;  %25527 = vmatmul.mubr.f32.gmra.mrb[10].mxu1 %v37987_v45 }
 0x4b7   : > { %25529 = vmatprep.mubr.f32.mxu1 %v37988_v36 }
 0x4b8   : > { %26615 = vmatmul.mubr.f32.gmra.mrb[2].mxu0 %v38059_v2 }
 0x4b9   : > { %26617 = vmatprep.mubr.f32.mxu0 %v38061_v20 }
 0x4ba   : > { %25530 = vmatmul.mubr.f32.gmra.mrb[12].mxu1 %v37989_v56 }
 0x4bb   : > { %25532 = vmatprep.mubr.f32.mxu1 %v37990_v11 }
 0x4bc   : > { %26618 = vmatmul.mubr.f32.gmra.mrb[4].mxu0 %v38063_v53 }
 0x4bd   : > { %26620 = vmatprep.mubr.f32.mxu0 %v38065_v28 }
 0x4be   : > { %25533 = vmatmul.mubr.f32.gmra.mrb[14].mxu1 %v37991_v44 }
 0x4bf   : > { %25535 = vmatprep.mubr.f32.mxu1 %v37992_v50 }
 0x4c0   : > { %26621 = vmatmul.mubr.f32.gmra.mrb[6].mxu0 %v38067_v42 }
 0x4c1   : > { %26623 = vmatprep.mubr.f32.mxu0 %v38069_v13 }
 0x4c2   : > { %25536 = vmatmul.mubr.f32.gmra.mrb[16].mxu1 %v37993_v41 }
 0x4c3   : > { %25538 = vmatprep.mubr.f32.mxu1 %v37994_v48 }
 0x4c4   : > { %26624 = vmatmul.mubr.f32.gmra.mrb[8].mxu0 %v38071_v14 }
 0x4c5   : > { %26626 = vmatprep.mubr.f32.mxu0 %v38073_v9 }
 0x4c6   : > { %25539 = vmatmul.mubr.f32.gmra.mrb[18].mxu1 %v37995_v60 }
 0x4c7   : > { %25541 = vmatprep.mubr.f32.mxu1 %v37996_v3 }
 0x4c8   : > { %26627 = vmatmul.mubr.f32.gmra.mrb[10].mxu0 %v38075_v7 }
 0x4c9   : > { %26629 = vmatprep.mubr.f32.mxu0 %v38077_v46 }
 0x4ca   : > { %25542 = vmatmul.mubr.f32.gmra.mrb[20].mxu1 %v37997_v63 }
 0x4cb   : > { %25544 = vmatprep.mubr.f32.mxu1 %v37998_v51 }
 0x4cc   : > { %26630 = vmatmul.mubr.f32.gmra.mrb[12].mxu0 %v38079_v49 }
 0x4cd   : > { %26632 = vmatprep.mubr.f32.mxu0 %v38081_v29 }
 0x4ce   : > { %25545 = vmatmul.mubr.f32.gmra.mrb[22].mxu1 %v37999_v19 }
 0x4cf   : > { %25547 = vmatprep.mubr.f32.mxu1 %v38000_v61 }
 0x4d0   : > { %26633 = vmatmul.mubr.f32.gmra.mrb[14].mxu0 %v38083_v32 }
 0x4d1   : > { %26635 = vmatprep.mubr.f32.mxu0 %v37966_v33 }
 0x4d2   : > { %25548 = vmatmul.mubr.f32.gmra.mrb[24].mxu1 %v38001_v12 }
 0x4d3   : > { %25550 = vmatprep.mubr.f32.mxu1 %v38002_v52 }
 0x4d4   : > { %26636 = vmatmul.mubr.f32.gmra.mrb[16].mxu0 %v37968_v39 }
 0x4d5   : > { %26638 = vmatprep.mubr.f32.mxu0 %v38087_v40  ;;  %v38134_v40 = vld [vmem:[#allocation201_spill] sm:$0xff] }
 0x4d6   : > { %25551 = vmatmul.mubr.f32.gmra.mrb[26].mxu1 %v38003_v23 }
 0x4d7   : > { %25555 = vmatprep.mubr.f32.mxu1 %v38089_v55  ;;  %v38100_v55 = vld [vmem:[#allocation134_spill] sm:$0xff] }
 0x4d8   : > { %26639 = vmatmul.mubr.f32.gmra.mrb[18].mxu0 %v37972_v18 }
 0x4d9   : > { %26641 = vmatprep.mubr.f32.mxu0 %v38090_v30  ;;  %v38124_v30 = vld [vmem:[#allocation193_spill] sm:$0xff] }
 0x4da   : > { %25556 = vmatmul.mubr.f32.vlgmr.msra.gmra.mrb[0].mxu1 %v32465_v43  ;;  %v38101_v43 = vld [vmem:[#allocation135_spill] sm:$0xff] }
 0x4db   : > { %25558 = vmatprep.mubr.f32.mxu1 %v37975_v16  ;;  %25598 = vmatpush3.msra.mxu1 %v38093_v62  ;;  %v38099_v62 = vld [vmem:[#allocation31_spill] sm:$0xff] }
 0x4dc   : > { %26642 = vmatmul.mubr.f32.gmra.mrb[20].mxu0 %v38091_v37  ;;  %v38102_v16 = vld [vmem:[#allocation139_spill] sm:$0xff] }
 0x4dd   : > { %26644 = vmatprep.mubr.f32.mxu0 %v38092_v21 }
 0x4de   : > { %25559 = vmatmul.mubr.f32.gmra.mrb[2].mxu1 %v37977_v25  ;;  %v38104_v25 = vld [vmem:[#allocation41_spill] sm:$0xff] }
 0x4df   : > { %25561 = vmatprep.mubr.f32.mxu1 %v37979_v1 }
 0x4e0   : > { %26645 = vmatmul.mubr.f32.gmra.mrb[22].mxu0 %v38094_v10  ;;  %v38122_v10 = vld [vmem:[#allocation20_spill] sm:$0xff] }
 0x4e1   : > { %26647 = vmatprep.mubr.f32.mxu0 %v38095_v4  ;;  %v3927_v21 = vand.u32 4294901760, %v38122_v10  ;;  %v38127_v10 = vld [vmem:[#allocation197_spill] sm:$0xff] }
 0x4e2   : > { %25562 = vmatmul.mubr.f32.gmra.mrb[4].mxu1 %v37981_v38 }
 0x4e3   : > { %25564 = vmatprep.mubr.f32.mxu1 %v37982_v27 }
 0x4e4   : > { %26648 = vmatmul.mubr.f32.gmra.mrb[24].mxu0 %v32494_v26  ;;  %v38119_v26 = vld [vmem:[#allocation187_spill] sm:$0xff] }
 0x4e5   : > { %26650 = vmatprep.mubr.f32.mxu0 %v38096_v57 }
 0x4e6   : > { %25565 = vmatmul.mubr.f32.gmra.mrb[6].mxu1 %v37983_v17 }
 0x4e7   : > { %25567 = vmatprep.mubr.f32.mxu1 %v37984_v8 }
 0x4e8   : > { %26651 = vmatmul.mubr.f32.gmra.mrb[26].mxu0 %v38097_v34  ;;  %v38103_v34 = vld [vmem:[#allocation140_spill] sm:$0xff] }
 0x4e9   : > { %26655 = vmatprep.mubr.f32.mxu0 %v38099_v62  ;;  %v38107_v62 = vld [vmem:[#allocation151_spill] sm:$0xff] }
 0x4ea   : > { %25568 = vmatmul.mubr.f32.gmra.mrb[8].mxu1 %v37985_v24 }
 0x4eb   : > { %25570 = vmatprep.mubr.f32.mxu1 %v38098_v35 }
 0x4ec   : > { %26656 = vmatmul.mubr.f32.vlgmr.msra.gmra.mrb[0].mxu0 %v38100_v55  ;;  %v38108_v55 = vld [vmem:[#allocation157_spill] sm:$0xff] }
 0x4ed   : > { %26658 = vmatprep.mubr.f32.mxu0 %v38101_v43  ;;  %26698 = vmatpush3.msra.mxu0 %v32861_v54  ;;  %v38106_v54 = vld [vmem:[#allocation148_spill] sm:$0xff] }
 0x4ee   : > { %26741 = vmatprep.subr.mxu0 %v32841_v59  ;;  %25571 = vmatmul.mubr.f32.gmra.mrb[10].mxu1 %v37987_v45  ;;  %v38109_v43 = vld [vmem:[#allocation160_spill] sm:$0xff] }
 0x4ef   : > { %25573 = vmatprep.mubr.f32.mxu1 %v37988_v36 }
 0x4f0   : > { %26659 = vmatmul.mubr.f32.gmra.mrb[2].mxu0 %v38102_v16  ;;  %v38110_v16 = vld [vmem:[#allocation163_spill] sm:$0xff] }
 0x4f1   : > { %26661 = vmatprep.mubr.f32.mxu0 %v38103_v34  ;;  %v38111_v34 = vld [vmem:[#allocation166_spill] sm:$0xff] }
 0x4f2   : > { %25574 = vmatmul.mubr.f32.gmra.mrb[12].mxu1 %v37989_v56 }
 0x4f3   : > { %25576 = vmatprep.mubr.f32.mxu1 %v37990_v11 }
 0x4f4   : > { %26662 = vmatmul.mubr.f32.gmra.mrb[4].mxu0 %v38104_v25  ;;  %v32949_v25 = vld [vmem:[%s30388_s8 + $0xf0] sm:$0xff] }
 0x4f5   : > { %26664 = vmatprep.mubr.f32.mxu0 %v38105_v31  ;;  %38112 = vst [vmem:[#allocation12_spill] sm:$0xff] %v32949_v25  ;;  %v38113_v31 = vld [vmem:[#allocation168_spill] sm:$0xff] }
 0x4f6   : > { %25577 = vmatmul.mubr.f32.gmra.mrb[14].mxu1 %v37991_v44 }
 0x4f7   : > { %25579 = vmatprep.mubr.f32.mxu1 %v37992_v50 }
 0x4f8   : > { %26665 = vmatmul.mubr.f32.gmra.mrb[6].mxu0 %v38106_v54  ;;  %v38114_v54 = vld [vmem:[#allocation172_spill] sm:$0xff] }
 0x4f9   : > { %26667 = vmatprep.mubr.f32.mxu0 %v38107_v62  ;;  %v10431_v62 = vsel %vm396_vm2, %v32949_v25, 0  ;;  %v38120_v25 = vld [vmem:[#allocation11_spill] sm:$0xff] }
 0x4fa   : > { %25580 = vmatmul.mubr.f32.gmra.mrb[16].mxu1 %v37993_v41 }
 0x4fb   : > { %25582 = vmatprep.mubr.f32.mxu1 %v37994_v48 }
 0x4fc   : > { %26668 = vmatmul.mubr.f32.gmra.mrb[8].mxu0 %v38108_v55  ;;  %v32958_v55 = vld [vmem:[%s30388_s8 + $0xf8] sm:$0xff] }
 0x4fd   : > { %26670 = vmatprep.mubr.f32.mxu0 %v38109_v43  ;;  %38115 = vst [vmem:[#allocation13_spill] sm:$0xff] %v32958_v55  ;;  %v38116_v43 = vld [vmem:[#allocation175_spill] sm:$0xff] }
 0x4fe   : > { %25583 = vmatmul.mubr.f32.gmra.mrb[18].mxu1 %v37995_v60 }
 0x4ff   : > { %25585 = vmatprep.mubr.f32.mxu1 %v37996_v3 }
 0x500   : > { %26671 = vmatmul.mubr.f32.gmra.mrb[10].mxu0 %v38110_v16  ;;  %v38117_v16 = vld [vmem:[#allocation176_spill] sm:$0xff] }
 0x501   : > { %26673 = vmatprep.mubr.f32.mxu0 %v38111_v34  ;;  %v32964_v34 = vand.u32 4294901760, %v10431_v62 }
 0x502   : > { %25586 = vmatmul.mubr.f32.gmra.mrb[20].mxu1 %v37997_v63 }
 0x503   : > { %25588 = vmatprep.mubr.f32.mxu1 %v37998_v51 }
 0x504   : > { %26674 = vmatmul.mubr.f32.gmra.mrb[12].mxu0 %v38113_v31  ;;  %v10434_v31 = vsel %vm396_vm2, %v32958_v55, 0  ;;  %v38123_v55 = vld [vmem:[#allocation190_spill] sm:$0xff] }
 0x505   : > { %26676 = vmatprep.mubr.f32.mxu0 %v38114_v54  ;;  %v38118_v54 = vld [vmem:[#allocation183_spill] sm:$0xff]  ;;  %v32970_v57 = vand.u32 4294901760, %v10434_v31 }
 0x506   : > { %25589 = vmatmul.mubr.f32.gmra.mrb[22].mxu1 %v37999_v19 }
 0x507   : > { %25591 = vmatprep.mubr.f32.mxu1 %v38000_v61 }
 0x508   : > { %26677 = vmatmul.mubr.f32.gmra.mrb[14].mxu0 %v38116_v43  ;;  %v32975_v43 = vsub.f32 %v10431_v62, %v32964_v34  ;;  %v38125_v62 = vld [vmem:[#allocation195_spill] sm:$0xff] }
 0x509   : > { %26679 = vmatprep.mubr.f32.mxu0 %v38117_v16  ;;  %v38121_v16 = vand.u32 4294901760, %v38120_v25 }
 0x50a   : > { %25592 = vmatmul.mubr.f32.gmra.mrb[24].mxu1 %v38001_v12 }
 0x50b   : > { %25594 = vmatprep.mubr.f32.mxu1 %v38002_v52  ;;  %v3916_v4 = vsub.f32 %v38120_v25, %v38121_v16  ;;  %v38126_v16 = vld [vmem:[#allocation291_spill] sm:$0xff] }
 0x50c   : > { %26680 = vmatmul.mubr.f32.gmra.mrb[16].mxu0 %v38118_v54  ;;  %v32984_v54 = vsub.f32 %v10434_v31, %v32970_v57  ;;  %v38128_v31 = vld [vmem:[#allocation294_spill] sm:$0xff] }
 0x50d   : > { %26682 = vmatprep.mubr.f32.mxu0 %v38119_v26  ;;  %v3917_v37 = vand.u32 4294901760, %v3916_v4  ;;  %v37230_v26 = vand.u32 4294901760, %v32975_v43  ;;  %v38129_v4 = vld [vmem:[#allocation198_spill] sm:$0xff] }
 0x50e   : > { %25595 = vmatmul.mubr.f32.gmra.mrb[26].mxu1 %v38003_v23  ;;  %v37229_v25 = vand.u32 4294901760, %v32984_v54 }
 0x50f   : > { %25599 = vmatprep.mubr.f32.mxu1 %v3917_v37 }
 0x510   : > { %26683 = vmatmul.mubr.f32.gmra.mrb[18].mxu0 %v38123_v55  ;;  %v10768_v55 = vsub.f32 %v32975_v43, %v37230_v26  ;;  %v10778_v37 = vsub.f32 %v32984_v54, %v37229_v25  ;;  %v38137_v25 = vld [vmem:[#allocation209_spill] sm:$0xff]  ;;  %v38145_v26 = vld [vmem:[#allocation70_spill] sm:$0xff] }
 0x511   : > { %26685 = vmatprep.mubr.f32.mxu0 %v38124_v30  ;;  %v38130_v30 = vld [vmem:[#allocation202_spill] sm:$0xff] }
 0x512   : > { %25600 = vmatmul.mubr.f32.vlgmr.msra.gmra.mrb[0].mxu1 %v3927_v21  ;;  %v38131_v21 = vld [vmem:[#allocation199_spill] sm:$0xff]  ;;  %v10779_v18 = vand.u32 4294901760, %v10778_v37 }
 0x513   : > { %25602 = vmatprep.mubr.f32.mxu1 %v38126_v16  ;;  %v38132_v16 = vld [vmem:[#allocation205_spill] sm:$0xff]  ;;  %v38139_v37 = vld [vmem:[#allocation87_spill] sm:$0xff] }
 0x514   : > { %26686 = vmatmul.mubr.f32.gmra.mrb[20].mxu0 %v38125_v62  ;;  %v10769_v62 = vand.u32 4294901760, %v10768_v55  ;;  %v38138_v55 = vld [vmem:[#allocation300_spill] sm:$0xff] }
 0x515   : > { %26688 = vmatprep.mubr.f32.mxu0 %v38127_v10  ;;  %v38133_v10 = vld [vmem:[#allocation200_spill] sm:$0xff] }
 0x516   : > { %25603 = vmatmul.mubr.f32.gmra.mrb[2].mxu1 %v38128_v31  ;;  %v38135_v31 = vld [vmem:[#allocation295_spill] sm:$0xff] }
 0x517   : > { %25605 = vmatprep.mubr.f32.mxu1 %v38130_v30 }
 0x518   : > { %26689 = vmatmul.mubr.f32.gmra.mrb[22].mxu0 %v38129_v4  ;;  %v38136_v4 = vld [vmem:[#allocation204_spill] sm:$0xff] }
 0x519   : > { %26691 = vmatprep.mubr.f32.mxu0 %v38131_v21  ;;  %v38141_v21 = vld [vmem:[#allocation88_spill] sm:$0xff] }
 0x51a   : > { %25606 = vmatmul.mubr.f32.gmra.mrb[4].mxu1 %v38132_v16 }
 0x51b   : > { %25608 = vmatprep.mubr.f32.mxu1 %v38134_v40 }
 0x51c   : > { %26692 = vmatmul.mubr.f32.gmra.mrb[24].mxu0 %v38133_v10  ;;  %v38143_v10 = vld [vmem:[#allocation283_spill] sm:$0xff] }
 0x51d   : > { %26694 = vmatprep.mubr.f32.mxu0 %v10769_v62  ;;  %v38142_v62 = vld [vmem:[#allocation17_spill] sm:$0xff] }
 0x51e   : > { %25609 = vmatmul.mubr.f32.gmra.mrb[6].mxu1 %v38135_v31  ;;  %v38159_v31 = vld [vmem:[#allocation7_spill] sm:$0xff] }
 0x51f   : > { %25611 = vmatprep.mubr.f32.mxu1 %v38136_v4 }
 0x520   : > { %26695 = vmatmul.mubr.f32.gmra.mrb[26].mxu0 %v10779_v18  ;;  %v38140_v18 = vld [vmem:[#allocation15_spill] sm:$0xff] }
 0x521   : > { %26699 = vmatprep.mubr.f32.mxu0 %v37979_v1 }
 0x522   : > { %25612 = vmatmul.mubr.f32.gmra.mrb[8].mxu1 %v38137_v25  ;;  %v38158_v25 = vld [vmem:[#allocation3_spill] sm:$0xff] }
 0x523   : > { %25614 = vmatprep.mubr.f32.mxu1 %v38138_v55  ;;  %v38156_v55 = vld [vmem:[#allocation25_spill] sm:$0xff] }
 0x524   : > { %26700 = vmatmul.mubr.f32.vlgmr.msra.gmra.mrb[0].mxu0 %v37981_v38 }
 0x525   : > { %26702 = vmatprep.mubr.f32.mxu0 %v37982_v27  ;;  %26742 = vmatpush3.msra.mxu0 %v32841_v59  ;;  %v38144_v59 = vld [vmem:[#allocation312_spill] sm:$0xff] }
 0x526   : > { %26785 = vmatprep.subr.mxu0 %v32791_v22  ;;  %25615 = vmatmul.mubr.f32.gmra.mrb[10].mxu1 %v38139_v37 }
 0x527   : > { %25617 = vmatprep.mubr.f32.mxu1 %v38140_v18  ;;  %v38146_v18 = vld [vmem:[#allocation313_spill] sm:$0xff] }
 0x528   : > { %26703 = vmatmul.mubr.f32.gmra.mrb[2].mxu0 %v37983_v17 }
 0x529   : > { %26705 = vmatprep.mubr.f32.mxu0 %v37984_v8 }
 0x52a   : > { %25618 = vmatmul.mubr.f32.gmra.mrb[12].mxu1 %v38141_v21  ;;  %v38147_v21 = vld [vmem:[#allocation282_spill] sm:$0xff] }
 0x52b   : > { %25620 = vmatprep.mubr.f32.mxu1 %v38142_v62  ;;  %v38148_v62 = vld [vmem:[#allocation316_spill] sm:$0xff] }
 0x52c   : > { %26706 = vmatmul.mubr.f32.gmra.mrb[4].mxu0 %v37985_v24 }
 0x52d   : > { %26708 = vmatprep.mubr.f32.mxu0 %v38098_v35 }
 0x52e   : > { %25621 = vmatmul.mubr.f32.gmra.mrb[14].mxu1 %v38143_v10  ;;  %v38149_v10 = vld [vmem:[#allocation318_spill] sm:$0xff] }
 0x52f   : > { %25623 = vmatprep.mubr.f32.mxu1 %v38144_v59  ;;  %v38150_v59 = vld [vmem:[#allocation321_spill] sm:$0xff] }
 0x530   : > { %26709 = vmatmul.mubr.f32.gmra.mrb[6].mxu0 %v37987_v45 }
 0x531   : > { %26711 = vmatprep.mubr.f32.mxu0 %v37988_v36 }
 0x532   : > { %25624 = vmatmul.mubr.f32.gmra.mrb[16].mxu1 %v38145_v26  ;;  %v38151_v26 = vld [vmem:[#allocation323_spill] sm:$0xff] }
 0x533   : > { %25626 = vmatprep.mubr.f32.mxu1 %v38146_v18  ;;  %v38152_v18 = vld [vmem:[#allocation325_spill] sm:$0xff] }
 0x534   : > { %26712 = vmatmul.mubr.f32.gmra.mrb[8].mxu0 %v37989_v56 }
 0x535   : > { %26714 = vmatprep.mubr.f32.mxu0 %v37990_v11 }
 0x536   : > { %25627 = vmatmul.mubr.f32.gmra.mrb[18].mxu1 %v38147_v21  ;;  %v38153_v21 = vld [vmem:[#allocation327_spill] sm:$0xff] }
 0x537   : > { %25629 = vmatprep.mubr.f32.mxu1 %v38148_v62  ;;  %v38154_v62 = vld [vmem:[#allocation86_spill] sm:$0xff] }
 0x538   : > { %26715 = vmatmul.mubr.f32.gmra.mrb[10].mxu0 %v37991_v44  ;;  %v38155_v37 = vand.u32 4294901760, %v38154_v62 }
 0x539   : > { %26717 = vmatprep.mubr.f32.mxu0 %v37992_v50 }
 0x53a   : > { %25630 = vmatmul.mubr.f32.gmra.mrb[20].mxu1 %v38149_v10  ;;  %v4186_v10 = vsub.f32 %v38154_v62, %v38155_v37  ;;  %v38160_v37 = vld [vmem:[#allocation9_spill] sm:$0xff]  ;;  %v38170_v62 = vld [vmem:[#allocation138_spill] sm:$0xff] }
 0x53b   : > { %25632 = vmatprep.mubr.f32.mxu1 %v38150_v59 }
 0x53c   : > { %26718 = vmatmul.mubr.f32.gmra.mrb[12].mxu0 %v37993_v41  ;;  %v4187_v59 = vand.u32 4294901760, %v4186_v10  ;;  %v38171_v10 = vld [vmem:[#allocation142_spill] sm:$0xff] }
 0x53d   : > { %26720 = vmatprep.mubr.f32.mxu0 %v37994_v48 }
 0x53e   : > { %25633 = vmatmul.mubr.f32.gmra.mrb[22].mxu1 %v38151_v26  ;;  %v38157_v26 = vld [vmem:[#allocation14_spill] sm:$0xff] }
 0x53f   : > { %25635 = vmatprep.mubr.f32.mxu1 %v38152_v18  ;;  %v4197_v4 = vsub.f32 %v38158_v25, %v38157_v26  ;;  %v38161_v26 = vld [vmem:[#allocation182_spill] sm:$0xff] }
 0x540   : > { %26721 = vmatmul.mubr.f32.gmra.mrb[14].mxu0 %v37995_v60  ;;  %v38162_v25 = vld [vmem:[#allocation186_spill] sm:$0xff] }
 0x541   : > { %26723 = vmatprep.mubr.f32.mxu0 %v37996_v3  ;;  %v4198_v18 = vand.u32 4294901760, %v4197_v4  ;;  %v38168_v4 = vld [vmem:[#allocation131_spill] sm:$0xff] }
 0x542   : > { %25636 = vmatmul.mubr.f32.gmra.mrb[24].mxu1 %v38153_v21 }
 0x543   : > { %25638 = vmatprep.mubr.f32.mxu1 %v38156_v55  ;;  %25641 = vmatprep.subr.mxu1 %v4198_v18 }
 0x544   : > { %26724 = vmatmul.mubr.f32.gmra.mrb[16].mxu0 %v37997_v63  ;;  %25642 = vmatpush3.msra.mxu1 %v4198_v18  ;;  %v38169_v18 = vld [vmem:[#allocation132_spill] sm:$0xff] }
 0x545   : > { %26726 = vmatprep.mubr.f32.mxu0 %v37998_v51 }
 0x546   : > { %25639 = vmatmul.mubr.f32.gmra.mrb[26].mxu1 %v4187_v59  ;;  %v38172_v59 = vld [vmem:[#allocation144_spill] sm:$0xff] }
 0x547   : > { %25643 = vmatprep.mubr.f32.mxu1 %v38159_v31  ;;  %v38165_v31 = vld [vmem:[#allocation122_spill] sm:$0xff] }
 0x548   : > { %26727 = vmatmul.mubr.f32.gmra.mrb[18].mxu0 %v37999_v19 }
 0x549   : > { %26729 = vmatprep.mubr.f32.mxu0 %v38000_v61 }
 0x54a   : > { %25644 = vmatmul.mubr.f32.vlgmr.msra.gmra.mrb[0].mxu1 %v38160_v37  ;;  %v38173_v37 = vld [vmem:[#allocation69_spill] sm:$0xff] }
 0x54b   : > { %25646 = vmatprep.mubr.f32.mxu1 %v37934_v6  ;;  %v38163_v6 = vld [vmem:[#allocation119_spill] sm:$0xff] }
 0x54c   : > { %26730 = vmatmul.mubr.f32.gmra.mrb[20].mxu0 %v38001_v12 }
 0x54d   : > { %26732 = vmatprep.mubr.f32.mxu0 %v38002_v52 }
 0x54e   : > { %25647 = vmatmul.mubr.f32.gmra.mrb[2].mxu1 %v37936_v5  ;;  %v38164_v5 = vld [vmem:[#allocation121_spill] sm:$0xff] }
 0x54f   : > { %25649 = vmatprep.mubr.f32.mxu1 %v38057_v0 }
 0x550   : > { %26733 = vmatmul.mubr.f32.gmra.mrb[22].mxu0 %v38003_v23 }
 0x551   : > { %26735 = vmatprep.mubr.f32.mxu0 %v38161_v26 }
 0x552   : > { %25650 = vmatmul.mubr.f32.gmra.mrb[4].mxu1 %v38059_v2 }
 0x553   : > { %25652 = vmatprep.mubr.f32.mxu1 %v38061_v20 }
 0x554   : > { %26736 = vmatmul.mubr.f32.gmra.mrb[24].mxu0 %v38162_v25 }
 0x555   : > { %26738 = vmatprep.mubr.f32.mxu0 %v32964_v34 }
 0x556   : > { %25653 = vmatmul.mubr.f32.gmra.mrb[6].mxu1 %v38063_v53 }
 0x557   : > { %25655 = vmatprep.mubr.f32.mxu1 %v38065_v28 }
 0x558   : > { %26739 = vmatmul.mubr.f32.gmra.mrb[26].mxu0 %v32970_v57 }
 0x559   : > { %26743 = vmatprep.mubr.f32.mxu0 %v38006_v47  ;;  %v38166_v47 = vld [vmem:[#allocation125_spill] sm:$0xff] }
 0x55a   : > { %25656 = vmatmul.mubr.f32.gmra.mrb[8].mxu1 %v38067_v42 }
 0x55b   : > { %25658 = vmatprep.mubr.f32.mxu1 %v38069_v13 }
 0x55c   : > { %26744 = vmatmul.mubr.f32.vlgmr.msra.gmra.mrb[0].mxu0 %v38007_v58  ;;  %v38167_v58 = vld [vmem:[#allocation130_spill] sm:$0xff] }
 0x55d   : > { %26746 = vmatprep.mubr.f32.mxu0 %v38163_v6  ;;  %26786 = vmatpush3.msra.mxu0 %v32791_v22  ;;  %v38174_v6 = vld [vmem:[#allocation146_spill] sm:$0xff] }
 0x55e   : > { %26829 = vmatprep.subr.mxu0 %v32849_v15  ;;  %25659 = vmatmul.mubr.f32.gmra.mrb[10].mxu1 %v38071_v14 }
 0x55f   : > { %25661 = vmatprep.mubr.f32.mxu1 %v38073_v9 }
 0x560   : > { %26747 = vmatmul.mubr.f32.gmra.mrb[2].mxu0 %v38164_v5  ;;  %v38175_v5 = vld [vmem:[#allocation72_spill] sm:$0xff] }
 0x561   : > { %26749 = vmatprep.mubr.f32.mxu0 %v38165_v31  ;;  %v38176_v31 = vld [vmem:[#allocation153_spill] sm:$0xff] }
 0x562   : > { %25662 = vmatmul.mubr.f32.gmra.mrb[12].mxu1 %v38075_v7 }
 0x563   : > { %25664 = vmatprep.mubr.f32.mxu1 %v38077_v46 }
 0x564   : > { %26750 = vmatmul.mubr.f32.gmra.mrb[4].mxu0 %v38166_v47  ;;  %v38177_v47 = vld [vmem:[#allocation74_spill] sm:$0xff] }
 0x565   : > { %26752 = vmatprep.mubr.f32.mxu0 %v38167_v58  ;;  %v38178_v58 = vld [vmem:[#allocation154_spill] sm:$0xff] }
 0x566   : > { %25665 = vmatmul.mubr.f32.gmra.mrb[14].mxu1 %v38079_v49 }
 0x567   : > { %25667 = vmatprep.mubr.f32.mxu1 %v38081_v29 }
 0x568   : > { %26753 = vmatmul.mubr.f32.gmra.mrb[6].mxu0 %v38168_v4  ;;  %v38179_v4 = vld [vmem:[#allocation76_spill] sm:$0xff] }
 0x569   : > { %26755 = vmatprep.mubr.f32.mxu0 %v38169_v18  ;;  %v38180_v18 = vld [vmem:[#allocation52_spill] sm:$0xff] }
 0x56a   : > { %25668 = vmatmul.mubr.f32.gmra.mrb[16].mxu1 %v38083_v32  ;;  %v38318_v32 = vld [vmem:[#allocation256_spill] sm:$0xff] }
 0x56b   : > { %25670 = vmatprep.mubr.f32.mxu1 %v37966_v33  ;;  %v38317_v33 = vld [vmem:[#allocation251_spill] sm:$0xff] }
 0x56c   : > { %26756 = vmatmul.mubr.f32.gmra.mrb[8].mxu0 %v38170_v62  ;;  %v38181_v62 = vld [vmem:[#allocation78_spill] sm:$0xff] }
 0x56d   : > { %26758 = vmatprep.mubr.f32.mxu0 %v38171_v10  ;;  %v38182_v10 = vld [vmem:[#allocation155_spill] sm:$0xff] }
 0x56e   : > { %25671 = vmatmul.mubr.f32.gmra.mrb[18].mxu1 %v37968_v39  ;;  %v38313_v39 = vld [vmem:[#allocation229_spill] sm:$0xff] }
 0x56f   : > { %25673 = vmatprep.mubr.f32.mxu1 %v38173_v37  ;;  %v38184_v37 = vld [vmem:[#allocation162_spill] sm:$0xff] }
 0x570   : > { %26759 = vmatmul.mubr.f32.gmra.mrb[10].mxu0 %v38172_v59  ;;  %v38183_v59 = vld [vmem:[#allocation80_spill] sm:$0xff] }
 0x571   : > { %26761 = vmatprep.mubr.f32.mxu0 %v38174_v6  ;;  %v38185_v6 = vld [vmem:[#allocation82_spill] sm:$0xff] }
 0x572   : > { %25674 = vmatmul.mubr.f32.gmra.mrb[20].mxu1 %v38175_v5  ;;  %v38186_v5 = vld [vmem:[#allocation164_spill] sm:$0xff] }
 0x573   : > { %25676 = vmatprep.mubr.f32.mxu1 %v38177_v47  ;;  %v38188_v47 = vld [vmem:[#allocation170_spill] sm:$0xff] }
 0x574   : > { %26762 = vmatmul.mubr.f32.gmra.mrb[12].mxu0 %v38176_v31  ;;  %v38187_v31 = vld [vmem:[#allocation84_spill] sm:$0xff] }
 0x575   : > { %26764 = vmatprep.mubr.f32.mxu0 %v38178_v58  ;;  %v38189_v58 = vld [vmem:[#allocation173_spill] sm:$0xff] }
 0x576   : > { %25677 = vmatmul.mubr.f32.gmra.mrb[22].mxu1 %v38179_v4  ;;  %v38190_v4 = vld [vmem:[#allocation178_spill] sm:$0xff] }
 0x577   : > { %25679 = vmatprep.mubr.f32.mxu1 %v38181_v62  ;;  %v38192_v62 = vld [vmem:[#allocation185_spill] sm:$0xff] }
 0x578   : > { %26765 = vmatmul.mubr.f32.gmra.mrb[14].mxu0 %v38180_v18  ;;  %v38191_v18 = vld [vmem:[#allocation181_spill] sm:$0xff] }
 0x579   : > { %26767 = vmatprep.mubr.f32.mxu0 %v38182_v10  ;;  %v38193_v10 = vld [vmem:[#allocation189_spill] sm:$0xff] }
 0x57a   : > { %25680 = vmatmul.mubr.f32.gmra.mrb[24].mxu1 %v38183_v59  ;;  %v38194_v59 = vld [vmem:[#allocation192_spill] sm:$0xff] }
 0x57b   : > { %25682 = vmatprep.mubr.f32.mxu1 %v38185_v6  ;;  %v38312_v6 = vld [vmem:[#allocation228_spill] sm:$0xff] }
 0x57c   : > { %26768 = vmatmul.mubr.f32.gmra.mrb[16].mxu0 %v38184_v37  ;;  %v38195_v37 = vld [vmem:[#allocation18_spill] sm:$0xff] }
 0x57d   : > { %26770 = vmatprep.mubr.f32.mxu0 %v38186_v5  ;;  %v38196_v5 = vld [vmem:[#allocation22_spill] sm:$0xff] }
 0x57e   : > { %25683 = vmatmul.mubr.f32.gmra.mrb[26].mxu1 %v38187_v31  ;;  %v38200_v31 = vld [vmem:[#allocation33_spill] sm:$0xff] }
 0x580   : > { %26771 = vmatmul.mubr.f32.gmra.mrb[18].mxu0 %v38188_v47  ;;  %v38197_v47 = vld [vmem:[#allocation27_spill] sm:$0xff] }
 0x581   : > { %26773 = vmatprep.mubr.f32.mxu0 %v38189_v58  ;;  %v38202_v58 = vld [vmem:[#allocation36_spill] sm:$0xff] }
 0x584   : > { %26774 = vmatmul.mubr.f32.gmra.mrb[20].mxu0 %v38190_v4  ;;  %v38198_v4 = vld [vmem:[#allocation128_spill] sm:$0xff] }
 0x585   : > { %26776 = vmatprep.mubr.f32.mxu0 %v38191_v18  ;;  %v38203_v18 = vld [vmem:[#allocation38_spill] sm:$0xff] }
 0x588   : > { %26777 = vmatmul.mubr.f32.gmra.mrb[22].mxu0 %v38192_v62  ;;  %v38199_v62 = vld [vmem:[#allocation129_spill] sm:$0xff] }
 0x589   : > { %26779 = vmatprep.mubr.f32.mxu0 %v38193_v10  ;;  %v38204_v10 = vld [vmem:[#allocation44_spill] sm:$0xff] }
 0x58c   : > { %26780 = vmatmul.mubr.f32.gmra.mrb[24].mxu0 %v38194_v59  ;;  %v38201_v59 = vld [vmem:[#allocation136_spill] sm:$0xff] }
 0x58d   : > { %26782 = vmatprep.mubr.f32.mxu0 %v32975_v43 }
 0x590   : > { %26783 = vmatmul.mubr.f32.gmra.mrb[26].mxu0 %v32984_v54 }
 0x591   : > { %26787 = vmatprep.mubr.f32.mxu0 %v38195_v37  ;;  %v38205_v37 = vld [vmem:[#allocation50_spill] sm:$0xff] }
 0x594   : > { %26788 = vmatmul.mubr.f32.vlgmr.msra.gmra.mrb[0].mxu0 %v38196_v5  ;;  %v38206_v5 = vld [vmem:[#allocation152_spill] sm:$0xff] }
 0x595   : > { %26790 = vmatprep.mubr.f32.mxu0 %v38197_v47  ;;  %26830 = vmatpush3.msra.mxu0 %v32849_v15  ;;  %v38207_v15 = vld [vmem:[#allocation51_spill] sm:$0xff]  ;;  %v38208_v47 = vld [vmem:[#allocation158_spill] sm:$0xff] }
 0x596   : > { %26873 = vmatprep.subr.mxu0 %v32791_v22 }
 0x598   : > { %26791 = vmatmul.mubr.f32.gmra.mrb[2].mxu0 %v38198_v4  ;;  %v38209_v4 = vld [vmem:[#allocation161_spill] sm:$0xff] }
 0x599   : > { %26793 = vmatprep.mubr.f32.mxu0 %v38199_v62  ;;  %v38210_v62 = vld [vmem:[#allocation57_spill] sm:$0xff] }
 0x59c   : > { %26794 = vmatmul.mubr.f32.gmra.mrb[4].mxu0 %v38200_v31  ;;  %v38211_v31 = vld [vmem:[#allocation58_spill] sm:$0xff] }
 0x59d   : > { %26796 = vmatprep.mubr.f32.mxu0 %v38201_v59  ;;  %v38212_v59 = vld [vmem:[#allocation61_spill] sm:$0xff] }
 0x5a0   : > { %26797 = vmatmul.mubr.f32.gmra.mrb[6].mxu0 %v38202_v58  ;;  %v38213_v58 = vld [vmem:[#allocation169_spill] sm:$0xff] }
 0x5a1   : > { %26799 = vmatprep.mubr.f32.mxu0 %v38203_v18  ;;  %v38214_v18 = vld [vmem:[#allocation177_spill] sm:$0xff] }
 0x5a4   : > { %26800 = vmatmul.mubr.f32.gmra.mrb[8].mxu0 %v38204_v10  ;;  %v38215_v10 = vld [vmem:[#allocation180_spill] sm:$0xff] }
 0x5a5   : > { %26802 = vmatprep.mubr.f32.mxu0 %v38205_v37  ;;  %v38216_v37 = vld [vmem:[#allocation184_spill] sm:$0xff] }
 0x5a8   : > { %26803 = vmatmul.mubr.f32.gmra.mrb[10].mxu0 %v38206_v5  ;;  %v38217_v5 = vld [vmem:[#allocation188_spill] sm:$0xff] }
 0x5a9   : > { %26805 = vmatprep.mubr.f32.mxu0 %v38207_v15  ;;  %v38218_v15 = vld [vmem:[#allocation191_spill] sm:$0xff] }
 0x5ac   : > { %26806 = vmatmul.mubr.f32.gmra.mrb[12].mxu0 %v38208_v47  ;;  %v38219_v47 = vld [vmem:[#allocation194_spill] sm:$0xff] }
 0x5ad   : > { %26808 = vmatprep.mubr.f32.mxu0 %v38209_v4  ;;  %v38220_v4 = vld [vmem:[#allocation196_spill] sm:$0xff] }
 0x5b0   : > { %26809 = vmatmul.mubr.f32.gmra.mrb[14].mxu0 %v38210_v62  ;;  %v23134_v62 = vld [vmem:[%s36458_s1 + $0x1c] sm:$0xf] }
 0x5b1   : > { %26811 = vmatprep.mubr.f32.mxu0 %v38211_v31  ;;  %v38221_v31 = vand.u32 4294901760, %v32975_v43  ;;  %v38223_v43 = vld [vmem:[#allocation13_spill] sm:$0xff] }
 0x5b4   : > { %26812 = vmatmul.mubr.f32.gmra.mrb[16].mxu0 %v38212_v59  ;;  %v12087_v59 = vsel %vm453_vm0, %v23134_v62, 0 }
 0x5b5   : > { %26814 = vmatprep.mubr.f32.mxu0 %v38213_v58  ;;  %v38222_v58 = vand.u32 4294901760, %v32984_v54  ;;  %v38224_v54 = vld [vmem:[#allocation12_spill] sm:$0xff] }
 0x5b8   : > { %26815 = vmatmul.mubr.f32.gmra.mrb[18].mxu0 %v38214_v18  ;;  %v33155_v18 = vand.u32 4294901760, %v12087_v59 }
 0x5b9   : > { %26817 = vmatprep.mubr.f32.mxu0 %v38215_v10  ;;  %v12076_v10 = vrot.slane %v38224_v54, 1 }
 0x5bc   : > { %26818 = vmatmul.mubr.f32.gmra.mrb[20].mxu0 %v38216_v37 }
 0x5bd   : > { %26820 = vmatprep.mubr.f32.mxu0 %v38217_v5  ;;  %v33191_v5 = vsub.f32 %v12087_v59, %v33155_v18  ;;  %v38255_v59 = vld [vmem:[#allocation255_spill] sm:$0xff] }
 0x5c0   : > { %26821 = vmatmul.mubr.f32.gmra.mrb[22].mxu0 %v38218_v15  ;;  %v33196_v15 = vand.u32 4294901760, %v33191_v5 }
 0x5c1   : > { %26823 = vmatprep.mubr.f32.mxu0 %v38219_v47 }
 0x5c2   : > { %v12439_v47 = vsub.f32 %v33191_v5, %v33196_v15 }
 0x5c4   : > { %26824 = vmatmul.mubr.f32.gmra.mrb[24].mxu0 %v38220_v4  ;;  %v12440_v4 = vand.u32 4294901760, %v12439_v47 }
 0x5c5   : > { %26826 = vmatprep.mubr.f32.mxu0 %v38221_v31  ;;  %v38254_v31 = vld [vmem:[#allocation253_spill] sm:$0xff] }
 0x5c8   : > { %26827 = vmatmul.mubr.f32.gmra.mrb[26].mxu0 %v38222_v58 }
 0x5c9   : > { %26831 = vmatprep.mubr.f32.mxu0 %v37979_v1 }
 0x5cc   : > { %26832 = vmatmul.mubr.f32.vlgmr.msra.gmra.mrb[0].mxu0 %v37981_v38 }
 0x5cd   : > { %26834 = vmatprep.mubr.f32.mxu0 %v37982_v27  ;;  %26874 = vmatpush3.msra.mxu0 %v32791_v22  ;;  %v37231_v22 = vrot.slane %v38223_v43, 1 }
 0x5ce   : > { %26917 = vmatprep.subr.mxu0 %v33155_v18 }
 0x5cf   : > { %v33178_v37 = vsel %vm340_vm3, %v12076_v10, %v37231_v22 }
 0x5d0   : > { %26835 = vmatmul.mubr.f32.gmra.mrb[2].mxu0 %v37983_v17 }
 0x5d1   : > { %26837 = vmatprep.mubr.f32.mxu0 %v37984_v8 }
 0x5d4   : > { %26838 = vmatmul.mubr.f32.gmra.mrb[4].mxu0 %v37985_v24 }
 0x5d5   : > { %26840 = vmatprep.mubr.f32.mxu0 %v38098_v35 }
 0x5d8   : > { %26841 = vmatmul.mubr.f32.gmra.mrb[6].mxu0 %v37987_v45 }
 0x5d9   : > { %26843 = vmatprep.mubr.f32.mxu0 %v37988_v36 }
 0x5dc   : > { %26844 = vmatmul.mubr.f32.gmra.mrb[8].mxu0 %v37989_v56 }
 0x5dd   : > { %26846 = vmatprep.mubr.f32.mxu0 %v37990_v11 }
 0x5e0   : > { %26847 = vmatmul.mubr.f32.gmra.mrb[10].mxu0 %v37991_v44 }
 0x5e1   : > { %26849 = vmatprep.mubr.f32.mxu0 %v37992_v50 }
 0x5e4   : > { %26850 = vmatmul.mubr.f32.gmra.mrb[12].mxu0 %v37993_v41 }
 0x5e5   : > { %26852 = vmatprep.mubr.f32.mxu0 %v37994_v48 }
 0x5e8   : > { %26853 = vmatmul.mubr.f32.gmra.mrb[14].mxu0 %v37995_v60 }
 0x5e9   : > { %26855 = vmatprep.mubr.f32.mxu0 %v37996_v3 }
 0x5ec   : > { %26856 = vmatmul.mubr.f32.gmra.mrb[16].mxu0 %v37997_v63 }
 0x5ed   : > { %26858 = vmatprep.mubr.f32.mxu0 %v37998_v51 }
 0x5f0   : > { %26859 = vmatmul.mubr.f32.gmra.mrb[18].mxu0 %v37999_v19 }
 0x5f1   : > { %26861 = vmatprep.mubr.f32.mxu0 %v38000_v61 }
 0x5f4   : > { %26862 = vmatmul.mubr.f32.gmra.mrb[20].mxu0 %v38001_v12 }
 0x5f5   : > { %26864 = vmatprep.mubr.f32.mxu0 %v38002_v52 }
 0x5f8   : > { %26865 = vmatmul.mubr.f32.gmra.mrb[22].mxu0 %v38003_v23 }
 0x5f9   : > { %26867 = vmatprep.mubr.f32.mxu0 %v38161_v26 }
 0x5fc   : > { %26868 = vmatmul.mubr.f32.gmra.mrb[24].mxu0 %v38162_v25 }
 0x5fd   : > { %26870 = vmatprep.mubr.f32.mxu0 %v32964_v34 }
 0x600   : > { %26871 = vmatmul.mubr.f32.gmra.mrb[26].mxu0 %v32970_v57 }
 0x601   : > { %26875 = vmatprep.mubr.f32.mxu0 %v37979_v1 }
 0x604   : > { %26876 = vmatmul.mubr.f32.vlgmr.msra.gmra.mrb[0].mxu0 %v37981_v38 }
 0x605   : > { %26878 = vmatprep.mubr.f32.mxu0 %v37982_v27  ;;  %26918 = vmatpush3.msra.mxu0 %v33155_v18  ;;  %v38243_v27 = vld [vmem:[#allocation233_spill] sm:$0xff] }
 0x606   : > { %26961 = vmatprep.subr.mxu0 %v12440_v4 }
 0x608   : > { %26879 = vmatmul.mubr.f32.gmra.mrb[2].mxu0 %v37983_v17  ;;  %v38242_v17 = vld [vmem:[#allocation232_spill] sm:$0xff] }
 0x609   : > { %26881 = vmatprep.mubr.f32.mxu0 %v37984_v8  ;;  %v38246_v8 = vld [vmem:[#allocation239_spill] sm:$0xff] }
 0x60c   : > { %26882 = vmatmul.mubr.f32.gmra.mrb[4].mxu0 %v37985_v24 }
 0x60d   : > { %26884 = vmatprep.mubr.f32.mxu0 %v38098_v35 }
 0x610   : > { %26885 = vmatmul.mubr.f32.gmra.mrb[6].mxu0 %v37987_v45 }
 0x611   : > { %26887 = vmatprep.mubr.f32.mxu0 %v37988_v36 }
 0x614   : > { %26888 = vmatmul.mubr.f32.gmra.mrb[8].mxu0 %v37989_v56  ;;  %v38247_v56 = vld [vmem:[#allocation242_spill] sm:$0xff] }
 0x615   : > { %26890 = vmatprep.mubr.f32.mxu0 %v37990_v11 }
 0x618   : > { %26891 = vmatmul.mubr.f32.gmra.mrb[10].mxu0 %v37991_v44 }
 0x619   : > { %26893 = vmatprep.mubr.f32.mxu0 %v37992_v50 }
 0x61c   : > { %26894 = vmatmul.mubr.f32.gmra.mrb[12].mxu0 %v37993_v41 }
 0x61d   : > { %26896 = vmatprep.mubr.f32.mxu0 %v37994_v48  ;;  %v33219_v1 = vpop.f32.mrb[0].mxu1 }
 0x61e   : > { %38225 = vst [vmem:[#allocation4_spill] sm:$0xff] %v33219_v1  ;;  %v33221_v24 = vpop.f32.mrb[1].mxu1  ;;  %v38311_v1 = vld [vmem:[#allocation227_spill] sm:$0xff] }
 0x61f   : > { %38226 = vst [vmem:[#allocation5_spill] sm:$0xff] %v33221_v24  ;;  %v38310_v24 = vld [vmem:[#allocation225_spill] sm:$0xff] }
 0x620   : > { %26897 = vmatmul.mubr.f32.gmra.mrb[14].mxu0 %v37995_v60 }
 0x621   : > { %26899 = vmatprep.mubr.f32.mxu0 %v37996_v3  ;;  %v33225_v45 = vpop.f32.mrb[2].mxu1 }
 0x622   : > { %38227 = vst [vmem:[#allocation6_spill] sm:$0xff] %v33225_v45  ;;  %v33227_v35 = vpop.f32.mrb[3].mxu1  ;;  %v38309_v45 = vld [vmem:[#allocation218_spill] sm:$0xff] }
 0x623   : > { %38228 = vst [vmem:[#allocation113_spill] sm:$0xff] %v33227_v35  ;;  %v38308_v35 = vld [vmem:[#allocation216_spill] sm:$0xff] }
 0x624   : > { %26900 = vmatmul.mubr.f32.gmra.mrb[16].mxu0 %v37997_v63 }
 0x625   : > { %26902 = vmatprep.mubr.f32.mxu0 %v37998_v51  ;;  %v33231_v44 = vpop.f32.mrb[4].mxu1 }
 0x626   : > { %38229 = vst [vmem:[#allocation116_spill] sm:$0xff] %v33231_v44  ;;  %v33233_v41 = vpop.f32.mrb[5].mxu1  ;;  %v38307_v44 = vld [vmem:[#allocation212_spill] sm:$0xff] }
 0x627   : > { %38230 = vst [vmem:[#allocation117_spill] sm:$0xff] %v33233_v41  ;;  %v38306_v41 = vld [vmem:[#allocation210_spill] sm:$0xff] }
 0x628   : > { %26903 = vmatmul.mubr.f32.gmra.mrb[18].mxu0 %v37999_v19 }
 0x629   : > { %26905 = vmatprep.mubr.f32.mxu0 %v38000_v61  ;;  %v33237_v48 = vpop.f32.mrb[6].mxu1 }
 0x62a   : > { %38231 = vst [vmem:[#allocation118_spill] sm:$0xff] %v33237_v48  ;;  %v33239_v60 = vpop.f32.mrb[7].mxu1  ;;  %v38305_v48 = vld [vmem:[#allocation208_spill] sm:$0xff] }
 0x62b   : > { %38232 = vst [vmem:[#allocation120_spill] sm:$0xff] %v33239_v60  ;;  %v38304_v60 = vld [vmem:[#allocation293_spill] sm:$0xff] }
 0x62c   : > { %26906 = vmatmul.mubr.f32.gmra.mrb[20].mxu0 %v38001_v12 }
 0x62d   : > { %26908 = vmatprep.mubr.f32.mxu0 %v38002_v52  ;;  %v33243_v3 = vpop.f32.mrb[8].mxu1  ;;  %v38239_v52 = vld [vmem:[#allocation226_spill] sm:$0xff] }
 0x62e   : > { %38233 = vst [vmem:[#allocation126_spill] sm:$0xff] %v33243_v3  ;;  %v33245_v63 = vpop.f32.mrb[9].mxu1  ;;  %v38303_v3 = vld [vmem:[#allocation290_spill] sm:$0xff] }
 0x62f   : > { %38234 = vst [vmem:[#allocation127_spill] sm:$0xff] %v33245_v63  ;;  %v38302_v63 = vld [vmem:[#allocation285_spill] sm:$0xff] }
 0x630   : > { %26909 = vmatmul.mubr.f32.gmra.mrb[22].mxu0 %v38003_v23 }
 0x631   : > { %26911 = vmatprep.mubr.f32.mxu0 %v38161_v26  ;;  %v33249_v51 = vpop.f32.mrb[10].mxu1  ;;  %v38251_v26 = vld [vmem:[#allocation250_spill] sm:$0xff] }
 0x632   : > { %38235 = vst [vmem:[#allocation133_spill] sm:$0xff] %v33249_v51  ;;  %v33251_v19 = vpop.f32.mrb[11].mxu1  ;;  %v38301_v51 = vld [vmem:[#allocation281_spill] sm:$0xff] }
 0x633   : > { %38236 = vst [vmem:[#allocation137_spill] sm:$0xff] %v33251_v19  ;;  %v38300_v19 = vld [vmem:[#allocation272_spill] sm:$0xff] }
 0x634   : > { %26912 = vmatmul.mubr.f32.gmra.mrb[24].mxu0 %v38162_v25 }
 0x635   : > { %26914 = vmatprep.mubr.f32.mxu0 %v32964_v34  ;;  %v33255_v61 = vpop.f32.mrb[12].mxu1  ;;  %v38250_v34 = vld [vmem:[#allocation247_spill] sm:$0xff] }
 0x636   : > { %38237 = vst [vmem:[#allocation141_spill] sm:$0xff] %v33255_v61  ;;  %v33257_v12 = vpop.f32.mrb[13].mxu1  ;;  %v38299_v61 = vld [vmem:[#allocation270_spill] sm:$0xff] }
 0x637   : > { %38238 = vst [vmem:[#allocation143_spill] sm:$0xff] %v33257_v12  ;;  %v38298_v12 = vld [vmem:[#allocation263_spill] sm:$0xff] }
 0x638   : > { %26915 = vmatmul.mubr.f32.gmra.mrb[26].mxu0 %v32970_v57 }
 0x639   : > { %26919 = vmatprep.mubr.f32.mxu0 %v38239_v52  ;;  %v33261_v36 = vpop.f32.mrb[14].mxu1  ;;  %v38259_v52 = vld [vmem:[#allocation266_spill] sm:$0xff] }
 0x63a   : > { %38240 = vst [vmem:[#allocation145_spill] sm:$0xff] %v33261_v36  ;;  %v33263_v23 = vpop.f32.mrb[15].mxu1  ;;  %v38297_v36 = vld [vmem:[#allocation261_spill] sm:$0xff] }
 0x63b   : > { %38241 = vst [vmem:[#allocation147_spill] sm:$0xff] %v33263_v23  ;;  %v38296_v23 = vld [vmem:[#allocation254_spill] sm:$0xff] }
 0x63c   : > { %26920 = vmatmul.mubr.f32.vlgmr.msra.gmra.mrb[0].mxu0 %v38242_v17 }
 0x63d   : > { %26922 = vmatprep.mubr.f32.mxu0 %v38243_v27  ;;  %26962 = vmatpush3.msra.mxu0 %v12440_v4  ;;  %v33268_v50 = vpop.f32.mrb[16].mxu1  ;;  %v38258_v4 = vld [vmem:[#allocation264_spill] sm:$0xff] }
 0x63e   : > { %27005 = vmatprep.subr.mxu0 %v33191_v5  ;;  %38244 = vst [vmem:[#allocation149_spill] sm:$0xff] %v33268_v50  ;;  %v33270_v38 = vpop.f32.mrb[17].mxu1  ;;  %v38295_v50 = vld [vmem:[#allocation252_spill] sm:$0xff] }
 0x63f   : > { %38245 = vst [vmem:[#allocation150_spill] sm:$0xff] %v33270_v38  ;;  %v38294_v38 = vld [vmem:[#allocation249_spill] sm:$0xff] }
 0x640   : > { %26923 = vmatmul.mubr.f32.gmra.mrb[2].mxu0 %v38246_v8  ;;  %v38262_v8 = vld [vmem:[#allocation273_spill] sm:$0xff] }
 0x641   : > { %26925 = vmatprep.mubr.f32.mxu0 %v38247_v56  ;;  %v33274_v11 = vpop.f32.mrb[18].mxu1  ;;  %v38263_v56 = vld [vmem:[#allocation274_spill] sm:$0xff] }
 0x642   : > { %38248 = vst [vmem:[#allocation156_spill] sm:$0xff] %v33274_v11  ;;  %v33276_v57 = vpop.f32.mrb[19].mxu1  ;;  %v38282_v11 = vld [vmem:[#allocation207_spill] sm:$0xff] }
 0x643   : > { %38249 = vst [vmem:[#allocation159_spill] sm:$0xff] %v33276_v57  ;;  %v38280_v57 = vld [vmem:[#allocation203_spill] sm:$0xff] }
 0x644   : > { %26926 = vmatmul.mubr.f32.gmra.mrb[4].mxu0 %v38250_v34  ;;  %v38264_v34 = vld [vmem:[#allocation67_spill] sm:$0xff] }
 0x645   : > { %26928 = vmatprep.mubr.f32.mxu0 %v38251_v26  ;;  %v33280_v25 = vpop.f32.mrb[20].mxu1  ;;  %v12077_v26 = vsel %vm340_vm3, %v38264_v34, %v12076_v10  ;;  %v38271_v34 = vrot.slane %v38223_v43, 1 }
 0x646   : > { %38252 = vst [vmem:[#allocation165_spill] sm:$0xff] %v33280_v25  ;;  %v33282_v62 = vpop.f32.mrb[21].mxu1  ;;  %v12080_v22 = vsel %vm396_vm2, %v12077_v26, 0 }
 0x647   : > { %38253 = vst [vmem:[#allocation167_spill] sm:$0xff] %v33282_v62 }
 0x648   : > { %26929 = vmatmul.mubr.f32.gmra.mrb[6].mxu0 %v38254_v31 }
 0x649   : > { %26931 = vmatprep.mubr.f32.mxu0 %v38255_v59  ;;  %v33286_v58 = vpop.f32.mrb[22].mxu1 }
 0x64a   : > { %38256 = vst [vmem:[#allocation171_spill] sm:$0xff] %v33286_v58  ;;  %v33288_v47 = vpop.f32.mrb[23].mxu1  ;;  %v38277_v58 = vld [vmem:[#allocation308_spill] sm:$0xff] }
 0x64b   : > { %38257 = vst [vmem:[#allocation174_spill] sm:$0xff] %v33288_v47 }
 0x64c   : > { %26932 = vmatmul.mubr.f32.gmra.mrb[8].mxu0 %v38258_v4  ;;  %v38267_v4 = vld [vmem:[#allocation277_spill] sm:$0xff] }
 0x64d   : > { %26934 = vmatprep.mubr.f32.mxu0 %v38259_v52  ;;  %v33292_v17 = vpop.f32.mrb[24].mxu1  ;;  %v38268_v52 = vld [vmem:[#allocation280_spill] sm:$0xff] }
 0x64e   : > { %38260 = vst [vmem:[#allocation179_spill] sm:$0xff] %v33292_v17  ;;  %v33294_v27 = vpop.f32.mrb[25].mxu1  ;;  %v38270_v17 = vld [vmem:[#allocation286_spill] sm:$0xff] }
 0x64f   : > { %38261 = vst [vmem:[#allocation112_spill] sm:$0xff] %v33294_v27  ;;  %v38269_v27 = vld [vmem:[#allocation284_spill] sm:$0xff] }
 0x650   : > { %26935 = vmatmul.mubr.f32.gmra.mrb[10].mxu0 %v38262_v8  ;;  %v12082_v8 = vsel %vm396_vm2, %v33178_v37, 0  ;;  %v38273_v37 = vld [vmem:[#allocation297_spill] sm:$0xff] }
 0x651   : > { %26937 = vmatprep.mubr.f32.mxu0 %v38263_v56  ;;  %v33302_v31 = vpop.f32.mrb[26].mxu1  ;;  %v33312_v56 = vand.u32 4294901760, %v12080_v22  ;;  %v33315_v10 = vand.u32 4294901760, %v12082_v8 }
 0x652   : > { %38265 = vst [vmem:[#allocation8_spill] sm:$0xff] %v33302_v31  ;;  %v33304_v59 = vpop.f32.mrb[27].mxu1  ;;  %v38274_v31 = vld [vmem:[#allocation303_spill] sm:$0xff] }
 0x653   : > { %38266 = vst [vmem:[#allocation115_spill] sm:$0xff] %v33304_v59  ;;  %v12084_v59 = vsel %vm396_vm2, %v38271_v34, 0  ;;  %v38275_v34 = vld [vmem:[#allocation305_spill] sm:$0xff] }
 0x654   : > { %26938 = vmatmul.mubr.f32.gmra.mrb[12].mxu0 %v38267_v4  ;;  %v38272_v4 = vld [vmem:[#allocation296_spill] sm:$0xff]  ;;  %v33324_v26 = vand.u32 4294901760, %v12084_v59 }
 0x655   : > { %26940 = vmatprep.mubr.f32.mxu0 %v38268_v52  ;;  %v33322_v52 = vsub.f32 %v12080_v22, %v33312_v56  ;;  %v38276_v22 = vld [vmem:[#allocation307_spill] sm:$0xff] }
 0x656   : > { %v33333_v47 = vsub.f32 %v12084_v59, %v33324_v26  ;;  %v38278_v59 = vld [vmem:[#allocation309_spill] sm:$0xff] }
 0x658   : > { %26941 = vmatmul.mubr.f32.gmra.mrb[14].mxu0 %v38269_v27  ;;  %v33328_v27 = vsub.f32 %v12082_v8, %v33315_v10  ;;  %v37233_v8 = vand.u32 4294901760, %v33333_v47 }
 0x659   : > { %26943 = vmatprep.mubr.f32.mxu0 %v38270_v17  ;;  %v37232_v17 = vand.u32 4294901760, %v33322_v52 }
 0x65c   : > { %26944 = vmatmul.mubr.f32.gmra.mrb[16].mxu0 %v38272_v4  ;;  %v37234_v4 = vand.u32 4294901760, %v33328_v27 }
 0x65d   : > { %26946 = vmatprep.mubr.f32.mxu0 %v38273_v37  ;;  %v12408_v37 = vsub.f32 %v33322_v52, %v37232_v17 }
 0x65f   : > { %v12409_v62 = vand.u32 4294901760, %v12408_v37  ;;  %v38283_v37 = vld [vmem:[#allocation211_spill] sm:$0xff] }
 0x660   : > { %26947 = vmatmul.mubr.f32.gmra.mrb[18].mxu0 %v38274_v31  ;;  %v12418_v31 = vsub.f32 %v33328_v27, %v37234_v4  ;;  %v38293_v4 = vld [vmem:[#allocation246_spill] sm:$0xff] }
 0x661   : > { %26949 = vmatprep.mubr.f32.mxu0 %v38275_v34  ;;  %v12428_v34 = vsub.f32 %v33333_v47, %v37233_v8  ;;  %v38291_v8 = vld [vmem:[#allocation241_spill] sm:$0xff] }
 0x662   : > { %v12419_v25 = vand.u32 4294901760, %v12418_v31  ;;  %v38289_v31 = vld [vmem:[#allocation230_spill] sm:$0xff] }
 0x663   : > { %v12429_v17 = vand.u32 4294901760, %v12428_v34  ;;  %v38290_v34 = vld [vmem:[#allocation231_spill] sm:$0xff] }
 0x664   : > { %26950 = vmatmul.mubr.f32.gmra.mrb[20].mxu0 %v38276_v22  ;;  %v38279_v22 = vld [vmem:[#allocation310_spill] sm:$0xff] }
 0x665   : > { %26952 = vmatprep.mubr.f32.mxu0 %v38277_v58  ;;  %v38281_v58 = vld [vmem:[#allocation206_spill] sm:$0xff] }
 0x668   : > { %26953 = vmatmul.mubr.f32.gmra.mrb[22].mxu0 %v38278_v59  ;;  %v38284_v59 = vld [vmem:[#allocation213_spill] sm:$0xff] }
 0x669   : > { %26955 = vmatprep.mubr.f32.mxu0 %v38279_v22  ;;  %v38285_v22 = vld [vmem:[#allocation219_spill] sm:$0xff] }
 0x66c   : > { %26956 = vmatmul.mubr.f32.gmra.mrb[24].mxu0 %v12409_v62  ;;  %v38286_v62 = vld [vmem:[#allocation220_spill] sm:$0xff] }
 0x66d   : > { %26958 = vmatprep.mubr.f32.mxu0 %v12419_v25  ;;  %v38287_v25 = vld [vmem:[#allocation221_spill] sm:$0xff] }
 0x670   : > { %26959 = vmatmul.mubr.f32.gmra.mrb[26].mxu0 %v12429_v17  ;;  %v38288_v17 = vld [vmem:[#allocation222_spill] sm:$0xff] }
 0x671   : > { %26963 = vmatprep.mubr.f32.mxu0 %v38280_v57 }
 0x674   : > { %26964 = vmatmul.mubr.f32.vlgmr.msra.gmra.mrb[0].mxu0 %v38281_v58 }
 0x675   : > { %26966 = vmatprep.mubr.f32.mxu0 %v38282_v11  ;;  %27006 = vmatpush3.msra.mxu0 %v33191_v5  ;;  %v38292_v5 = vld [vmem:[#allocation243_spill] sm:$0xff] }
 0x676   : > { %27049 = vmatprep.subr.mxu0 %v33155_v18 }
 0x678   : > { %26967 = vmatmul.mubr.f32.gmra.mrb[2].mxu0 %v38283_v37 }
 0x679   : > { %26969 = vmatprep.mubr.f32.mxu0 %v38284_v59 }
 0x67c   : > { %26970 = vmatmul.mubr.f32.gmra.mrb[4].mxu0 %v38285_v22 }
 0x67d   : > { %26972 = vmatprep.mubr.f32.mxu0 %v38286_v62 }
 0x680   : > { %26973 = vmatmul.mubr.f32.gmra.mrb[6].mxu0 %v38287_v25 }
 0x681   : > { %26975 = vmatprep.mubr.f32.mxu0 %v38288_v17 }
 0x684   : > { %26976 = vmatmul.mubr.f32.gmra.mrb[8].mxu0 %v38289_v31 }
 0x685   : > { %26978 = vmatprep.mubr.f32.mxu0 %v38290_v34 }
 0x688   : > { %26979 = vmatmul.mubr.f32.gmra.mrb[10].mxu0 %v38291_v8 }
 0x689   : > { %26981 = vmatprep.mubr.f32.mxu0 %v38292_v5 }
 0x68c   : > { %26982 = vmatmul.mubr.f32.gmra.mrb[12].mxu0 %v38293_v4 }
 0x68d   : > { %26984 = vmatprep.mubr.f32.mxu0 %v38294_v38 }
 0x690   : > { %26985 = vmatmul.mubr.f32.gmra.mrb[14].mxu0 %v38295_v50 }
 0x691   : > { %26987 = vmatprep.mubr.f32.mxu0 %v38296_v23 }
 0x694   : > { %26988 = vmatmul.mubr.f32.gmra.mrb[16].mxu0 %v38297_v36 }
 0x695   : > { %26990 = vmatprep.mubr.f32.mxu0 %v38298_v12 }
 0x698   : > { %26991 = vmatmul.mubr.f32.gmra.mrb[18].mxu0 %v38299_v61 }
 0x699   : > { %26993 = vmatprep.mubr.f32.mxu0 %v38300_v19 }
 0x69c   : > { %26994 = vmatmul.mubr.f32.gmra.mrb[20].mxu0 %v38301_v51 }
 0x69d   : > { %26996 = vmatprep.mubr.f32.mxu0 %v38302_v63 }
 0x6a0   : > { %26997 = vmatmul.mubr.f32.gmra.mrb[22].mxu0 %v38303_v3 }
 0x6a1   : > { %26999 = vmatprep.mubr.f32.mxu0 %v38304_v60 }
 0x6a4   : > { %27000 = vmatmul.mubr.f32.gmra.mrb[24].mxu0 %v33312_v56 }
 0x6a5   : > { %27002 = vmatprep.mubr.f32.mxu0 %v33315_v10 }
 0x6a8   : > { %27003 = vmatmul.mubr.f32.gmra.mrb[26].mxu0 %v33324_v26 }
 0x6a9   : > { %27007 = vmatprep.mubr.f32.mxu0 %v38305_v48  ;;  %v38314_v48 = vld [vmem:[#allocation238_spill] sm:$0xff] }
 0x6ac   : > { %27008 = vmatmul.mubr.f32.vlgmr.msra.gmra.mrb[0].mxu0 %v38306_v41  ;;  %v38315_v41 = vld [vmem:[#allocation240_spill] sm:$0xff] }
 0x6ad   : > { %27010 = vmatprep.mubr.f32.mxu0 %v38307_v44  ;;  %27050 = vmatpush3.msra.mxu0 %v33155_v18  ;;  %v38316_v44 = vld [vmem:[#allocation248_spill] sm:$0xff] }
 0x6ae   : > { %27093 = vmatprep.subr.mxu0 %v33196_v15 }
 0x6b0   : > { %27011 = vmatmul.mubr.f32.gmra.mrb[2].mxu0 %v38308_v35  ;;  %v38319_v35 = vld [vmem:[#allocation258_spill] sm:$0xff] }
 0x6b1   : > { %27013 = vmatprep.mubr.f32.mxu0 %v38309_v45  ;;  %v38320_v45 = vld [vmem:[#allocation260_spill] sm:$0xff] }
 0x6b4   : > { %27014 = vmatmul.mubr.f32.gmra.mrb[4].mxu0 %v38310_v24  ;;  %v38321_v24 = vld [vmem:[#allocation262_spill] sm:$0xff] }
 0x6b5   : > { %27016 = vmatprep.mubr.f32.mxu0 %v38311_v1  ;;  %v38322_v1 = vld [vmem:[#allocation268_spill] sm:$0xff] }
 0x6b8   : > { %27017 = vmatmul.mubr.f32.gmra.mrb[6].mxu0 %v38312_v6  ;;  %v38323_v6 = vld [vmem:[#allocation271_spill] sm:$0xff] }
 0x6b9   : > { %27019 = vmatprep.mubr.f32.mxu0 %v38313_v39  ;;  %v38324_v39 = vld [vmem:[#allocation276_spill] sm:$0xff] }
 0x6bc   : > { %27020 = vmatmul.mubr.f32.gmra.mrb[8].mxu0 %v38314_v48  ;;  %v38325_v48 = vld [vmem:[#allocation279_spill] sm:$0xff] }
 0x6bd   : > { %27022 = vmatprep.mubr.f32.mxu0 %v38315_v41  ;;  %v38326_v41 = vld [vmem:[#allocation289_spill] sm:$0xff] }
 0x6c0   : > { %27023 = vmatmul.mubr.f32.gmra.mrb[10].mxu0 %v38316_v44  ;;  %v38327_v44 = vld [vmem:[#allocation292_spill] sm:$0xff] }
 0x6c1   : > { %27025 = vmatprep.mubr.f32.mxu0 %v38317_v33  ;;  %v38328_v33 = vld [vmem:[#allocation299_spill] sm:$0xff] }
 0x6c4   : > { %27026 = vmatmul.mubr.f32.gmra.mrb[12].mxu0 %v38318_v32  ;;  %v38329_v32 = vld [vmem:[#allocation302_spill] sm:$0xff] }
 0x6c5   : > { %27028 = vmatprep.mubr.f32.mxu0 %v38319_v35  ;;  %v38330_v35 = vld [vmem:[#allocation214_spill] sm:$0xff] }
 0x6c8   : > { %27029 = vmatmul.mubr.f32.gmra.mrb[14].mxu0 %v38320_v45  ;;  %v38331_v45 = vld [vmem:[#allocation215_spill] sm:$0xff] }
 0x6c9   : > { %27031 = vmatprep.mubr.f32.mxu0 %v38321_v24  ;;  %v38332_v24 = vld [vmem:[#allocation217_spill] sm:$0xff] }
 0x6cc   : > { %27032 = vmatmul.mubr.f32.gmra.mrb[16].mxu0 %v38322_v1  ;;  %v38333_v1 = vld [vmem:[#allocation223_spill] sm:$0xff] }
 0x6cd   : > { %27034 = vmatprep.mubr.f32.mxu0 %v38323_v6  ;;  %v38334_v6 = vld [vmem:[#allocation224_spill] sm:$0xff] }
 0x6d0   : > { %27035 = vmatmul.mubr.f32.gmra.mrb[18].mxu0 %v38324_v39  ;;  %v38335_v39 = vld [vmem:[#allocation234_spill] sm:$0xff] }
 0x6d1   : > { %27037 = vmatprep.mubr.f32.mxu0 %v38325_v48  ;;  %v38336_v48 = vld [vmem:[#allocation235_spill] sm:$0xff] }
 0x6d4   : > { %27038 = vmatmul.mubr.f32.gmra.mrb[20].mxu0 %v38326_v41  ;;  %v38337_v41 = vld [vmem:[#allocation236_spill] sm:$0xff] }
 0x6d5   : > { %27040 = vmatprep.mubr.f32.mxu0 %v38327_v44  ;;  %v38338_v44 = vld [vmem:[#allocation237_spill] sm:$0xff] }
 0x6d8   : > { %27041 = vmatmul.mubr.f32.gmra.mrb[22].mxu0 %v38328_v33  ;;  %v38339_v33 = vld [vmem:[#allocation244_spill] sm:$0xff] }
 0x6d9   : > { %27043 = vmatprep.mubr.f32.mxu0 %v38329_v32  ;;  %v38340_v32 = vld [vmem:[#allocation245_spill] sm:$0xff] }
 0x6dc   : > { %27044 = vmatmul.mubr.f32.gmra.mrb[24].mxu0 %v33322_v52 }
 0x6dd   : > { %27046 = vmatprep.mubr.f32.mxu0 %v33328_v27 }
 0x6e0   : > { %27047 = vmatmul.mubr.f32.gmra.mrb[26].mxu0 %v33333_v47 }
 0x6e1   : > { %27051 = vmatprep.mubr.f32.mxu0 %v38330_v35  ;;  %v38341_v35 = vld [vmem:[#allocation257_spill] sm:$0xff] }
 0x6e4   : > { %27052 = vmatmul.mubr.f32.vlgmr.msra.gmra.mrb[0].mxu0 %v38331_v45  ;;  %v38343_v45 = vld [vmem:[#allocation64_spill] sm:$0xff] }
 0x6e5   : > { %27054 = vmatprep.mubr.f32.mxu0 %v38332_v24  ;;  %27094 = vmatpush3.msra.mxu0 %v33196_v15  ;;  %v38342_v15 = vld [vmem:[#allocation259_spill] sm:$0xff]  ;;  %v38344_v24 = vld [vmem:[#allocation265_spill] sm:$0xff] }
 0x6e6   : > { %27137 = vmatprep.subr.mxu0 %v33155_v18 }
 0x6e8   : > { %27055 = vmatmul.mubr.f32.gmra.mrb[2].mxu0 %v38333_v1  ;;  %v38345_v1 = vld [vmem:[#allocation267_spill] sm:$0xff] }
 0x6e9   : > { %27057 = vmatprep.mubr.f32.mxu0 %v38334_v6  ;;  %v38346_v6 = vld [vmem:[#allocation269_spill] sm:$0xff] }
 0x6ec   : > { %27058 = vmatmul.mubr.f32.gmra.mrb[4].mxu0 %v38335_v39  ;;  %v38347_v39 = vld [vmem:[#allocation275_spill] sm:$0xff] }
 0x6ed   : > { %27060 = vmatprep.mubr.f32.mxu0 %v38336_v48  ;;  %v38348_v48 = vld [vmem:[#allocation278_spill] sm:$0xff] }
 0x6f0   : > { %27061 = vmatmul.mubr.f32.gmra.mrb[6].mxu0 %v38337_v41  ;;  %v38349_v41 = vld [vmem:[#allocation287_spill] sm:$0xff] }
 0x6f1   : > { %27063 = vmatprep.mubr.f32.mxu0 %v38338_v44  ;;  %v38350_v44 = vld [vmem:[#allocation288_spill] sm:$0xff] }
 0x6f4   : > { %27064 = vmatmul.mubr.f32.gmra.mrb[8].mxu0 %v38339_v33  ;;  %v38351_v33 = vld [vmem:[#allocation298_spill] sm:$0xff] }
 0x6f5   : > { %27066 = vmatprep.mubr.f32.mxu0 %v38340_v32  ;;  %v38352_v32 = vld [vmem:[#allocation301_spill] sm:$0xff] }
 0x6f8   : > { %27067 = vmatmul.mubr.f32.gmra.mrb[10].mxu0 %v38341_v35  ;;  %v38353_v35 = vld [vmem:[#allocation304_spill] sm:$0xff] }
 0x6f9   : > { %27069 = vmatprep.mubr.f32.mxu0 %v38342_v15  ;;  %v38354_v15 = vld [vmem:[#allocation306_spill] sm:$0xff] }
 0x6fc   : > { %27070 = vmatmul.mubr.f32.gmra.mrb[12].mxu0 %v38343_v45  ;;  %v38355_v45 = vand.u32 4294901760, %v33322_v52 }
 0x6fd   : > { %27072 = vmatprep.mubr.f32.mxu0 %v38344_v24  ;;  %v23135_v24 = vld [vmem:[%s36458_s1 + $0x20] sm:$0xf] }
 0x700   : > { %27073 = vmatmul.mubr.f32.gmra.mrb[14].mxu0 %v38345_v1  ;;  %v38356_v1 = vand.u32 4294901760, %v33328_v27 }
 0x701   : > { %27075 = vmatprep.mubr.f32.mxu0 %v38346_v6  ;;  %v13737_v6 = vsel %vm453_vm0, %v23135_v24, 0 }
 0x704   : > { %27076 = vmatmul.mubr.f32.gmra.mrb[16].mxu0 %v38347_v39  ;;  %v38357_v39 = vand.u32 4294901760, %v33333_v47  ;;  %v13726_v47 = vrot.slane %v38224_v54, 2 }
 0x705   : > { %27078 = vmatprep.mubr.f32.mxu0 %v38348_v48  ;;  %v33449_v48 = vand.u32 4294901760, %v13737_v6 }
 0x707   : > { %v33485_v27 = vsub.f32 %v13737_v6, %v33449_v48  ;;  %v38380_v6 = vld [vmem:[#allocation63_spill] sm:$0xff] }
 0x708   : > { %27079 = vmatmul.mubr.f32.gmra.mrb[18].mxu0 %v38349_v41 }
 0x709   : > { %27081 = vmatprep.mubr.f32.mxu0 %v38350_v44  ;;  %v33490_v41 = vand.u32 4294901760, %v33485_v27 }
 0x70b   : > { %v14089_v44 = vsub.f32 %v33485_v27, %v33490_v41 }
 0x70c   : > { %27082 = vmatmul.mubr.f32.gmra.mrb[20].mxu0 %v38351_v33 }
 0x70d   : > { %27084 = vmatprep.mubr.f32.mxu0 %v38352_v32  ;;  %v14090_v33 = vand.u32 4294901760, %v14089_v44  ;;  %v38386_v44 = vld [vmem:[#allocation78_spill] sm:$0xff] }
 0x710   : > { %27085 = vmatmul.mubr.f32.gmra.mrb[22].mxu0 %v38353_v35  ;;  %v38377_v35 = vld [vmem:[#allocation124_spill] sm:$0xff] }
 0x711   : > { %27087 = vmatprep.mubr.f32.mxu0 %v38354_v15 }
 0x714   : > { %27088 = vmatmul.mubr.f32.gmra.mrb[24].mxu0 %v38355_v45 }
 0x715   : > { %27090 = vmatprep.mubr.f32.mxu0 %v38356_v1 }
 0x718   : > { %27091 = vmatmul.mubr.f32.gmra.mrb[26].mxu0 %v38357_v39  ;;  %v38381_v39 = vld [vmem:[#allocation66_spill] sm:$0xff] }
 0x719   : > { %27095 = vmatprep.mubr.f32.mxu0 %v38280_v57 }
 0x71c   : > { %27096 = vmatmul.mubr.f32.vlgmr.msra.gmra.mrb[0].mxu0 %v38281_v58 }
 0x71d   : > { %27098 = vmatprep.mubr.f32.mxu0 %v38282_v11  ;;  %27138 = vmatpush3.msra.mxu0 %v33155_v18  ;;  %v13728_v18 = vrot.slane %v38223_v43, 2 }
 0x71e   : > { %27181 = vmatprep.subr.mxu0 %v33449_v48 }
 0x71f   : > { %v33472_v52 = vsel %vm3732_vm1, %v13726_v47, %v13728_v18  ;;  %v13734_v54 = vsel %vm396_vm2, %v13728_v18, 0  ;;  %v38382_v18 = vld [vmem:[#allocation69_spill] sm:$0xff] }
 0x720   : > { %27099 = vmatmul.mubr.f32.gmra.mrb[2].mxu0 %v38283_v37 }
 0x721   : > { %27101 = vmatprep.mubr.f32.mxu0 %v38284_v59 }
 0x724   : > { %27102 = vmatmul.mubr.f32.gmra.mrb[4].mxu0 %v38285_v22 }
 0x725   : > { %27104 = vmatprep.mubr.f32.mxu0 %v38286_v62 }
 0x728   : > { %27105 = vmatmul.mubr.f32.gmra.mrb[6].mxu0 %v38287_v25 }
 0x729   : > { %27107 = vmatprep.mubr.f32.mxu0 %v38288_v17 }
 0x72c   : > { %27108 = vmatmul.mubr.f32.gmra.mrb[8].mxu0 %v38289_v31 }
 0x72d   : > { %27110 = vmatprep.mubr.f32.mxu0 %v38290_v34 }
 0x730   : > { %27111 = vmatmul.mubr.f32.gmra.mrb[10].mxu0 %v38291_v8 }
 0x731   : > { %27113 = vmatprep.mubr.f32.mxu0 %v38292_v5 }
 0x734   : > { %27114 = vmatmul.mubr.f32.gmra.mrb[12].mxu0 %v38293_v4 }
 0x735   : > { %27116 = vmatprep.mubr.f32.mxu0 %v38294_v38 }
 0x738   : > { %27117 = vmatmul.mubr.f32.gmra.mrb[14].mxu0 %v38295_v50 }
 0x739   : > { %27119 = vmatprep.mubr.f32.mxu0 %v38296_v23 }
 0x73c   : > { %27120 = vmatmul.mubr.f32.gmra.mrb[16].mxu0 %v38297_v36 }
 0x73d   : > { %27122 = vmatprep.mubr.f32.mxu0 %v38298_v12 }
 0x740   : > { %27123 = vmatmul.mubr.f32.gmra.mrb[18].mxu0 %v38299_v61 }
 0x741   : > { %27125 = vmatprep.mubr.f32.mxu0 %v38300_v19 }
 0x744   : > { %27126 = vmatmul.mubr.f32.gmra.mrb[20].mxu0 %v38301_v51 }
 0x745   : > { %27128 = vmatprep.mubr.f32.mxu0 %v38302_v63 }
 0x748   : > { %27129 = vmatmul.mubr.f32.gmra.mrb[22].mxu0 %v38303_v3 }
 0x749   : > { %27131 = vmatprep.mubr.f32.mxu0 %v38304_v60 }
 0x74c   : > { %27132 = vmatmul.mubr.f32.gmra.mrb[24].mxu0 %v33312_v56 }
 0x74d   : > { %27134 = vmatprep.mubr.f32.mxu0 %v33315_v10 }
 0x750   : > { %27135 = vmatmul.mubr.f32.gmra.mrb[26].mxu0 %v33324_v26 }
 0x751   : > { %27139 = vmatprep.mubr.f32.mxu0 %v38280_v57  ;;  %v13732_v57 = vsel %vm396_vm2, %v33472_v52, 0  ;;  %v38384_v52 = vld [vmem:[#allocation74_spill] sm:$0xff] }
 0x754   : > { %27140 = vmatmul.mubr.f32.vlgmr.msra.gmra.mrb[0].mxu0 %v38281_v58 }
 0x755   : > { %27142 = vmatprep.mubr.f32.mxu0 %v38282_v11  ;;  %27182 = vmatpush3.msra.mxu0 %v33449_v48 }
 0x756   : > { %27225 = vmatprep.subr.mxu0 %v14090_v33 }
 0x758   : > { %27143 = vmatmul.mubr.f32.gmra.mrb[2].mxu0 %v38283_v37  ;;  %v33562_v37 = vand.u32 4294901760, %v13734_v54 }
 0x759   : > { %27145 = vmatprep.mubr.f32.mxu0 %v38284_v59  ;;  %v38374_v59 = vld [vmem:[#allocation321_spill] sm:$0xff] }
 0x75a   : > { %v33571_v43 = vsub.f32 %v13734_v54, %v33562_v37  ;;  %v38406_v54 = vld [vmem:[#allocation71_spill] sm:$0xff] }
 0x75c   : > { %27146 = vmatmul.mubr.f32.gmra.mrb[4].mxu0 %v38285_v22 }
 0x75d   : > { %27148 = vmatprep.mubr.f32.mxu0 %v38286_v62  ;;  %v38375_v62 = vld [vmem:[#allocation323_spill] sm:$0xff] }
 0x760   : > { %27149 = vmatmul.mubr.f32.gmra.mrb[6].mxu0 %v38287_v25 }
 0x761   : > { %27151 = vmatprep.mubr.f32.mxu0 %v38288_v17  ;;  %v38376_v17 = vld [vmem:[#allocation325_spill] sm:$0xff] }
 0x764   : > { %27152 = vmatmul.mubr.f32.gmra.mrb[8].mxu0 %v38289_v31 }
 0x765   : > { %27154 = vmatprep.mubr.f32.mxu0 %v38290_v34 }
 0x768   : > { %27155 = vmatmul.mubr.f32.gmra.mrb[10].mxu0 %v38291_v8  ;;  %v38373_v8 = vld [vmem:[#allocation318_spill] sm:$0xff] }
 0x769   : > { %27157 = vmatprep.mubr.f32.mxu0 %v38292_v5  ;;  %v14077_v5 = vand.u32 4294901760, %v33571_v43 }
 0x76b   : > { %v14078_v45 = vsub.f32 %v33571_v43, %v14077_v5 }
 0x76c   : > { %27158 = vmatmul.mubr.f32.gmra.mrb[12].mxu0 %v38293_v4  ;;  %v33553_v4 = vand.u32 4294901760, %v13732_v57 }
 0x76d   : > { %27160 = vmatprep.mubr.f32.mxu0 %v38294_v38  ;;  %v38370_v38 = vld [vmem:[#allocation313_spill] sm:$0xff]  ;;  %v14079_v1 = vand.u32 4294901760, %v14078_v45  ;;  %v38415_v45 = vld [vmem:[#allocation322_spill] sm:$0xff] }
 0x76e   : > { %v33566_v22 = vsub.f32 %v13732_v57, %v33553_v4  ;;  %v38403_v57 = vld [vmem:[#allocation62_spill] sm:$0xff] }
 0x770   : > { %27161 = vmatmul.mubr.f32.gmra.mrb[14].mxu0 %v38295_v50  ;;  %v38369_v50 = vld [vmem:[#allocation70_spill] sm:$0xff]  ;;  %v14067_v31 = vand.u32 4294901760, %v33566_v22 }
 0x771   : > { %27163 = vmatprep.mubr.f32.mxu0 %v38296_v23 }
 0x772   : > { %v14068_v32 = vsub.f32 %v33566_v22, %v14067_v31 }
 0x774   : > { %27164 = vmatmul.mubr.f32.gmra.mrb[16].mxu0 %v38297_v36  ;;  %v38368_v36 = vld [vmem:[#allocation311_spill] sm:$0xff]  ;;  %v14069_v24 = vand.u32 4294901760, %v14068_v32 }
 0x775   : > { %27166 = vmatprep.mubr.f32.mxu0 %v38298_v12  ;;  %v38367_v12 = vld [vmem:[#allocation312_spill] sm:$0xff]  ;;  %v13727_v23 = vsel %vm3732_vm1, %v38368_v36, %v13726_v47  ;;  %v38398_v36 = vld [vmem:[#allocation46_spill] sm:$0xff]  ;;  %v38412_v32 = vld [vmem:[#allocation83_spill] sm:$0xff] }
 0x776   : > { %v13730_v11 = vsel %vm396_vm2, %v13727_v23, 0  ;;  %v38383_v47 = vld [vmem:[#allocation72_spill] sm:$0xff]  ;;  %v38399_v23 = vld [vmem:[#allocation47_spill] sm:$0xff] }
 0x778   : > { %27167 = vmatmul.mubr.f32.gmra.mrb[18].mxu0 %v38299_v61  ;;  %v38363_v61 = vld [vmem:[#allocation15_spill] sm:$0xff] }
 0x779   : > { %27169 = vmatprep.mubr.f32.mxu0 %v38300_v19  ;;  %v38362_v19 = vld [vmem:[#allocation87_spill] sm:$0xff] }
 0x77c   : > { %27170 = vmatmul.mubr.f32.gmra.mrb[20].mxu0 %v38301_v51  ;;  %v38361_v51 = vld [vmem:[#allocation300_spill] sm:$0xff] }
 0x77d   : > { %27172 = vmatprep.mubr.f32.mxu0 %v38302_v63  ;;  %v38358_v63 = vld [vmem:[#allocation295_spill] sm:$0xff] }
 0x780   : > { %27173 = vmatmul.mubr.f32.gmra.mrb[22].mxu0 %v38303_v3  ;;  %v38359_v3 = vld [vmem:[#allocation204_spill] sm:$0xff] }
 0x781   : > { %27175 = vmatprep.mubr.f32.mxu0 %v38304_v60  ;;  %v38360_v60 = vld [vmem:[#allocation209_spill] sm:$0xff] }
 0x784   : > { %27176 = vmatmul.mubr.f32.gmra.mrb[24].mxu0 %v33312_v56  ;;  %v38371_v56 = vld [vmem:[#allocation282_spill] sm:$0xff] }
 0x785   : > { %27178 = vmatprep.mubr.f32.mxu0 %v33315_v10  ;;  %v33550_v10 = vand.u32 4294901760, %v13730_v11 }
 0x787   : > { %v33560_v58 = vsub.f32 %v13730_v11, %v33550_v10  ;;  %v38402_v11 = vld [vmem:[#allocation59_spill] sm:$0xff] }
 0x788   : > { %27179 = vmatmul.mubr.f32.gmra.mrb[26].mxu0 %v33324_v26  ;;  %v38372_v26 = vld [vmem:[#allocation316_spill] sm:$0xff] }
 0x789   : > { %27183 = vmatprep.mubr.f32.mxu0 %v38130_v30  ;;  %v38364_v30 = vld [vmem:[#allocation88_spill] sm:$0xff]  ;;  %v14057_v25 = vand.u32 4294901760, %v33560_v58 }
 0x78b   : > { %v14058_v34 = vsub.f32 %v33560_v58, %v14057_v25 }
 0x78c   : > { %27184 = vmatmul.mubr.f32.vlgmr.msra.gmra.mrb[0].mxu0 %v38132_v16  ;;  %v38365_v16 = vld [vmem:[#allocation17_spill] sm:$0xff] }
 0x78d   : > { %27186 = vmatprep.mubr.f32.mxu0 %v38134_v40  ;;  %27226 = vmatpush3.msra.mxu0 %v14090_v33  ;;  %v38366_v40 = vld [vmem:[#allocation283_spill] sm:$0xff]  ;;  %v14059_v15 = vand.u32 4294901760, %v14058_v34  ;;  %v38387_v33 = vld [vmem:[#allocation80_spill] sm:$0xff]  ;;  %v38411_v34 = vld [vmem:[#allocation81_spill] sm:$0xff] }
 0x78e   : > { %27269 = vmatprep.subr.mxu0 %v33485_v27 }
 0x790   : > { %27187 = vmatmul.mubr.f32.gmra.mrb[2].mxu0 %v38358_v63  ;;  %v38388_v63 = vld [vmem:[#allocation82_spill] sm:$0xff] }
 0x791   : > { %27189 = vmatprep.mubr.f32.mxu0 %v38359_v3  ;;  %v38389_v3 = vld [vmem:[#allocation314_spill] sm:$0xff] }
 0x794   : > { %27190 = vmatmul.mubr.f32.gmra.mrb[4].mxu0 %v38360_v60  ;;  %v38390_v60 = vld [vmem:[#allocation317_spill] sm:$0xff] }
 0x795   : > { %27192 = vmatprep.mubr.f32.mxu0 %v38361_v51  ;;  %v38391_v51 = vld [vmem:[#allocation23_spill] sm:$0xff] }
 0x798   : > { %27193 = vmatmul.mubr.f32.gmra.mrb[6].mxu0 %v38362_v19  ;;  %v38392_v19 = vld [vmem:[#allocation26_spill] sm:$0xff] }
 0x799   : > { %27195 = vmatprep.mubr.f32.mxu0 %v38363_v61  ;;  %v38393_v61 = vld [vmem:[#allocation28_spill] sm:$0xff] }
 0x79c   : > { %27196 = vmatmul.mubr.f32.gmra.mrb[8].mxu0 %v38364_v30  ;;  %v38394_v30 = vld [vmem:[#allocation32_spill] sm:$0xff] }
 0x79d   : > { %27198 = vmatprep.mubr.f32.mxu0 %v38365_v16  ;;  %v38395_v16 = vld [vmem:[#allocation34_spill] sm:$0xff] }
 0x7a0   : > { %27199 = vmatmul.mubr.f32.gmra.mrb[10].mxu0 %v38366_v40  ;;  %v38396_v40 = vld [vmem:[#allocation39_spill] sm:$0xff] }
 0x7a1   : > { %27201 = vmatprep.mubr.f32.mxu0 %v38367_v12  ;;  %v38397_v12 = vld [vmem:[#allocation42_spill] sm:$0xff] }
 0x7a4   : > { %27202 = vmatmul.mubr.f32.gmra.mrb[12].mxu0 %v38369_v50  ;;  %v38400_v50 = vld [vmem:[#allocation53_spill] sm:$0xff] }
 0x7a5   : > { %27204 = vmatprep.mubr.f32.mxu0 %v38370_v38  ;;  %v38401_v38 = vld [vmem:[#allocation55_spill] sm:$0xff] }
 0x7a8   : > { %27205 = vmatmul.mubr.f32.gmra.mrb[14].mxu0 %v38371_v56  ;;  %v38404_v56 = vld [vmem:[#allocation65_spill] sm:$0xff] }
 0x7a9   : > { %27207 = vmatprep.mubr.f32.mxu0 %v38372_v26  ;;  %v38405_v26 = vld [vmem:[#allocation68_spill] sm:$0xff] }
 0x7ac   : > { %27208 = vmatmul.mubr.f32.gmra.mrb[16].mxu0 %v38373_v8  ;;  %v38407_v8 = vld [vmem:[#allocation73_spill] sm:$0xff] }
 0x7ad   : > { %27210 = vmatprep.mubr.f32.mxu0 %v38374_v59  ;;  %v38408_v59 = vld [vmem:[#allocation75_spill] sm:$0xff] }
 0x7b0   : > { %27211 = vmatmul.mubr.f32.gmra.mrb[18].mxu0 %v38375_v62  ;;  %v38409_v62 = vld [vmem:[#allocation77_spill] sm:$0xff] }
 0x7b1   : > { %27213 = vmatprep.mubr.f32.mxu0 %v38376_v17  ;;  %v38410_v17 = vld [vmem:[#allocation79_spill] sm:$0xff] }
 0x7b4   : > { %27214 = vmatmul.mubr.f32.gmra.mrb[20].mxu0 %v38153_v21  ;;  %v38378_v21 = vld [vmem:[#allocation328_spill] sm:$0xff] }
 0x7b5   : > { %27216 = vmatprep.mubr.f32.mxu0 %v38156_v55  ;;  %v38379_v55 = vld [vmem:[#allocation60_spill] sm:$0xff] }
 0x7b8   : > { %27217 = vmatmul.mubr.f32.gmra.mrb[22].mxu0 %v38377_v35  ;;  %v38413_v35 = vld [vmem:[#allocation85_spill] sm:$0xff] }
 0x7b9   : > { %27219 = vmatprep.mubr.f32.mxu0 %v38378_v21  ;;  %v38416_v21 = vld [vmem:[#allocation89_spill] sm:$0xff] }
 0x7bc   : > { %27220 = vmatmul.mubr.f32.gmra.mrb[24].mxu0 %v14059_v15  ;;  %v38414_v15 = vld [vmem:[#allocation319_spill] sm:$0xff] }
 0x7bd   : > { %27222 = vmatprep.mubr.f32.mxu0 %v14069_v24  ;;  %v38417_v24 = vld [vmem:[#allocation90_spill] sm:$0xff] }
 0x7c0   : > { %27223 = vmatmul.mubr.f32.gmra.mrb[26].mxu0 %v14079_v1  ;;  %v38418_v1 = vld [vmem:[#allocation91_spill] sm:$0xff] }
 0x7c1   : > { %27227 = vmatprep.mubr.f32.mxu0 %v38057_v0 }
 0x7c4   : > { %27228 = vmatmul.mubr.f32.vlgmr.msra.gmra.mrb[0].mxu0 %v38059_v2 }
 0x7c5   : > { %27230 = vmatprep.mubr.f32.mxu0 %v38061_v20  ;;  %27270 = vmatpush3.msra.mxu0 %v33485_v27  ;;  %v38385_v27 = vld [vmem:[#allocation76_spill] sm:$0xff] }
 0x7c6   : > { %27313 = vmatprep.subr.mxu0 %v33449_v48 }
 0x7c8   : > { %27231 = vmatmul.mubr.f32.gmra.mrb[2].mxu0 %v38063_v53 }
 0x7c9   : > { %27233 = vmatprep.mubr.f32.mxu0 %v38065_v28 }
 0x7cc   : > { %27234 = vmatmul.mubr.f32.gmra.mrb[4].mxu0 %v38067_v42 }
 0x7cd   : > { %27236 = vmatprep.mubr.f32.mxu0 %v38069_v13 }
 0x7d0   : > { %27237 = vmatmul.mubr.f32.gmra.mrb[6].mxu0 %v38071_v14 }
 0x7d1   : > { %27239 = vmatprep.mubr.f32.mxu0 %v38073_v9 }
 0x7d4   : > { %27240 = vmatmul.mubr.f32.gmra.mrb[8].mxu0 %v38075_v7 }
 0x7d5   : > { %27242 = vmatprep.mubr.f32.mxu0 %v38077_v46 }
 0x7d8   : > { %27243 = vmatmul.mubr.f32.gmra.mrb[10].mxu0 %v38079_v49 }
 0x7d9   : > { %27245 = vmatprep.mubr.f32.mxu0 %v38081_v29 }
 0x7dc   : > { %27246 = vmatmul.mubr.f32.gmra.mrb[12].mxu0 %v38379_v55 }
 0x7dd   : > { %27248 = vmatprep.mubr.f32.mxu0 %v38380_v6 }
 0x7e0   : > { %27249 = vmatmul.mubr.f32.gmra.mrb[14].mxu0 %v38381_v39 }
 0x7e1   : > { %27251 = vmatprep.mubr.f32.mxu0 %v38382_v18 }
 0x7e4   : > { %27252 = vmatmul.mubr.f32.gmra.mrb[16].mxu0 %v38383_v47 }
 0x7e5   : > { %27254 = vmatprep.mubr.f32.mxu0 %v38384_v52 }
 0x7e8   : > { %27255 = vmatmul.mubr.f32.gmra.mrb[18].mxu0 %v38385_v27 }
 0x7e9   : > { %27257 = vmatprep.mubr.f32.mxu0 %v38386_v44 }
 0x7ec   : > { %27258 = vmatmul.mubr.f32.gmra.mrb[20].mxu0 %v38387_v33 }
 0x7ed   : > { %27260 = vmatprep.mubr.f32.mxu0 %v38388_v63 }
 0x7f0   : > { %27261 = vmatmul.mubr.f32.gmra.mrb[22].mxu0 %v38389_v3 }
 0x7f1   : > { %27263 = vmatprep.mubr.f32.mxu0 %v38390_v60 }
 0x7f4   : > { %27264 = vmatmul.mubr.f32.gmra.mrb[24].mxu0 %v33550_v10 }
 0x7f5   : > { %27266 = vmatprep.mubr.f32.mxu0 %v33553_v4 }
 0x7f8   : > { %27267 = vmatmul.mubr.f32.gmra.mrb[26].mxu0 %v33562_v37 }
 0x7f9   : > { %27271 = vmatprep.mubr.f32.mxu0 %v38391_v51  ;;  %v38419_v51 = vld [vmem:[#allocation92_spill] sm:$0xff] }
 0x7fc   : > { %27272 = vmatmul.mubr.f32.vlgmr.msra.gmra.mrb[0].mxu0 %v38392_v19  ;;  %v38420_v19 = vld [vmem:[#allocation93_spill] sm:$0xff] }
 0x7fd   : > { %27274 = vmatprep.mubr.f32.mxu0 %v38393_v61  ;;  %27314 = vmatpush3.msra.mxu0 %v33449_v48  ;;  %v38421_v61 = vld [vmem:[#allocation94_spill] sm:$0xff] }
 0x7fe   : > { %27357 = vmatprep.subr.mxu0 %v33490_v41 }
 0x800   : > { %27275 = vmatmul.mubr.f32.gmra.mrb[2].mxu0 %v38394_v30  ;;  %v38422_v30 = vld [vmem:[#allocation95_spill] sm:$0xff] }
 0x801   : > { %27277 = vmatprep.mubr.f32.mxu0 %v38395_v16  ;;  %v38423_v16 = vld [vmem:[#allocation96_spill] sm:$0xff] }
 0x804   : > { %27278 = vmatmul.mubr.f32.gmra.mrb[4].mxu0 %v38396_v40  ;;  %v38424_v40 = vld [vmem:[#allocation97_spill] sm:$0xff] }
 0x805   : > { %27280 = vmatprep.mubr.f32.mxu0 %v38397_v12  ;;  %v38425_v12 = vld [vmem:[#allocation98_spill] sm:$0xff] }
 0x808   : > { %27281 = vmatmul.mubr.f32.gmra.mrb[6].mxu0 %v38398_v36  ;;  %v38426_v36 = vld [vmem:[#allocation99_spill] sm:$0xff] }
 0x809   : > { %27283 = vmatprep.mubr.f32.mxu0 %v38399_v23  ;;  %v38427_v23 = vld [vmem:[#allocation100_spill] sm:$0xff] }
 0x80c   : > { %27284 = vmatmul.mubr.f32.gmra.mrb[8].mxu0 %v38400_v50  ;;  %v38429_v50 = vld [vmem:[#allocation102_spill] sm:$0xff] }
 0x80d   : > { %27286 = vmatprep.mubr.f32.mxu0 %v38401_v38  ;;  %v38430_v38 = vld [vmem:[#allocation103_spill] sm:$0xff] }
 0x810   : > { %27287 = vmatmul.mubr.f32.gmra.mrb[10].mxu0 %v38402_v11  ;;  %v38431_v11 = vld [vmem:[#allocation104_spill] sm:$0xff] }
 0x811   : > { %27289 = vmatprep.mubr.f32.mxu0 %v38403_v57  ;;  %v38432_v57 = vld [vmem:[#allocation105_spill] sm:$0xff] }
 0x814   : > { %27290 = vmatmul.mubr.f32.gmra.mrb[12].mxu0 %v38404_v56  ;;  %v38433_v56 = vld [vmem:[#allocation106_spill] sm:$0xff] }
 0x815   : > { %27292 = vmatprep.mubr.f32.mxu0 %v38405_v26  ;;  %v38434_v26 = vld [vmem:[#allocation107_spill] sm:$0xff] }
 0x818   : > { %27293 = vmatmul.mubr.f32.gmra.mrb[14].mxu0 %v38406_v54  ;;  %v38435_v54 = vld [vmem:[#allocation108_spill] sm:$0xff] }
 0x819   : > { %27295 = vmatprep.mubr.f32.mxu0 %v38407_v8  ;;  %v38436_v8 = vld [vmem:[#allocation109_spill] sm:$0xff] }
 0x81c   : > { %27296 = vmatmul.mubr.f32.gmra.mrb[16].mxu0 %v38408_v59  ;;  %v38437_v59 = vld [vmem:[#allocation110_spill] sm:$0xff] }
 0x81d   : > { %27298 = vmatprep.mubr.f32.mxu0 %v38409_v62  ;;  %v38438_v62 = vld [vmem:[#allocation111_spill] sm:$0xff] }
 0x820   : > { %27299 = vmatmul.mubr.f32.gmra.mrb[18].mxu0 %v38410_v17  ;;  %v38439_v17 = vld [vmem:[#allocation324_spill] sm:$0xff] }
 0x821   : > { %27301 = vmatprep.mubr.f32.mxu0 %v38411_v34  ;;  %v38440_v34 = vld [vmem:[#allocation326_spill] sm:$0xff] }
 0x824   : > { %27302 = vmatmul.mubr.f32.gmra.mrb[20].mxu0 %v38412_v32 }
 0x825   : > { %27304 = vmatprep.mubr.f32.mxu0 %v38413_v35 }
 0x828   : > { %27305 = vmatmul.mubr.f32.gmra.mrb[22].mxu0 %v38414_v15 }
 0x829   : > { %27307 = vmatprep.mubr.f32.mxu0 %v38415_v45 }
 0x82c   : > { %27308 = vmatmul.mubr.f32.gmra.mrb[24].mxu0 %v33560_v58 }
 0x82d   : > { %27310 = vmatprep.mubr.f32.mxu0 %v33566_v22 }
 0x830   : > { %27311 = vmatmul.mubr.f32.gmra.mrb[26].mxu0 %v33571_v43 }
 0x831   : > { %27315 = vmatprep.mubr.f32.mxu0 %v38416_v21  ;;  %v15633_v21 = vld [vmem:[%s36460_s3 + $0x30] sm:$0xff] }
 0x834   : > { %27316 = vmatmul.mubr.f32.vlgmr.msra.gmra.mrb[0].mxu0 %v38417_v24 }
 0x835   : > { %27318 = vmatprep.mubr.f32.mxu0 %v38418_v1  ;;  %27358 = vmatpush3.msra.mxu0 %v33490_v41  ;;  %v38428_v41 = vld [vmem:[#allocation101_spill] sm:$0xff] }
 0x836   : > { %27401 = vmatprep.subr.mxu0 %v33449_v48 }
 0x838   : > { %27319 = vmatmul.mubr.f32.gmra.mrb[2].mxu0 %v38419_v51 }
 0x839   : > { %27321 = vmatprep.mubr.f32.mxu0 %v38420_v19 }
 0x83c   : > { %27322 = vmatmul.mubr.f32.gmra.mrb[4].mxu0 %v38421_v61 }
 0x83d   : > { %27324 = vmatprep.mubr.f32.mxu0 %v38422_v30 }
 0x840   : > { %27325 = vmatmul.mubr.f32.gmra.mrb[6].mxu0 %v38423_v16 }
 0x841   : > { %27327 = vmatprep.mubr.f32.mxu0 %v38424_v40  ;;  %v33833_v40 = vand.u32 4294901760, %v15633_v21 }
 0x843   : > { %38453 = vst [vmem:[#allocation40_spill] sm:$0xff] %v33833_v40 }
 0x844   : > { %27328 = vmatmul.mubr.f32.gmra.mrb[8].mxu0 %v38425_v12 }
 0x845   : > { %27330 = vmatprep.mubr.f32.mxu0 %v38426_v36  ;;  %v38454_v36 = vld [vmem:[#allocation6_spill] sm:$0xff] }
 0x848   : > { %27331 = vmatmul.mubr.f32.gmra.mrb[10].mxu0 %v38427_v23 }
 0x849   : > { %27333 = vmatprep.mubr.f32.mxu0 %v38428_v41 }
 0x84c   : > { %27334 = vmatmul.mubr.f32.gmra.mrb[12].mxu0 %v38429_v50 }
 0x84d   : > { %27336 = vmatprep.mubr.f32.mxu0 %v38430_v38 }
 0x850   : > { %27337 = vmatmul.mubr.f32.gmra.mrb[14].mxu0 %v38431_v11 }
 0x851   : > { %27339 = vmatprep.mubr.f32.mxu0 %v38432_v57  ;;  %v38455_v57 = vld [vmem:[#allocation113_spill] sm:$0xff] }
 0x854   : > { %27340 = vmatmul.mubr.f32.gmra.mrb[16].mxu0 %v38433_v56 }
 0x855   : > { %27342 = vmatprep.mubr.f32.mxu0 %v38434_v26 }
 0x858   : > { %27343 = vmatmul.mubr.f32.gmra.mrb[18].mxu0 %v38435_v54 }
 0x859   : > { %27345 = vmatprep.mubr.f32.mxu0 %v38436_v8 }
 0x85c   : > { %27346 = vmatmul.mubr.f32.gmra.mrb[20].mxu0 %v38437_v59 }
 0x85d   : > { %27348 = vmatprep.mubr.f32.mxu0 %v38438_v62 }
 0x860   : > { %27349 = vmatmul.mubr.f32.gmra.mrb[22].mxu0 %v38439_v17  ;;  %v33854_v17 = vsub.f32 %v15633_v21, %v33833_v40 }
 0x861   : > { %27351 = vmatprep.mubr.f32.mxu0 %v38440_v34 }
 0x862   : > { %38457 = vst [vmem:[#allocation48_spill] sm:$0xff] %v33854_v17 }
 0x864   : > { %27352 = vmatmul.mubr.f32.gmra.mrb[24].mxu0 %v14057_v25  ;;  %v15632_v25 = vld [vmem:[%s36460_s3 + $0x28] sm:$0xff] }
 0x865   : > { %27354 = vmatprep.mubr.f32.mxu0 %v14067_v31  ;;  %v15649_v43 = vsel %vm15641_vm4, %v15632_v25, 0  ;;  %v15631_v31 = vld [vmem:[%s36460_s3 + $0x20] sm:$0xff] }
 0x868   : > { %27355 = vmatmul.mubr.f32.gmra.mrb[26].mxu0 %v14077_v5 }
 0x869   : > { %27359 = vmatprep.mubr.f32.mxu0 %v38057_v0 }
 0x86c   : > { %27360 = vmatmul.mubr.f32.vlgmr.msra.gmra.mrb[0].mxu0 %v38059_v2 }
 0x86d   : > { %27362 = vmatprep.mubr.f32.mxu0 %v38061_v20  ;;  %27402 = vmatpush3.msra.mxu0 %v33449_v48  ;;  %v15629_v48 = vld [vmem:[%s36460_s3 + $0x10] sm:$0xff] }
 0x870   : > { %27363 = vmatmul.mubr.f32.gmra.mrb[2].mxu0 %v38063_v53 }
 0x871   : > { %27365 = vmatprep.mubr.f32.mxu0 %v38065_v28 }
 0x874   : > { %27366 = vmatmul.mubr.f32.gmra.mrb[4].mxu0 %v38067_v42 }
 0x875   : > { %27368 = vmatprep.mubr.f32.mxu0 %v38069_v13 }
 0x878   : > { %27369 = vmatmul.mubr.f32.gmra.mrb[6].mxu0 %v38071_v14 }
 0x879   : > { %27371 = vmatprep.mubr.f32.mxu0 %v38073_v9 }
 0x87c   : > { %27372 = vmatmul.mubr.f32.gmra.mrb[8].mxu0 %v38075_v7 }
 0x87d   : > { %27374 = vmatprep.mubr.f32.mxu0 %v38077_v46 }
 0x880   : > { %27375 = vmatmul.mubr.f32.gmra.mrb[10].mxu0 %v38079_v49 }
 0x881   : > { %27377 = vmatprep.mubr.f32.mxu0 %v38081_v29 }
 0x884   : > { %27378 = vmatmul.mubr.f32.gmra.mrb[12].mxu0 %v38379_v55 }
 0x885   : > { %27380 = vmatprep.mubr.f32.mxu0 %v38380_v6 }
 0x888   : > { %27381 = vmatmul.mubr.f32.gmra.mrb[14].mxu0 %v38381_v39 }
 0x889   : > { %27383 = vmatprep.mubr.f32.mxu0 %v38382_v18 }
 0x88c   : > { %27384 = vmatmul.mubr.f32.gmra.mrb[16].mxu0 %v38383_v47 }
 0x88d   : > { %27386 = vmatprep.mubr.f32.mxu0 %v38384_v52 }
 0x890   : > { %27387 = vmatmul.mubr.f32.gmra.mrb[18].mxu0 %v38385_v27 }
 0x891   : > { %27389 = vmatprep.mubr.f32.mxu0 %v38386_v44 }
 0x894   : > { %27390 = vmatmul.mubr.f32.gmra.mrb[20].mxu0 %v38387_v33 }
 0x895   : > { %27392 = vmatprep.mubr.f32.mxu0 %v38388_v63 }
 0x898   : > { %27393 = vmatmul.mubr.f32.gmra.mrb[22].mxu0 %v38389_v3 }
 0x899   : > { %27395 = vmatprep.mubr.f32.mxu0 %v38390_v60 }
 0x89c   : > { %27396 = vmatmul.mubr.f32.gmra.mrb[24].mxu0 %v33550_v10 }
 0x89d   : > { %27398 = vmatprep.mubr.f32.mxu0 %v33553_v4 }
 0x8a0   : > { %27399 = vmatmul.mubr.f32.gmra.mrb[26].mxu0 %v33562_v37 }
 0x8a1   : > { %27403 = vmatprep.mubr.f32.mxu0 %v38057_v0 }
 0x8a4   : > { %27404 = vmatmul.mubr.f32.vlgmr.msra.gmra.mrb[0].mxu0 %v38059_v2 }
 0x8a5   : > { %27406 = vmatprep.mubr.f32.mxu0 %v38061_v20 }
 0x8a8   : > { %27407 = vmatmul.mubr.f32.gmra.mrb[2].mxu0 %v38063_v53 }
 0x8a9   : > { %27409 = vmatprep.mubr.f32.mxu0 %v38065_v28  ;;  %v37246_v28 = vmov 0.0|0.0  }
 0x8aa   : > { %28429 = vmatprep.subr.bf16.mxu1 %v37246_v28 }
 0x8ac   : > { %27410 = vmatmul.mubr.f32.gmra.mrb[4].mxu0 %v38067_v42 }
 0x8ad   : > { %27412 = vmatprep.mubr.f32.mxu0 %v38069_v13 }
 0x8b0   : > { %27413 = vmatmul.mubr.f32.gmra.mrb[6].mxu0 %v38071_v14  ;;  %v15630_v14 = vld [vmem:[%s36460_s3 + $0x18] sm:$0xff] }
 0x8b1   : > { %27415 = vmatprep.mubr.f32.mxu0 %v38073_v9  ;;  %v15628_v9 = vld [vmem:[%s36460_s3 + $0x8] sm:$0xff]  ;;  %v15646_v42 = vsel %vm15641_vm4, %v15630_v14, 0  ;;  %v38458_v14 = vld [vmem:[#allocation116_spill] sm:$0xff] }
 0x8b2   : > { %v15643_v20 = vsel %vm15641_vm4, %v15628_v9, 0 }
 0x8b3   : > { %v33744_v53 = vand.u32 4294901760, %v15643_v20 }
 0x8b4   : > { %27416 = vmatmul.mubr.f32.gmra.mrb[8].mxu0 %v38075_v7 }
 0x8b5   : > { %27418 = vmatprep.mubr.f32.mxu0 %v38077_v46  ;;  %v33747_v0 = vsub.f32 %v15643_v20, %v33744_v53  ;;  %v15627_v46 = vld [vmem:[%s36460_s3] sm:$0xff] }
 0x8b6   : > { %v33756_v13 = vand.u32 4294901760, %v15627_v46 }
 0x8b7   : > { %38441 = vst [vmem:[#allocation16_spill] sm:$0xff] %v33747_v0  ;;  %v37245_v7 = vand.u32 4294901760, %v33747_v0 }
 0x8b8   : > { %27419 = vmatmul.mubr.f32.gmra.mrb[10].mxu0 %v38079_v49  ;;  %v33759_v2 = vsub.f32 %v15627_v46, %v33756_v13 }
 0x8b9   : > { %27421 = vmatprep.mubr.f32.mxu0 %v38081_v29  ;;  %v15760_v29 = vsub.f32 %v33747_v0, %v37245_v7 }
 0x8ba   : > { %38442 = vst [vmem:[#allocation114_spill] sm:$0xff] %v33759_v2  ;;  %v37244_v58 = vand.u32 4294901760, %v33759_v2 }
 0x8bb   : > { %v15761_v49 = vand.u32 4294901760, %v15760_v29 }
 0x8bc   : > { %27422 = vmatmul.mubr.f32.gmra.mrb[12].mxu0 %v38379_v55 }
 0x8bd   : > { %27424 = vmatprep.mubr.f32.mxu0 %v38380_v6  ;;  %15762 = vmatprep.mubr.f32.mxu1 %v15761_v49  ;;  %v33788_v6 = vand.u32 4294901760, %v15649_v43 }
 0x8bf   : > { %38446 = vst [vmem:[#allocation24_spill] sm:$0xff] %v33788_v6 }
 0x8c0   : > { %27425 = vmatmul.mubr.f32.gmra.mrb[14].mxu0 %v38381_v39  ;;  %v33790_v39 = vand.u32 4294901760, %v15631_v31 }
 0x8c1   : > { %27427 = vmatprep.mubr.f32.mxu0 %v38382_v18 }
 0x8c2   : > { %38447 = vst [vmem:[#allocation29_spill] sm:$0xff] %v33790_v39  ;;  %v33816_v15 = vsub.f32 %v15631_v31, %v33790_v39  ;;  %v15636_v31 = vld [vmem:[%s36460_s3 + $0x48] sm:$0xff] }
 0x8c4   : > { %27428 = vmatmul.mubr.f32.gmra.mrb[16].mxu0 %v38383_v47  ;;  %v33795_v47 = vld [vmem:[%s36459_s2] ss:$0 sm:$0xff]  ;;  %38451 = vst [vmem:[#allocation35_spill] sm:$0xff] %v33816_v15  ;;  %v37240_v30 = vand.u32 4294901760, %v33816_v15 }
 0x8c5   : > { %27430 = vmatprep.mubr.f32.mxu0 %v38384_v52  ;;  %v38448_v52 = vld [vmem:[#allocation4_spill] sm:$0xff] }
 0x8c6   : > { %v33851_v62 = vsub.f32 %v33816_v15, %v37240_v30  ;;  %v38463_v30 = vld [vmem:[#allocation126_spill] sm:$0xff] }
 0x8c8   : > { %27431 = vmatmul.mubr.f32.gmra.mrb[18].mxu0 %v38385_v27 }
 0x8c9   : > { %27433 = vmatprep.mubr.f32.mxu0 %v38386_v44 }
 0x8cc   : > { %27434 = vmatmul.mubr.f32.gmra.mrb[20].mxu0 %v38387_v33  ;;  %v33801_v33 = vsub.f32 %v33759_v2, %v37244_v58  ;;  %v38482_v2 = vld [vmem:[#allocation167_spill] sm:$0xff] }
 0x8cd   : > { %27436 = vmatprep.mubr.f32.mxu0 %v38388_v63  ;;  %v33804_v63 = vsub.f32 %v15649_v43, %v33788_v6  ;;  %v37238_v43 = vand.u32 4294901760, %v33854_v17 }
 0x8cf   : > { %38449 = vst [vmem:[#allocation30_spill] sm:$0xff] %v33804_v63  ;;  %v37241_v51 = vand.u32 4294901760, %v33804_v63 }
 0x8d0   : > { %27437 = vmatmul.mubr.f32.gmra.mrb[22].mxu0 %v38389_v3  ;;  %v15634_v3 = vld [vmem:[%s36460_s3 + $0x38] sm:$0xff] }
 0x8d1   : > { %27439 = vmatprep.mubr.f32.mxu0 %v38390_v60  ;;  %v38450_v60 = vld [vmem:[#allocation5_spill] sm:$0xff]  ;;  %v15652_v45 = vsel %vm15641_vm4, %v15634_v3, 0  ;;  %v33840_v38 = vsub.f32 %v33804_v63, %v37241_v51 }
 0x8d2   : > { %v33831_v16 = vand.u32 4294901760, %v15652_v45 }
 0x8d4   : > { %27440 = vmatmul.mubr.f32.gmra.mrb[24].mxu0 %v33550_v10  ;;  %v33768_v10 = vand.u32 4294901760, %v15646_v42  ;;  %38452 = vst [vmem:[#allocation37_spill] sm:$0xff] %v33831_v16  ;;  %v33845_v54 = vsub.f32 %v15652_v45, %v33831_v16 }
 0x8d5   : > { %27442 = vmatprep.mubr.f32.mxu0 %v33553_v4  ;;  %v33770_v4 = vand.u32 4294901760, %v15629_v48 }
 0x8d6   : > { %38456 = vst [vmem:[#allocation43_spill] sm:$0xff] %v33845_v54  ;;  %v37239_v49 = vand.u32 4294901760, %v33845_v54 }
 0x8d7   : > { %38443 = vst [vmem:[#allocation10_spill] sm:$0xff] %v33770_v4  ;;  %v33777_v22 = vsub.f32 %v15629_v48, %v33770_v4 }
 0x8d8   : > { %27443 = vmatmul.mubr.f32.gmra.mrb[26].mxu0 %v33562_v37  ;;  %v33774_v37 = vsub.f32 %v15646_v42, %v33768_v10  ;;  %v33872_v3 = vsub.f32 %v33845_v54, %v37239_v49 }
 0x8d9   : > { %38445 = vst [vmem:[#allocation21_spill] sm:$0xff] %v33777_v22  ;;  %v37242_v55 = vand.u32 4294901760, %v33777_v22 }
 0x8da   : > { %38444 = vst [vmem:[#allocation19_spill] sm:$0xff] %v33774_v37  ;;  %v37243_v5 = vand.u32 4294901760, %v33774_v37 }
 0x8db   : > { %v33826_v1 = vsub.f32 %v33777_v22, %v37242_v55  ;;  %v38479_v22 = vld [vmem:[#allocation159_spill] sm:$0xff] }
 0x8dc   : > { %v33813_v35 = vsub.f32 %v33774_v37, %v37243_v5 }
 0x977   : > { %v27405_v18 = vpop.f32.mrb[0].mxu0 }
 0x978   : > { %v28699_v27 = vadd.f32 %v27405_v18, %v38448_v52  ;;  %v15180_v44 = vpop.f32.mrb[1].mxu0 }
 0x979   : > { %v28700_v32 = vadd.f32 %v15180_v44, %v38450_v60 }
 0x97a   : > { %v15382_v24 = vadd.f32 %v28699_v27, %v33795_v47  ;;  %v38459_v27 = vld [vmem:[#allocation117_spill] sm:$0xff] }
 0x97b   : > { %v15381_v19 = vadd.f32 %v28700_v32, %v33795_v47  ;;  %v27408_v61 = vpop.f32.mrb[2].mxu0 }
 0x97c   : > { %v15410_v12 = vmax.f32 %v15382_v24, 0.0  ;;  %v28701_v23 = vadd.f32 %v27408_v61, %v38454_v36  ;;  %v15192_v41 = vpop.f32.mrb[3].mxu0  ;;  %v33881_v36 = vsub.f32 %v33854_v17, %v37238_v43 }
 0x97d   : > { %v15409_v11 = vmax.f32 %v15381_v19, 0.0  ;;  %v28702_v56 = vadd.f32 %v15192_v41, %v38455_v57 }
 0x97e   : > { %v15464_v8 = vrot.slane %v15410_v12, 1  ;;  %v15384_v59 = vadd.f32 %v28701_v23, %v33795_v47  ;;  %v15655_v23 = vsel %vm15641_vm4, %v15636_v31, 0 }
 0x97f   : > { %v15463_v34 = vrot.slane %v15409_v11, 1  ;;  %v15383_v9 = vadd.f32 %v28702_v56, %v33795_v47  ;;  %v27411_v20 = vpop.f32.mrb[4].mxu0 }
 0x980   : > { %v33859_v46 = vmax.f32 %v15384_v59, 0.0  ;;  %v28703_v42 = vadd.f32 %v27411_v20, %v38458_v14  ;;  %v15204_v48 = vpop.f32.mrb[5].mxu0 }
 0x981   : > { %v15465_v18 = vsel %vm340_vm3, %v15463_v34, %v15464_v8  ;;  %v15411_v52 = vmax.f32 %v15383_v9, 0.0  ;;  %v28704_v44 = vadd.f32 %v15204_v48, %v38459_v27 }
 0x982   : > { %v15540_v60 = vmax.f32 %v15409_v11, %v15465_v18  ;;  %v15468_v32 = vrot.slane %v33859_v46, 1  ;;  %v15386_v45 = vadd.f32 %v28703_v42, %v33795_v47  ;;  %v38460_v11 = vld [vmem:[#allocation118_spill] sm:$0xff]  ;;  %v38461_v42 = vld [vmem:[#allocation120_spill] sm:$0xff] }
 0x983   : > { %v15466_v24 = vrot.slane %v15411_v52, 1  ;;  %v15385_v19 = vadd.f32 %v28704_v44, %v33795_v47  ;;  %v27414_v61 = vpop.f32.mrb[6].mxu0 }
 0x984   : > { %v15566_v41 = vmax.f32 %v15540_v60, %v15411_v52  ;;  %v15414_v57 = vmax.f32 %v15386_v45, 0.0  ;;  %v28705_v56 = vadd.f32 %v27414_v61, %v38460_v11  ;;  %v15216_v59 = vpop.f32.mrb[7].mxu0  ;;  %v33891_v61 = vand.u32 4294901760, %v15655_v23 }
 0x985   : > { %v15467_v9 = vsel %vm340_vm3, %v15464_v8, %v15466_v24  ;;  %v15469_v20 = vsel %vm340_vm3, %v15466_v24, %v15468_v32  ;;  %v15413_v14 = vmax.f32 %v15385_v19, 0.0  ;;  %v28706_v48 = vadd.f32 %v15216_v59, %v38461_v42 }
 0x986   : > { %v15541_v18 = vmax.f32 %v15410_v12, %v15467_v9  ;;  %v15542_v27 = vmax.f32 %v15411_v52, %v15469_v20  ;;  %v15601_v44 = vmax.f32 %v15566_v41, %v15469_v20  ;;  %v15472_v43 = vrot.slane %v15414_v57, 1  ;;  %38462 = vst [vmem:[#allocation49_spill] sm:$0xff] %v33891_v61 }
 0x987   : > { %v15470_v49 = vrot.slane %v15413_v14, 1  ;;  %v15388_v31 = vadd.f32 %v28705_v56, %v33795_v47  ;;  %v15387_v60 = vadd.f32 %v28706_v48, %v33795_v47  ;;  %v27417_v45 = vpop.f32.mrb[8].mxu0 }
 0x988   : > { %v15568_v11 = vmax.f32 %v15542_v27, %v15413_v14  ;;  %v28707_v8 = vadd.f32 %v27417_v45, %v38463_v30  ;;  %v15228_v51 = vpop.f32.mrb[9].mxu0  ;;  %v15567_v24 = vmax.f32 %v15541_v18, %v33859_v46  ;;  %v38464_v18 = vld [vmem:[#allocation127_spill] sm:$0xff] }
 0x989   : > { %v15471_v12 = vsel %vm340_vm3, %v15468_v32, %v15470_v49  ;;  %v15473_v52 = vsel %vm340_vm3, %v15470_v49, %v15472_v43  ;;  %v33898_v41 = vmax.f32 %v15388_v31, 0.0  ;;  %v15415_v56 = vmax.f32 %v15387_v60, 0.0  ;;  %v38465_v31 = vld [vmem:[#allocation133_spill] sm:$0xff] }
 0x98a   : > { %v15543_v59 = vmax.f32 %v33859_v46, %v15471_v12  ;;  %v15544_v9 = vmax.f32 %v15413_v14, %v15473_v52  ;;  %v33901_v20 = vmax.f32 %v15568_v11, %v15473_v52  ;;  %v15390_v42 = vadd.f32 %v28707_v8, %v33795_v47  ;;  %v38466_v52 = vld [vmem:[#allocation137_spill] sm:$0xff] }
 0x98b   : > { %v15476_v30 = vrot.slane %v33898_v41, 1  ;;  %v15474_v48 = vrot.slane %v15415_v56, 1  ;;  %v28708_v27 = vadd.f32 %v15228_v51, %v38464_v18  ;;  %v27420_v45 = vpop.f32.mrb[10].mxu0  ;;  %v33906_v55 = vmax.f32 %v15567_v24, %v15471_v12 }
 0x98c   : > { %v15570_v32 = vmax.f32 %v15544_v9, %v15415_v56  ;;  %v33908_v49 = vmax.f32 %v15390_v42, 0.0  ;;  %v28709_v60 = vadd.f32 %v27420_v45, %v38465_v31  ;;  %v15240_v5 = vpop.f32.mrb[11].mxu0  ;;  %v15668_v46 = vand.u32 4294901760, %v15601_v44  ;;  %v38467_v31 = vld [vmem:[#allocation141_spill] sm:$0xff] }
 0x98d   : > { %v15475_v14 = vsel %vm340_vm3, %v15472_v43, %v15474_v48  ;;  %v15477_v11 = vsel %vm340_vm3, %v15474_v48, %v15476_v30  ;;  %v15389_v8 = vadd.f32 %v28708_v27, %v33795_v47  ;;  %v28710_v58 = vadd.f32 %v15240_v5, %v38466_v52 }
 0x98e   : > { %v15545_v7 = vmax.f32 %v15414_v57, %v15475_v14  ;;  %v15546_v51 = vmax.f32 %v15415_v56, %v15477_v11  ;;  %v33915_v18 = vmax.f32 %v15570_v32, %v15477_v11  ;;  %v15480_v24 = vrot.slane %v33908_v49, 1 }
 0x98f   : > { %v15417_v12 = vmax.f32 %v15389_v8, 0.0  ;;  %v15392_v9 = vadd.f32 %v28709_v60, %v33795_v47  ;;  %v15391_v42 = vadd.f32 %v28710_v58, %v33795_v47  ;;  %v27423_v45 = vpop.f32.mrb[12].mxu0  ;;  %v15671_v43 = vand.u32 4294901760, %v33906_v55  ;;  %v38469_v58 = vld [vmem:[#allocation143_spill] sm:$0xff] }
 0x990   : > { %v28711_v48 = vadd.f32 %v27423_v45, %v38467_v31  ;;  %v15252_v19 = vpop.f32.mrb[13].mxu0  ;;  %v15569_v27 = vmax.f32 %v15543_v59, %v15414_v57  ;;  %v15571_v5 = vmax.f32 %v15545_v7, %v33898_v41  ;;  %v33924_v56 = vsub.f32 %v15655_v23, %v33891_v61 }
 0x991   : > { %v15478_v32 = vrot.slane %v15417_v12, 1  ;;  %v15572_v11 = vmax.f32 %v15546_v51, %v15417_v12  ;;  %v33926_v52 = vmax.f32 %v15392_v9, 0.0  ;;  %v15419_v8 = vmax.f32 %v15391_v42, 0.0 }
 0x992   : > { %38468 = vst [vmem:[#allocation54_spill] sm:$0xff] %v33924_v56  ;;  %v15394_v60 = vadd.f32 %v28711_v48, %v33795_v47  ;;  %v28712_v34 = vadd.f32 %v15252_v19, %v38469_v58  ;;  %v33930_v21 = vpack.c.bf16 %v15671_v43, %v15668_v46  ;;  %v33932_v25 = vsub.f32 %v15601_v44, %v15668_v46  ;;  %v38471_v48 = vld [vmem:[#allocation145_spill] sm:$0xff] }
 0x993   : > { %v33935_v57 = vsel %vm340_vm3, %v15476_v30, %v15478_v32  ;;  %v15481_v7 = vsel %vm340_vm3, %v15478_v32, %v15480_v24  ;;  %v15484_v23 = vrot.slane %v33926_v52, 1  ;;  %v15482_v59 = vrot.slane %v15419_v8, 1  ;;  %v27426_v51 = vpop.f32.mrb[14].mxu0 }
 0x994   : > { %38470 = vst [vmem:[#allocation56_spill] sm:$0xff] %v33930_v21  ;;  %v15548_v42 = vmax.f32 %v15417_v12, %v15481_v7  ;;  %v33941_v45 = vmax.f32 %v15572_v11, %v15481_v7  ;;  %v33943_v19 = vmax.f32 %v15394_v60, 0.0  ;;  %28431 = vmatpush1.bf16.msra.mxu1 %v33930_v21  ;;  %v15264_v44 = vpop.f32.mrb[15].mxu0  ;;  %v15393_v31 = vadd.f32 %v28712_v34, %v33795_v47 }
 0x995   : > { %v33947_v30 = vsel %vm340_vm3, %v15480_v24, %v15482_v59  ;;  %v15485_v46 = vsel %vm340_vm3, %v15482_v59, %v15484_v23  ;;  %v28713_v32 = vadd.f32 %v27426_v51, %v38471_v48  ;;  %28432 = vmatprep.subr.bf16.mxu1 %v37246_v28  ;;  %v38472_v24 = vld [vmem:[#allocation147_spill] sm:$0xff]  ;;  %v15604_v50 = vmax.f32 %v15569_v27, %v15475_v14  ;;  %v38473_v51 = vld [vmem:[#allocation149_spill] sm:$0xff] }
 0x996   : > { %v15550_v11 = vmax.f32 %v15419_v8, %v15485_v46  ;;  %v15574_v60 = vmax.f32 %v15548_v42, %v15419_v8  ;;  %v15488_v58 = vrot.slane %v33943_v19, 1  ;;  %v15421_v7 = vmax.f32 %v15393_v31, 0.0 }
 0x997   : > { %v15396_v29 = vadd.f32 %v28713_v32, %v33795_v47  ;;  %v28714_v26 = vadd.f32 %v15264_v44, %v38472_v24  ;;  %v27429_v59 = vpop.f32.mrb[16].mxu0  ;;  %v15674_v34 = vand.u32 4294901760, %v33901_v20  ;;  %v33963_v12 = vmax.f32 %v15571_v5, %v33935_v57 }
 0x998   : > { %v33958_v9 = vmax.f32 %v15574_v60, %v15485_v46  ;;  %v28715_v48 = vadd.f32 %v27429_v59, %v38473_v51  ;;  %v15276_v28 = vpop.f32.mrb[17].mxu0  ;;  %v15486_v8 = vrot.slane %v15421_v7, 1  ;;  %v15576_v42 = vmax.f32 %v15550_v11, %v15421_v7  ;;  %v38474_v46 = vld [vmem:[#allocation150_spill] sm:$0xff] }
 0x999   : > { %v33965_v17 = vmax.f32 %v15396_v29, 0.0  ;;  %v15395_v31 = vadd.f32 %v28714_v26, %v33795_v47  ;;  %v33969_v44 = vsub.f32 %v33906_v55, %v15671_v43  ;;  %v15677_v14 = vand.u32 4294901760, %v15604_v50 }
 0x99a   : > { %v15398_v27 = vadd.f32 %v28715_v48, %v33795_v47  ;;  %v28716_v32 = vadd.f32 %v15276_v28, %v38474_v46  ;;  %v33974_v60 = vsel %vm340_vm3, %v15484_v23, %v15486_v8  ;;  %v15489_v5 = vsel %vm340_vm3, %v15486_v8, %v15488_v58 }
 0x99b   : > { %v15492_v24 = vrot.slane %v33965_v17, 1  ;;  %v15423_v11 = vmax.f32 %v15395_v31, 0.0  ;;  %v27432_v29 = vpop.f32.mrb[18].mxu0  ;;  %v15552_v59 = vmax.f32 %v15421_v7, %v15489_v5  ;;  %v33980_v55 = vmax.f32 %v15576_v42, %v15489_v5  ;;  %v38476_v42 = vld [vmem:[#allocation156_spill] sm:$0xff] }
 0x99c   : > { %v33982_v43 = vpack.c.bf16 %v15677_v14, %v15674_v34  ;;  %v15288_v51 = vpop.f32.mrb[19].mxu0  ;;  %v33985_v28 = vsub.f32 %v33901_v20, %v15674_v34  ;;  %v33987_v23 = vmax.f32 %v15398_v27, 0.0  ;;  %v15397_v8 = vadd.f32 %v28716_v32, %v33795_v47 }
 0x99d   : > { %v15490_v48 = vrot.slane %v15423_v11, 1  ;;  %v15578_v46 = vmax.f32 %v15552_v59, %v15423_v11  ;;  %v15680_v31 = vand.u32 4294901760, %v33915_v18  ;;  %v15683_v7 = vand.u32 4294901760, %v33963_v12 }
 0x99e   : > { %38475 = vst [vmem:[#allocation315_spill] sm:$0xff] %v33982_v43  ;;  %28434 = vmatpush1.bf16.msra.mxu1 %v33982_v43  ;;  %v28717_v5 = vadd.f32 %v27432_v29, %v38476_v42  ;;  %v15496_v20 = vrot.slane %v33987_v23, 1  ;;  %v38477_v34 = vmov 0.0|0.0   ;;  %v15425_v27 = vmax.f32 %v15397_v8, 0.0 }
 0x99f   : > { %v33995_v26 = vsel %vm340_vm3, %v15488_v58, %v15490_v48  ;;  %v15493_v54 = vsel %vm340_vm3, %v15490_v48, %v15492_v24  ;;  %28435 = vmatprep.subr.bf16.mxu1 %v38477_v34  ;;  %v27435_v32 = vpop.f32.mrb[20].mxu0  ;;  %v34004_v43 = vpack.c.bf16 %v15683_v7, %v15680_v31  ;;  %v34006_v42 = vsub.f32 %v15604_v50, %v15677_v14 }
 0x9a0   : > { %v15554_v15 = vmax.f32 %v15423_v11, %v15493_v54  ;;  %v34002_v63 = vmax.f32 %v15578_v46, %v15493_v54  ;;  %v15300_v29 = vpop.f32.mrb[21].mxu0  ;;  %v15494_v58 = vrot.slane %v15425_v27, 1  ;;  %v15400_v48 = vadd.f32 %v28717_v5, %v33795_v47  ;;  %v38481_v46 = vld [vmem:[#allocation165_spill] sm:$0xff] }
 0x9a1   : > { %38478 = vst [vmem:[#allocation2_spill] sm:$0xff] %v34004_v43  ;;  %v28718_v37 = vadd.f32 %v15288_v51, %v38479_v22  ;;  %v38480_v8 = vmax.f32 %v33898_v41, %v33935_v57  ;;  %v15686_v54 = vand.u32 4294901760, %v33941_v45  ;;  %v28719_v59 = vadd.f32 %v27435_v32, %v38481_v46 }
 0x9a2   : > { %v15580_v21 = vmax.f32 %v15554_v15, %v15425_v27  ;;  %28437 = vmatpush1.bf16.msra.mxu1 %v34004_v43  ;;  %v34018_v50 = vsel %vm340_vm3, %v15492_v24, %v15494_v58  ;;  %v15497_v14 = vsel %vm340_vm3, %v15494_v58, %v15496_v20  ;;  %v34021_v5 = vmax.f32 %v15400_v48, 0.0 }
 0x9a3   : > { %v15573_v11 = vmax.f32 %v38480_v8, %v33908_v49  ;;  %28438 = vmatprep.subr.bf16.mxu1 %v38477_v34  ;;  %v15399_v22 = vadd.f32 %v28718_v37, %v33795_v47  ;;  %v27438_v15 = vpop.f32.mrb[22].mxu0  ;;  %v15556_v57 = vmax.f32 %v15425_v27, %v15497_v14  ;;  %v34031_v24 = vsub.f32 %v33915_v18, %v15680_v31  ;;  %v38484_v31 = vld [vmem:[#allocation171_spill] sm:$0xff] }
 0x9a4   : > { %v34027_v51 = vmax.f32 %v15580_v21, %v15497_v14  ;;  %v15312_v8 = vpop.f32.mrb[23].mxu0  ;;  %v15500_v58 = vrot.slane %v34021_v5, 1  ;;  %v15402_v46 = vadd.f32 %v28719_v59, %v33795_v47  ;;  %v34036_v37 = vsub.f32 %v33963_v12, %v15683_v7 }
 0x9a5   : > { %v15608_v32 = vmax.f32 %v15573_v11, %v33947_v30  ;;  %v15427_v48 = vmax.f32 %v15399_v22, 0.0  ;;  %v28720_v41 = vadd.f32 %v15300_v29, %v38482_v2  ;;  %v38483_v21 = vmax.f32 %v33908_v49, %v33947_v30 }
 0x9a6   : > { %v34043_v18 = vmax.f32 %v15402_v46, 0.0  ;;  %v28721_v0 = vadd.f32 %v27438_v15, %v38484_v31  ;;  %v34049_v12 = vsub.f32 %v33941_v45, %v15686_v54  ;;  %v15692_v15 = vand.u32 4294901760, %v33958_v9 }
 0x9a7   : > { %v15689_v43 = vand.u32 4294901760, %v15608_v32  ;;  %v15575_v27 = vmax.f32 %v38483_v21, %v33926_v52  ;;  %v15498_v11 = vrot.slane %v15427_v48, 1  ;;  %v15582_v14 = vmax.f32 %v15556_v57, %v15427_v48  ;;  %v27441_v22 = vpop.f32.mrb[24].mxu0  ;;  %v38486_v21 = vld [vmem:[#allocation174_spill] sm:$0xff] }
 0x9a8   : > { %v15401_v7 = vadd.f32 %v28720_v41, %v33795_v47  ;;  %v15324_v59 = vpop.f32.mrb[25].mxu0  ;;  %v15504_v29 = vrot.slane %v34043_v18, 1  ;;  %v34077_v39 = vsub.f32 %v33958_v9, %v15692_v15 }
 0x9a9   : > { %v34046_v61 = vpack.c.bf16 %v15689_v43, %v15686_v54  ;;  %v15610_v2 = vmax.f32 %v15575_v27, %v33974_v60  ;;  %v34054_v49 = vsel %vm340_vm3, %v15496_v20, %v15498_v11  ;;  %v15501_v30 = vsel %vm340_vm3, %v15498_v11, %v15500_v58 }
 0x9aa   : > { %v15558_v46 = vmax.f32 %v15427_v48, %v15501_v30  ;;  %v34061_v45 = vmax.f32 %v15582_v14, %v15501_v30  ;;  %v15429_v54 = vmax.f32 %v15401_v7, 0.0  ;;  %v15404_v20 = vadd.f32 %v28721_v0, %v33795_v47  ;;  %v38488_v30 = vld [vmem:[#allocation179_spill] sm:$0xff] }
 0x9ab   : > { %38485 = vst [vmem:[#allocation320_spill] sm:$0xff] %v34046_v61  ;;  %28440 = vmatpush1.bf16.msra.mxu1 %v34046_v61  ;;  %v15695_v41 = vand.u32 4294901760, %v15610_v2  ;;  %v28722_v27 = vadd.f32 %v15312_v8, %v38486_v21  ;;  %v38487_v11 = vmax.f32 %v33926_v52, %v33974_v60  ;;  %v27444_v40 = vpop.f32.mrb[26].mxu0  ;;  %v34071_v57 = vsub.f32 %v15608_v32, %v15689_v43 }
 0x9ac   : > { %28441 = vmatprep.subr.bf16.mxu1 %v38477_v34  ;;  %v15502_v48 = vrot.slane %v15429_v54, 1  ;;  %v15584_v14 = vmax.f32 %v15558_v46, %v15429_v54  ;;  %v28723_v61 = vadd.f32 %v27441_v22, %v38488_v30  ;;  %v15336_v7 = vpop.f32.mrb[27].mxu0  ;;  %v34079_v0 = vmax.f32 %v15404_v20, 0.0 }
 0x9ad   : > { %v15577_v31 = vmax.f32 %v38487_v11, %v33943_v19  ;;  %v34074_v16 = vpack.c.bf16 %v15695_v41, %v15692_v15  ;;  %v15403_v8 = vadd.f32 %v28722_v27, %v33795_v47  ;;  %v15698_v32 = vand.u32 4294901760, %v33980_v55  ;;  %v38490_v27 = vld [vmem:[#allocation112_spill] sm:$0xff] }
 0x9ae   : > { %v34083_v52 = vsel %vm340_vm3, %v15500_v58, %v15502_v48  ;;  %v15505_v60 = vsel %vm340_vm3, %v15502_v48, %v15504_v29  ;;  %v15508_v9 = vrot.slane %v34079_v0, 1  ;;  %v15406_v20 = vadd.f32 %v28723_v61, %v33795_v47 }
 0x9af   : > { %38489 = vst [vmem:[#allocation123_spill] sm:$0xff] %v34074_v16  ;;  %v15612_v43 = vmax.f32 %v15577_v31, %v33995_v26  ;;  %v15560_v46 = vmax.f32 %v15429_v54, %v15505_v60  ;;  %v34090_v21 = vmax.f32 %v15584_v14, %v15505_v60  ;;  %28443 = vmatpush1.bf16.msra.mxu1 %v34074_v16  ;;  %v15431_v58 = vmax.f32 %v15403_v8, 0.0  ;;  %v38492_v14 = vld [vmem:[#allocation8_spill] sm:$0xff]  ;;  %v38493_v60 = vld [vmem:[#allocation115_spill] sm:$0xff] }
 0x9b0   : > { %28444 = vmatprep.subr.bf16.mxu1 %v38477_v34  ;;  %v28724_v11 = vadd.f32 %v15324_v59, %v38490_v27  ;;  %v34097_v31 = vsub.f32 %v15610_v2, %v15695_v41  ;;  %v38491_v54 = vmax.f32 %v33943_v19, %v33995_v26  ;;  %v28725_v30 = vadd.f32 %v27444_v40, %v38492_v14 }
 0x9b1   : > { %v15701_v15 = vand.u32 4294901760, %v15612_v43  ;;  %v28726_v22 = vadd.f32 %v15336_v7, %v38493_v60  ;;  %v15506_v16 = vrot.slane %v15431_v58, 1  ;;  %v15586_v6 = vmax.f32 %v15560_v46, %v15431_v58 }
 0x9b2   : > { %v15579_v48 = vmax.f32 %v38491_v54, %v33965_v17  ;;  %v34108_v8 = vsub.f32 %v33980_v55, %v15698_v32  ;;  %v15434_v61 = vmax.f32 %v15406_v20, 0.0  ;;  %v15405_v2 = vadd.f32 %v28724_v11, %v33795_v47 }
 0x9b3   : > { %v34105_v4 = vpack.c.bf16 %v15701_v15, %v15698_v32  ;;  %v15704_v41 = vand.u32 4294901760, %v34002_v63  ;;  %v15507_v19 = vsel %vm340_vm3, %v15504_v29, %v15506_v16  ;;  %v15509_v40 = vsel %vm340_vm3, %v15506_v16, %v15508_v9 }
 0x9b4   : > { %v15614_v59 = vmax.f32 %v15579_v48, %v34018_v50  ;;  %v15408_v26 = vadd.f32 %v28725_v30, %v33795_v47  ;;  %v15407_v7 = vadd.f32 %v28726_v22, %v33795_v47  ;;  %v15561_v55 = vmax.f32 %v34043_v18, %v15507_v19 }
 0x9b5   : > { %38494 = vst [vmem:[#allocation31_spill] sm:$0xff] %v34105_v4  ;;  %28446 = vmatpush1.bf16.msra.mxu1 %v34105_v4  ;;  %v15562_v32 = vmax.f32 %v15431_v58, %v15509_v40  ;;  %v34119_v46 = vmax.f32 %v15586_v6, %v15509_v40  ;;  %v15512_v20 = vrot.slane %v15434_v61, 1  ;;  %v15433_v27 = vmax.f32 %v15405_v2, 0.0 }
 0x9b6   : > { %28447 = vmatprep.subr.bf16.mxu1 %v38477_v34  ;;  %v15707_v11 = vand.u32 4294901760, %v15614_v59  ;;  %v15436_v54 = vmax.f32 %v15408_v26, 0.0  ;;  %v15435_v29 = vmax.f32 %v15407_v7, 0.0  ;;  %v34122_v48 = vsub.f32 %v15612_v43, %v15701_v15 }
 0x9b7   : > { %v15565_v16 = vmax.f32 %v15434_v61, %v15512_v20  ;;  %v38495_v14 = vmax.f32 %v33965_v17, %v34018_v50  ;;  %v38496_v6 = vmax.f32 %v33987_v23, %v34054_v49  ;;  %v15510_v58 = vrot.slane %v15433_v27, 1 }
 0x9b8   : > { %v15588_v30 = vmax.f32 %v15562_v32, %v15433_v27  ;;  %v34132_v60 = vpack.c.bf16 %v15707_v11, %v15704_v41  ;;  %v34135_v2 = vsub.f32 %v34002_v63, %v15704_v41  ;;  %v15596_v15 = vrot.slane %v15436_v54, 1 }
 0x9b9   : > { %v15581_v47 = vmax.f32 %v38495_v14, %v33987_v23  ;;  %v15583_v22 = vmax.f32 %v38496_v6, %v34021_v5  ;;  %v15591_v43 = vmax.f32 %v15565_v16, %v15436_v54  ;;  %v15594_v40 = vrot.slane %v15435_v29, 1 }
 0x9ba   : > { %38497 = vst [vmem:[#allocation134_spill] sm:$0xff] %v34132_v60  ;;  %v15511_v17 = vsel %vm340_vm3, %v15508_v9, %v15510_v58  ;;  %28449 = vmatpush1.bf16.msra.mxu1 %v34132_v60  ;;  %v15513_v50 = vsel %vm340_vm3, %v15510_v58, %v15512_v20  ;;  %v15710_v23 = vand.u32 4294901760, %v34027_v51  ;;  %v34146_v54 = vsub.f32 %v15614_v59, %v15707_v11 }
 0x9bb   : > { %v15616_v26 = vmax.f32 %v15581_v47, %v34054_v49  ;;  %v15618_v7 = vmax.f32 %v15583_v22, %v34083_v52  ;;  %v15563_v32 = vmax.f32 %v34079_v0, %v15511_v17  ;;  %v15626_v14 = vmax.f32 %v15591_v43, %v15596_v15  ;;  %28450 = vmatprep.subr.bf16.mxu1 %v38477_v34 }
 0x9bc   : > { %v15564_v63 = vmax.f32 %v15433_v27, %v15513_v50  ;;  %v15595_v41 = vsel %vm340_vm3, %v15512_v20, %v15594_v40  ;;  %v15597_v49 = vsel %vm340_vm3, %v15594_v40, %v15596_v15  ;;  %v15623_v9 = vmax.f32 %v15588_v30, %v15513_v50 }
 0x9bd   : > { %v15713_v16 = vand.u32 4294901760, %v15616_v26  ;;  %v15589_v47 = vmax.f32 %v15563_v32, %v15434_v61  ;;  %v15716_v58 = vand.u32 4294901760, %v34061_v45  ;;  %v15719_v60 = vand.u32 4294901760, %v15618_v7 }
 0x9be   : > { %v15590_v6 = vmax.f32 %v15564_v63, %v15435_v29  ;;  %v34151_v22 = vsel %vm15663_vm5, %v15626_v14, 0  ;;  %v34156_v27 = vsub.f32 %v34027_v51, %v15710_v23  ;;  %v38499_v59 = vmax.f32 %v34021_v5, %v34083_v52 }
 0x9bf   : > { %v34153_v43 = vpack.c.bf16 %v15713_v16, %v15710_v23  ;;  %v34162_v11 = vmax.f32 %v15589_v47, %v15595_v41  ;;  %v34164_v29 = vsub.f32 %v15616_v26, %v15713_v16  ;;  %v34166_v30 = vpack.c.bf16 %v15719_v60, %v15716_v58 }
 0x9c0   : > { %v15585_v20 = vmax.f32 %v38499_v59, %v34043_v18  ;;  %v15625_v61 = vmax.f32 %v15590_v6, %v15597_v49  ;;  %v15722_v40 = vand.u32 4294901760, %v34090_v21  ;;  %v15587_v51 = vmax.f32 %v15561_v55, %v34079_v0 }
 0x9c1   : > { %38498 = vst [vmem:[#allocation135_spill] sm:$0xff] %v34153_v43  ;;  %38500 = vst [vmem:[#allocation139_spill] sm:$0xff] %v34166_v30  ;;  %28452 = vmatpush1.bf16.msra.mxu1 %v34153_v43  ;;  %v15728_v50 = vand.u32 4294901760, %v34119_v46  ;;  %v15734_v5 = vand.u32 4294901760, %v15623_v9  ;;  %v37301_v18 = vand.u32 4294901760, %v34162_v11  ;;  %v37293_v52 = vand.u32 4294901760, %v34151_v22 }
 0x9c2   : > { %v15620_v15 = vmax.f32 %v15585_v20, %v15507_v19  ;;  %v15740_v23 = vand.u32 4294901760, %v15625_v61  ;;  %28453 = vmatprep.subr.bf16.mxu1 %v38477_v34  ;;  %v34176_v26 = vsub.f32 %v34061_v45, %v15716_v58  ;;  %v34178_v32 = vsub.f32 %v15618_v7, %v15719_v60 }
 0x9c3   : > { %v15622_v14 = vmax.f32 %v15587_v51, %v15511_v17  ;;  %v34183_v0 = vsub.f32 %v34090_v21, %v15722_v40  ;;  %v34186_v55 = vsub.f32 %v34119_v46, %v15728_v50  ;;  %v34190_v41 = vpack.c.bf16 %v37301_v18, %v15734_v5 }
 0x9c4   : > { %v15725_v19 = vand.u32 4294901760, %v15620_v15  ;;  %v34180_v63 = vsub.f32 %v15625_v61, %v15740_v23  ;;  %v34195_v7 = vsub.f32 %v15623_v9, %v15734_v5  ;;  %v34199_v17 = vpack.c.bf16 %v37293_v52, %v15740_v23 }
 0x9c5   : > { %38501 = vst [vmem:[#allocation140_spill] sm:$0xff] %v34190_v41  ;;  %28455 = vmatpush1.bf16.msra.mxu1 %v34166_v30  ;;  %v15731_v60 = vand.u32 4294901760, %v15622_v14  ;;  %v37292_v46 = vand.u32 4294901760, %v33932_v25  ;;  %v37289_v49 = vand.u32 4294901760, %v33969_v44  ;;  %v37288_v16 = vand.u32 4294901760, %v33985_v28 }
 0x9c6   : > { %v34193_v45 = vpack.c.bf16 %v15725_v19, %v15722_v40  ;;  %38503 = vst [vmem:[#allocation45_spill] sm:$0xff] %v34199_v17  ;;  %28456 = vmatprep.subr.bf16.mxu1 %v38477_v34  ;;  %v34202_v21 = vsub.f32 %v15620_v15, %v15725_v19  ;;  %v37290_v9 = vand.u32 4294901760, %v34006_v42  ;;  %v37291_v58 = vand.u32 4294901760, %v34031_v24 }
 0x9c7   : > { %v34207_v47 = vpack.c.bf16 %v15731_v60, %v15728_v50  ;;  %v34209_v6 = vsub.f32 %v15622_v14, %v15731_v60  ;;  %v15867_v59 = vsub.f32 %v33932_v25, %v37292_v46  ;;  %v15874_v20 = vsub.f32 %v33969_v44, %v37289_v49 }
 0x9c8   : > { %38502 = vst [vmem:[#allocation41_spill] sm:$0xff] %v34193_v45  ;;  %v15881_v61 = vsub.f32 %v33985_v28, %v37288_v16  ;;  %v37294_v15 = vand.u32 4294901760, %v34036_v37  ;;  %v15888_v40 = vsub.f32 %v34006_v42, %v37290_v9  ;;  %v15895_v51 = vsub.f32 %v34031_v24, %v37291_v58 }
 0x9c9   : > { %38504 = vst [vmem:[#allocation148_spill] sm:$0xff] %v34207_v47  ;;  %28458 = vmatpush1.bf16.msra.mxu1 %v34193_v45  ;;  %v37295_v50 = vand.u32 4294901760, %v34049_v12  ;;  %v37300_v23 = vand.u32 4294901760, %v34071_v57  ;;  %v15868_v5 = vand.u32 4294901760, %v15867_v59  ;;  %v15875_v19 = vand.u32 4294901760, %v15874_v20 }
 0x9ca   : > { %28459 = vmatprep.subr.bf16.mxu1 %v38477_v34  ;;  %v15882_v14 = vand.u32 4294901760, %v15881_v61  ;;  %v15902_v60 = vsub.f32 %v34036_v37, %v37294_v15  ;;  %v15889_v16 = vand.u32 4294901760, %v15888_v40  ;;  %v15896_v49 = vand.u32 4294901760, %v15895_v51 }
 0x9cb   : > { %v15909_v9 = vsub.f32 %v34049_v12, %v37295_v50  ;;  %v15916_v58 = vsub.f32 %v34071_v57, %v37300_v23  ;;  %v28469_v46 = vpack.c.bf16 %v15875_v19, %v15868_v5  ;;  %v37296_v59 = vand.u32 4294901760, %v34077_v39 }
 0x9cc   : > { %v15903_v52 = vand.u32 4294901760, %v15902_v60  ;;  %v37297_v20 = vand.u32 4294901760, %v34097_v31  ;;  %v34245_v61 = vpack.c.bf16 %v15889_v16, %v15882_v14  ;;  %v37298_v15 = vand.u32 4294901760, %v34108_v8 }
 0x9cd   : > { %28461 = vmatpush1.bf16.msra.mxu1 %v34207_v47  ;;  %v15910_v40 = vand.u32 4294901760, %v15909_v9  ;;  %v15917_v51 = vand.u32 4294901760, %v15916_v58  ;;  %v15923_v5 = vsub.f32 %v34077_v39, %v37296_v59  ;;  %v37299_v60 = vand.u32 4294901760, %v34122_v48 }
 0x9ce   : > { %28462 = vmatprep.subr.bf16.mxu1 %v38477_v34  ;;  %v34249_v50 = vpack.c.bf16 %v15903_v52, %v15896_v49  ;;  %v15930_v19 = vsub.f32 %v34097_v31, %v37297_v20  ;;  %v15937_v9 = vsub.f32 %v34108_v8, %v37298_v15  ;;  %v37304_v58 = vand.u32 4294901760, %v34135_v2 }
 0x9cf   : > { %v34258_v16 = vpack.c.bf16 %v15917_v51, %v15910_v40  ;;  %v37305_v52 = vand.u32 4294901760, %v34146_v54  ;;  %v15924_v49 = vand.u32 4294901760, %v15923_v5  ;;  %v15944_v59 = vsub.f32 %v34122_v48, %v37299_v60 }
 0x9d0   : > { %v15931_v14 = vand.u32 4294901760, %v15930_v19  ;;  %v37306_v20 = vand.u32 4294901760, %v34156_v27  ;;  %v15938_v40 = vand.u32 4294901760, %v15937_v9  ;;  %v15951_v51 = vsub.f32 %v34135_v2, %v37304_v58 }
 0x9d1   : > { %28464 = vmatpush1.bf16.msra.mxu1 %v34190_v41  ;;  %v15958_v15 = vsub.f32 %v34146_v54, %v37305_v52  ;;  %v37307_v5 = vand.u32 4294901760, %v34164_v29  ;;  %v15945_v60 = vand.u32 4294901760, %v15944_v59  ;;  %v37312_v9 = vand.u32 4294901760, %v34176_v26 }
 0x9d2   : > { %28465 = vmatprep.subr.bf16.mxu1 %v38477_v34  ;;  %v34278_v19 = vpack.c.bf16 %v15931_v14, %v15924_v49  ;;  %v15965_v23 = vsub.f32 %v34156_v27, %v37306_v20  ;;  %v15952_v18 = vand.u32 4294901760, %v15951_v51  ;;  %v37313_v52 = vand.u32 4294901760, %v34178_v32  ;;  %v15635_v49 = vld [vmem:[%s36460_s3 + $0x40] sm:$0xff] }
 0x9d3   : > { %v15959_v41 = vand.u32 4294901760, %v15958_v15  ;;  %v15972_v58 = vsub.f32 %v34164_v29, %v37307_v5  ;;  %v34291_v14 = vpack.c.bf16 %v15945_v60, %v15938_v40  ;;  %v15979_v20 = vsub.f32 %v34176_v26, %v37312_v9 }
 0x9d4   : > { %v15966_v59 = vand.u32 4294901760, %v15965_v23  ;;  %v37316_v51 = vand.u32 4294901760, %v34183_v0  ;;  %v15986_v47 = vsub.f32 %v34178_v32, %v37313_v52  ;;  %v37321_v45 = vand.u32 4294901760, %v34202_v21 }
 0x9d5   : > { %28467 = vmatpush1.bf16.msra.mxu1 %v34199_v17  ;;  %v34298_v15 = vpack.c.bf16 %v15959_v41, %v15952_v18  ;;  %v15973_v5 = vand.u32 4294901760, %v15972_v58  ;;  %v15980_v23 = vand.u32 4294901760, %v15979_v20  ;;  %v34309_v9 = vand.u32 4294901760, %v15635_v49  ;;  %v15638_v18 = vld [vmem:[%s36460_s3 + $0x58] sm:$0xff] }
 0x9d6   : > { %28468 = vmatprep.subr.bf16.mxu1 %v38477_v34  ;;  %v15993_v60 = vsub.f32 %v34183_v0, %v37316_v51  ;;  %v15987_v58 = vand.u32 4294901760, %v15986_v47  ;;  %v16000_v52 = vsub.f32 %v34202_v21, %v37321_v45  ;;  %v37323_v20 = vand.u32 4294901760, %v34186_v55 }
 0x9d7   : > { %38505 = vst [vmem:[#allocation151_spill] sm:$0xff] %v34309_v9  ;;  %v34314_v41 = vpack.c.bf16 %v15973_v5, %v15966_v59  ;;  %v38506_v17 = vand.u32 4294901760, %v34162_v11  ;;  %v38507_v40 = vand.u32 4294901760, %v33801_v33  ;;  %v34328_v43 = vsub.f32 %v15635_v49, %v34309_v9  ;;  %v15637_v5 = vld [vmem:[%s36460_s3 + $0x50] sm:$0xff] }
 0x9d8   : > { %v15994_v30 = vand.u32 4294901760, %v15993_v60  ;;  %v37322_v47 = vand.u32 4294901760, %v34209_v6  ;;  %v38509_v59 = vand.u32 4294901760, %v33813_v35  ;;  %v34336_v45 = vpack.c.bf16 %v15987_v58, %v15980_v23  ;;  %v15640_v23 = vld [vmem:[%s36460_s3 + $0x68] sm:$0x1] }
 0x9d9   : > { %v34323_v51 = vsub.f32 %v34162_v11, %v38506_v17  ;;  %15768 = vmatmul.mubr.f32.vlgmr.msra.gmra.mrb[28].mxu1 %v38507_v40  ;;  %38508 = vst [vmem:[#allocation157_spill] sm:$0xff] %v34328_v43  ;;  %v16001_v11 = vand.u32 4294901760, %v16000_v52  ;;  %v16007_v33 = vsub.f32 %v34186_v55, %v37323_v20  ;;  %v15658_v17 = vsel %vm15641_vm4, %v15638_v18, 0  ;;  %v15639_v40 = vld [vmem:[%s36460_s3 + $0x60] sm:$0x1] }
 0x9da   : > { %28470 = vmatpush1.bf16.msra.mxu1 %v28469_v46  ;;  %15777 = vmatprep.mubr.f32.mxu1 %v38509_v59  ;;  %v38510_v49 = vand.u32 4294901760, %v34151_v22  ;;  %v16014_v35 = vsub.f32 %v34209_v6, %v37322_v47  ;;  %v34352_v52 = vand.u32 4294901760, %v15658_v17  ;;  %v38511_v18 = vand.u32 4294901760, %v33924_v56 }
 0x9db   : > { %28471 = vmatprep.subr.bf16.mxu1 %v38477_v34  ;;  %v34365_v59 = vand.u32 4294901760, %v15637_v5  ;;  %v38512_v47 = vand.u32 4294901760, %v33826_v1  ;;  %v16008_v20 = vand.u32 4294901760, %v16007_v33  ;;  %v37331_v9 = vand.u32 4294901760, %v34323_v51 }
 0x9dc   : > { %v34345_v60 = vsub.f32 %v34151_v22, %v38510_v49  ;;  %v34360_v22 = vpack.c.bf16 %v16001_v11, %v15994_v30  ;;  %v15820_v58 = vsub.f32 %v33924_v56, %v38511_v18  ;;  %v37328_v49 = vand.u32 4294901760, %v34195_v7 }
 0x9dd   : > { %15783 = vmatmul.mubr.f32.gmra.mrb[30].mxu1 %v38512_v47  ;;  %v16015_v46 = vand.u32 4294901760, %v16014_v35  ;;  %v34371_v4 = vsub.f32 %v15658_v17, %v34352_v52  ;;  %v38514_v30 = vand.u32 4294901760, %v33840_v38  ;;  %v34378_v11 = vsub.f32 %v15637_v5, %v34365_v59 }
 0x9de   : > { %28473 = vmatpush1.bf16.msra.mxu1 %v34245_v61  ;;  %v16021_v1 = vsub.f32 %v34195_v7, %v37328_v49  ;;  %v15661_v47 = vsel %vm15641_vm4, %v15640_v23, 0  ;;  %v34384_v33 = vand.u32 4294901760, %v15639_v40  ;;  %v38516_v17 = vand.u32 4294901760, %v34328_v43 }
 0x9df   : > { %38513 = vst [vmem:[#allocation160_spill] sm:$0xff] %v34371_v4  ;;  %15792 = vmatprep.mubr.f32.mxu1 %v38514_v30  ;;  %38515 = vst [vmem:[#allocation163_spill] sm:$0xff] %v34378_v11  ;;  %28474 = vmatprep.subr.bf16.mxu1 %v38477_v34  ;;  %v34390_v35 = vpack.c.bf16 %v16015_v46, %v16008_v20  ;;  %v37332_v38 = vand.u32 4294901760, %v34371_v4  ;;  %v16028_v5 = vsub.f32 %v34323_v51, %v37331_v9 }
 0x9e0   : > { %v15826_v61 = vsub.f32 %v34328_v43, %v38516_v17  ;;  %v16022_v30 = vand.u32 4294901760, %v16021_v1  ;;  %v34397_v23 = vand.u32 4294901760, %v15661_v47  ;;  %v34400_v49 = vsub.f32 %v15639_v40, %v34384_v33 }
 0x9e1   : > { %v38517_v56 = vand.u32 4294901760, %v33851_v62  ;;  %v15835_v20 = vsub.f32 %v34371_v4, %v37332_v38  ;;  %v16029_v46 = vand.u32 4294901760, %v16028_v5  ;;  %v16034_v17 = vand.u32 4294901760, %v34180_v63 }
 0x9e2   : > { %v16041_v9 = vand.u32 4294901760, %v34345_v60  ;;  %28476 = vmatpush1.bf16.msra.mxu1 %v34249_v50  ;;  %v38518_v1 = vand.u32 4294901760, %v33872_v3  ;;  %v15821_v18 = vand.u32 4294901760, %v15820_v58  ;;  %v38519_v40 = vand.u32 4294901760, %v34378_v11 }
 0x9e3   : > { %15798 = vmatmul.mubr.f32.gmra.mrb[32].mxu1 %v38517_v56  ;;  %v34416_v56 = vsub.f32 %v15661_v47, %v34397_v23  ;;  %28477 = vmatprep.subr.bf16.mxu1 %v38477_v34  ;;  %v15827_v38 = vand.u32 4294901760, %v15826_v61  ;;  %v28502_v4 = vpack.c.bf16 %v16029_v46, %v16022_v30  ;;  %v16035_v50 = vsub.f32 %v34180_v63, %v16034_v17 }
 0x9e4   : > { %15807 = vmatprep.mubr.f32.mxu1 %v38518_v1  ;;  %v15841_v62 = vsub.f32 %v34378_v11, %v38519_v40  ;;  %v16042_v3 = vsub.f32 %v34345_v60, %v16041_v9  ;;  %v15836_v1 = vand.u32 4294901760, %v15835_v20  ;;  %v37340_v43 = vand.u32 4294901760, %v34400_v49 }
 0x9e5   : > { %v37339_v58 = vand.u32 4294901760, %v34416_v56  ;;  %v38520_v40 = vand.u32 4294901760, %v33881_v36  ;;  %v16036_v5 = vand.u32 4294901760, %v16035_v50  ;;  %v38525_v50 = vand.u32 4294901760, %v34031_v24 }
 0x9e6   : > { %v16043_v11 = vand.u32 4294901760, %v16042_v3  ;;  %28479 = vmatpush1.bf16.msra.mxu1 %v34258_v16  ;;  %v15842_v20 = vand.u32 4294901760, %v15841_v62  ;;  %v15856_v62 = vsub.f32 %v34400_v49, %v37340_v43  ;;  %v38521_v16 = vand.u32 4294901760, %v33932_v25 }
 0x9e7   : > { %15813 = vmatmul.mubr.f32.gmra.mrb[34].mxu1 %v38520_v40  ;;  %v15850_v46 = vsub.f32 %v34416_v56, %v37339_v58  ;;  %28480 = vmatprep.subr.bf16.mxu1 %v38477_v34  ;;  %v38523_v43 = vand.u32 4294901760, %v33985_v28  ;;  %v38524_v58 = vand.u32 4294901760, %v34006_v42  ;;  %v38527_v30 = vand.u32 4294901760, %v34049_v12 }
 0x9e8   : > { %15822 = vmatprep.mubr.f32.mxu1 %v15821_v18  ;;  %v28505_v3 = vpack.c.bf16 %v16043_v11, %v16036_v5  ;;  %v38522_v18 = vand.u32 4294901760, %v33969_v44  ;;  %v38526_v11 = vand.u32 4294901760, %v34036_v37  ;;  %v38530_v61 = vand.u32 4294901760, %v34077_v39 }
 0x9e9   : > { %v34469_v36 = vpack.c.bf16 %v38524_v58, %v38523_v43  ;;  %v15851_v5 = vand.u32 4294901760, %v15850_v46  ;;  %v38531_v43 = vand.u32 4294901760, %v34097_v31  ;;  %v38533_v47 = vand.u32 4294901760, %v34108_v8 }
 0x9ea   : > { %v34463_v40 = vpack.c.bf16 %v38522_v18, %v38521_v16  ;;  %28482 = vmatpush1.bf16.msra.mxu1 %v34278_v19  ;;  %v38528_v16 = vand.u32 4294901760, %v34071_v57  ;;  %v38536_v19 = vand.u32 4294901760, %v34135_v2  ;;  %v38539_v46 = vand.u32 4294901760, %v34156_v27 }
 0x9eb   : > { %15828 = vmatmul.mubr.f32.gmra.mrb[36].mxu1 %v15827_v38  ;;  %v34475_v38 = vpack.c.bf16 %v38526_v11, %v38525_v50  ;;  %v34488_v58 = vpack.c.bf16 %v38531_v43, %v38530_v61  ;;  %v38534_v50 = vand.u32 4294901760, %v34122_v48  ;;  %28483 = vmatprep.subr.bf16.mxu1 %v38477_v34  ;;  %v38542_v43 = vand.u32 4294901760, %v34176_v26 }
 0x9ec   : > { %15837 = vmatprep.mubr.f32.mxu1 %v15836_v1  ;;  %v34482_v18 = vpack.c.bf16 %v38528_v16, %v38527_v30  ;;  %v38537_v1 = vand.u32 4294901760, %v34146_v54  ;;  %v38540_v16 = vand.u32 4294901760, %v34164_v29 }
 0x9ed   : > { %38532 = vst [vmem:[#allocation168_spill] sm:$0xff] %v34488_v58  ;;  %v34494_v11 = vpack.c.bf16 %v38534_v50, %v38533_v47  ;;  %v38543_v58 = vand.u32 4294901760, %v34178_v32  ;;  %v38544_v50 = vand.u32 4294901760, %v34183_v0 }
 0x9ee   : > { %38529 = vst [vmem:[#allocation166_spill] sm:$0xff] %v34482_v18  ;;  %v34501_v30 = vpack.c.bf16 %v38537_v1, %v38536_v19  ;;  %v34507_v61 = vpack.c.bf16 %v38540_v16, %v38539_v46  ;;  %v38546_v19 = vand.u32 4294901760, %v34186_v55  ;;  %v38547_v1 = vand.u32 4294901760, %v34209_v6  ;;  %28485 = vmatpush1.bf16.msra.mxu1 %v34291_v14  ;;  %v38553_v14 = vld [vmem:[#allocation24_spill] sm:$0xff] }
 0x9ef   : > { %38535 = vst [vmem:[#allocation172_spill] sm:$0xff] %v34494_v11  ;;  %v34513_v47 = vpack.c.bf16 %v38543_v58, %v38542_v43  ;;  %v38545_v11 = vand.u32 4294901760, %v34202_v21  ;;  %v38548_v46 = vand.u32 4294901760, %v34195_v7  ;;  %v38549_v16 = vand.u32 4294901760, %v34323_v51  ;;  %15843 = vmatmul.mubr.f32.gmra.mrb[38].mxu1 %v15842_v20  ;;  %28486 = vmatprep.subr.bf16.mxu1 %v38477_v34  ;;  %v38585_v20 = vld [vmem:[#allocation160_spill] sm:$0xff] }
 0x9f0   : > { %38538 = vst [vmem:[#allocation175_spill] sm:$0xff] %v34501_v30  ;;  %38541 = vst [vmem:[#allocation176_spill] sm:$0xff] %v34507_v61  ;;  %v34525_v30 = vpack.c.bf16 %v38547_v1, %v38546_v19  ;;  %v34533_v58 = vpack.c.bf16 %v16041_v9, %v16034_v17  ;;  %v15857_v43 = vand.u32 4294901760, %v15856_v62  ;;  %15852 = vmatprep.mubr.f32.mxu1 %v15851_v5  ;;  %v38551_v9 = vld [vmem:[#allocation10_spill] sm:$0xff]  ;;  %v38584_v17 = vld [vmem:[#allocation123_spill] sm:$0xff] }
 0x9f1   : > { %v34519_v18 = vpack.c.bf16 %v38545_v11, %v38544_v50  ;;  %v34531_v61 = vpack.c.bf16 %v38549_v16, %v38548_v46  ;;  %v38587_v62 = vld [vmem:[#allocation31_spill] sm:$0xff]  ;;  %v38588_v5 = vld [vmem:[#allocation134_spill] sm:$0xff]  ;;  %v38592_v1 = vld [vmem:[#allocation41_spill] sm:$0xff] }
 0x9f2   : > { %28488 = vmatpush1.bf16.msra.mxu1 %v34298_v15  ;;  %v38554_v15 = vld [vmem:[#allocation29_spill] sm:$0xff]  ;;  %v38590_v50 = vld [vmem:[#allocation135_spill] sm:$0xff]  ;;  %v38593_v46 = vld [vmem:[#allocation148_spill] sm:$0xff] }
 0x9f3   : > { %15858 = vmatmul.mubr.f32.gmra.mrb[40].mxu1 %v15857_v43  ;;  %28489 = vmatprep.subr.bf16.mxu1 %v38477_v34  ;;  %v38591_v19 = vld [vmem:[#allocation139_spill] sm:$0xff]  ;;  %v38594_v16 = vld [vmem:[#allocation140_spill] sm:$0xff]  ;;  %v38595_v43 = vld [vmem:[#allocation45_spill] sm:$0xff] }
 0x9f4   : > { %16058 = vmatprep.mubr.f32.mxu1 %v33744_v53 }
 0x9f6   : > { %28491 = vmatpush1.bf16.msra.mxu1 %v34314_v41  ;;  %v38557_v41 = vld [vmem:[#allocation40_spill] sm:$0xff] }
 0x9f7   : > { %28492 = vmatprep.subr.bf16.mxu1 %v38477_v34 }
 0x9fa   : > { %28494 = vmatpush1.bf16.msra.mxu1 %v34336_v45  ;;  %v38550_v45 = vpack.c.bf16 %v33969_v44, %v33932_v25  ;;  %v38555_v25 = vpack.c.bf16 %v34036_v37, %v34031_v24  ;;  %v38556_v44 = vld [vmem:[#allocation37_spill] sm:$0xff]  ;;  %v38561_v24 = vpack.c.bf16 %v34097_v31, %v34077_v39  ;;  %v38562_v37 = vpack.c.bf16 %v34122_v48, %v34108_v8 }
 0x9fb   : > { %28495 = vmatprep.subr.bf16.mxu1 %v38477_v34  ;;  %v38563_v39 = vpack.c.bf16 %v34146_v54, %v34135_v2  ;;  %v38566_v31 = vpack.c.bf16 %v34178_v32, %v34176_v26  ;;  %v38567_v8 = vpack.c.bf16 %v34202_v21, %v34183_v0  ;;  %v38568_v48 = vpack.c.bf16 %v34209_v6, %v34186_v55  ;;  %v38573_v26 = vld [vmem:[#allocation19_spill] sm:$0xff]  ;;  %v38574_v32 = vld [vmem:[#allocation21_spill] sm:$0xff]  ;;  %v38576_v55 = vld [vmem:[#allocation30_spill] sm:$0xff] }
 0x9fc   : > { %v38569_v2 = vpack.c.bf16 %v34323_v51, %v34195_v7  ;;  %v38570_v54 = vpack.c.bf16 %v34345_v60, %v34180_v63  ;;  %v38575_v0 = vld [vmem:[#allocation315_spill] sm:$0xff]  ;;  %v38578_v7 = vld [vmem:[#allocation2_spill] sm:$0xff]  ;;  %v38580_v6 = vld [vmem:[#allocation48_spill] sm:$0xff] }
 0x9fd   : > { %v38577_v63 = vld [vmem:[#allocation35_spill] sm:$0xff]  ;;  %v38581_v51 = vld [vmem:[#allocation320_spill] sm:$0xff]  ;;  %v38582_v60 = vld [vmem:[#allocation54_spill] sm:$0xff] }
 0x9fe   : > { %28497 = vmatpush1.bf16.msra.mxu1 %v34360_v22  ;;  %v38560_v22 = vld [vmem:[#allocation151_spill] sm:$0xff] }
 0x9ff   : > { %28498 = vmatprep.subr.bf16.mxu1 %v38477_v34  ;;  %v38579_v21 = vld [vmem:[#allocation43_spill] sm:$0xff] }
 0xa02   : > { %28500 = vmatpush1.bf16.msra.mxu1 %v34390_v35  ;;  %v38583_v35 = vld [vmem:[#allocation157_spill] sm:$0xff] }
 0xa03   : > { %28501 = vmatprep.subr.bf16.mxu1 %v38477_v34 }
 0xa06   : > { %28503 = vmatpush1.bf16.msra.mxu1 %v28502_v4  ;;  %v38552_v4 = vpack.c.bf16 %v34006_v42, %v33985_v28  ;;  %v38558_v28 = vpack.c.bf16 %v34071_v57, %v34049_v12  ;;  %v38559_v42 = vld [vmem:[#allocation49_spill] sm:$0xff]  ;;  %v38564_v12 = vld [vmem:[#allocation16_spill] sm:$0xff]  ;;  %v38565_v57 = vpack.c.bf16 %v34164_v29, %v34156_v27  ;;  %v38571_v27 = vld [vmem:[#allocation114_spill] sm:$0xff] }
 0xa07   : > { %28504 = vmatprep.subr.bf16.mxu1 %v38477_v34  ;;  %v38572_v29 = vld [vmem:[#allocation56_spill] sm:$0xff]  ;;  %v38589_v11 = vand.u32 4294901760, %v38564_v12 }
 0xa0a   : > { %28506 = vmatpush1.bf16.msra.mxu1 %v28505_v3  ;;  %v38586_v3 = vld [vmem:[#allocation163_spill] sm:$0xff] }
 0xa0b   : > { %28507 = vmatprep.subr.bf16.mxu1 %v38477_v34 }
 0xa0d   : > { %16060 = vmatmul.mubr.f32.vlgmr.msra.gmra.mrb[28].mxu1 %v33756_v13 }
 0xa0e   : > { %28509 = vmatpush1.bf16.msra.mxu1 %v38550_v45  ;;  %16065 = vmatprep.mubr.f32.mxu1 %v33768_v10  ;;  %v38596_v45 = vand.u32 4294901760, %v38571_v27 }
 0xa0f   : > { %28510 = vmatprep.subr.bf16.mxu1 %v38477_v34 }
 0xa11   : > { %16067 = vmatmul.mubr.f32.gmra.mrb[30].mxu1 %v38551_v9 }
 0xa12   : > { %28512 = vmatpush1.bf16.msra.mxu1 %v38552_v4  ;;  %16072 = vmatprep.mubr.f32.mxu1 %v38553_v14  ;;  %v38597_v4 = vand.u32 4294901760, %v38573_v26 }
 0xa13   : > { %28513 = vmatprep.subr.bf16.mxu1 %v38477_v34 }
 0xa15   : > { %16074 = vmatmul.mubr.f32.gmra.mrb[32].mxu1 %v38554_v15 }
 0xa16   : > { %28515 = vmatpush1.bf16.msra.mxu1 %v38555_v25  ;;  %16079 = vmatprep.mubr.f32.mxu1 %v38556_v44  ;;  %v38598_v25 = vand.u32 4294901760, %v38574_v32 }
 0xa17   : > { %28516 = vmatprep.subr.bf16.mxu1 %v38477_v34 }
 0xa19   : > { %16081 = vmatmul.mubr.f32.gmra.mrb[34].mxu1 %v38557_v41 }
 0xa1a   : > { %28518 = vmatpush1.bf16.msra.mxu1 %v38558_v28  ;;  %16086 = vmatprep.mubr.f32.mxu1 %v38559_v42  ;;  %v38599_v28 = vand.u32 4294901760, %v38576_v55 }
 0xa1b   : > { %28519 = vmatprep.subr.bf16.mxu1 %v38477_v34 }
 0xa1d   : > { %16088 = vmatmul.mubr.f32.gmra.mrb[36].mxu1 %v38560_v22 }
 0xa1e   : > { %28521 = vmatpush1.bf16.msra.mxu1 %v38561_v24  ;;  %16093 = vmatprep.mubr.f32.mxu1 %v34352_v52  ;;  %v38600_v24 = vand.u32 4294901760, %v38577_v63 }
 0xa1f   : > { %28522 = vmatprep.subr.bf16.mxu1 %v38477_v34 }
 0xa21   : > { %16095 = vmatmul.mubr.f32.gmra.mrb[38].mxu1 %v34365_v59 }
 0xa22   : > { %28524 = vmatpush1.bf16.msra.mxu1 %v38562_v37  ;;  %16100 = vmatprep.mubr.f32.mxu1 %v34397_v23  ;;  %v38602_v37 = vand.u32 4294901760, %v38580_v6 }
 0xa23   : > { %28525 = vmatprep.subr.bf16.mxu1 %v38477_v34 }
 0xa25   : > { %16102 = vmatmul.mubr.f32.gmra.mrb[40].mxu1 %v34384_v33 }
 0xa26   : > { %28527 = vmatpush1.bf16.msra.mxu1 %v38563_v39  ;;  %16225 = vmatprep.mubr.f32.mxu1 %v38564_v12  ;;  %v38603_v39 = vld [vmem:[#allocation166_spill] sm:$0xff]  ;;  %v38605_v12 = vand.u32 4294901760, %v38583_v35 }
 0xa27   : > { %28528 = vmatprep.subr.bf16.mxu1 %v38477_v34 }
 0xa2a   : > { %28530 = vmatpush1.bf16.msra.mxu1 %v38565_v57  ;;  %v38606_v57 = vld [vmem:[#allocation168_spill] sm:$0xff] }
 0xa2b   : > { %28531 = vmatprep.subr.bf16.mxu1 %v38477_v34 }
 0xa2e   : > { %28533 = vmatpush1.bf16.msra.mxu1 %v38566_v31  ;;  %v38608_v31 = vand.u32 4294901760, %v38586_v3 }
 0xa2f   : > { %28534 = vmatprep.subr.bf16.mxu1 %v38477_v34 }
 0xa32   : > { %28536 = vmatpush1.bf16.msra.mxu1 %v38567_v8  ;;  %v38609_v8 = vld [vmem:[#allocation172_spill] sm:$0xff] }
 0xa33   : > { %28537 = vmatprep.subr.bf16.mxu1 %v38477_v34 }
 0xa36   : > { %28539 = vmatpush1.bf16.msra.mxu1 %v38568_v48  ;;  %v38610_v48 = vand.u32 4294901760, %v34416_v56 }
 0xa37   : > { %28540 = vmatprep.subr.bf16.mxu1 %v38477_v34 }
 0xa3a   : > { %28542 = vmatpush1.bf16.msra.mxu1 %v38569_v2  ;;  %v38611_v2 = vand.u32 4294901760, %v34400_v49 }
 0xa3b   : > { %28543 = vmatprep.subr.bf16.mxu1 %v38477_v34 }
 0xa3e   : > { %28545 = vmatpush1.bf16.msra.mxu1 %v38570_v54  ;;  %v38612_v54 = vld [vmem:[#allocation175_spill] sm:$0xff] }
 0xa3f   : > { %28546 = vmatprep.subr.bf16.mxu1 %v38477_v34 }
 0xa41   : > { %16228 = vmatmul.mubr.f32.vlgmr.msra.gmra.mrb[28].mxu1 %v38571_v27  ;;  %v38613_v27 = vld [vmem:[#allocation176_spill] sm:$0xff] }
 0xa42   : > { %28548 = vmatpush1.bf16.msra.mxu1 %v38572_v29  ;;  %16234 = vmatprep.mubr.f32.mxu1 %v38573_v26 }
 0xa43   : > { %28549 = vmatprep.subr.bf16.mxu1 %v38477_v34 }
 0xa45   : > { %16237 = vmatmul.mubr.f32.gmra.mrb[30].mxu1 %v38574_v32 }
 0xa46   : > { %28551 = vmatpush1.bf16.msra.mxu1 %v38575_v0  ;;  %16243 = vmatprep.mubr.f32.mxu1 %v38576_v55 }
 0xa47   : > { %28552 = vmatprep.subr.bf16.mxu1 %v38477_v34 }
 0xa49   : > { %16246 = vmatmul.mubr.f32.gmra.mrb[32].mxu1 %v38577_v63 }
 0xa4a   : > { %28554 = vmatpush1.bf16.msra.mxu1 %v38578_v7  ;;  %16252 = vmatprep.mubr.f32.mxu1 %v38579_v21 }
 0xa4b   : > { %28555 = vmatprep.subr.bf16.mxu1 %v38477_v34 }
 0xa4d   : > { %16255 = vmatmul.mubr.f32.gmra.mrb[34].mxu1 %v38580_v6 }
 0xa4e   : > { %28557 = vmatpush1.bf16.msra.mxu1 %v38581_v51  ;;  %16261 = vmatprep.mubr.f32.mxu1 %v38582_v60 }
 0xa4f   : > { %28558 = vmatprep.subr.bf16.mxu1 %v38477_v34 }
 0xa51   : > { %16264 = vmatmul.mubr.f32.gmra.mrb[36].mxu1 %v38583_v35 }
 0xa52   : > { %28560 = vmatpush1.bf16.msra.mxu1 %v38584_v17  ;;  %16270 = vmatprep.mubr.f32.mxu1 %v38585_v20 }
 0xa53   : > { %28561 = vmatprep.subr.bf16.mxu1 %v38477_v34 }
 0xa55   : > { %16273 = vmatmul.mubr.f32.gmra.mrb[38].mxu1 %v38586_v3 }
 0xa56   : > { %28563 = vmatpush1.bf16.msra.mxu1 %v38587_v62  ;;  %16279 = vmatprep.mubr.f32.mxu1 %v34416_v56 }
 0xa57   : > { %28564 = vmatprep.subr.bf16.mxu1 %v38477_v34 }
 0xa59   : > { %16282 = vmatmul.mubr.f32.gmra.mrb[40].mxu1 %v34400_v49 }
 0xa5a   : > { %28566 = vmatpush1.bf16.msra.mxu1 %v38588_v5  ;;  %16380 = vmatprep.mubr.f32.mxu1 %v38589_v11 }
 0xa5b   : > { %28567 = vmatprep.subr.bf16.mxu1 %v38477_v34 }
 0xa5e   : > { %28569 = vmatpush1.bf16.msra.mxu1 %v38590_v50 }
 0xa5f   : > { %28570 = vmatprep.subr.bf16.mxu1 %v38477_v34 }
 0xa62   : > { %28572 = vmatpush1.bf16.msra.mxu1 %v38591_v19 }
 0xa63   : > { %28573 = vmatprep.subr.bf16.mxu1 %v38477_v34 }
 0xa66   : > { %28575 = vmatpush1.bf16.msra.mxu1 %v38592_v1 }
 0xa67   : > { %28576 = vmatprep.subr.bf16.mxu1 %v38477_v34 }
 0xa6a   : > { %28578 = vmatpush1.bf16.msra.mxu1 %v38593_v46 }
 0xa6b   : > { %28579 = vmatprep.subr.bf16.mxu1 %v38477_v34 }
 0xa6e   : > { %28581 = vmatpush1.bf16.msra.mxu1 %v38594_v16 }
 0xa6f   : > { %28582 = vmatprep.subr.bf16.mxu1 %v38477_v34 }
 0xa72   : > { %28584 = vmatpush1.bf16.msra.mxu1 %v38595_v43 }
 0xa73   : > { %28585 = vmatprep.subr.bf16.mxu1 %v38477_v34 }
 0xa75   : > { %16384 = vmatmul.mubr.f32.vlgmr.msra.gmra.mrb[28].mxu1 %v38596_v45 }
 0xa76   : > { %28587 = vmatpush1.bf16.msra.mxu1 %v34463_v40  ;;  %16391 = vmatprep.mubr.f32.mxu1 %v38597_v4  ;;  %v38601_v40 = vand.u32 4294901760, %v38579_v21 }
 0xa77   : > { %28588 = vmatprep.subr.bf16.mxu1 %v38477_v34 }
 0xa79   : > { %16395 = vmatmul.mubr.f32.gmra.mrb[30].mxu1 %v38598_v25 }
 0xa7a   : > { %28590 = vmatpush1.bf16.msra.mxu1 %v34469_v36  ;;  %16402 = vmatprep.mubr.f32.mxu1 %v38599_v28  ;;  %v38604_v36 = vand.u32 4294901760, %v38582_v60 }
 0xa7b   : > { %28591 = vmatprep.subr.bf16.mxu1 %v38477_v34 }
 0xa7d   : > { %16406 = vmatmul.mubr.f32.gmra.mrb[32].mxu1 %v38600_v24 }
 0xa7e   : > { %28593 = vmatpush1.bf16.msra.mxu1 %v34475_v38  ;;  %16413 = vmatprep.mubr.f32.mxu1 %v38601_v40  ;;  %v38607_v38 = vand.u32 4294901760, %v38585_v20 }
 0xa7f   : > { %28594 = vmatprep.subr.bf16.mxu1 %v38477_v34 }
 0xa81   : > { %16417 = vmatmul.mubr.f32.gmra.mrb[34].mxu1 %v38602_v37 }
 0xa82   : > { %28596 = vmatpush1.bf16.msra.mxu1 %v38603_v39  ;;  %16424 = vmatprep.mubr.f32.mxu1 %v38604_v36 }
 0xa83   : > { %28597 = vmatprep.subr.bf16.mxu1 %v38477_v34 }
 0xa85   : > { %16428 = vmatmul.mubr.f32.gmra.mrb[36].mxu1 %v38605_v12 }
 0xa86   : > { %28599 = vmatpush1.bf16.msra.mxu1 %v38606_v57  ;;  %16435 = vmatprep.mubr.f32.mxu1 %v38607_v38 }
 0xa87   : > { %28600 = vmatprep.subr.bf16.mxu1 %v38477_v34 }
 0xa89   : > { %16439 = vmatmul.mubr.f32.gmra.mrb[38].mxu1 %v38608_v31 }
 0xa8a   : > { %28602 = vmatpush1.bf16.msra.mxu1 %v38609_v8  ;;  %16446 = vmatprep.mubr.f32.mxu1 %v38610_v48 }
 0xa8b   : > { %28603 = vmatprep.subr.bf16.mxu1 %v38477_v34 }
 0xa8d   : > { %16450 = vmatmul.mubr.f32.gmra.mrb[40].mxu1 %v38611_v2 }
 0xa8e   : > { %28605 = vmatpush1.bf16.msra.mxu1 %v38612_v54  ;;  %16598 = vmatprep.mubr.f32.mxu1 %v33744_v53 }
 0xa8f   : > { %28606 = vmatprep.subr.bf16.mxu1 %v38477_v34 }
 0xa92   : > { %28608 = vmatpush1.bf16.msra.mxu1 %v38613_v27 }
 0xa93   : > { %28609 = vmatprep.subr.bf16.mxu1 %v38477_v34 }
 0xa96   : > { %28611 = vmatpush1.bf16.msra.mxu1 %v34513_v47 }
 0xa97   : > { %28612 = vmatprep.subr.bf16.mxu1 %v38477_v34 }
 0xa9a   : > { %28614 = vmatpush1.bf16.msra.mxu1 %v34519_v18 }
 0xa9b   : > { %28615 = vmatprep.subr.bf16.mxu1 %v38477_v34 }
 0xa9e   : > { %28617 = vmatpush1.bf16.msra.mxu1 %v34525_v30 }
 0xa9f   : > { %28618 = vmatprep.subr.bf16.mxu1 %v38477_v34 }
 0xaa2   : > { %28620 = vmatpush1.bf16.msra.mxu1 %v34531_v61 }
 0xaa3   : > { %28621 = vmatprep.subr.bf16.mxu1 %v38477_v34 }
 0xaa6   : > { %28623 = vmatpush1.bf16.msra.mxu1 %v34533_v58 }
 0xaa7   : > { %28624 = vmatprep.subr.bf16.mxu1 %v38477_v34 }
 0xaa9   : > { %16600 = vmatmul.mubr.f32.vlgmr.msra.gmra.mrb[28].mxu1 %v33756_v13 }
 0xaaa   : > { %28626 = vmatpush1.bf16.msra.mxu1 %v38572_v29  ;;  %16605 = vmatprep.mubr.f32.mxu1 %v33768_v10 }
 0xaab   : > { %28627 = vmatprep.subr.bf16.mxu1 %v38477_v34 }
 0xaad   : > { %16607 = vmatmul.mubr.f32.gmra.mrb[30].mxu1 %v38551_v9 }
 0xaae   : > { %28629 = vmatpush1.bf16.msra.mxu1 %v38575_v0  ;;  %16612 = vmatprep.mubr.f32.mxu1 %v38553_v14 }
 0xaaf   : > { %28630 = vmatprep.subr.bf16.mxu1 %v38477_v34 }
 0xab1   : > { %16614 = vmatmul.mubr.f32.gmra.mrb[32].mxu1 %v38554_v15 }
 0xab2   : > { %28632 = vmatpush1.bf16.msra.mxu1 %v38578_v7  ;;  %16619 = vmatprep.mubr.f32.mxu1 %v38556_v44 }
 0xab3   : > { %28633 = vmatprep.subr.bf16.mxu1 %v38477_v34 }
 0xab5   : > { %16621 = vmatmul.mubr.f32.gmra.mrb[34].mxu1 %v38557_v41 }
 0xab6   : > { %28635 = vmatpush1.bf16.msra.mxu1 %v38581_v51  ;;  %16626 = vmatprep.mubr.f32.mxu1 %v38559_v42 }
 0xab7   : > { %28636 = vmatprep.subr.bf16.mxu1 %v38477_v34 }
 0xab9   : > { %16628 = vmatmul.mubr.f32.gmra.mrb[36].mxu1 %v38560_v22 }
 0xaba   : > { %28638 = vmatpush1.bf16.msra.mxu1 %v38584_v17  ;;  %16633 = vmatprep.mubr.f32.mxu1 %v34352_v52 }
 0xabb   : > { %28639 = vmatprep.subr.bf16.mxu1 %v38477_v34 }
 0xabd   : > { %16635 = vmatmul.mubr.f32.gmra.mrb[38].mxu1 %v34365_v59 }
 0xabe   : > { %28641 = vmatpush1.bf16.msra.mxu1 %v38587_v62  ;;  %16640 = vmatprep.mubr.f32.mxu1 %v34397_v23 }
 0xabf   : > { %28642 = vmatprep.subr.bf16.mxu1 %v38477_v34 }
 0xac1   : > { %16642 = vmatmul.mubr.f32.gmra.mrb[40].mxu1 %v34384_v33 }
 0xac2   : > { %28644 = vmatpush1.bf16.msra.mxu1 %v38588_v5  ;;  %16738 = vmatprep.mubr.f32.mxu1 %v33744_v53  ;;  %v37347_v53 = vmov 0.0  }
 0xac3   : > { %28645 = vmatprep.subr.bf16.mxu1 %v38477_v34 }
 0xac6   : > { %28647 = vmatpush1.bf16.msra.mxu1 %v38590_v50 }
 0xac7   : > { %28648 = vmatprep.subr.bf16.mxu1 %v38477_v34 }
 0xaca   : > { %28650 = vmatpush1.bf16.msra.mxu1 %v38591_v19 }
 0xacb   : > { %28651 = vmatprep.subr.bf16.mxu1 %v38477_v34 }
 0xace   : > { %28653 = vmatpush1.bf16.msra.mxu1 %v38592_v1 }
 0xacf   : > { %28654 = vmatprep.subr.bf16.mxu1 %v38477_v34 }
 0xad2   : > { %28656 = vmatpush1.bf16.msra.mxu1 %v38593_v46 }
 0xad3   : > { %28657 = vmatprep.subr.bf16.mxu1 %v38477_v34 }
 0xad6   : > { %28659 = vmatpush1.bf16.msra.mxu1 %v38594_v16 }
 0xad7   : > { %28660 = vmatprep.subr.bf16.mxu1 %v38477_v34 }
 0xada   : > { %28662 = vmatpush1.bf16.msra.mxu1 %v38595_v43 }
 0xadb   : > { %27445 = vmatprep.subr.mxu1 %v37347_v53 }
 0xadd   : > { %16740 = vmatmul.mubr.f32.vlgmr.msra.gmra.mrb[28].mxu1 %v33756_v13  ;;  %v23137_v13 = vld [vmem:[%s36461_s4 + $0x8] sm:$0xff] }
 0xade   : > { %16745 = vmatprep.mubr.f32.mxu1 %v33768_v10  ;;  %v34766_v10 = vand.u32 4294901760, %v23137_v13 }
 0xae0   : > { %27446 = vmatpush3.msra.mxu1 %v34766_v10  ;;  %v34778_v18 = vsub.f32 %v23137_v13, %v34766_v10 }
 0xae1   : > { %16747 = vmatmul.mubr.f32.gmra.mrb[30].mxu1 %v38551_v9  ;;  %27462 = vmatprep.subr.mxu1 %v37347_v53 }
 0xae2   : > { %16752 = vmatprep.mubr.f32.mxu1 %v38553_v14  ;;  %v16934_v29 = vand.u32 4294901760, %v34778_v18 }
 0xae4   : > { %v16935_v50 = vsub.f32 %v34778_v18, %v16934_v29 }
 0xae5   : > { %16754 = vmatmul.mubr.f32.gmra.mrb[32].mxu1 %v38554_v15 }
 0xae6   : > { %16759 = vmatprep.mubr.f32.mxu1 %v38556_v44  ;;  %v16936_v40 = vand.u32 4294901760, %v16935_v50 }
 0xae9   : > { %16761 = vmatmul.mubr.f32.gmra.mrb[34].mxu1 %v38557_v41 }
 0xaea   : > { %16766 = vmatprep.mubr.f32.mxu1 %v38559_v42 }
 0xaed   : > { %16768 = vmatmul.mubr.f32.gmra.mrb[36].mxu1 %v38560_v22 }
 0xaee   : > { %16773 = vmatprep.mubr.f32.mxu1 %v34352_v52 }
 0xaf1   : > { %16775 = vmatmul.mubr.f32.gmra.mrb[38].mxu1 %v34365_v59 }
 0xaf2   : > { %16780 = vmatprep.mubr.f32.mxu1 %v34397_v23 }
 0xaf5   : > { %16782 = vmatmul.mubr.f32.gmra.mrb[40].mxu1 %v34384_v33 }
 0xaf6   : > { %27447 = vmatprep.mubr.msk.f32.mxu1 %vm30324_vm6, %v37347_v53 }
 0xbb0   : > { %v16741_v52 = vpop.f32.mrb[28].mxu1 }
 0xbb1   : > { %v34773_v59 = vsel %vm16804_vm7, %v16741_v52, 0  ;;  %v16743_v49 = vpop.f32.mrb[29].mxu1  ;;  %v16795_v33 = vrot.slane %v16741_v52, 1  ;;  %v18063_v23 = vrot.slane %v16741_v52, 2  ;;  %v18708_v30 = vrot.slane %v16741_v52, 7 }
 0xbb4   : > { %v34775_v56 = vpop.f32.mrb[30].mxu1 }
 0xbb5   : > { %v16796_v61 = vrot.slane %v34775_v56, 1  ;;  %v18064_v47 = vrot.slane %v34775_v56, 2  ;;  %v18709_v58 = vrot.slane %v34775_v56, 7  ;;  %v16750_v9 = vpop.f32.mrb[31].mxu1  ;;  %v34785_v14 = vsel %vm16804_vm7, %v34775_v56, 0 }
 0xbb6   : > { %v20612_v0 = vrot.slane %v34775_v56, 6 }
 0xbb7   : > { %v16797_v15 = vsel %vm340_vm3, %v16795_v33, %v16796_v61  ;;  %v18065_v44 = vsel %vm3732_vm1, %v18063_v23, %v18064_v47  ;;  %v18710_v41 = vsel %vm18707_vm8, %v18708_v30, %v18709_v58 }
 0xbb8   : > { %v34794_v42 = vpop.f32.mrb[32].mxu1  ;;  %v16805_v22 = vsel %vm16804_vm7, %v16797_v15, 0  ;;  %v34799_v26 = vsel %vm16804_vm7, %v18065_v44, 0  ;;  %v34802_v32 = vsel %vm16804_vm7, %v18710_v41, 0 }
 0xbb9   : > { %v16798_v55 = vrot.slane %v34794_v42, 1  ;;  %v34808_v63 = vsel %vm16804_vm7, %v34794_v42, 0  ;;  %v20613_v7 = vrot.slane %v34794_v42, 6  ;;  %v16757_v21 = vpop.f32.mrb[33].mxu1  ;;  %v34811_v6 = vand.u32 4294901760, %v16805_v22 }
 0xbbb   : > { %v20614_v51 = vsel %vm20611_vm9, %v20612_v0, %v20613_v7  ;;  %v16799_v60 = vsel %vm340_vm3, %v16796_v61, %v16798_v55  ;;  %v34823_v20 = vsub.f32 %v16805_v22, %v34811_v6 }
 0xbbc   : > { %v34818_v35 = vsel %vm16804_vm7, %v20614_v51, 0  ;;  %v34820_v17 = vpop.f32.mrb[34].mxu1  ;;  %v16807_v3 = vsel %vm16804_vm7, %v16799_v60, 0 }
 0xbbd   : > { %38614 = vst [vmem:[#allocation183_spill] sm:$0xff] %v34818_v35  ;;  %v16800_v62 = vrot.slane %v34820_v17, 1  ;;  %v34829_v5 = vsel %vm16804_vm7, %v34820_v17, 0  ;;  %v16764_v11 = vpop.f32.mrb[35].mxu1  ;;  %v16883_v19 = vand.u32 4294901760, %v34823_v20  ;;  %v34835_v1 = vand.u32 4294901760, %v16807_v3 }
 0xbbf   : > { %v16801_v46 = vsel %vm340_vm3, %v16798_v55, %v16800_v62  ;;  %v16884_v43 = vsub.f32 %v34823_v20, %v16883_v19  ;;  %v34844_v45 = vsub.f32 %v16807_v3, %v34835_v1 }
 0xbc0   : > { %v34838_v16 = vpop.f32.mrb[36].mxu1  ;;  %v16809_v4 = vsel %vm16804_vm7, %v16801_v46, 0 }
 0xbc1   : > { %v16802_v25 = vrot.slane %v34838_v16, 1  ;;  %v34850_v28 = vsel %vm16804_vm7, %v34838_v16, 0  ;;  %v16771_v24 = vpop.f32.mrb[37].mxu1  ;;  %v16885_v37 = vand.u32 4294901760, %v16884_v43  ;;  %v34853_v39 = vand.u32 4294901760, %v34844_v45 }
 0xbc2   : > { %v34855_v36 = vand.u32 4294901760, %v16809_v4  ;;  %v20617_v57 = vrot.slane %v34838_v16, 6  ;;  %v18715_v49 = vrot.slane %v34838_v16, 7 }
 0xbc3   : > { %38615 = vst [vmem:[#allocation187_spill] sm:$0xff] %v34853_v39  ;;  %v16803_v12 = vsel %vm340_vm3, %v16800_v62, %v16802_v25  ;;  %27448 = vmatmul.mubr.f32.vlgmr.msra.gmra.mrb[42].mxu1 %v16885_v37  ;;  %v16894_v31 = vsub.f32 %v34844_v45, %v34853_v39  ;;  %v16813_v51 = vsel %vm16804_vm7, %v16802_v25, 0  ;;  %v18711_v37 = vrot.slane %v34794_v42, 7 }
 0xbc4   : > { %v16776_v38 = vpop.f32.mrb[38].mxu1  ;;  %v34862_v8 = vsub.f32 %v16809_v4, %v34855_v36  ;;  %v16811_v48 = vsel %vm16804_vm7, %v16803_v12, 0  ;;  %27450 = vmatprep.mubr.msk.f32.mxu1 %vm30324_vm6, %v37347_v53  ;;  %27463 = vmatpush3.msra.mxu1 %v16936_v40  ;;  %v34914_v46 = vand.u32 4294901760, %v16813_v51  ;;  %v18066_v12 = vrot.slane %v34794_v42, 2 }
 0xbc5   : > { %v34866_v2 = vsel %vm16804_vm7, %v16776_v38, 0  ;;  %v19980_v54 = vrot.slane %v16776_v38, 1  ;;  %v20619_v27 = vrot.slane %v16776_v38, 6  ;;  %v21256_v13 = vrot.slane %v16776_v38, 7  ;;  %v16778_v52 = vpop.f32.mrb[39].mxu1  ;;  %27479 = vmatprep.subr.mxu1 %v37347_v53 }
 0xbc6   : > { %v34871_v33 = vand.u32 4294901760, %v16894_v31  ;;  %v34892_v22 = vand.u32 4294901760, %v34862_v8  ;;  %v34894_v0 = vand.u32 4294901760, %v16811_v48  ;;  %v18070_v52 = vrot.slane %v34838_v16, 2 }
 0xbc7   : > { %v19981_v23 = vsel %vm340_vm3, %v16802_v25, %v19980_v54  ;;  %v34876_v30 = vsel %vm16804_vm7, %v19980_v54, 0  ;;  %v20620_v61 = vsel %vm20611_vm9, %v20617_v57, %v20619_v27  ;;  %v34882_v9 = vsel %vm16804_vm7, %v20619_v27, 0 }
 0xbc8   : > { %38616 = vst [vmem:[#allocation11_spill] sm:$0xff] %v34882_v9  ;;  %v34885_v15 = vsel %vm16804_vm7, %v19981_v23, 0  ;;  %v34888_v44 = vsel %vm16804_vm7, %v20620_v61, 0  ;;  %27451 = vmatmul.mubr.f32.gmra.mrb[44].mxu1 %v34871_v33  ;;  %v16783_v41 = vpop.f32.mrb[40].mxu1  ;;  %38618 = vst [vmem:[#allocation190_spill] sm:$0xff] %v34892_v22  ;;  %v21257_v55 = vsel %vm18707_vm8, %v18715_v49, %v21256_v13  ;;  %v34904_v3 = vsel %vm16804_vm7, %v21256_v13, 0 }
 0xbc9   : > { %38617 = vst [vmem:[#allocation20_spill] sm:$0xff] %v34888_v44  ;;  %v16785_v21 = vpop.f32.mrb[41].mxu1  ;;  %27453 = vmatprep.mubr.msk.f32.mxu1 %vm30324_vm6, %v37347_v53  ;;  %v34901_v60 = vsel %vm16804_vm7, %v21257_v55, 0  ;;  %38620 = vst [vmem:[#allocation195_spill] sm:$0xff] %v34904_v3  ;;  %v34907_v62 = vsel %vm16804_vm7, %v16783_v41, 0  ;;  %v16904_v11 = vsub.f32 %v34862_v8, %v34892_v22  ;;  %v34912_v50 = vsub.f32 %v16811_v48, %v34894_v0 }
 0xbca   : > { %38619 = vst [vmem:[#allocation193_spill] sm:$0xff] %v34901_v60  ;;  %38621 = vst [vmem:[#allocation291_spill] sm:$0xff] %v34907_v62  ;;  %v34922_v25 = vsub.f32 %v16813_v51, %v34914_v46  ;;  %v18067_v48 = vsel %vm3732_vm1, %v18064_v47, %v18066_v12  ;;  %v18068_v54 = vrot.slane %v34820_v17, 2  ;;  %v18713_v27 = vrot.slane %v34820_v17, 7 }
 0xbcb   : > { %v34916_v43 = vand.u32 4294901760, %v16904_v11  ;;  %v34919_v4 = vand.u32 4294901760, %v34912_v50  ;;  %v34944_v13 = vsel %vm16804_vm7, %v18067_v48, 0  ;;  %v18712_v47 = vsel %vm18707_vm8, %v18709_v58, %v18711_v37 }
 0xbcc   : > { %v16923_v40 = vand.u32 4294901760, %v34922_v25  ;;  %v18069_v23 = vsel %vm3732_vm1, %v18066_v12, %v18068_v54  ;;  %v18071_v55 = vsel %vm3732_vm1, %v18068_v54, %v18070_v52  ;;  %v34958_v21 = vsel %vm16804_vm7, %v18070_v52, 0 }
 0xbcd   : > { %38622 = vst [vmem:[#allocation197_spill] sm:$0xff] %v34919_v4  ;;  %27454 = vmatmul.mubr.f32.gmra.mrb[46].mxu1 %v34916_v43  ;;  %v16914_v24 = vsub.f32 %v34912_v50, %v34919_v4  ;;  %v34954_v41 = vsel %vm16804_vm7, %v18069_v23, 0  ;;  %v34961_v51 = vsel %vm16804_vm7, %v18071_v55, 0  ;;  %v34964_v11 = vsel %vm16804_vm7, %v18712_v47, 0 }
 0xbce   : > { %27456 = vmatprep.mubr.msk.f32.mxu1 %vm30324_vm6, %v37347_v53  ;;  %v16924_v31 = vsub.f32 %v34922_v25, %v16923_v40  ;;  %v18714_v56 = vsel %vm18707_vm8, %v18711_v37, %v18713_v27  ;;  %v20615_v37 = vrot.slane %v34820_v17, 6  ;;  %v35070_v42 = vand.u32 4294901760, %v34773_v59 }
 0xbcf   : > { %v34932_v38 = vand.u32 4294901760, %v16914_v24  ;;  %v34970_v58 = vsel %vm16804_vm7, %v18714_v56, 0  ;;  %v18716_v24 = vsel %vm18707_vm8, %v18713_v27, %v18715_v49 }
 0xbd0   : > { %v16925_v61 = vand.u32 4294901760, %v16924_v31  ;;  %v34975_v12 = vsel %vm16804_vm7, %v18716_v24, 0  ;;  %v34983_v31 = vsel %vm16804_vm7, %v18715_v49, 0  ;;  %v20616_v48 = vsel %vm20611_vm9, %v20613_v7, %v20615_v37 }
 0xbd1   : > { %27457 = vmatmul.mubr.f32.gmra.mrb[48].mxu1 %v34932_v38  ;;  %v34995_v54 = vsel %vm16804_vm7, %v20616_v48, 0  ;;  %v20618_v17 = vsel %vm20611_vm9, %v20615_v37, %v20617_v57 }
 0xbd2   : > { %27459 = vmatprep.mubr.msk.f32.mxu1 %vm30324_vm6, %v37347_v53  ;;  %38623 = vst [vmem:[#allocation294_spill] sm:$0xff] %v34995_v54  ;;  %v35002_v49 = vsel %vm16804_vm7, %v20618_v17, 0 }
 0xbd3   : > { %38624 = vst [vmem:[#allocation198_spill] sm:$0xff] %v35002_v49  ;;  %v38626_v49 = vmov 0.0  }
 0xbd5   : > { %27460 = vmatmul.mubr.f32.gmra.mrb[50].mxu1 %v16925_v61 }
 0xbd6   : > { %27464 = vmatprep.mubr.msk.f32.mxu1 %vm30324_vm6, %v37347_v53 }
 0xbd9   : > { %27465 = vmatmul.mubr.f32.vlgmr.msra.gmra.mrb[52].mxu1 %v34811_v6 }
 0xbda   : > { %27467 = vmatprep.mubr.msk.f32.mxu1 %vm30324_vm6, %v37347_v53  ;;  %27480 = vmatpush3.msra.mxu1 %v34778_v18 }
 0xbdb   : > { %27496 = vmatprep.subr.mxu1 %v37347_v53 }
 0xbdd   : > { %27468 = vmatmul.mubr.f32.gmra.mrb[54].mxu1 %v34835_v1 }
 0xbde   : > { %27470 = vmatprep.mubr.msk.f32.mxu1 %vm30324_vm6, %v37347_v53 }
 0xbe1   : > { %27471 = vmatmul.mubr.f32.gmra.mrb[56].mxu1 %v34855_v36 }
 0xbe2   : > { %27473 = vmatprep.mubr.msk.f32.mxu1 %vm30324_vm6, %v37347_v53 }
 0xbe5   : > { %27474 = vmatmul.mubr.f32.gmra.mrb[58].mxu1 %v34894_v0 }
 0xbe6   : > { %27476 = vmatprep.mubr.msk.f32.mxu1 %vm30324_vm6, %v37347_v53 }
 0xbe9   : > { %27477 = vmatmul.mubr.f32.gmra.mrb[60].mxu1 %v34914_v46 }
 0xbea   : > { %27481 = vmatprep.mubr.msk.f32.mxu1 %vm30324_vm6, %v37347_v53 }
 0xbed   : > { %27482 = vmatmul.mubr.f32.vlgmr.msra.gmra.mrb[62].mxu1 %v34823_v20 }
 0xbee   : > { %27484 = vmatprep.mubr.msk.f32.mxu1 %vm30324_vm6, %v37347_v53  ;;  %27497 = vmatpush3.msra.mxu1 %v34766_v10 }
 0xbef   : > { %27513 = vmatprep.subr.mxu1 %v37347_v53 }
 0xbf1   : > { %27485 = vmatmul.mubr.f32.gmra.mrb[64].mxu1 %v34844_v45 }
 0xbf2   : > { %27487 = vmatprep.mubr.msk.f32.mxu1 %vm30324_vm6, %v37347_v53 }
 0xbf5   : > { %27488 = vmatmul.mubr.f32.gmra.mrb[66].mxu1 %v34862_v8 }
 0xbf6   : > { %27490 = vmatprep.mubr.msk.f32.mxu1 %vm30324_vm6, %v37347_v53 }
 0xbf9   : > { %27491 = vmatmul.mubr.f32.gmra.mrb[68].mxu1 %v34912_v50 }
 0xbfa   : > { %27493 = vmatprep.mubr.msk.f32.mxu1 %vm30324_vm6, %v37347_v53 }
 0xbfd   : > { %27494 = vmatmul.mubr.f32.gmra.mrb[70].mxu1 %v34922_v25 }
 0xbfe   : > { %27498 = vmatprep.mubr.msk.f32.mxu1 %vm30324_vm6, %v37347_v53 }
 0xc01   : > { %27499 = vmatmul.mubr.f32.vlgmr.msra.gmra.mrb[72].mxu1 %v16883_v19 }
 0xc02   : > { %27501 = vmatprep.mubr.msk.f32.mxu1 %vm30324_vm6, %v37347_v53  ;;  %27514 = vmatpush3.msra.mxu1 %v16934_v29  ;;  %v35079_v29 = vsub.f32 %v34773_v59, %v35070_v42  ;;  %v35095_v59 = vand.u32 4294901760, %v34808_v63 }
 0xc03   : > { %27530 = vmatprep.subr.mxu1 %v37347_v53 }
 0xc04   : > { %v17511_v20 = vand.u32 4294901760, %v35079_v29 }
 0xc05   : > { %27502 = vmatmul.mubr.f32.gmra.mrb[74].mxu1 %v34853_v39 }
 0xc06   : > { %27504 = vmatprep.mubr.msk.f32.mxu1 %vm30324_vm6, %v37347_v53  ;;  %v17512_v57 = vsub.f32 %v35079_v29, %v17511_v20 }
 0xc08   : > { %v17513_v52 = vand.u32 4294901760, %v17512_v57 }
 0xc09   : > { %27505 = vmatmul.mubr.f32.gmra.mrb[76].mxu1 %v34892_v22 }
 0xc0a   : > { %27507 = vmatprep.mubr.msk.f32.mxu1 %vm30324_vm6, %v37347_v53 }
 0xc0d   : > { %27508 = vmatmul.mubr.f32.gmra.mrb[78].mxu1 %v34919_v4 }
 0xc0e   : > { %27510 = vmatprep.mubr.msk.f32.mxu1 %vm30324_vm6, %v37347_v53 }
 0xc11   : > { %27511 = vmatmul.mubr.f32.gmra.mrb[80].mxu1 %v16923_v40  ;;  %v35112_v40 = vsub.f32 %v34808_v63, %v35095_v59  ;;  %v35128_v63 = vand.u32 4294901760, %v34850_v28 }
 0xc12   : > { %27515 = vmatprep.mubr.msk.f32.mxu1 %vm30324_vm6, %v37347_v53 }
 0xc13   : > { %v35133_v55 = vand.u32 4294901760, %v35112_v40 }
 0xc15   : > { %27516 = vmatmul.mubr.f32.vlgmr.msra.gmra.mrb[82].mxu1 %v34811_v6  ;;  %v17532_v56 = vsub.f32 %v35112_v40, %v35133_v55 }
 0xc16   : > { %27518 = vmatprep.mubr.msk.f32.mxu1 %vm30324_vm6, %v37347_v53  ;;  %27531 = vmatpush3.msra.mxu1 %v34766_v10  ;;  %v16787_v10 = vld [vmem:[%s36461_s4] sm:$0xff] }
 0xc17   : > { %27547 = vmatprep.subr.mxu1 %v37347_v53  ;;  %v35066_v18 = vand.u32 4294901760, %v16787_v10  ;;  %v35152_v37 = vand.u32 4294901760, %v17532_v56 }
 0xc19   : > { %27519 = vmatmul.mubr.f32.gmra.mrb[84].mxu1 %v34835_v1  ;;  %v35084_v7 = vsub.f32 %v16787_v10, %v35066_v18 }
 0xc1a   : > { %27521 = vmatprep.mubr.msk.f32.mxu1 %vm30324_vm6, %v37347_v53 }
 0xc1b   : > { %v17562_v19 = vand.u32 4294901760, %v35084_v7 }
 0xc1d   : > { %27522 = vmatmul.mubr.f32.gmra.mrb[86].mxu1 %v34855_v36  ;;  %v17563_v25 = vsub.f32 %v35084_v7, %v17562_v19 }
 0xc1e   : > { %27524 = vmatprep.mubr.msk.f32.mxu1 %vm30324_vm6, %v37347_v53 }
 0xc1f   : > { %v17564_v23 = vand.u32 4294901760, %v17563_v25 }
 0xc21   : > { %27525 = vmatmul.mubr.f32.gmra.mrb[88].mxu1 %v34894_v0 }
 0xc22   : > { %27527 = vmatprep.mubr.msk.f32.mxu1 %vm30324_vm6, %v37347_v53 }
 0xc25   : > { %27528 = vmatmul.mubr.f32.gmra.mrb[90].mxu1 %v34914_v46 }
 0xc26   : > { %27532 = vmatprep.mubr.msk.f32.mxu1 %vm30324_vm6, %v37347_v53 }
 0xc29   : > { %27533 = vmatmul.mubr.f32.vlgmr.msra.gmra.mrb[92].mxu1 %v34811_v6  ;;  %v35087_v6 = vand.u32 4294901760, %v34785_v14 }
 0xc2a   : > { %27535 = vmatprep.mubr.msk.f32.mxu1 %vm30324_vm6, %v37347_v53  ;;  %27548 = vmatpush3.msra.mxu1 %v35066_v18 }
 0xc2b   : > { %27564 = vmatprep.subr.mxu1 %v37347_v53  ;;  %v35099_v16 = vsub.f32 %v34785_v14, %v35087_v6  ;;  %v35115_v14 = vand.u32 4294901760, %v34829_v5 }
 0xc2d   : > { %27536 = vmatmul.mubr.f32.gmra.mrb[94].mxu1 %v34835_v1  ;;  %v35118_v27 = vand.u32 4294901760, %v35099_v16  ;;  %v35125_v47 = vsub.f32 %v34829_v5, %v35115_v14 }
 0xc2e   : > { %27538 = vmatprep.mubr.msk.f32.mxu1 %vm30324_vm6, %v37347_v53 }
 0xc2f   : > { %v17522_v61 = vsub.f32 %v35099_v16, %v35118_v27  ;;  %v35146_v24 = vand.u32 4294901760, %v35125_v47 }
 0xc31   : > { %27539 = vmatmul.mubr.f32.gmra.mrb[96].mxu1 %v34855_v36  ;;  %v35141_v5 = vand.u32 4294901760, %v17522_v61  ;;  %v35254_v61 = vand.u32 4294901760, %v34799_v26 }
 0xc32   : > { %27541 = vmatprep.mubr.msk.f32.mxu1 %vm30324_vm6, %v37347_v53 }
 0xc35   : > { %27542 = vmatmul.mubr.f32.gmra.mrb[98].mxu1 %v34894_v0 }
 0xc36   : > { %27544 = vmatprep.mubr.msk.f32.mxu1 %vm30324_vm6, %v37347_v53 }
 0xc39   : > { %27545 = vmatmul.mubr.f32.gmra.mrb[100].mxu1 %v34914_v46  ;;  %v35139_v46 = vsub.f32 %v34850_v28, %v35128_v63  ;;  %v17542_v28 = vsub.f32 %v35125_v47, %v35146_v24 }
 0xc3a   : > { %27549 = vmatprep.mubr.msk.f32.mxu1 %vm30324_vm6, %v37347_v53 }
 0xc3b   : > { %v35157_v48 = vand.u32 4294901760, %v35139_v46  ;;  %v35162_v17 = vand.u32 4294901760, %v17542_v28 }
 0xc3d   : > { %27550 = vmatmul.mubr.f32.vlgmr.msra.gmra.mrb[102].mxu1 %v17513_v52  ;;  %38625 = vst [vmem:[#allocation202_spill] sm:$0xff] %v35162_v17  ;;  %v17552_v10 = vsub.f32 %v35139_v46, %v35157_v48 }
 0xc3e   : > { %27552 = vmatprep.mubr.msk.f32.mxu1 %vm30324_vm6, %v37347_v53  ;;  %27565 = vmatpush3.msra.mxu1 %v17564_v23 }
 0xc3f   : > { %27581 = vmatprep.subr.mxu1 %v37347_v53  ;;  %v35169_v57 = vand.u32 4294901760, %v17552_v10 }
 0xc41   : > { %27553 = vmatmul.mubr.f32.gmra.mrb[104].mxu1 %v35141_v5 }
 0xc42   : > { %27555 = vmatprep.mubr.msk.f32.mxu1 %vm30324_vm6, %v37347_v53 }
 0xc45   : > { %27556 = vmatmul.mubr.f32.gmra.mrb[106].mxu1 %v35152_v37 }
 0xc46   : > { %27558 = vmatprep.mubr.msk.f32.mxu1 %vm30324_vm6, %v37347_v53 }
 0xc49   : > { %27559 = vmatmul.mubr.f32.gmra.mrb[108].mxu1 %v35162_v17 }
 0xc4a   : > { %27561 = vmatprep.mubr.msk.f32.mxu1 %vm30324_vm6, %v37347_v53 }
 0xc4d   : > { %27562 = vmatmul.mubr.f32.gmra.mrb[110].mxu1 %v35169_v57 }
 0xc4e   : > { %27566 = vmatprep.mubr.msk.f32.mxu1 %vm30324_vm6, %v37347_v53 }
 0xc51   : > { %27567 = vmatmul.mubr.f32.vlgmr.msra.gmra.mrb[112].mxu1 %v35070_v42 }
 0xc52   : > { %27569 = vmatprep.mubr.msk.f32.mxu1 %vm30324_vm6, %v37347_v53  ;;  %27582 = vmatpush3.msra.mxu1 %v35084_v7 }
 0xc53   : > { %27598 = vmatprep.subr.mxu1 %v37347_v53 }
 0xc55   : > { %27570 = vmatmul.mubr.f32.gmra.mrb[114].mxu1 %v35087_v6 }
 0xc56   : > { %27572 = vmatprep.mubr.msk.f32.mxu1 %vm30324_vm6, %v37347_v53 }
 0xc59   : > { %27573 = vmatmul.mubr.f32.gmra.mrb[116].mxu1 %v35095_v59 }
 0xc5a   : > { %27575 = vmatprep.mubr.msk.f32.mxu1 %vm30324_vm6, %v37347_v53 }
 0xc5d   : > { %27576 = vmatmul.mubr.f32.gmra.mrb[118].mxu1 %v35115_v14 }
 0xc5e   : > { %27578 = vmatprep.mubr.msk.f32.mxu1 %vm30324_vm6, %v37347_v53 }
 0xc61   : > { %27579 = vmatmul.mubr.f32.gmra.mrb[120].mxu1 %v35128_v63 }
 0xc62   : > { %27583 = vmatprep.mubr.msk.f32.mxu1 %vm30324_vm6, %v37347_v53 }
 0xc65   : > { %27584 = vmatmul.mubr.f32.vlgmr.msra.gmra.mrb[122].mxu1 %v35079_v29 }
 0xc66   : > { %27586 = vmatprep.mubr.msk.f32.mxu1 %vm30324_vm6, %v37347_v53  ;;  %27599 = vmatpush3.msra.mxu1 %v35066_v18 }
 0xc67   : > { %27615 = vmatprep.subr.mxu1 %v37347_v53 }
 0xc69   : > { %27587 = vmatmul.mubr.f32.gmra.mrb[124].mxu1 %v35099_v16 }
 0xc6a   : > { %27589 = vmatprep.mubr.msk.f32.mxu1 %vm30324_vm6, %v37347_v53 }
 0xc6d   : > { %27590 = vmatmul.mubr.f32.gmra.mrb[126].mxu1 %v35112_v40 }
 0xc6e   : > { %27592 = vmatprep.mubr.msk.f32.mxu1 %vm30324_vm6, %v37347_v53 }
 0xc71   : > { %27593 = vmatmul.mubr.f32.gmra.mrb[128].mxu1 %v35125_v47 }
 0xc72   : > { %27595 = vmatprep.mubr.msk.f32.mxu1 %vm30324_vm6, %v37347_v53 }
 0xc75   : > { %27596 = vmatmul.mubr.f32.gmra.mrb[130].mxu1 %v35139_v46 }
 0xc76   : > { %27600 = vmatprep.mubr.msk.f32.mxu1 %vm30324_vm6, %v37347_v53 }
 0xc79   : > { %27601 = vmatmul.mubr.f32.vlgmr.msra.gmra.mrb[132].mxu1 %v17511_v20 }
 0xc7a   : > { %27603 = vmatprep.mubr.msk.f32.mxu1 %vm30324_vm6, %v37347_v53  ;;  %27616 = vmatpush3.msra.mxu1 %v17562_v19 }
 0xc7b   : > { %27632 = vmatprep.subr.mxu1 %v37347_v53 }
 0xc7d   : > { %27604 = vmatmul.mubr.f32.gmra.mrb[134].mxu1 %v35118_v27 }
 0xc7e   : > { %27606 = vmatprep.mubr.msk.f32.mxu1 %vm30324_vm6, %v37347_v53 }
 0xc81   : > { %27607 = vmatmul.mubr.f32.gmra.mrb[136].mxu1 %v35133_v55 }
 0xc82   : > { %27609 = vmatprep.mubr.msk.f32.mxu1 %vm30324_vm6, %v37347_v53 }
 0xc85   : > { %27610 = vmatmul.mubr.f32.gmra.mrb[138].mxu1 %v35146_v24 }
 0xc86   : > { %27612 = vmatprep.mubr.msk.f32.mxu1 %vm30324_vm6, %v37347_v53 }
 0xc89   : > { %27613 = vmatmul.mubr.f32.gmra.mrb[140].mxu1 %v35157_v48 }
 0xc8a   : > { %27617 = vmatprep.mubr.msk.f32.mxu1 %vm30324_vm6, %v37347_v53 }
 0xc8d   : > { %27618 = vmatmul.mubr.f32.vlgmr.msra.gmra.mrb[142].mxu1 %v35070_v42 }
 0xc8e   : > { %27620 = vmatprep.mubr.msk.f32.mxu1 %vm30324_vm6, %v37347_v53  ;;  %27633 = vmatpush3.msra.mxu1 %v35066_v18  ;;  %v23138_v18 = vld [vmem:[%s36461_s4 + $0x10] sm:$0xff] }
 0xc8f   : > { %27649 = vmatprep.subr.mxu1 %v37347_v53  ;;  %v35247_v25 = vand.u32 4294901760, %v23138_v18 }
 0xc91   : > { %27621 = vmatmul.mubr.f32.gmra.mrb[144].mxu1 %v35087_v6  ;;  %v35261_v10 = vsub.f32 %v23138_v18, %v35247_v25 }
 0xc92   : > { %27623 = vmatprep.mubr.msk.f32.mxu1 %vm30324_vm6, %v37347_v53 }
 0xc93   : > { %v37352_v34 = vand.u32 4294901760, %v35261_v10 }
 0xc95   : > { %27624 = vmatmul.mubr.f32.gmra.mrb[146].mxu1 %v35095_v59 }
 0xc96   : > { %v16887_v29 = vpop.f32.mrb[42].mxu1  ;;  %27626 = vmatprep.mubr.msk.f32.mxu1 %vm30324_vm6, %v37347_v53 }
 0xc97   : > { %v27449_v7 = vpop.f32.mrb[43].mxu1 }
 0xc98   : > { %v35268_v7 = vand.u32 4294901760, %v34944_v13 }
 0xc99   : > { %27627 = vmatmul.mubr.f32.gmra.mrb[148].mxu1 %v35115_v14 }
 0xc9a   : > { %27629 = vmatprep.mubr.msk.f32.mxu1 %vm30324_vm6, %v37347_v53  ;;  %v35277_v18 = vsub.f32 %v34944_v13, %v35268_v7  ;;  %v18202_v13 = vsub.f32 %v35261_v10, %v37352_v34 }
 0xc9b   : > { %v16897_v20 = vpop.f32.mrb[44].mxu1 }
 0xc9c   : > { %v27452_v19 = vpop.f32.mrb[45].mxu1  ;;  %v37355_v9 = vand.u32 4294901760, %v35277_v18  ;;  %v18203_v54 = vand.u32 4294901760, %v18202_v13 }
 0xc9d   : > { %27630 = vmatmul.mubr.f32.gmra.mrb[150].mxu1 %v35128_v63 }
 0xc9e   : > { %27634 = vmatprep.mubr.msk.f32.mxu1 %vm30324_vm6, %v37347_v53  ;;  %v18161_v34 = vsub.f32 %v35277_v18, %v37355_v9 }
 0xca0   : > { %v16907_v52 = vpop.f32.mrb[46].mxu1 }
 0xca1   : > { %v27455_v23 = vpop.f32.mrb[47].mxu1  ;;  %27635 = vmatmul.mubr.f32.vlgmr.msra.gmra.mrb[152].mxu1 %v35070_v42  ;;  %v35265_v42 = vsub.f32 %v34799_v26, %v35254_v61  ;;  %v35280_v26 = vand.u32 4294901760, %v34954_v41 }
 0xca2   : > { %27637 = vmatprep.mubr.msk.f32.mxu1 %vm30324_vm6, %v37347_v53  ;;  %27650 = vmatpush3.msra.mxu1 %v35247_v25 }
 0xca3   : > { %27666 = vmatprep.subr.mxu1 %v37347_v53  ;;  %v35294_v44 = vsub.f32 %v34954_v41, %v35280_v26 }
 0xca4   : > { %v16917_v56 = vpop.f32.mrb[48].mxu1 }
 0xca5   : > { %v27458_v28 = vpop.f32.mrb[49].mxu1  ;;  %27638 = vmatmul.mubr.f32.gmra.mrb[154].mxu1 %v35087_v6  ;;  %v37356_v41 = vand.u32 4294901760, %v35294_v44 }
 0xca6   : > { %27640 = vmatprep.mubr.msk.f32.mxu1 %vm30324_vm6, %v37347_v53  ;;  %v37350_v28 = vand.u32 4294901760, %v35265_v42 }
 0xca7   : > { %v18171_v13 = vsub.f32 %v35294_v44, %v37356_v41 }
 0xca8   : > { %v16927_v19 = vpop.f32.mrb[50].mxu1 }
 0xca9   : > { %v27461_v23 = vpop.f32.mrb[51].mxu1  ;;  %27641 = vmatmul.mubr.f32.gmra.mrb[156].mxu1 %v35095_v59 }
 0xcaa   : > { %27643 = vmatprep.mubr.msk.f32.mxu1 %vm30324_vm6, %v37347_v53  ;;  %v18151_v23 = vsub.f32 %v35265_v42, %v37350_v28 }
 0xcac   : > { %v17003_v62 = vpop.f32.mrb[52].mxu1  ;;  %v18152_v28 = vand.u32 4294901760, %v18151_v23  ;;  %v18162_v23 = vand.u32 4294901760, %v18161_v34  ;;  %v18172_v34 = vand.u32 4294901760, %v18171_v13 }
 0xcad   : > { %v17004_v3 = vadd.f32 %v17003_v62, %v16887_v29  ;;  %v27466_v60 = vpop.f32.mrb[53].mxu1  ;;  %27644 = vmatmul.mubr.f32.gmra.mrb[158].mxu1 %v35115_v14 }
 0xcae   : > { %27646 = vmatprep.mubr.msk.f32.mxu1 %vm30324_vm6, %v37347_v53  ;;  %v35297_v60 = vand.u32 4294901760, %v34961_v51 }
 0xcb0   : > { %v17009_v62 = vpop.f32.mrb[54].mxu1  ;;  %v35308_v35 = vsub.f32 %v34961_v51, %v35297_v60 }
 0xcb1   : > { %v17010_v29 = vadd.f32 %v17009_v62, %v16897_v20  ;;  %v27469_v53 = vpop.f32.mrb[55].mxu1  ;;  %27647 = vmatmul.mubr.f32.gmra.mrb[160].mxu1 %v35128_v63  ;;  %v35311_v20 = vand.u32 4294901760, %v34958_v21 }
 0xcb2   : > { %27651 = vmatprep.mubr.msk.f32.mxu1 %vm30324_vm6, %v38626_v49  ;;  %v37358_v9 = vand.u32 4294901760, %v35308_v35 }
 0xcb3   : > { %v35321_v51 = vsub.f32 %v34958_v21, %v35311_v20 }
 0xcb4   : > { %v17015_v53 = vpop.f32.mrb[56].mxu1 }
 0xcb5   : > { %v17016_v62 = vadd.f32 %v17015_v53, %v16907_v52  ;;  %v27472_v4 = vpop.f32.mrb[57].mxu1  ;;  %27652 = vmatmul.mubr.f32.vlgmr.msra.gmra.mrb[162].mxu1 %v18152_v28  ;;  %v18190_v53 = vand.u32 4294901760, %v35321_v51 }
 0xcb6   : > { %27654 = vmatprep.mubr.msk.f32.mxu1 %vm30324_vm6, %v38626_v49  ;;  %27667 = vmatpush3.msra.mxu1 %v18203_v54  ;;  %v18181_v54 = vsub.f32 %v35308_v35, %v37358_v9 }
 0xcb7   : > { %27683 = vmatprep.subr.mxu1 %v38626_v49 }
 0xcb8   : > { %v17021_v52 = vpop.f32.mrb[58].mxu1 }
 0xcb9   : > { %v17022_v4 = vadd.f32 %v17021_v52, %v16917_v56  ;;  %v27475_v28 = vpop.f32.mrb[59].mxu1  ;;  %27655 = vmatmul.mubr.f32.gmra.mrb[164].mxu1 %v18162_v23  ;;  %v18182_v56 = vand.u32 4294901760, %v18181_v54  ;;  %v18191_v23 = vsub.f32 %v35321_v51, %v18190_v53 }
 0xcba   : > { %27657 = vmatprep.mubr.msk.f32.mxu1 %vm30324_vm6, %v38626_v49 }
 0xcbb   : > { %v18192_v9 = vand.u32 4294901760, %v18191_v23 }
 0xcbc   : > { %v17027_v41 = vpop.f32.mrb[60].mxu1 }
 0xcbd   : > { %v17028_v22 = vadd.f32 %v17027_v41, %v16927_v19  ;;  %v27478_v21 = vpop.f32.mrb[61].mxu1  ;;  %27658 = vmatmul.mubr.f32.gmra.mrb[166].mxu1 %v18172_v34 }
 0xcbe   : > { %27660 = vmatprep.mubr.msk.f32.mxu1 %vm30324_vm6, %v38626_v49 }
 0xcc0   : > { %v17101_v52 = vpop.f32.mrb[62].mxu1 }
 0xcc1   : > { %v17102_v13 = vadd.f32 %v17101_v52, %v17004_v3  ;;  %v27483_v28 = vpop.f32.mrb[63].mxu1  ;;  %27661 = vmatmul.mubr.f32.gmra.mrb[168].mxu1 %v18182_v56 }
 0xcc2   : > { %27663 = vmatprep.mubr.msk.f32.mxu1 %vm30324_vm6, %v38626_v49 }
 0xcc4   : > { %v17108_v39 = vpop.f32.mrb[64].mxu1 }
 0xcc5   : > { %v17109_v19 = vadd.f32 %v17108_v39, %v17010_v29  ;;  %v27486_v41 = vpop.f32.mrb[65].mxu1  ;;  %27664 = vmatmul.mubr.f32.gmra.mrb[170].mxu1 %v18192_v9 }
 0xcc6   : > { %27668 = vmatprep.mubr.msk.f32.mxu1 %vm30324_vm6, %v38626_v49 }
 0xcc8   : > { %v17115_v34 = vpop.f32.mrb[66].mxu1 }
 0xcc9   : > { %v17116_v54 = vadd.f32 %v17115_v34, %v17016_v62  ;;  %v27489_v21 = vpop.f32.mrb[67].mxu1  ;;  %27669 = vmatmul.mubr.f32.vlgmr.msra.gmra.mrb[172].mxu1 %v35254_v61 }
 0xcca   : > { %27671 = vmatprep.mubr.msk.f32.mxu1 %vm30324_vm6, %v38626_v49  ;;  %27684 = vmatpush3.msra.mxu1 %v35261_v10 }
 0xccb   : > { %27700 = vmatprep.subr.mxu1 %v38626_v49 }
 0xccc   : > { %v17122_v3 = vpop.f32.mrb[68].mxu1 }
 0xccd   : > { %v17123_v56 = vadd.f32 %v17122_v3, %v17022_v4  ;;  %v27492_v39 = vpop.f32.mrb[69].mxu1  ;;  %27672 = vmatmul.mubr.f32.gmra.mrb[174].mxu1 %v35268_v7 }
 0xcce   : > { %27674 = vmatprep.mubr.msk.f32.mxu1 %vm30324_vm6, %v38626_v49 }
 0xcd0   : > { %v17129_v9 = vpop.f32.mrb[70].mxu1 }
 0xcd1   : > { %v17130_v29 = vadd.f32 %v17129_v9, %v17028_v22  ;;  %v27495_v62 = vpop.f32.mrb[71].mxu1  ;;  %27675 = vmatmul.mubr.f32.gmra.mrb[176].mxu1 %v35280_v26 }
 0xcd2   : > { %27677 = vmatprep.mubr.msk.f32.mxu1 %vm30324_vm6, %v38626_v49 }
 0xcd4   : > { %v17203_v23 = vpop.f32.mrb[72].mxu1 }
 0xcd5   : > { %v17204_v52 = vadd.f32 %v17203_v23, %v17102_v13  ;;  %v27500_v28 = vpop.f32.mrb[73].mxu1  ;;  %27678 = vmatmul.mubr.f32.gmra.mrb[178].mxu1 %v35297_v60 }
 0xcd6   : > { %27680 = vmatprep.mubr.msk.f32.mxu1 %vm30324_vm6, %v38626_v49 }
 0xcd8   : > { %v17211_v4 = vpop.f32.mrb[74].mxu1 }
 0xcd9   : > { %v17212_v41 = vadd.f32 %v17211_v4, %v17109_v19  ;;  %v27503_v34 = vpop.f32.mrb[75].mxu1  ;;  %27681 = vmatmul.mubr.f32.gmra.mrb[180].mxu1 %v35311_v20 }
 0xcda   : > { %27685 = vmatprep.mubr.msk.f32.mxu1 %vm30324_vm6, %v38626_v49 }
 0xcdc   : > { %v17219_v22 = vpop.f32.mrb[76].mxu1 }
 0xcdd   : > { %v17220_v21 = vadd.f32 %v17219_v22, %v17116_v54  ;;  %v27506_v3 = vpop.f32.mrb[77].mxu1  ;;  %27686 = vmatmul.mubr.f32.vlgmr.msra.gmra.mrb[182].mxu1 %v35265_v42 }
 0xcde   : > { %27688 = vmatprep.mubr.msk.f32.mxu1 %vm30324_vm6, %v38626_v49  ;;  %27701 = vmatpush3.msra.mxu1 %v35247_v25 }
 0xcdf   : > { %27717 = vmatprep.subr.mxu1 %v38626_v49 }
 0xce0   : > { %v17227_v13 = vpop.f32.mrb[78].mxu1 }
 0xce1   : > { %v17228_v19 = vadd.f32 %v17227_v13, %v17123_v56  ;;  %v27509_v39 = vpop.f32.mrb[79].mxu1  ;;  %27689 = vmatmul.mubr.f32.gmra.mrb[184].mxu1 %v35277_v18 }
 0xce2   : > { %27691 = vmatprep.mubr.msk.f32.mxu1 %vm30324_vm6, %v38626_v49  ;;  %v38627_v39 = vand.u32 4294901760, %v35265_v42 }
 0xce4   : > { %v17235_v9 = vpop.f32.mrb[80].mxu1 }
 0xce5   : > { %v17236_v54 = vadd.f32 %v17235_v9, %v17130_v29  ;;  %v27512_v62 = vpop.f32.mrb[81].mxu1  ;;  %27692 = vmatmul.mubr.f32.gmra.mrb[186].mxu1 %v35294_v44 }
 0xce6   : > { %27694 = vmatprep.mubr.msk.f32.mxu1 %vm30324_vm6, %v38626_v49 }
 0xce8   : > { %v17309_v23 = vpop.f32.mrb[82].mxu1 }
 0xce9   : > { %v17310_v28 = vadd.f32 %v17309_v23, %v17204_v52  ;;  %v27517_v4 = vpop.f32.mrb[83].mxu1  ;;  %27695 = vmatmul.mubr.f32.gmra.mrb[188].mxu1 %v35308_v35  ;;  %v38628_v52 = vand.u32 4294901760, %v35261_v10  ;;  %v38629_v23 = vand.u32 4294901760, %v35277_v18 }
 0xcea   : > { %27697 = vmatprep.mubr.msk.f32.mxu1 %vm30324_vm6, %v38626_v49 }
 0xcec   : > { %v17315_v56 = vpop.f32.mrb[84].mxu1 }
 0xced   : > { %v17316_v34 = vadd.f32 %v17315_v56, %v17212_v41  ;;  %v27520_v22 = vpop.f32.mrb[85].mxu1  ;;  %27698 = vmatmul.mubr.f32.gmra.mrb[190].mxu1 %v35321_v51  ;;  %v38630_v56 = vand.u32 4294901760, %v35294_v44 }
 0xcee   : > { %27702 = vmatprep.mubr.msk.f32.mxu1 %vm30324_vm6, %v38626_v49 }
 0xcf0   : > { %v17321_v29 = vpop.f32.mrb[86].mxu1 }
 0xcf1   : > { %v17322_v3 = vadd.f32 %v17321_v29, %v17220_v21  ;;  %v27523_v13 = vpop.f32.mrb[87].mxu1  ;;  %27703 = vmatmul.mubr.f32.vlgmr.msra.gmra.mrb[192].mxu1 %v38627_v39 }
 0xcf2   : > { %27705 = vmatprep.mubr.msk.f32.mxu1 %vm30324_vm6, %v38626_v49  ;;  %27718 = vmatpush3.msra.mxu1 %v38628_v52 }
 0xcf3   : > { %27734 = vmatprep.subr.mxu1 %v38626_v49 }
 0xcf4   : > { %v17327_v41 = vpop.f32.mrb[88].mxu1 }
 0xcf5   : > { %v17328_v9 = vadd.f32 %v17327_v41, %v17228_v19  ;;  %v27526_v62 = vpop.f32.mrb[89].mxu1  ;;  %27706 = vmatmul.mubr.f32.gmra.mrb[194].mxu1 %v38629_v23  ;;  %v38631_v19 = vand.u32 4294901760, %v35308_v35 }
 0xcf6   : > { %27708 = vmatprep.mubr.msk.f32.mxu1 %vm30324_vm6, %v38626_v49 }
 0xcf8   : > { %v17333_v21 = vpop.f32.mrb[90].mxu1 }
 0xcf9   : > { %v17334_v42 = vadd.f32 %v17333_v21, %v17236_v54  ;;  %v27529_v4 = vpop.f32.mrb[91].mxu1  ;;  %27709 = vmatmul.mubr.f32.gmra.mrb[196].mxu1 %v38630_v56 }
 0xcfa   : > { %27711 = vmatprep.mubr.msk.f32.mxu1 %vm30324_vm6, %v38626_v49 }
 0xcfc   : > { %v17405_v10 = vpop.f32.mrb[92].mxu1 }
 0xcfd   : > { %v17406_v22 = vadd.f32 %v17405_v10, %v17310_v28  ;;  %v27534_v29 = vpop.f32.mrb[93].mxu1  ;;  %27712 = vmatmul.mubr.f32.gmra.mrb[198].mxu1 %v38631_v19 }
 0xcfe   : > { %27714 = vmatprep.mubr.msk.f32.mxu1 %vm30324_vm6, %v38626_v49  ;;  %v35423_v29 = vand.u32 4294901760, %v34802_v32 }
 0xd00   : > { %v17411_v18 = vpop.f32.mrb[94].mxu1 }
 0xd01   : > { %v17412_v13 = vadd.f32 %v17411_v18, %v17316_v34  ;;  %v27537_v39 = vpop.f32.mrb[95].mxu1  ;;  %27715 = vmatmul.mubr.f32.gmra.mrb[200].mxu1 %v18190_v53 }
 0xd02   : > { %27719 = vmatprep.mubr.msk.f32.mxu1 %vm30324_vm6, %v38626_v49  ;;  %v35434_v39 = vsub.f32 %v34802_v32, %v35423_v29  ;;  %v35449_v32 = vand.u32 4294901760, %v34970_v58 }
 0xd04   : > { %v17417_v44 = vpop.f32.mrb[96].mxu1 }
 0xd05   : > { %v17418_v54 = vadd.f32 %v17417_v44, %v17322_v3  ;;  %v27540_v52 = vpop.f32.mrb[97].mxu1  ;;  %27720 = vmatmul.mubr.f32.vlgmr.msra.gmra.mrb[202].mxu1 %v35254_v61  ;;  %v35437_v44 = vand.u32 4294901760, %v34964_v11 }
 0xd06   : > { %27722 = vmatprep.mubr.msk.f32.mxu1 %vm30324_vm6, %v38626_v49  ;;  %27735 = vmatpush3.msra.mxu1 %v35247_v25 }
 0xd07   : > { %27751 = vmatprep.subr.mxu1 %v38626_v49 }
 0xd08   : > { %v17423_v35 = vpop.f32.mrb[98].mxu1 }
 0xd09   : > { %v17424_v28 = vadd.f32 %v17423_v35, %v17328_v9  ;;  %v27543_v34 = vpop.f32.mrb[99].mxu1  ;;  %27723 = vmatmul.mubr.f32.gmra.mrb[204].mxu1 %v35268_v7  ;;  %v23139_v9 = vld [vmem:[%s36461_s4 + $0x18] sm:$0xff] }
 0xd0a   : > { %27725 = vmatprep.mubr.msk.f32.mxu1 %vm30324_vm6, %v38626_v49  ;;  %v35416_v4 = vand.u32 4294901760, %v23139_v9  ;;  %v35446_v34 = vsub.f32 %v34964_v11, %v35437_v44 }
 0xd0c   : > { %v17429_v51 = vpop.f32.mrb[100].mxu1 }
 0xd0d   : > { %v17430_v53 = vadd.f32 %v17429_v51, %v17334_v42  ;;  %v27546_v3 = vpop.f32.mrb[101].mxu1  ;;  %27726 = vmatmul.mubr.f32.gmra.mrb[206].mxu1 %v35280_v26 }
 0xd0e   : > { %27728 = vmatprep.mubr.msk.f32.mxu1 %vm30324_vm6, %v38626_v49 }
 0xd10   : > { %v17515_v41 = vpop.f32.mrb[102].mxu1 }
 0xd11   : > { %v17516_v25 = vadd.f32 %v17515_v41, %v17406_v22  ;;  %v27551_v62 = vpop.f32.mrb[103].mxu1  ;;  %27729 = vmatmul.mubr.f32.gmra.mrb[208].mxu1 %v35297_v60  ;;  %v35461_v41 = vand.u32 4294901760, %v35446_v34 }
 0xd12   : > { %27731 = vmatprep.mubr.msk.f32.mxu1 %vm30324_vm6, %v38626_v49 }
 0xd14   : > { %v17525_v23 = vpop.f32.mrb[104].mxu1 }
 0xd15   : > { %v17526_v21 = vadd.f32 %v17525_v23, %v17412_v13  ;;  %v27554_v42 = vpop.f32.mrb[105].mxu1  ;;  %27732 = vmatmul.mubr.f32.gmra.mrb[210].mxu1 %v35311_v20 }
 0xd16   : > { %27736 = vmatprep.mubr.msk.f32.mxu1 %vm30324_vm6, %v38626_v49 }
 0xd18   : > { %v17535_v56 = vpop.f32.mrb[106].mxu1 }
 0xd19   : > { %v17536_v10 = vadd.f32 %v17535_v56, %v17418_v54  ;;  %v27557_v22 = vpop.f32.mrb[107].mxu1  ;;  %27737 = vmatmul.mubr.f32.vlgmr.msra.gmra.mrb[212].mxu1 %v35254_v61  ;;  %v35430_v61 = vsub.f32 %v23139_v9, %v35416_v4 }
 0xd1a   : > { %27739 = vmatprep.mubr.msk.f32.mxu1 %vm30324_vm6, %v38626_v49  ;;  %27752 = vmatpush3.msra.mxu1 %v35416_v4  ;;  %v18806_v22 = vsub.f32 %v35446_v34, %v35461_v41 }
 0xd1b   : > { %27768 = vmatprep.subr.mxu1 %v38626_v49 }
 0xd1c   : > { %v17545_v19 = vpop.f32.mrb[108].mxu1 }
 0xd1d   : > { %v17546_v18 = vadd.f32 %v17545_v19, %v17424_v28  ;;  %v27560_v13 = vpop.f32.mrb[109].mxu1  ;;  %27740 = vmatmul.mubr.f32.gmra.mrb[214].mxu1 %v35268_v7  ;;  %v37361_v7 = vand.u32 4294901760, %v35434_v39  ;;  %v37360_v28 = vand.u32 4294901760, %v35430_v61 }
 0xd1e   : > { %27742 = vmatprep.mubr.msk.f32.mxu1 %vm30324_vm6, %v38626_v49 }
 0xd1f   : > { %v18847_v11 = vsub.f32 %v35430_v61, %v37360_v28 }
 0xd20   : > { %v17555_v54 = vpop.f32.mrb[110].mxu1 }
 0xd21   : > { %v17556_v52 = vadd.f32 %v17555_v54, %v17430_v53  ;;  %v27563_v35 = vpop.f32.mrb[111].mxu1  ;;  %27743 = vmatmul.mubr.f32.gmra.mrb[216].mxu1 %v35280_v26  ;;  %v18796_v26 = vsub.f32 %v35434_v39, %v37361_v7  ;;  %v18848_v56 = vand.u32 4294901760, %v18847_v11 }
 0xd22   : > { %27745 = vmatprep.mubr.msk.f32.mxu1 %vm30324_vm6, %v38626_v49  ;;  %v35487_v35 = vand.u32 4294901760, %v18806_v22 }
 0xd23   : > { %v18797_v42 = vand.u32 4294901760, %v18796_v26 }
 0xd24   : > { %v17631_v51 = vpop.f32.mrb[112].mxu1 }
 0xd25   : > { %v17632_v3 = vadd.f32 %v17631_v51, %v17516_v25  ;;  %v27568_v53 = vpop.f32.mrb[113].mxu1  ;;  %27746 = vmatmul.mubr.f32.gmra.mrb[218].mxu1 %v35297_v60  ;;  %v35465_v25 = vsub.f32 %v34970_v58, %v35449_v32  ;;  %v35468_v60 = vand.u32 4294901760, %v34975_v12 }
 0xd26   : > { %27748 = vmatprep.mubr.msk.f32.mxu1 %vm30324_vm6, %v38626_v49 }
 0xd27   : > { %v35476_v19 = vand.u32 4294901760, %v35465_v25  ;;  %v35480_v58 = vsub.f32 %v34975_v12, %v35468_v60 }
 0xd28   : > { %v17637_v62 = vpop.f32.mrb[114].mxu1 }
 0xd29   : > { %v17638_v9 = vadd.f32 %v17637_v62, %v17526_v21  ;;  %v27571_v23 = vpop.f32.mrb[115].mxu1  ;;  %27749 = vmatmul.mubr.f32.gmra.mrb[220].mxu1 %v35311_v20  ;;  %v35483_v21 = vand.u32 4294901760, %v34983_v31  ;;  %v18816_v51 = vsub.f32 %v35465_v25, %v35476_v19  ;;  %v35492_v53 = vand.u32 4294901760, %v35480_v58 }
 0xd2a   : > { %27753 = vmatprep.mubr.msk.f32.mxu1 %vm30324_vm6, %v38626_v49 }
 0xd2b   : > { %v35496_v12 = vsub.f32 %v34983_v31, %v35483_v21  ;;  %v35502_v62 = vand.u32 4294901760, %v18816_v51  ;;  %v18826_v23 = vsub.f32 %v35480_v58, %v35492_v53 }
 0xd2c   : > { %v17643_v13 = vpop.f32.mrb[116].mxu1 }
 0xd2d   : > { %v17644_v20 = vadd.f32 %v17643_v13, %v17536_v10  ;;  %v27574_v54 = vpop.f32.mrb[117].mxu1  ;;  %27754 = vmatmul.mubr.f32.vlgmr.msra.gmra.mrb[222].mxu1 %v18797_v42  ;;  %v18835_v42 = vand.u32 4294901760, %v35496_v12 }
 0xd2e   : > { %27756 = vmatprep.mubr.msk.f32.mxu1 %vm30324_vm6, %v38626_v49  ;;  %27769 = vmatpush3.msra.mxu1 %v18848_v56 }
 0xd2f   : > { %27785 = vmatprep.subr.mxu1 %v38626_v49  ;;  %v18836_v13 = vsub.f32 %v35496_v12, %v18835_v42 }
 0xd30   : > { %v17649_v10 = vpop.f32.mrb[118].mxu1 }
 0xd31   : > { %v17650_v26 = vadd.f32 %v17649_v10, %v17546_v18  ;;  %v27577_v11 = vpop.f32.mrb[119].mxu1  ;;  %27757 = vmatmul.mubr.f32.gmra.mrb[224].mxu1 %v35487_v35  ;;  %v35510_v18 = vand.u32 4294901760, %v18826_v23 }
 0xd32   : > { %27759 = vmatprep.mubr.msk.f32.mxu1 %vm30324_vm6, %v38626_v49 }
 0xd34   : > { %v17655_v56 = vpop.f32.mrb[120].mxu1 }
 0xd35   : > { %v17656_v31 = vadd.f32 %v17655_v56, %v17556_v52  ;;  %v27580_v22 = vpop.f32.mrb[121].mxu1  ;;  %27760 = vmatmul.mubr.f32.gmra.mrb[226].mxu1 %v35502_v62  ;;  %v18837_v52 = vand.u32 4294901760, %v18836_v13 }
 0xd36   : > { %27762 = vmatprep.mubr.msk.f32.mxu1 %vm30324_vm6, %v38626_v49 }
 0xd38   : > { %v17729_v54 = vpop.f32.mrb[122].mxu1 }
 0xd39   : > { %v17730_v51 = vadd.f32 %v17729_v54, %v17632_v3  ;;  %v27585_v10 = vpop.f32.mrb[123].mxu1  ;;  %27763 = vmatmul.mubr.f32.gmra.mrb[228].mxu1 %v35510_v18 }
 0xd3a   : > { %27765 = vmatprep.mubr.msk.f32.mxu1 %vm30324_vm6, %v38626_v49 }
 0xd3c   : > { %v17736_v11 = vpop.f32.mrb[124].mxu1 }
 0xd3d   : > { %v17737_v56 = vadd.f32 %v17736_v11, %v17638_v9  ;;  %v27588_v22 = vpop.f32.mrb[125].mxu1  ;;  %27766 = vmatmul.mubr.f32.gmra.mrb[230].mxu1 %v18837_v52 }
 0xd3e   : > { %27770 = vmatprep.mubr.msk.f32.mxu1 %vm30324_vm6, %v38626_v49 }
 0xd40   : > { %v17743_v23 = vpop.f32.mrb[126].mxu1 }
 0xd41   : > { %v17744_v28 = vadd.f32 %v17743_v23, %v17644_v20  ;;  %v27591_v7 = vpop.f32.mrb[127].mxu1  ;;  %27771 = vmatmul.mubr.f32.vlgmr.msra.gmra.mrb[232].mxu1 %v35423_v29 }
 0xd42   : > { %27773 = vmatprep.mubr.msk.f32.mxu1 %vm30324_vm6, %v38626_v49  ;;  %27786 = vmatpush3.msra.mxu1 %v35430_v61 }
 0xd43   : > { %27802 = vmatprep.subr.mxu1 %v38626_v49 }
 0xd44   : > { %v17750_v3 = vpop.f32.mrb[128].mxu1 }
 0xd45   : > { %v17751_v13 = vadd.f32 %v17750_v3, %v17650_v26  ;;  %v27594_v9 = vpop.f32.mrb[129].mxu1  ;;  %27774 = vmatmul.mubr.f32.gmra.mrb[234].mxu1 %v35437_v44 }
 0xd46   : > { %27776 = vmatprep.mubr.msk.f32.mxu1 %vm30324_vm6, %v38626_v49 }
 0xd48   : > { %v17757_v54 = vpop.f32.mrb[130].mxu1 }
 0xd49   : > { %v17758_v20 = vadd.f32 %v17757_v54, %v17656_v31  ;;  %v27597_v7 = vpop.f32.mrb[131].mxu1  ;;  %27777 = vmatmul.mubr.f32.gmra.mrb[236].mxu1 %v35449_v32 }
 0xd4a   : > { %27779 = vmatprep.mubr.msk.f32.mxu1 %vm30324_vm6, %v38626_v49 }
 0xd4c   : > { %v17831_v10 = vpop.f32.mrb[132].mxu1 }
 0xd4d   : > { %v17832_v52 = vadd.f32 %v17831_v10, %v17730_v51  ;;  %v27602_v11 = vpop.f32.mrb[133].mxu1  ;;  %27780 = vmatmul.mubr.f32.gmra.mrb[238].mxu1 %v35468_v60 }
 0xd4e   : > { %27782 = vmatprep.mubr.msk.f32.mxu1 %vm30324_vm6, %v38626_v49 }
 0xd50   : > { %v17839_v26 = vpop.f32.mrb[134].mxu1 }
 0xd51   : > { %v17840_v22 = vadd.f32 %v17839_v26, %v17737_v56  ;;  %v27605_v23 = vpop.f32.mrb[135].mxu1  ;;  %27783 = vmatmul.mubr.f32.gmra.mrb[240].mxu1 %v35483_v21 }
 0xd52   : > { %27787 = vmatprep.mubr.msk.f32.mxu1 %vm30324_vm6, %v38626_v49 }
 0xd54   : > { %v17847_v31 = vpop.f32.mrb[136].mxu1 }
 0xd55   : > { %v17848_v3 = vadd.f32 %v17847_v31, %v17744_v28  ;;  %v27608_v9 = vpop.f32.mrb[137].mxu1  ;;  %27788 = vmatmul.mubr.f32.vlgmr.msra.gmra.mrb[242].mxu1 %v35434_v39 }
 0xd56   : > { %27790 = vmatprep.mubr.msk.f32.mxu1 %vm30324_vm6, %v38626_v49  ;;  %27803 = vmatpush3.msra.mxu1 %v35416_v4 }
 0xd57   : > { %27819 = vmatprep.subr.mxu1 %v38626_v49 }
 0xd58   : > { %v17855_v51 = vpop.f32.mrb[138].mxu1 }
 0xd59   : > { %v17856_v56 = vadd.f32 %v17855_v51, %v17751_v13  ;;  %v27611_v54 = vpop.f32.mrb[139].mxu1  ;;  %27791 = vmatmul.mubr.f32.gmra.mrb[244].mxu1 %v35446_v34 }
 0xd5a   : > { %27793 = vmatprep.mubr.msk.f32.mxu1 %vm30324_vm6, %v38626_v49 }
 0xd5c   : > { %v17863_v7 = vpop.f32.mrb[140].mxu1 }
 0xd5d   : > { %v17864_v28 = vadd.f32 %v17863_v7, %v17758_v20  ;;  %v27614_v10 = vpop.f32.mrb[141].mxu1  ;;  %27794 = vmatmul.mubr.f32.gmra.mrb[246].mxu1 %v35465_v25  ;;  %v38632_v7 = vand.u32 4294901760, %v35434_v39 }
 0xd5e   : > { %27796 = vmatprep.mubr.msk.f32.mxu1 %vm30324_vm6, %v38626_v49 }
 0xd60   : > { %v17937_v11 = vpop.f32.mrb[142].mxu1 }
 0xd61   : > { %v17938_v26 = vadd.f32 %v17937_v11, %v17832_v52  ;;  %v27619_v23 = vpop.f32.mrb[143].mxu1  ;;  %27797 = vmatmul.mubr.f32.gmra.mrb[248].mxu1 %v35480_v58  ;;  %v38633_v52 = vand.u32 4294901760, %v35430_v61 }
 0xd62   : > { %27799 = vmatprep.mubr.msk.f32.mxu1 %vm30324_vm6, %v38626_v49 }
 0xd64   : > { %v17943_v13 = vpop.f32.mrb[144].mxu1 }
 0xd65   : > { %v17944_v31 = vadd.f32 %v17943_v13, %v17840_v22  ;;  %v27622_v9 = vpop.f32.mrb[145].mxu1  ;;  %27800 = vmatmul.mubr.f32.gmra.mrb[250].mxu1 %v35496_v12 }
 0xd66   : > { %27804 = vmatprep.mubr.msk.f32.mxu1 %vm30324_vm6, %v38626_v49 }
 0xd68   : > { %v17949_v20 = vpop.f32.mrb[146].mxu1 }
 0xd69   : > { %v17950_v51 = vadd.f32 %v17949_v20, %v17848_v3  ;;  %v27625_v54 = vpop.f32.mrb[147].mxu1  ;;  %27805 = vmatmul.mubr.f32.vlgmr.msra.gmra.mrb[252].mxu1 %v38632_v7 }
 0xd6a   : > { %27807 = vmatprep.mubr.msk.f32.mxu1 %vm30324_vm6, %v38626_v49  ;;  %27820 = vmatpush3.msra.mxu1 %v38633_v52 }
 0xd6b   : > { %27836 = vmatprep.subr.mxu1 %v38626_v49 }
 0xd6c   : > { %v17955_v22 = vpop.f32.mrb[148].mxu1 }
 0xd6d   : > { %v17956_v10 = vadd.f32 %v17955_v22, %v17856_v56  ;;  %v27628_v11 = vpop.f32.mrb[149].mxu1  ;;  %27808 = vmatmul.mubr.f32.gmra.mrb[254].mxu1 %v35461_v41 }
 0xd6e   : > { %27810 = vmatprep.mubr.msk.f32.mxu1 %vm30324_vm6, %v38626_v49 }
 0xd70   : > { %v17961_v3 = vpop.f32.mrb[150].mxu1 }
 0xd71   : > { %v17962_v23 = vadd.f32 %v17961_v3, %v17864_v28  ;;  %v27631_v39 = vpop.f32.mrb[151].mxu1  ;;  %27811 = vmatmul.mubr.f32.gmra.mrb[0].mxu1 %v35476_v19 }
 0xd72   : > { %27813 = vmatprep.mubr.msk.f32.mxu1 %vm30324_vm6, %v38626_v49 }
 0xd74   : > { %v18033_v61 = vpop.f32.mrb[152].mxu1 }
 0xd75   : > { %v35567_v13 = vadd.f32 %v18033_v61, %v17938_v26  ;;  %v27636_v9 = vpop.f32.mrb[153].mxu1  ;;  %27814 = vmatmul.mubr.f32.gmra.mrb[2].mxu1 %v35492_v53 }
 0xd76   : > { %27816 = vmatprep.mubr.msk.f32.mxu1 %vm30324_vm6, %v38626_v49 }
 0xd78   : > { %v18039_v56 = vpop.f32.mrb[154].mxu1 }
 0xd79   : > { %v35572_v20 = vadd.f32 %v18039_v56, %v17944_v31  ;;  %v27639_v54 = vpop.f32.mrb[155].mxu1  ;;  %27817 = vmatmul.mubr.f32.gmra.mrb[4].mxu1 %v18835_v42 }
 0xd7a   : > { %27821 = vmatprep.mubr.msk.f32.mxu1 %vm30324_vm6, %v38626_v49 }
 0xd7c   : > { %v18045_v28 = vpop.f32.mrb[156].mxu1 }
 0xd7d   : > { %v35578_v7 = vadd.f32 %v18045_v28, %v17950_v51  ;;  %v27642_v26 = vpop.f32.mrb[157].mxu1  ;;  %27822 = vmatmul.mubr.f32.vlgmr.msra.gmra.mrb[6].mxu1 %v35423_v29 }
 0xd7e   : > { %27824 = vmatprep.mubr.msk.f32.mxu1 %vm30324_vm6, %v38626_v49  ;;  %27837 = vmatpush3.msra.mxu1 %v35416_v4 }
 0xd7f   : > { %27853 = vmatprep.subr.mxu1 %v38626_v49 }
 0xd80   : > { %v18051_v31 = vpop.f32.mrb[158].mxu1 }
 0xd81   : > { %v35585_v52 = vadd.f32 %v18051_v31, %v17956_v10  ;;  %v27645_v12 = vpop.f32.mrb[159].mxu1  ;;  %27825 = vmatmul.mubr.f32.gmra.mrb[8].mxu1 %v35437_v44  ;;  %v23140_v10 = vld [vmem:[%s36461_s4 + $0x20] sm:$0xff] }
 0xd82   : > { %27827 = vmatprep.mubr.msk.f32.mxu1 %vm30324_vm6, %v38626_v49  ;;  %v35604_v39 = vand.u32 4294901760, %v23140_v10 }
 0xd84   : > { %v18057_v42 = vpop.f32.mrb[160].mxu1  ;;  %v35615_v28 = vsub.f32 %v23140_v10, %v35604_v39 }
 0xd85   : > { %v35590_v51 = vadd.f32 %v18057_v42, %v17962_v23  ;;  %v27648_v22 = vpop.f32.mrb[161].mxu1  ;;  %27828 = vmatmul.mubr.f32.gmra.mrb[10].mxu1 %v35449_v32 }
 0xd86   : > { %27830 = vmatprep.mubr.msk.f32.mxu1 %vm30324_vm6, %v38626_v49 }
 0xd88   : > { %v18154_v4 = vpop.f32.mrb[162].mxu1 }
 0xd89   : > { %v27653_v11 = vpop.f32.mrb[163].mxu1  ;;  %27831 = vmatmul.mubr.f32.gmra.mrb[12].mxu1 %v35468_v60 }
 0xd8a   : > { %27833 = vmatprep.mubr.msk.f32.mxu1 %vm30324_vm6, %v38626_v49 }
 0xd8c   : > { %v18164_v3 = vpop.f32.mrb[164].mxu1 }
 0xd8d   : > { %v27656_v23 = vpop.f32.mrb[165].mxu1  ;;  %27834 = vmatmul.mubr.f32.gmra.mrb[14].mxu1 %v35483_v21 }
 0xd8e   : > { %27838 = vmatprep.mubr.msk.f32.mxu1 %vm30324_vm6, %v38626_v49 }
 0xd90   : > { %v18174_v61 = vpop.f32.mrb[166].mxu1 }
 0xd91   : > { %v27659_v9 = vpop.f32.mrb[167].mxu1  ;;  %27839 = vmatmul.mubr.f32.vlgmr.msra.gmra.mrb[16].mxu1 %v35423_v29  ;;  %v37362_v29 = vand.u32 4294901760, %v35615_v28 }
 0xd92   : > { %27841 = vmatprep.mubr.msk.f32.mxu1 %vm30324_vm6, %v38626_v49  ;;  %27854 = vmatpush3.msra.mxu1 %v35604_v39 }
 0xd93   : > { %27870 = vmatprep.subr.mxu1 %v38626_v49  ;;  %v19475_v11 = vsub.f32 %v35615_v28, %v37362_v29 }
 0xd94   : > { %v18184_v56 = vpop.f32.mrb[168].mxu1 }
 0xd95   : > { %v27662_v54 = vpop.f32.mrb[169].mxu1  ;;  %27842 = vmatmul.mubr.f32.gmra.mrb[18].mxu1 %v35437_v44 }
 0xd96   : > { %27844 = vmatprep.mubr.msk.f32.mxu1 %vm30324_vm6, %v38626_v49  ;;  %v19476_v54 = vand.u32 4294901760, %v19475_v11 }
 0xd98   : > { %v18194_v26 = vpop.f32.mrb[170].mxu1 }
 0xd99   : > { %v27665_v31 = vpop.f32.mrb[171].mxu1  ;;  %27845 = vmatmul.mubr.f32.gmra.mrb[20].mxu1 %v35449_v32 }
 0xd9a   : > { %27847 = vmatprep.mubr.msk.f32.mxu1 %vm30324_vm6, %v38626_v49 }
 0xd9c   : > { %v18270_v12 = vpop.f32.mrb[172].mxu1 }
 0xd9d   : > { %v18271_v42 = vadd.f32 %v18270_v12, %v18154_v4  ;;  %v27670_v22 = vpop.f32.mrb[173].mxu1  ;;  %27848 = vmatmul.mubr.f32.gmra.mrb[22].mxu1 %v35468_v60  ;;  %v35631_v4 = vand.u32 4294901760, %v34866_v2 }
 0xd9e   : > { %27850 = vmatprep.mubr.msk.f32.mxu1 %vm30324_vm6, %v38626_v49 }
 0xda0   : > { %v18276_v10 = vpop.f32.mrb[174].mxu1 }
 0xda1   : > { %v18277_v23 = vadd.f32 %v18276_v10, %v18164_v3  ;;  %v27673_v9 = vpop.f32.mrb[175].mxu1  ;;  %27851 = vmatmul.mubr.f32.gmra.mrb[24].mxu1 %v35483_v21  ;;  %v35638_v3 = vsub.f32 %v34866_v2, %v35631_v4 }
 0xda2   : > { %27855 = vmatprep.mubr.msk.f32.mxu1 %vm30324_vm6, %v38626_v49 }
 0xda4   : > { %v18282_v31 = vpop.f32.mrb[176].mxu1 }
 0xda5   : > { %v18283_v12 = vadd.f32 %v18282_v31, %v18174_v61  ;;  %v27676_v22 = vpop.f32.mrb[177].mxu1  ;;  %27856 = vmatmul.mubr.f32.vlgmr.msra.gmra.mrb[26].mxu1 %v35141_v5  ;;  %v35645_v5 = vand.u32 4294901760, %v35638_v3 }
 0xda6   : > { %27858 = vmatprep.mubr.msk.f32.mxu1 %vm30324_vm6, %v38626_v49  ;;  %27871 = vmatpush3.msra.mxu1 %v19476_v54 }
 0xda7   : > { %27887 = vmatprep.subr.mxu1 %v38626_v49  ;;  %v19464_v2 = vsub.f32 %v35638_v3, %v35645_v5 }
 0xda8   : > { %v18288_v21 = vpop.f32.mrb[178].mxu1 }
 0xda9   : > { %v18289_v11 = vadd.f32 %v18288_v21, %v18184_v56  ;;  %v27679_v10 = vpop.f32.mrb[179].mxu1  ;;  %27859 = vmatmul.mubr.f32.gmra.mrb[28].mxu1 %v35152_v37  ;;  %v35655_v21 = vand.u32 4294901760, %v19464_v2 }
 0xdaa   : > { %27861 = vmatprep.mubr.msk.f32.mxu1 %vm30324_vm6, %v38626_v49 }
 0xdac   : > { %v18294_v61 = vpop.f32.mrb[180].mxu1 }
 0xdad   : > { %v18295_v9 = vadd.f32 %v18294_v61, %v18194_v26  ;;  %v27682_v54 = vpop.f32.mrb[181].mxu1  ;;  %27862 = vmatmul.mubr.f32.gmra.mrb[30].mxu1 %v35162_v17 }
 0xdae   : > { %27864 = vmatprep.mubr.msk.f32.mxu1 %vm30324_vm6, %v38626_v49 }
 0xdb0   : > { %v18368_v56 = vpop.f32.mrb[182].mxu1 }
 0xdb1   : > { %v18369_v31 = vadd.f32 %v18368_v56, %v18271_v42  ;;  %v27687_v22 = vpop.f32.mrb[183].mxu1  ;;  %27865 = vmatmul.mubr.f32.gmra.mrb[32].mxu1 %v35169_v57 }
 0xdb2   : > { %27867 = vmatprep.mubr.msk.f32.mxu1 %vm30324_vm6, %v38626_v49 }
 0xdb4   : > { %v18375_v26 = vpop.f32.mrb[184].mxu1 }
 0xdb5   : > { %v18376_v10 = vadd.f32 %v18375_v26, %v18277_v23  ;;  %v27690_v61 = vpop.f32.mrb[185].mxu1  ;;  %27868 = vmatmul.mubr.f32.gmra.mrb[34].mxu1 %v35655_v21 }
 0xdb6   : > { %27872 = vmatprep.mubr.msk.f32.mxu1 %vm30324_vm6, %v38626_v49 }
 0xdb8   : > { %v18382_v54 = vpop.f32.mrb[186].mxu1 }
 0xdb9   : > { %v18383_v29 = vadd.f32 %v18382_v54, %v18283_v12  ;;  %v27693_v17 = vpop.f32.mrb[187].mxu1  ;;  %27873 = vmatmul.mubr.f32.vlgmr.msra.gmra.mrb[36].mxu1 %v35087_v6 }
 0xdba   : > { %27875 = vmatprep.mubr.msk.f32.mxu1 %vm30324_vm6, %v38626_v49  ;;  %27888 = vmatpush3.msra.mxu1 %v35615_v28 }
 0xdbb   : > { %27904 = vmatprep.subr.mxu1 %v38626_v49 }
 0xdbc   : > { %v18389_v42 = vpop.f32.mrb[188].mxu1 }
 0xdbd   : > { %v18390_v23 = vadd.f32 %v18389_v42, %v18289_v11  ;;  %v27696_v2 = vpop.f32.mrb[189].mxu1  ;;  %27876 = vmatmul.mubr.f32.gmra.mrb[38].mxu1 %v35095_v59 }
 0xdbe   : > { %27878 = vmatprep.mubr.msk.f32.mxu1 %vm30324_vm6, %v38626_v49 }
 0xdc0   : > { %v18396_v56 = vpop.f32.mrb[190].mxu1 }
 0xdc1   : > { %v18397_v12 = vadd.f32 %v18396_v56, %v18295_v9  ;;  %v27699_v17 = vpop.f32.mrb[191].mxu1  ;;  %27879 = vmatmul.mubr.f32.gmra.mrb[40].mxu1 %v35115_v14 }
 0xdc2   : > { %27881 = vmatprep.mubr.msk.f32.mxu1 %vm30324_vm6, %v38626_v49 }
 0xdc4   : > { %v18470_v22 = vpop.f32.mrb[192].mxu1 }
 0xdc5   : > { %v18471_v26 = vadd.f32 %v18470_v22, %v18369_v31  ;;  %v27704_v61 = vpop.f32.mrb[193].mxu1  ;;  %27882 = vmatmul.mubr.f32.gmra.mrb[42].mxu1 %v35128_v63 }
 0xdc6   : > { %27884 = vmatprep.mubr.msk.f32.mxu1 %vm30324_vm6, %v38626_v49 }
 0xdc8   : > { %v18478_v11 = vpop.f32.mrb[194].mxu1 }
 0xdc9   : > { %v18479_v54 = vadd.f32 %v18478_v11, %v18376_v10  ;;  %v27707_v42 = vpop.f32.mrb[195].mxu1  ;;  %27885 = vmatmul.mubr.f32.gmra.mrb[44].mxu1 %v35631_v4 }
 0xdca   : > { %27889 = vmatprep.mubr.msk.f32.mxu1 %vm30324_vm6, %v38626_v49 }
 0xdcc   : > { %v18486_v9 = vpop.f32.mrb[196].mxu1 }
 0xdcd   : > { %v18487_v2 = vadd.f32 %v18486_v9, %v18383_v29  ;;  %v27710_v56 = vpop.f32.mrb[197].mxu1  ;;  %27890 = vmatmul.mubr.f32.vlgmr.msra.gmra.mrb[46].mxu1 %v35099_v16 }
 0xdce   : > { %27892 = vmatprep.mubr.msk.f32.mxu1 %vm30324_vm6, %v38626_v49  ;;  %27905 = vmatpush3.msra.mxu1 %v35604_v39 }
 0xdcf   : > { %27921 = vmatprep.subr.mxu1 %v38626_v49 }
 0xdd0   : > { %v18494_v31 = vpop.f32.mrb[198].mxu1 }
 0xdd1   : > { %v18495_v10 = vadd.f32 %v18494_v31, %v18390_v23  ;;  %v27713_v17 = vpop.f32.mrb[199].mxu1  ;;  %27893 = vmatmul.mubr.f32.gmra.mrb[48].mxu1 %v35112_v40 }
 0xdd2   : > { %27895 = vmatprep.mubr.msk.f32.mxu1 %vm30324_vm6, %v38626_v49 }
 0xdd4   : > { %v18502_v22 = vpop.f32.mrb[200].mxu1 }
 0xdd5   : > { %v18503_v29 = vadd.f32 %v18502_v22, %v18397_v12  ;;  %v27716_v61 = vpop.f32.mrb[201].mxu1  ;;  %27896 = vmatmul.mubr.f32.gmra.mrb[50].mxu1 %v35125_v47 }
 0xdd6   : > { %27898 = vmatprep.mubr.msk.f32.mxu1 %vm30324_vm6, %v38626_v49 }
 0xdd8   : > { %v18576_v16 = vpop.f32.mrb[202].mxu1 }
 0xdd9   : > { %v18577_v11 = vadd.f32 %v18576_v16, %v18471_v26  ;;  %v27721_v42 = vpop.f32.mrb[203].mxu1  ;;  %27899 = vmatmul.mubr.f32.gmra.mrb[52].mxu1 %v35139_v46  ;;  %v38634_v26 = vand.u32 4294901760, %v35615_v28 }
 0xdda   : > { %27901 = vmatprep.mubr.msk.f32.mxu1 %vm30324_vm6, %v38626_v49 }
 0xddc   : > { %v18582_v23 = vpop.f32.mrb[204].mxu1 }
 0xddd   : > { %v18583_v9 = vadd.f32 %v18582_v23, %v18479_v54  ;;  %v27724_v56 = vpop.f32.mrb[205].mxu1  ;;  %27902 = vmatmul.mubr.f32.gmra.mrb[54].mxu1 %v35638_v3 }
 0xdde   : > { %27906 = vmatprep.mubr.msk.f32.mxu1 %vm30324_vm6, %v38626_v49 }
 0xde0   : > { %v18588_v12 = vpop.f32.mrb[206].mxu1 }
 0xde1   : > { %v18589_v31 = vadd.f32 %v18588_v12, %v18487_v2  ;;  %v27727_v17 = vpop.f32.mrb[207].mxu1  ;;  %27907 = vmatmul.mubr.f32.vlgmr.msra.gmra.mrb[56].mxu1 %v35118_v27 }
 0xde2   : > { %27909 = vmatprep.mubr.msk.f32.mxu1 %vm30324_vm6, %v38626_v49  ;;  %27922 = vmatpush3.msra.mxu1 %v38634_v26 }
 0xde3   : > { %27938 = vmatprep.subr.mxu1 %v38626_v49 }
 0xde4   : > { %v18594_v54 = vpop.f32.mrb[208].mxu1 }
 0xde5   : > { %v18595_v22 = vadd.f32 %v18594_v54, %v18495_v10  ;;  %v27730_v61 = vpop.f32.mrb[209].mxu1  ;;  %27910 = vmatmul.mubr.f32.gmra.mrb[58].mxu1 %v35133_v55 }
 0xde6   : > { %27912 = vmatprep.mubr.msk.f32.mxu1 %vm30324_vm6, %v38626_v49 }
 0xde8   : > { %v18600_v2 = vpop.f32.mrb[210].mxu1 }
 0xde9   : > { %v18601_v16 = vadd.f32 %v18600_v2, %v18503_v29  ;;  %v27733_v42 = vpop.f32.mrb[211].mxu1  ;;  %27913 = vmatmul.mubr.f32.gmra.mrb[60].mxu1 %v35146_v24 }
 0xdea   : > { %27915 = vmatprep.mubr.msk.f32.mxu1 %vm30324_vm6, %v38626_v49 }
 0xdec   : > { %v18672_v27 = vpop.f32.mrb[212].mxu1 }
 0xded   : > { %v18673_v28 = vadd.f32 %v18672_v27, %v18577_v11  ;;  %v27738_v23 = vpop.f32.mrb[213].mxu1  ;;  %27916 = vmatmul.mubr.f32.gmra.mrb[62].mxu1 %v35157_v48 }
 0xdee   : > { %27918 = vmatprep.mubr.msk.f32.mxu1 %vm30324_vm6, %v38626_v49 }
 0xdef   : > { %v35710_v10 = vadd.f32 %v18673_v28, %v35567_v13 }
 0xdf0   : > { %v18678_v56 = vpop.f32.mrb[214].mxu1 }
 0xdf1   : > { %v18679_v12 = vadd.f32 %v18678_v56, %v18583_v9  ;;  %v27741_v29 = vpop.f32.mrb[215].mxu1  ;;  %27919 = vmatmul.mubr.f32.gmra.mrb[64].mxu1 %v35645_v5 }
 0xdf2   : > { %27923 = vmatprep.mubr.msk.f32.mxu1 %vm30324_vm6, %v38626_v49 }
 0xdf3   : > { %v35716_v17 = vadd.f32 %v18679_v12, %v35572_v20 }
 0xdf4   : > { %v18684_v11 = vpop.f32.mrb[216].mxu1 }
 0xdf5   : > { %v18685_v26 = vadd.f32 %v18684_v11, %v18589_v31  ;;  %v27744_v54 = vpop.f32.mrb[217].mxu1  ;;  %27924 = vmatmul.mubr.f32.vlgmr.msra.gmra.mrb[66].mxu1 %v35087_v6 }
 0xdf6   : > { %27926 = vmatprep.mubr.msk.f32.mxu1 %vm30324_vm6, %v38626_v49  ;;  %27939 = vmatpush3.msra.mxu1 %v35604_v39 }
 0xdf7   : > { %v35723_v13 = vadd.f32 %v18685_v26, %v35578_v7  ;;  %27955 = vmatprep.subr.mxu1 %v38626_v49 }
 0xdf8   : > { %v18690_v9 = vpop.f32.mrb[218].mxu1 }
 0xdf9   : > { %v18691_v61 = vadd.f32 %v18690_v9, %v18595_v22  ;;  %v27747_v2 = vpop.f32.mrb[219].mxu1  ;;  %27927 = vmatmul.mubr.f32.gmra.mrb[68].mxu1 %v35095_v59 }
 0xdfa   : > { %27929 = vmatprep.mubr.msk.f32.mxu1 %vm30324_vm6, %v38626_v49 }
 0xdfb   : > { %v35730_v20 = vadd.f32 %v18691_v61, %v35585_v52  ;;  %v23141_v52 = vld [vmem:[%s36461_s4 + $0x28] sm:$0xff] }
 0xdfc   : > { %v18696_v31 = vpop.f32.mrb[220].mxu1 }
 0xdfd   : > { %v18697_v42 = vadd.f32 %v18696_v31, %v18601_v16  ;;  %v27750_v27 = vpop.f32.mrb[221].mxu1  ;;  %27930 = vmatmul.mubr.f32.gmra.mrb[70].mxu1 %v35115_v14 }
 0xdfe   : > { %27932 = vmatprep.mubr.msk.f32.mxu1 %vm30324_vm6, %v38626_v49 }
 0xdff   : > { %v35736_v7 = vadd.f32 %v18697_v42, %v35590_v51  ;;  %v35747_v51 = vand.u32 4294901760, %v23141_v52  ;;  %v35771_v42 = vand.u32 4294901760, %v34885_v15 }
 0xe00   : > { %v18799_v39 = vpop.f32.mrb[222].mxu1 }
 0xe01   : > { %v27755_v22 = vpop.f32.mrb[223].mxu1  ;;  %27933 = vmatmul.mubr.f32.gmra.mrb[72].mxu1 %v35128_v63  ;;  %v35758_v11 = vsub.f32 %v23141_v52, %v35747_v51 }
 0xe02   : > { %27935 = vmatprep.mubr.msk.f32.mxu1 %vm30324_vm6, %v38626_v49 }
 0xe04   : > { %v18809_v16 = vpop.f32.mrb[224].mxu1 }
 0xe05   : > { %v27758_v28 = vpop.f32.mrb[225].mxu1  ;;  %27936 = vmatmul.mubr.f32.gmra.mrb[74].mxu1 %v35631_v4 }
 0xe06   : > { %27940 = vmatprep.mubr.msk.f32.mxu1 %vm30324_vm6, %v38626_v49  ;;  %v35777_v28 = vand.u32 4294901760, %v34876_v30 }
 0xe08   : > { %v18819_v23 = vpop.f32.mrb[226].mxu1 }
 0xe09   : > { %v27761_v56 = vpop.f32.mrb[227].mxu1  ;;  %27941 = vmatmul.mubr.f32.vlgmr.msra.gmra.mrb[76].mxu1 %v35087_v6  ;;  %v20105_v6 = vand.u32 4294901760, %v35758_v11 }
 0xe0a   : > { %27943 = vmatprep.mubr.msk.f32.mxu1 %vm30324_vm6, %v38626_v49  ;;  %27956 = vmatpush3.msra.mxu1 %v35747_v51  ;;  %v35781_v56 = vsub.f32 %v34885_v15, %v35771_v42 }
 0xe0b   : > { %27972 = vmatprep.subr.mxu1 %v38626_v49  ;;  %v20106_v31 = vsub.f32 %v35758_v11, %v20105_v6 }
 0xe0c   : > { %v18829_v12 = vpop.f32.mrb[228].mxu1 }
 0xe0d   : > { %v27764_v29 = vpop.f32.mrb[229].mxu1  ;;  %27944 = vmatmul.mubr.f32.gmra.mrb[78].mxu1 %v35095_v59 }
 0xe0e   : > { %27946 = vmatprep.mubr.msk.f32.mxu1 %vm30324_vm6, %v38626_v49 }
 0xe10   : > { %v18839_v26 = vpop.f32.mrb[230].mxu1 }
 0xe11   : > { %v27767_v54 = vpop.f32.mrb[231].mxu1  ;;  %27947 = vmatmul.mubr.f32.gmra.mrb[80].mxu1 %v35115_v14 }
 0xe12   : > { %27949 = vmatprep.mubr.msk.f32.mxu1 %vm30324_vm6, %v38626_v49 }
 0xe14   : > { %v18915_v9 = vpop.f32.mrb[232].mxu1 }
 0xe15   : > { %v18916_v61 = vadd.f32 %v18915_v9, %v18799_v39  ;;  %v27772_v2 = vpop.f32.mrb[233].mxu1  ;;  %27950 = vmatmul.mubr.f32.gmra.mrb[82].mxu1 %v35128_v63  ;;  %v20107_v39 = vand.u32 4294901760, %v20106_v31 }
 0xe16   : > { %27952 = vmatprep.mubr.msk.f32.mxu1 %vm30324_vm6, %v38626_v49  ;;  %v37364_v2 = vand.u32 4294901760, %v35781_v56 }
 0xe18   : > { %v18921_v27 = vpop.f32.mrb[234].mxu1 }
 0xe19   : > { %v18922_v22 = vadd.f32 %v18921_v27, %v18809_v16  ;;  %v27775_v52 = vpop.f32.mrb[235].mxu1  ;;  %27953 = vmatmul.mubr.f32.gmra.mrb[84].mxu1 %v35631_v4  ;;  %v35788_v16 = vsub.f32 %v34876_v30, %v35777_v28 }
 0xe1a   : > { %27957 = vmatprep.mubr.msk.f32.mxu1 %vm30324_vm6, %v38626_v49 }
 0xe1c   : > { %v18927_v29 = vpop.f32.mrb[236].mxu1 }
 0xe1d   : > { %v18928_v54 = vadd.f32 %v18927_v29, %v18819_v23  ;;  %v27778_v9 = vpop.f32.mrb[237].mxu1  ;;  %27958 = vmatmul.mubr.f32.vlgmr.msra.gmra.mrb[86].mxu1 %v34871_v33  ;;  %v20085_v33 = vsub.f32 %v35781_v56, %v37364_v2  ;;  %v20094_v23 = vand.u32 4294901760, %v35788_v16 }
 0xe1e   : > { %27960 = vmatprep.mubr.msk.f32.mxu1 %vm30324_vm6, %v38626_v49  ;;  %27973 = vmatpush3.msra.mxu1 %v20107_v39 }
 0xe1f   : > { %27989 = vmatprep.subr.mxu1 %v38626_v49 }
 0xe20   : > { %v18933_v31 = vpop.f32.mrb[238].mxu1 }
 0xe21   : > { %v18934_v15 = vadd.f32 %v18933_v31, %v18829_v12  ;;  %v27781_v27 = vpop.f32.mrb[239].mxu1  ;;  %27961 = vmatmul.mubr.f32.gmra.mrb[88].mxu1 %v34916_v43  ;;  %v20086_v12 = vand.u32 4294901760, %v20085_v33  ;;  %v20095_v43 = vsub.f32 %v35788_v16, %v20094_v23 }
 0xe22   : > { %27963 = vmatprep.mubr.msk.f32.mxu1 %vm30324_vm6, %v38626_v49 }
 0xe23   : > { %v20096_v27 = vand.u32 4294901760, %v20095_v43 }
 0xe24   : > { %v18939_v30 = vpop.f32.mrb[240].mxu1 }
 0xe25   : > { %v18940_v52 = vadd.f32 %v18939_v30, %v18839_v26  ;;  %v27784_v39 = vpop.f32.mrb[241].mxu1  ;;  %27964 = vmatmul.mubr.f32.gmra.mrb[90].mxu1 %v34932_v38 }
 0xe26   : > { %27966 = vmatprep.mubr.msk.f32.mxu1 %vm30324_vm6, %v38626_v49 }
 0xe28   : > { %v19013_v29 = vpop.f32.mrb[242].mxu1 }
 0xe29   : > { %v19014_v9 = vadd.f32 %v19013_v29, %v18916_v61  ;;  %v27789_v31 = vpop.f32.mrb[243].mxu1  ;;  %27967 = vmatmul.mubr.f32.gmra.mrb[92].mxu1 %v20086_v12 }
 0xe2a   : > { %27969 = vmatprep.mubr.msk.f32.mxu1 %vm30324_vm6, %v38626_v49 }
 0xe2c   : > { %v19020_v26 = vpop.f32.mrb[244].mxu1 }
 0xe2d   : > { %v19021_v30 = vadd.f32 %v19020_v26, %v18922_v22  ;;  %v27792_v39 = vpop.f32.mrb[245].mxu1  ;;  %27970 = vmatmul.mubr.f32.gmra.mrb[94].mxu1 %v20096_v27 }
 0xe2e   : > { %27974 = vmatprep.mubr.msk.f32.mxu1 %vm30324_vm6, %v38626_v49 }
 0xe30   : > { %v19027_v38 = vpop.f32.mrb[246].mxu1 }
 0xe31   : > { %v19028_v33 = vadd.f32 %v19027_v38, %v18928_v54  ;;  %v27795_v2 = vpop.f32.mrb[247].mxu1  ;;  %27975 = vmatmul.mubr.f32.vlgmr.msra.gmra.mrb[96].mxu1 %v34835_v1 }
 0xe32   : > { %27977 = vmatprep.mubr.msk.f32.mxu1 %vm30324_vm6, %v38626_v49  ;;  %27990 = vmatpush3.msra.mxu1 %v35758_v11 }
 0xe33   : > { %28006 = vmatprep.subr.mxu1 %v38626_v49 }
 0xe34   : > { %v19034_v61 = vpop.f32.mrb[248].mxu1 }
 0xe35   : > { %v19035_v12 = vadd.f32 %v19034_v61, %v18934_v15  ;;  %v27798_v22 = vpop.f32.mrb[249].mxu1  ;;  %27978 = vmatmul.mubr.f32.gmra.mrb[98].mxu1 %v34855_v36 }
 0xe36   : > { %27980 = vmatprep.mubr.msk.f32.mxu1 %vm30324_vm6, %v38626_v49 }
 0xe38   : > { %v19041_v43 = vpop.f32.mrb[250].mxu1 }
 0xe39   : > { %v19042_v54 = vadd.f32 %v19041_v43, %v18940_v52  ;;  %v27801_v2 = vpop.f32.mrb[251].mxu1  ;;  %27981 = vmatmul.mubr.f32.gmra.mrb[100].mxu1 %v34894_v0 }
 0xe3a   : > { %27983 = vmatprep.mubr.msk.f32.mxu1 %vm30324_vm6, %v38626_v49 }
 0xe3c   : > { %v19115_v29 = vpop.f32.mrb[252].mxu1 }
 0xe3d   : > { %v19116_v31 = vadd.f32 %v19115_v29, %v19014_v9  ;;  %v27806_v27 = vpop.f32.mrb[253].mxu1  ;;  %27984 = vmatmul.mubr.f32.gmra.mrb[102].mxu1 %v35771_v42 }
 0xe3e   : > { %27986 = vmatprep.mubr.msk.f32.mxu1 %vm30324_vm6, %v38626_v49 }
 0xe40   : > { %v19123_v15 = vpop.f32.mrb[254].mxu1 }
 0xe41   : > { %v19124_v26 = vadd.f32 %v19123_v15, %v19021_v30  ;;  %v27809_v39 = vpop.f32.mrb[255].mxu1  ;;  %27987 = vmatmul.mubr.f32.gmra.mrb[104].mxu1 %v35777_v28 }
 0xe42   : > { %27991 = vmatprep.mubr.msk.f32.mxu1 %vm30324_vm6, %v38626_v49 }
 0xe44   : > { %v19131_v52 = vpop.f32.mrb[0].mxu1 }
 0xe45   : > { %v19132_v38 = vadd.f32 %v19131_v52, %v19028_v33  ;;  %v27812_v61 = vpop.f32.mrb[1].mxu1  ;;  %27992 = vmatmul.mubr.f32.vlgmr.msra.gmra.mrb[106].mxu1 %v34844_v45  ;;  %v38635_v52 = vld [vmem:[#allocation187_spill] sm:$0xff] }
 0xe46   : > { %27994 = vmatprep.mubr.msk.f32.mxu1 %vm30324_vm6, %v38626_v49  ;;  %28007 = vmatpush3.msra.mxu1 %v35747_v51 }
 0xe47   : > { %28023 = vmatprep.subr.mxu1 %v38626_v49 }
 0xe48   : > { %v19139_v9 = vpop.f32.mrb[2].mxu1 }
 0xe49   : > { %v19140_v30 = vadd.f32 %v19139_v9, %v19035_v12  ;;  %v27815_v22 = vpop.f32.mrb[3].mxu1  ;;  %27995 = vmatmul.mubr.f32.gmra.mrb[108].mxu1 %v34862_v8  ;;  %v38636_v9 = vld [vmem:[#allocation190_spill] sm:$0xff] }
 0xe4a   : > { %27997 = vmatprep.mubr.msk.f32.mxu1 %vm30324_vm6, %v38626_v49 }
 0xe4c   : > { %v19147_v43 = vpop.f32.mrb[4].mxu1 }
 0xe4d   : > { %v19148_v33 = vadd.f32 %v19147_v43, %v19042_v54  ;;  %v27818_v2 = vpop.f32.mrb[5].mxu1  ;;  %27998 = vmatmul.mubr.f32.gmra.mrb[110].mxu1 %v34912_v50 }
 0xe4e   : > { %28000 = vmatprep.mubr.msk.f32.mxu1 %vm30324_vm6, %v38626_v49  ;;  %v38637_v2 = vld [vmem:[#allocation197_spill] sm:$0xff] }
 0xe50   : > { %v19221_v45 = vpop.f32.mrb[6].mxu1 }
 0xe51   : > { %v19222_v29 = vadd.f32 %v19221_v45, %v19116_v31  ;;  %v27823_v27 = vpop.f32.mrb[7].mxu1  ;;  %28001 = vmatmul.mubr.f32.gmra.mrb[112].mxu1 %v35781_v56 }
 0xe52   : > { %28003 = vmatprep.mubr.msk.f32.mxu1 %vm30324_vm6, %v38626_v49  ;;  %v38638_v27 = vand.u32 4294901760, %v35781_v56 }
 0xe54   : > { %v19227_v8 = vpop.f32.mrb[8].mxu1 }
 0xe55   : > { %v19228_v12 = vadd.f32 %v19227_v8, %v19124_v26  ;;  %v27826_v15 = vpop.f32.mrb[9].mxu1  ;;  %28004 = vmatmul.mubr.f32.gmra.mrb[114].mxu1 %v35788_v16 }
 0xe56   : > { %28008 = vmatprep.mubr.msk.f32.mxu1 %vm30324_vm6, %v38626_v49 }
 0xe58   : > { %v19233_v50 = vpop.f32.mrb[10].mxu1 }
 0xe59   : > { %v19234_v54 = vadd.f32 %v19233_v50, %v19132_v38  ;;  %v27829_v39 = vpop.f32.mrb[11].mxu1  ;;  %28009 = vmatmul.mubr.f32.vlgmr.msra.gmra.mrb[116].mxu1 %v38635_v52 }
 0xe5a   : > { %28011 = vmatprep.mubr.msk.f32.mxu1 %vm30324_vm6, %v38626_v49  ;;  %28024 = vmatpush3.msra.mxu1 %v20105_v6 }
 0xe5b   : > { %28040 = vmatprep.subr.mxu1 %v38626_v49 }
 0xe5c   : > { %v19239_v31 = vpop.f32.mrb[12].mxu1 }
 0xe5d   : > { %v19240_v26 = vadd.f32 %v19239_v31, %v19140_v30  ;;  %v27832_v61 = vpop.f32.mrb[13].mxu1  ;;  %28012 = vmatmul.mubr.f32.gmra.mrb[118].mxu1 %v38636_v9 }
 0xe5e   : > { %28014 = vmatprep.mubr.msk.f32.mxu1 %vm30324_vm6, %v38626_v49 }
 0xe60   : > { %v19245_v38 = vpop.f32.mrb[14].mxu1 }
 0xe61   : > { %v19246_v22 = vadd.f32 %v19245_v38, %v19148_v33  ;;  %v27835_v43 = vpop.f32.mrb[15].mxu1  ;;  %28015 = vmatmul.mubr.f32.gmra.mrb[120].mxu1 %v38637_v2 }
 0xe62   : > { %28017 = vmatprep.mubr.msk.f32.mxu1 %vm30324_vm6, %v38626_v49  ;;  %v38639_v43 = vld [vmem:[#allocation183_spill] sm:$0xff] }
 0xe63   : > { %v35905_v2 = vand.u32 4294901760, %v38639_v43 }
 0xe64   : > { %v19317_v11 = vpop.f32.mrb[16].mxu1 }
 0xe65   : > { %v19318_v6 = vadd.f32 %v19317_v11, %v19222_v29  ;;  %v27840_v45 = vpop.f32.mrb[17].mxu1  ;;  %28018 = vmatmul.mubr.f32.gmra.mrb[122].mxu1 %v38638_v27  ;;  %v38640_v27 = vld [vmem:[#allocation294_spill] sm:$0xff] }
 0xe66   : > { %28020 = vmatprep.mubr.msk.f32.mxu1 %vm30324_vm6, %v38626_v49 }
 0xe67   : > { %v35860_v30 = vadd.f32 %v19318_v6, %v35710_v10 }
 0xe68   : > { %v19323_v8 = vpop.f32.mrb[18].mxu1 }
 0xe69   : > { %v19324_v33 = vadd.f32 %v19323_v8, %v19228_v12  ;;  %v27843_v15 = vpop.f32.mrb[19].mxu1  ;;  %28021 = vmatmul.mubr.f32.gmra.mrb[124].mxu1 %v20094_v23  ;;  %v35919_v8 = vand.u32 4294901760, %v38640_v27 }
 0xe6a   : > { %28025 = vmatprep.mubr.msk.f32.mxu1 %vm30324_vm6, %v38626_v49 }
 0xe6b   : > { %v35867_v29 = vadd.f32 %v19324_v33, %v35716_v17 }
 0xe6c   : > { %v19329_v56 = vpop.f32.mrb[20].mxu1 }
 0xe6d   : > { %v19330_v50 = vadd.f32 %v19329_v56, %v19234_v54  ;;  %v27846_v39 = vpop.f32.mrb[21].mxu1  ;;  %28026 = vmatmul.mubr.f32.vlgmr.msra.gmra.mrb[126].mxu1 %v34835_v1 }
 0xe6e   : > { %28028 = vmatprep.mubr.msk.f32.mxu1 %vm30324_vm6, %v38626_v49  ;;  %28041 = vmatpush3.msra.mxu1 %v35747_v51  ;;  %v38641_v39 = vld [vmem:[#allocation198_spill] sm:$0xff] }
 0xe6f   : > { %28057 = vmatprep.subr.mxu1 %v38626_v49  ;;  %v35875_v10 = vadd.f32 %v19330_v50, %v35723_v13  ;;  %v35928_v50 = vsub.f32 %v38640_v27, %v35919_v8 }
 0xe70   : > { %v19335_v16 = vpop.f32.mrb[22].mxu1 }
 0xe71   : > { %v19336_v23 = vadd.f32 %v19335_v16, %v19240_v26  ;;  %v27849_v12 = vpop.f32.mrb[23].mxu1  ;;  %28029 = vmatmul.mubr.f32.gmra.mrb[128].mxu1 %v34855_v36  ;;  %v35931_v16 = vand.u32 4294901760, %v38641_v39 }
 0xe72   : > { %28031 = vmatprep.mubr.msk.f32.mxu1 %vm30324_vm6, %v38626_v49 }
 0xe73   : > { %v35881_v17 = vadd.f32 %v19336_v23, %v35730_v20  ;;  %v23142_v20 = vld [vmem:[%s36461_s4 + $0x30] sm:$0xff] }
 0xe74   : > { %v19341_v54 = vpop.f32.mrb[24].mxu1 }
 0xe75   : > { %v19342_v52 = vadd.f32 %v19341_v54, %v19246_v22  ;;  %v27852_v31 = vpop.f32.mrb[25].mxu1  ;;  %28032 = vmatmul.mubr.f32.gmra.mrb[130].mxu1 %v34894_v0 }
 0xe76   : > { %28034 = vmatprep.mubr.msk.f32.mxu1 %vm30324_vm6, %v38626_v49 }
 0xe77   : > { %v35887_v13 = vadd.f32 %v19342_v52, %v35736_v7  ;;  %v35898_v7 = vand.u32 4294901760, %v23142_v20  ;;  %v38642_v52 = vld [vmem:[#allocation20_spill] sm:$0xff] }
 0xe78   : > { %v19427_v51 = vpop.f32.mrb[26].mxu1  ;;  %v35940_v31 = vand.u32 4294901760, %v38642_v52 }
 0xe79   : > { %v27857_v26 = vpop.f32.mrb[27].mxu1  ;;  %28035 = vmatmul.mubr.f32.gmra.mrb[132].mxu1 %v35771_v42  ;;  %v35912_v45 = vsub.f32 %v23142_v20, %v35898_v7  ;;  %v37366_v20 = vand.u32 4294901760, %v35928_v50 }
 0xe7a   : > { %28037 = vmatprep.mubr.msk.f32.mxu1 %vm30324_vm6, %v38626_v49 }
 0xe7c   : > { %v19437_v61 = vpop.f32.mrb[28].mxu1 }
 0xe7d   : > { %v27860_v9 = vpop.f32.mrb[29].mxu1  ;;  %28038 = vmatmul.mubr.f32.gmra.mrb[134].mxu1 %v35777_v28 }
 0xe7e   : > { %28042 = vmatprep.mubr.msk.f32.mxu1 %vm30324_vm6, %v38626_v49 }
 0xe80   : > { %v19447_v38 = vpop.f32.mrb[30].mxu1 }
 0xe81   : > { %v27863_v22 = vpop.f32.mrb[31].mxu1  ;;  %28043 = vmatmul.mubr.f32.vlgmr.msra.gmra.mrb[136].mxu1 %v34835_v1  ;;  %v35916_v1 = vsub.f32 %v38639_v43, %v35905_v2  ;;  %v38643_v43 = vld [vmem:[#allocation11_spill] sm:$0xff] }
 0xe82   : > { %28045 = vmatprep.mubr.msk.f32.mxu1 %vm30324_vm6, %v38626_v49  ;;  %28058 = vmatpush3.msra.mxu1 %v35898_v7 }
 0xe83   : > { %28074 = vmatprep.subr.mxu1 %v38626_v49  ;;  %v20699_v56 = vand.u32 4294901760, %v35916_v1 }
 0xe84   : > { %v19457_v11 = vpop.f32.mrb[32].mxu1 }
 0xe85   : > { %v27866_v6 = vpop.f32.mrb[33].mxu1  ;;  %28046 = vmatmul.mubr.f32.gmra.mrb[138].mxu1 %v34855_v36  ;;  %v37368_v36 = vand.u32 4294901760, %v35912_v45  ;;  %v20700_v26 = vsub.f32 %v35916_v1, %v20699_v56 }
 0xe86   : > { %28048 = vmatprep.mubr.msk.f32.mxu1 %vm30324_vm6, %v38626_v49  ;;  %v35952_v6 = vand.u32 4294901760, %v38643_v43 }
 0xe88   : > { %v19467_v33 = vpop.f32.mrb[34].mxu1 }
 0xe89   : > { %v27869_v15 = vpop.f32.mrb[35].mxu1  ;;  %28049 = vmatmul.mubr.f32.gmra.mrb[140].mxu1 %v34894_v0  ;;  %v20751_v0 = vsub.f32 %v35912_v45, %v37368_v36 }
 0xe8a   : > { %28051 = vmatprep.mubr.msk.f32.mxu1 %vm30324_vm6, %v38626_v49  ;;  %v20701_v15 = vand.u32 4294901760, %v20700_v26 }
 0xe8b   : > { %v20752_v27 = vand.u32 4294901760, %v20751_v0  ;;  %v35968_v0 = vsub.f32 %v38643_v43, %v35952_v6 }
 0xe8c   : > { %v19543_v23 = vpop.f32.mrb[36].mxu1 }
 0xe8d   : > { %v19544_v12 = vadd.f32 %v19543_v23, %v19427_v51  ;;  %v27874_v54 = vpop.f32.mrb[37].mxu1  ;;  %28052 = vmatmul.mubr.f32.gmra.mrb[142].mxu1 %v35771_v42  ;;  %v35948_v51 = vsub.f32 %v38641_v39, %v35931_v16  ;;  %v20710_v23 = vsub.f32 %v35928_v50, %v37366_v20 }
 0xe8e   : > { %28054 = vmatprep.mubr.msk.f32.mxu1 %vm30324_vm6, %v38626_v49 }
 0xe8f   : > { %v37365_v39 = vand.u32 4294901760, %v35948_v51  ;;  %v20711_v26 = vand.u32 4294901760, %v20710_v23  ;;  %v20739_v23 = vand.u32 4294901760, %v35968_v0 }
 0xe90   : > { %v19549_v42 = vpop.f32.mrb[38].mxu1 }
 0xe91   : > { %v19550_v9 = vadd.f32 %v19549_v42, %v19437_v61  ;;  %v27877_v22 = vpop.f32.mrb[39].mxu1  ;;  %28055 = vmatmul.mubr.f32.gmra.mrb[144].mxu1 %v35777_v28  ;;  %v35962_v61 = vsub.f32 %v38642_v52, %v35940_v31 }
 0xe92   : > { %28059 = vmatprep.mubr.msk.f32.mxu1 %vm30324_vm6, %v38626_v49  ;;  %v20720_v22 = vsub.f32 %v35948_v51, %v37365_v39 }
 0xe93   : > { %v37367_v52 = vand.u32 4294901760, %v35962_v61 }
 0xe94   : > { %v19555_v54 = vpop.f32.mrb[40].mxu1 }
 0xe95   : > { %v19556_v28 = vadd.f32 %v19555_v54, %v19447_v38  ;;  %v27880_v42 = vpop.f32.mrb[41].mxu1  ;;  %28060 = vmatmul.mubr.f32.vlgmr.msra.gmra.mrb[146].mxu1 %v20701_v15  ;;  %v20730_v43 = vsub.f32 %v35962_v61, %v37367_v52 }
 0xe96   : > { %28062 = vmatprep.mubr.msk.f32.mxu1 %vm30324_vm6, %v38626_v49  ;;  %28075 = vmatpush3.msra.mxu1 %v20752_v27  ;;  %v20721_v27 = vand.u32 4294901760, %v20720_v22 }
 0xe97   : > { %28091 = vmatprep.subr.mxu1 %v38626_v49 }
 0xe98   : > { %v19561_v38 = vpop.f32.mrb[42].mxu1 }
 0xe99   : > { %v19562_v54 = vadd.f32 %v19561_v38, %v19457_v11  ;;  %v27883_v15 = vpop.f32.mrb[43].mxu1  ;;  %28063 = vmatmul.mubr.f32.gmra.mrb[148].mxu1 %v20711_v26  ;;  %v20731_v11 = vand.u32 4294901760, %v20730_v43  ;;  %v20740_v26 = vsub.f32 %v35968_v0, %v20739_v23 }
 0xe9a   : > { %28065 = vmatprep.mubr.msk.f32.mxu1 %vm30324_vm6, %v38626_v49 }
 0xe9b   : > { %v20741_v52 = vand.u32 4294901760, %v20740_v26 }
 0xe9c   : > { %v19567_v42 = vpop.f32.mrb[44].mxu1 }
 0xe9d   : > { %v19568_v39 = vadd.f32 %v19567_v42, %v19467_v33  ;;  %v27886_v20 = vpop.f32.mrb[45].mxu1  ;;  %28066 = vmatmul.mubr.f32.gmra.mrb[150].mxu1 %v20721_v27 }
 0xe9e   : > { %28068 = vmatprep.mubr.msk.f32.mxu1 %vm30324_vm6, %v38626_v49 }
 0xea0   : > { %v19641_v38 = vpop.f32.mrb[46].mxu1 }
 0xea1   : > { %v19642_v22 = vadd.f32 %v19641_v38, %v19544_v12  ;;  %v27891_v15 = vpop.f32.mrb[47].mxu1  ;;  %28069 = vmatmul.mubr.f32.gmra.mrb[152].mxu1 %v20731_v11 }
 0xea2   : > { %28071 = vmatprep.mubr.msk.f32.mxu1 %vm30324_vm6, %v38626_v49 }
 0xea4   : > { %v19648_v36 = vpop.f32.mrb[48].mxu1 }
 0xea5   : > { %v19649_v33 = vadd.f32 %v19648_v36, %v19550_v9  ;;  %v27894_v20 = vpop.f32.mrb[49].mxu1  ;;  %28072 = vmatmul.mubr.f32.gmra.mrb[154].mxu1 %v20741_v52 }
 0xea6   : > { %28076 = vmatprep.mubr.msk.f32.mxu1 %vm30324_vm6, %v38626_v49 }
 0xea8   : > { %v19655_v27 = vpop.f32.mrb[50].mxu1 }
 0xea9   : > { %v19656_v43 = vadd.f32 %v19655_v27, %v19556_v28  ;;  %v27897_v42 = vpop.f32.mrb[51].mxu1  ;;  %28077 = vmatmul.mubr.f32.vlgmr.msra.gmra.mrb[156].mxu1 %v35905_v2 }
 0xeaa   : > { %28079 = vmatprep.mubr.msk.f32.mxu1 %vm30324_vm6, %v38626_v49  ;;  %28092 = vmatpush3.msra.mxu1 %v35912_v45 }
 0xeab   : > { %28108 = vmatprep.subr.mxu1 %v38626_v49 }
 0xeac   : > { %v19662_v12 = vpop.f32.mrb[52].mxu1 }
 0xead   : > { %v19663_v11 = vadd.f32 %v19662_v12, %v19562_v54  ;;  %v27900_v36 = vpop.f32.mrb[53].mxu1  ;;  %28080 = vmatmul.mubr.f32.gmra.mrb[158].mxu1 %v35919_v8 }
 0xeae   : > { %28082 = vmatprep.mubr.msk.f32.mxu1 %vm30324_vm6, %v38626_v49 }
 0xeb0   : > { %v19669_v9 = vpop.f32.mrb[54].mxu1 }
 0xeb1   : > { %v19670_v28 = vadd.f32 %v19669_v9, %v19568_v39  ;;  %v27903_v52 = vpop.f32.mrb[55].mxu1  ;;  %28083 = vmatmul.mubr.f32.gmra.mrb[160].mxu1 %v35931_v16 }
 0xeb2   : > { %28085 = vmatprep.mubr.msk.f32.mxu1 %vm30324_vm6, %v38626_v49 }
 0xeb4   : > { %v19743_v26 = vpop.f32.mrb[56].mxu1 }
 0xeb5   : > { %v19744_v38 = vadd.f32 %v19743_v26, %v19642_v22  ;;  %v27908_v15 = vpop.f32.mrb[57].mxu1  ;;  %28086 = vmatmul.mubr.f32.gmra.mrb[162].mxu1 %v35940_v31 }
 0xeb6   : > { %28088 = vmatprep.mubr.msk.f32.mxu1 %vm30324_vm6, %v38626_v49 }
 0xeb8   : > { %v19751_v54 = vpop.f32.mrb[58].mxu1 }
 0xeb9   : > { %v19752_v20 = vadd.f32 %v19751_v54, %v19649_v33  ;;  %v27911_v27 = vpop.f32.mrb[59].mxu1  ;;  %28089 = vmatmul.mubr.f32.gmra.mrb[164].mxu1 %v35952_v6 }
 0xeba   : > { %28093 = vmatprep.mubr.msk.f32.mxu1 %vm30324_vm6, %v38626_v49 }
 0xebc   : > { %v19759_v39 = vpop.f32.mrb[60].mxu1 }
 0xebd   : > { %v19760_v42 = vadd.f32 %v19759_v39, %v19656_v43  ;;  %v27914_v12 = vpop.f32.mrb[61].mxu1  ;;  %28094 = vmatmul.mubr.f32.vlgmr.msra.gmra.mrb[166].mxu1 %v35916_v1 }
 0xebe   : > { %28096 = vmatprep.mubr.msk.f32.mxu1 %vm30324_vm6, %v38626_v49  ;;  %28109 = vmatpush3.msra.mxu1 %v35898_v7 }
 0xebf   : > { %28125 = vmatprep.subr.mxu1 %v38626_v49 }
 0xec0   : > { %v19767_v22 = vpop.f32.mrb[62].mxu1 }
 0xec1   : > { %v27917_v33 = vpop.f32.mrb[63].mxu1  ;;  %28097 = vmatmul.mubr.f32.gmra.mrb[168].mxu1 %v35928_v50  ;;  %v19768_v36 = vadd.f32 %v19767_v22, %v19663_v11 }
 0xec2   : > { %28099 = vmatprep.mubr.msk.f32.mxu1 %vm30324_vm6, %v38626_v49 }
 0xec4   : > { %v19775_v9 = vpop.f32.mrb[64].mxu1 }
 0xec5   : > { %v27920_v43 = vpop.f32.mrb[65].mxu1  ;;  %28100 = vmatmul.mubr.f32.gmra.mrb[170].mxu1 %v35948_v51  ;;  %v19776_v52 = vadd.f32 %v19775_v9, %v19670_v28 }
 0xec6   : > { %28102 = vmatprep.mubr.msk.f32.mxu1 %vm30324_vm6, %v38626_v49  ;;  %v38645_v43 = vand.u32 4294901760, %v35928_v50 }
 0xec8   : > { %v19849_v26 = vpop.f32.mrb[66].mxu1 }
 0xec9   : > { %v27925_v15 = vpop.f32.mrb[67].mxu1  ;;  %28103 = vmatmul.mubr.f32.gmra.mrb[172].mxu1 %v35962_v61  ;;  %v19850_v54 = vadd.f32 %v19849_v26, %v19744_v38  ;;  %v38644_v38 = vand.u32 4294901760, %v35912_v45  ;;  %v38646_v26 = vand.u32 4294901760, %v35948_v51 }
 0xeca   : > { %28105 = vmatprep.mubr.msk.f32.mxu1 %vm30324_vm6, %v38626_v49 }
 0xecc   : > { %v19855_v11 = vpop.f32.mrb[68].mxu1 }
 0xecd   : > { %v27928_v27 = vpop.f32.mrb[69].mxu1  ;;  %28106 = vmatmul.mubr.f32.gmra.mrb[174].mxu1 %v35968_v0  ;;  %v19856_v39 = vadd.f32 %v19855_v11, %v19752_v20 }
 0xece   : > { %28110 = vmatprep.mubr.msk.f32.mxu1 %vm30324_vm6, %v38626_v49 }
 0xed0   : > { %v19861_v28 = vpop.f32.mrb[70].mxu1 }
 0xed1   : > { %v27931_v12 = vpop.f32.mrb[71].mxu1  ;;  %28111 = vmatmul.mubr.f32.vlgmr.msra.gmra.mrb[176].mxu1 %v20699_v56  ;;  %v19862_v22 = vadd.f32 %v19861_v28, %v19760_v42 }
 0xed2   : > { %28113 = vmatprep.mubr.msk.f32.mxu1 %vm30324_vm6, %v38626_v49  ;;  %28126 = vmatpush3.msra.mxu1 %v38644_v38 }
 0xed3   : > { %28142 = vmatprep.subr.mxu1 %v38626_v49 }
 0xed4   : > { %v19867_v33 = vpop.f32.mrb[72].mxu1 }
 0xed5   : > { %v19868_v9 = vadd.f32 %v19867_v33, %v19768_v36  ;;  %v27934_v20 = vpop.f32.mrb[73].mxu1  ;;  %28114 = vmatmul.mubr.f32.gmra.mrb[178].mxu1 %v38645_v43  ;;  %v38647_v36 = vand.u32 4294901760, %v35962_v61 }
 0xed6   : > { %28116 = vmatprep.mubr.msk.f32.mxu1 %vm30324_vm6, %v38626_v49 }
 0xed8   : > { %v19873_v1 = vpop.f32.mrb[74].mxu1 }
 0xed9   : > { %v19874_v56 = vadd.f32 %v19873_v1, %v19776_v52  ;;  %v27937_v42 = vpop.f32.mrb[75].mxu1  ;;  %28117 = vmatmul.mubr.f32.gmra.mrb[180].mxu1 %v38646_v26 }
 0xeda   : > { %28119 = vmatprep.mubr.msk.f32.mxu1 %vm30324_vm6, %v38626_v49 }
 0xedc   : > { %v19945_v45 = vpop.f32.mrb[76].mxu1 }
 0xedd   : > { %v19946_v15 = vadd.f32 %v19945_v45, %v19850_v54  ;;  %v27942_v11 = vpop.f32.mrb[77].mxu1  ;;  %28120 = vmatmul.mubr.f32.gmra.mrb[182].mxu1 %v38647_v36 }
 0xede   : > { %28122 = vmatprep.mubr.msk.f32.mxu1 %vm30324_vm6, %v38626_v49 }
 0xedf   : > { %v36044_v50 = vadd.f32 %v19946_v15, %v35860_v30 }
 0xee0   : > { %v19951_v52 = vpop.f32.mrb[78].mxu1 }
 0xee1   : > { %v19952_v27 = vadd.f32 %v19951_v52, %v19856_v39  ;;  %v27945_v28 = vpop.f32.mrb[79].mxu1  ;;  %28123 = vmatmul.mubr.f32.gmra.mrb[184].mxu1 %v20739_v23 }
 0xee2   : > { %28127 = vmatprep.mubr.msk.f32.mxu1 %vm30324_vm6, %v38626_v49  ;;  %v38648_v28 = vld [vmem:[#allocation193_spill] sm:$0xff] }
 0xee3   : > { %v36051_v51 = vadd.f32 %v19952_v27, %v35867_v29 }
 0xee4   : > { %v19957_v61 = vpop.f32.mrb[80].mxu1 }
 0xee5   : > { %v19958_v54 = vadd.f32 %v19957_v61, %v19862_v22  ;;  %v27948_v12 = vpop.f32.mrb[81].mxu1  ;;  %28128 = vmatmul.mubr.f32.vlgmr.msra.gmra.mrb[186].mxu1 %v35905_v2  ;;  %v36106_v61 = vand.u32 4294901760, %v38648_v28 }
 0xee6   : > { %28130 = vmatprep.mubr.msk.f32.mxu1 %vm30324_vm6, %v38626_v49  ;;  %28143 = vmatpush3.msra.mxu1 %v35898_v7 }
 0xee7   : > { %v36058_v30 = vadd.f32 %v19958_v54, %v35875_v10  ;;  %28159 = vmatprep.subr.mxu1 %v38626_v49 }
 0xee8   : > { %v19963_v0 = vpop.f32.mrb[82].mxu1 }
 0xee9   : > { %v19964_v23 = vadd.f32 %v19963_v0, %v19868_v9  ;;  %v27951_v39 = vpop.f32.mrb[83].mxu1  ;;  %28131 = vmatmul.mubr.f32.gmra.mrb[188].mxu1 %v35919_v8 }
 0xeea   : > { %28133 = vmatprep.mubr.msk.f32.mxu1 %vm30324_vm6, %v38626_v49  ;;  %v36116_v39 = vsub.f32 %v38648_v28, %v36106_v61 }
 0xeeb   : > { %v36065_v29 = vadd.f32 %v19964_v23, %v35881_v17  ;;  %v23143_v17 = vld [vmem:[%s36461_s4 + $0x38] sm:$0xff] }
 0xeec   : > { %v19969_v22 = vpop.f32.mrb[84].mxu1 }
 0xeed   : > { %v19970_v38 = vadd.f32 %v19969_v22, %v19874_v56  ;;  %v27954_v33 = vpop.f32.mrb[85].mxu1  ;;  %28134 = vmatmul.mubr.f32.gmra.mrb[190].mxu1 %v35931_v16 }
 0xeee   : > { %28136 = vmatprep.mubr.msk.f32.mxu1 %vm30324_vm6, %v38626_v49 }
 0xeef   : > { %v36071_v10 = vadd.f32 %v19970_v38, %v35887_v13  ;;  %v36082_v13 = vand.u32 4294901760, %v23143_v17 }
 0xef0   : > { %v20058_v7 = vpop.f32.mrb[86].mxu1 }
 0xef1   : > { %v27959_v9 = vpop.f32.mrb[87].mxu1  ;;  %28137 = vmatmul.mubr.f32.gmra.mrb[192].mxu1 %v35940_v31  ;;  %v36093_v45 = vsub.f32 %v23143_v17, %v36082_v13 }
 0xef2   : > { %28139 = vmatprep.mubr.msk.f32.mxu1 %vm30324_vm6, %v38626_v49 }
 0xef4   : > { %v20068_v20 = vpop.f32.mrb[88].mxu1 }
 0xef5   : > { %v27962_v43 = vpop.f32.mrb[89].mxu1  ;;  %28140 = vmatmul.mubr.f32.gmra.mrb[194].mxu1 %v35952_v6 }
 0xef6   : > { %28144 = vmatprep.mubr.msk.f32.mxu1 %vm30324_vm6, %v38626_v49 }
 0xef8   : > { %v20078_v1 = vpop.f32.mrb[90].mxu1 }
 0xef9   : > { %v27965_v56 = vpop.f32.mrb[91].mxu1  ;;  %28145 = vmatmul.mubr.f32.vlgmr.msra.gmra.mrb[196].mxu1 %v35905_v2  ;;  %v21381_v2 = vand.u32 4294901760, %v36093_v45 }
 0xefa   : > { %28147 = vmatprep.mubr.msk.f32.mxu1 %vm30324_vm6, %v38626_v49  ;;  %28160 = vmatpush3.msra.mxu1 %v36082_v13 }
 0xefb   : > { %28176 = vmatprep.subr.mxu1 %v38626_v49 }
 0xefc   : > { %v20088_v42 = vpop.f32.mrb[92].mxu1 }
 0xefd   : > { %v27968_v26 = vpop.f32.mrb[93].mxu1  ;;  %28148 = vmatmul.mubr.f32.gmra.mrb[198].mxu1 %v35919_v8  ;;  %v21382_v8 = vsub.f32 %v36093_v45, %v21381_v2 }
 0xefe   : > { %28150 = vmatprep.mubr.msk.f32.mxu1 %vm30324_vm6, %v38626_v49 }
 0xeff   : > { %v21383_v0 = vand.u32 4294901760, %v21382_v8 }
 0xf00   : > { %v20098_v15 = vpop.f32.mrb[94].mxu1 }
 0xf01   : > { %v27971_v11 = vpop.f32.mrb[95].mxu1  ;;  %28151 = vmatmul.mubr.f32.gmra.mrb[200].mxu1 %v35931_v16 }
 0xf02   : > { %28153 = vmatprep.mubr.msk.f32.mxu1 %vm30324_vm6, %v38626_v49 }
 0xf04   : > { %v20174_v36 = vpop.f32.mrb[96].mxu1 }
 0xf05   : > { %v20175_v52 = vadd.f32 %v20174_v36, %v20058_v7  ;;  %v27976_v27 = vpop.f32.mrb[97].mxu1  ;;  %28154 = vmatmul.mubr.f32.gmra.mrb[202].mxu1 %v35940_v31  ;;  %v38649_v31 = vld [vmem:[#allocation195_spill] sm:$0xff]  ;;  %v21360_v7 = vand.u32 4294901760, %v36116_v39 }
 0xf06   : > { %28156 = vmatprep.mubr.msk.f32.mxu1 %vm30324_vm6, %v38626_v49  ;;  %v36112_v23 = vand.u32 4294901760, %v38649_v31 }
 0xf08   : > { %v20180_v16 = vpop.f32.mrb[98].mxu1 }
 0xf09   : > { %v20181_v54 = vadd.f32 %v20180_v16, %v20068_v20  ;;  %v27979_v12 = vpop.f32.mrb[99].mxu1  ;;  %28157 = vmatmul.mubr.f32.gmra.mrb[204].mxu1 %v35952_v6  ;;  %v36123_v6 = vsub.f32 %v38649_v31, %v36112_v23 }
 0xf0a   : > { %28161 = vmatprep.mubr.msk.f32.mxu1 %vm30324_vm6, %v38626_v49 }
 0xf0b   : > { %v21370_v43 = vand.u32 4294901760, %v36123_v6 }
 0xf0c   : > { %v20186_v22 = vpop.f32.mrb[100].mxu1 }
 0xf0d   : > { %v20187_v38 = vadd.f32 %v20186_v22, %v20078_v1  ;;  %v27982_v33 = vpop.f32.mrb[101].mxu1  ;;  %28162 = vmatmul.mubr.f32.vlgmr.msra.gmra.mrb[206].mxu1 %v35487_v35  ;;  %v21361_v35 = vsub.f32 %v36116_v39, %v21360_v7 }
 0xf0e   : > { %28164 = vmatprep.mubr.msk.f32.mxu1 %vm30324_vm6, %v38626_v49  ;;  %28177 = vmatpush3.msra.mxu1 %v21383_v0 }
 0xf0f   : > { %28193 = vmatprep.subr.mxu1 %v38626_v49 }
 0xf10   : > { %v20192_v9 = vpop.f32.mrb[102].mxu1 }
 0xf11   : > { %v20193_v17 = vadd.f32 %v20192_v9, %v20088_v42  ;;  %v27985_v20 = vpop.f32.mrb[103].mxu1  ;;  %28165 = vmatmul.mubr.f32.gmra.mrb[208].mxu1 %v35502_v62  ;;  %v21362_v42 = vand.u32 4294901760, %v21361_v35  ;;  %v21371_v62 = vsub.f32 %v36123_v6, %v21370_v43 }
 0xf12   : > { %28167 = vmatprep.mubr.msk.f32.mxu1 %vm30324_vm6, %v38626_v49 }
 0xf13   : > { %v21372_v8 = vand.u32 4294901760, %v21371_v62 }
 0xf14   : > { %v20198_v1 = vpop.f32.mrb[104].mxu1 }
 0xf15   : > { %v20199_v56 = vadd.f32 %v20198_v1, %v20098_v15  ;;  %v27988_v26 = vpop.f32.mrb[105].mxu1  ;;  %28168 = vmatmul.mubr.f32.gmra.mrb[210].mxu1 %v35510_v18 }
 0xf16   : > { %28170 = vmatprep.mubr.msk.f32.mxu1 %vm30324_vm6, %v38626_v49 }
 0xf18   : > { %v20272_v11 = vpop.f32.mrb[106].mxu1 }
 0xf19   : > { %v20273_v36 = vadd.f32 %v20272_v11, %v20175_v52  ;;  %v27993_v27 = vpop.f32.mrb[107].mxu1  ;;  %28171 = vmatmul.mubr.f32.gmra.mrb[212].mxu1 %v21362_v42 }
 0xf1a   : > { %28173 = vmatprep.mubr.msk.f32.mxu1 %vm30324_vm6, %v38626_v49 }
 0xf1c   : > { %v20279_v15 = vpop.f32.mrb[108].mxu1 }
 0xf1d   : > { %v20280_v28 = vadd.f32 %v20279_v15, %v20181_v54  ;;  %v27996_v16 = vpop.f32.mrb[109].mxu1  ;;  %28174 = vmatmul.mubr.f32.gmra.mrb[214].mxu1 %v21372_v8 }
 0xf1e   : > { %28178 = vmatprep.mubr.msk.f32.mxu1 %vm30324_vm6, %v38626_v49 }
 0xf20   : > { %v20286_v18 = vpop.f32.mrb[110].mxu1 }
 0xf21   : > { %v20287_v12 = vadd.f32 %v20286_v18, %v20187_v38  ;;  %v27999_v0 = vpop.f32.mrb[111].mxu1  ;;  %28179 = vmatmul.mubr.f32.vlgmr.msra.gmra.mrb[216].mxu1 %v35437_v44 }
 0xf22   : > { %28181 = vmatprep.mubr.msk.f32.mxu1 %vm30324_vm6, %v38626_v49  ;;  %28194 = vmatpush3.msra.mxu1 %v36093_v45 }
 0xf23   : > { %28210 = vmatprep.subr.mxu1 %v38626_v49 }
 0xf24   : > { %v20293_v52 = vpop.f32.mrb[112].mxu1 }
 0xf25   : > { %v20294_v31 = vadd.f32 %v20293_v52, %v20193_v17  ;;  %v28002_v54 = vpop.f32.mrb[113].mxu1  ;;  %28182 = vmatmul.mubr.f32.gmra.mrb[218].mxu1 %v35449_v32 }
 0xf26   : > { %28184 = vmatprep.mubr.msk.f32.mxu1 %vm30324_vm6, %v38626_v49 }
 0xf28   : > { %v20300_v22 = vpop.f32.mrb[114].mxu1 }
 0xf29   : > { %v20301_v38 = vadd.f32 %v20300_v22, %v20199_v56  ;;  %v28005_v33 = vpop.f32.mrb[115].mxu1  ;;  %28185 = vmatmul.mubr.f32.gmra.mrb[220].mxu1 %v35468_v60 }
 0xf2a   : > { %28187 = vmatprep.mubr.msk.f32.mxu1 %vm30324_vm6, %v38626_v49 }
 0xf2c   : > { %v20374_v9 = vpop.f32.mrb[116].mxu1 }
 0xf2d   : > { %v20375_v20 = vadd.f32 %v20374_v9, %v20273_v36  ;;  %v28010_v35 = vpop.f32.mrb[117].mxu1  ;;  %28188 = vmatmul.mubr.f32.gmra.mrb[222].mxu1 %v36106_v61 }
 0xf2e   : > { %28190 = vmatprep.mubr.msk.f32.mxu1 %vm30324_vm6, %v38626_v49 }
 0xf30   : > { %v20382_v17 = vpop.f32.mrb[118].mxu1 }
 0xf31   : > { %v20383_v1 = vadd.f32 %v20382_v17, %v20280_v28  ;;  %v28013_v26 = vpop.f32.mrb[119].mxu1  ;;  %28191 = vmatmul.mubr.f32.gmra.mrb[224].mxu1 %v36112_v23 }
 0xf32   : > { %28195 = vmatprep.mubr.msk.f32.mxu1 %vm30324_vm6, %v38626_v49 }
 0xf34   : > { %v20390_v56 = vpop.f32.mrb[120].mxu1 }
 0xf35   : > { %v20391_v42 = vadd.f32 %v20390_v56, %v20287_v12  ;;  %v28016_v62 = vpop.f32.mrb[121].mxu1  ;;  %28196 = vmatmul.mubr.f32.vlgmr.msra.gmra.mrb[226].mxu1 %v35446_v34 }
 0xf36   : > { %28198 = vmatprep.mubr.msk.f32.mxu1 %vm30324_vm6, %v38626_v49  ;;  %28211 = vmatpush3.msra.mxu1 %v36082_v13 }
 0xf37   : > { %28227 = vmatprep.subr.mxu1 %v38626_v49 }
 0xf38   : > { %v20398_v11 = vpop.f32.mrb[122].mxu1 }
 0xf39   : > { %v20399_v36 = vadd.f32 %v20398_v11, %v20294_v31  ;;  %v28019_v27 = vpop.f32.mrb[123].mxu1  ;;  %28199 = vmatmul.mubr.f32.gmra.mrb[228].mxu1 %v35465_v25 }
 0xf3a   : > { %28201 = vmatprep.mubr.msk.f32.mxu1 %vm30324_vm6, %v38626_v49 }
 0xf3c   : > { %v20406_v8 = vpop.f32.mrb[124].mxu1 }
 0xf3d   : > { %v20407_v15 = vadd.f32 %v20406_v8, %v20301_v38  ;;  %v28022_v28 = vpop.f32.mrb[125].mxu1  ;;  %28202 = vmatmul.mubr.f32.gmra.mrb[230].mxu1 %v35480_v58 }
 0xf3e   : > { %28204 = vmatprep.mubr.msk.f32.mxu1 %vm30324_vm6, %v38626_v49 }
 0xf40   : > { %v20480_v34 = vpop.f32.mrb[126].mxu1 }
 0xf41   : > { %v20481_v16 = vadd.f32 %v20480_v34, %v20375_v20  ;;  %v28027_v18 = vpop.f32.mrb[127].mxu1  ;;  %28205 = vmatmul.mubr.f32.gmra.mrb[232].mxu1 %v36116_v39 }
 0xf42   : > { %28207 = vmatprep.mubr.msk.f32.mxu1 %vm30324_vm6, %v38626_v49 }
 0xf44   : > { %v20486_v25 = vpop.f32.mrb[128].mxu1 }
 0xf45   : > { %v20487_v12 = vadd.f32 %v20486_v25, %v20383_v1  ;;  %v28030_v0 = vpop.f32.mrb[129].mxu1  ;;  %28208 = vmatmul.mubr.f32.gmra.mrb[234].mxu1 %v36123_v6 }
 0xf46   : > { %28212 = vmatprep.mubr.msk.f32.mxu1 %vm30324_vm6, %v38626_v49 }
 0xf48   : > { %v20492_v58 = vpop.f32.mrb[130].mxu1 }
 0xf49   : > { %v20493_v52 = vadd.f32 %v20492_v58, %v20391_v42  ;;  %v28033_v31 = vpop.f32.mrb[131].mxu1  ;;  %28213 = vmatmul.mubr.f32.vlgmr.msra.gmra.mrb[236].mxu1 %v35461_v41 }
 0xf4a   : > { %28215 = vmatprep.mubr.msk.f32.mxu1 %vm30324_vm6, %v38626_v49  ;;  %28228 = vmatpush3.msra.mxu1 %v21381_v2 }
 0xf4b   : > { %28244 = vmatprep.subr.mxu1 %v38626_v49 }
 0xf4c   : > { %v20498_v54 = vpop.f32.mrb[132].mxu1 }
 0xf4d   : > { %v20499_v22 = vadd.f32 %v20498_v54, %v20399_v36  ;;  %v28036_v38 = vpop.f32.mrb[133].mxu1  ;;  %28216 = vmatmul.mubr.f32.gmra.mrb[238].mxu1 %v35476_v19 }
 0xf4e   : > { %28218 = vmatprep.mubr.msk.f32.mxu1 %vm30324_vm6, %v38626_v49  ;;  %v38650_v38 = vld [vmem:[#allocation291_spill] sm:$0xff] }
 0xf50   : > { %v20504_v33 = vpop.f32.mrb[134].mxu1 }
 0xf51   : > { %v20505_v9 = vadd.f32 %v20504_v33, %v20407_v15  ;;  %v28039_v20 = vpop.f32.mrb[135].mxu1  ;;  %28219 = vmatmul.mubr.f32.gmra.mrb[240].mxu1 %v35492_v53  ;;  %v36260_v33 = vand.u32 4294901760, %v38650_v38 }
 0xf52   : > { %28221 = vmatprep.mubr.msk.f32.mxu1 %vm30324_vm6, %v38626_v49 }
 0xf54   : > { %v20576_v41 = vpop.f32.mrb[136].mxu1 }
 0xf55   : > { %v20577_v45 = vadd.f32 %v20576_v41, %v20481_v16  ;;  %v28044_v2 = vpop.f32.mrb[137].mxu1  ;;  %28222 = vmatmul.mubr.f32.gmra.mrb[242].mxu1 %v21360_v7  ;;  %v36267_v41 = vsub.f32 %v38650_v38, %v36260_v33 }
 0xf56   : > { %28224 = vmatprep.mubr.msk.f32.mxu1 %vm30324_vm6, %v38626_v49 }
 0xf57   : > { %v36195_v19 = vadd.f32 %v20577_v45, %v36044_v50 }
 0xf58   : > { %v20582_v35 = vpop.f32.mrb[138].mxu1 }
 0xf59   : > { %v20583_v17 = vadd.f32 %v20582_v35, %v20487_v12  ;;  %v28047_v1 = vpop.f32.mrb[139].mxu1  ;;  %28225 = vmatmul.mubr.f32.gmra.mrb[244].mxu1 %v21370_v43  ;;  %v38651_v35 = vld [vmem:[#allocation202_spill] sm:$0xff] }
 0xf5a   : > { %28229 = vmatprep.mubr.msk.f32.mxu1 %vm30324_vm6, %v38626_v49 }
 0xf5b   : > { %v36202_v53 = vadd.f32 %v20583_v17, %v36051_v51 }
 0xf5c   : > { %v20588_v39 = vpop.f32.mrb[140].mxu1 }
 0xf5d   : > { %v20589_v7 = vadd.f32 %v20588_v39, %v20493_v52  ;;  %v28050_v26 = vpop.f32.mrb[141].mxu1  ;;  %28230 = vmatmul.mubr.f32.vlgmr.msra.gmra.mrb[246].mxu1 %v35437_v44 }
 0xf5e   : > { %28232 = vmatprep.mubr.msk.f32.mxu1 %vm30324_vm6, %v38626_v49  ;;  %28245 = vmatpush3.msra.mxu1 %v36082_v13 }
 0xf5f   : > { %v36209_v50 = vadd.f32 %v20589_v7, %v36058_v30  ;;  %28261 = vmatprep.subr.mxu1 %v38626_v49 }
 0xf60   : > { %v20594_v6 = vpop.f32.mrb[142].mxu1 }
 0xf61   : > { %v20595_v43 = vadd.f32 %v20594_v6, %v20499_v22  ;;  %v28053_v56 = vpop.f32.mrb[143].mxu1  ;;  %28233 = vmatmul.mubr.f32.gmra.mrb[248].mxu1 %v35449_v32 }
 0xf62   : > { %28235 = vmatprep.mubr.msk.f32.mxu1 %vm30324_vm6, %v38626_v49 }
 0xf63   : > { %v36216_v51 = vadd.f32 %v20595_v43, %v36065_v29  ;;  %v23144_v29 = vld [vmem:[%s36461_s4 + $0x40] sm:$0xff] }
 0xf64   : > { %v20600_v42 = vpop.f32.mrb[144].mxu1 }
 0xf65   : > { %v20601_v62 = vadd.f32 %v20600_v42, %v20505_v9  ;;  %v28056_v11 = vpop.f32.mrb[145].mxu1  ;;  %28236 = vmatmul.mubr.f32.gmra.mrb[250].mxu1 %v35468_v60 }
 0xf66   : > { %28238 = vmatprep.mubr.msk.f32.mxu1 %vm30324_vm6, %v38626_v49 }
 0xf67   : > { %v36222_v30 = vadd.f32 %v20601_v62, %v36071_v10  ;;  %v36233_v10 = vand.u32 4294901760, %v23144_v29 }
 0xf68   : > { %v20703_v13 = vpop.f32.mrb[146].mxu1 }
 0xf69   : > { %v28061_v36 = vpop.f32.mrb[147].mxu1  ;;  %28239 = vmatmul.mubr.f32.gmra.mrb[252].mxu1 %v36106_v61  ;;  %v36244_v18 = vsub.f32 %v23144_v29, %v36233_v10 }
 0xf6a   : > { %28241 = vmatprep.mubr.msk.f32.mxu1 %vm30324_vm6, %v38626_v49 }
 0xf6c   : > { %v20713_v27 = vpop.f32.mrb[148].mxu1 }
 0xf6d   : > { %v28064_v8 = vpop.f32.mrb[149].mxu1  ;;  %28242 = vmatmul.mubr.f32.gmra.mrb[254].mxu1 %v36112_v23 }
 0xf6e   : > { %28246 = vmatprep.mubr.msk.f32.mxu1 %vm30324_vm6, %v38626_v49 }
 0xf70   : > { %v20723_v15 = vpop.f32.mrb[150].mxu1 }
 0xf71   : > { %v28067_v28 = vpop.f32.mrb[151].mxu1  ;;  %28247 = vmatmul.mubr.f32.vlgmr.msra.gmra.mrb[0].mxu1 %v35437_v44  ;;  %v22009_v44 = vand.u32 4294901760, %v36244_v18 }
 0xf72   : > { %28249 = vmatprep.mubr.msk.f32.mxu1 %vm30324_vm6, %v38626_v49  ;;  %28262 = vmatpush3.msra.mxu1 %v36233_v10 }
 0xf73   : > { %28278 = vmatprep.subr.mxu1 %v38626_v49 }
 0xf74   : > { %v20733_v34 = vpop.f32.mrb[152].mxu1 }
 0xf75   : > { %v28070_v16 = vpop.f32.mrb[153].mxu1  ;;  %28250 = vmatmul.mubr.f32.gmra.mrb[2].mxu1 %v35449_v32  ;;  %v22010_v32 = vsub.f32 %v36244_v18, %v22009_v44 }
 0xf76   : > { %28252 = vmatprep.mubr.msk.f32.mxu1 %vm30324_vm6, %v38626_v49 }
 0xf77   : > { %v22011_v22 = vand.u32 4294901760, %v22010_v32 }
 0xf78   : > { %v20743_v25 = vpop.f32.mrb[154].mxu1 }
 0xf79   : > { %v28073_v12 = vpop.f32.mrb[155].mxu1  ;;  %28253 = vmatmul.mubr.f32.gmra.mrb[4].mxu1 %v35468_v60 }
 0xf7a   : > { %28255 = vmatprep.mubr.msk.f32.mxu1 %vm30324_vm6, %v38626_v49 }
 0xf7c   : > { %v20819_v0 = vpop.f32.mrb[156].mxu1 }
 0xf7d   : > { %v20820_v58 = vadd.f32 %v20819_v0, %v20703_v13  ;;  %v28078_v52 = vpop.f32.mrb[157].mxu1  ;;  %28256 = vmatmul.mubr.f32.gmra.mrb[6].mxu1 %v36106_v61 }
 0xf7e   : > { %28258 = vmatprep.mubr.msk.f32.mxu1 %vm30324_vm6, %v38626_v49 }
 0xf80   : > { %v20825_v31 = vpop.f32.mrb[158].mxu1 }
 0xf81   : > { %v20826_v54 = vadd.f32 %v20825_v31, %v20713_v27  ;;  %v28081_v60 = vpop.f32.mrb[159].mxu1  ;;  %28259 = vmatmul.mubr.f32.gmra.mrb[8].mxu1 %v36112_v23 }
 0xf82   : > { %28263 = vmatprep.mubr.msk.f32.mxu1 %vm30324_vm6, %v38626_v49 }
 0xf84   : > { %v20831_v61 = vpop.f32.mrb[160].mxu1 }
 0xf85   : > { %v20832_v9 = vadd.f32 %v20831_v61, %v20723_v15  ;;  %v28084_v20 = vpop.f32.mrb[161].mxu1  ;;  %28264 = vmatmul.mubr.f32.vlgmr.msra.gmra.mrb[10].mxu1 %v35152_v37  ;;  %v21998_v37 = vand.u32 4294901760, %v36267_v41 }
 0xf86   : > { %28266 = vmatprep.mubr.msk.f32.mxu1 %vm30324_vm6, %v38626_v49  ;;  %28279 = vmatpush3.msra.mxu1 %v22011_v22 }
 0xf87   : > { %28295 = vmatprep.subr.mxu1 %v38626_v49  ;;  %v21999_v7 = vsub.f32 %v36267_v41, %v21998_v37 }
 0xf88   : > { %v20837_v23 = vpop.f32.mrb[162].mxu1 }
 0xf89   : > { %v20838_v45 = vadd.f32 %v20837_v23, %v20733_v34  ;;  %v28087_v2 = vpop.f32.mrb[163].mxu1  ;;  %28267 = vmatmul.mubr.f32.gmra.mrb[12].mxu1 %v38651_v35  ;;  %v22000_v56 = vand.u32 4294901760, %v21999_v7 }
 0xf8a   : > { %28269 = vmatprep.mubr.msk.f32.mxu1 %vm30324_vm6, %v38626_v49 }
 0xf8c   : > { %v20843_v17 = vpop.f32.mrb[164].mxu1 }
 0xf8d   : > { %v20844_v1 = vadd.f32 %v20843_v17, %v20743_v25  ;;  %v28090_v39 = vpop.f32.mrb[165].mxu1  ;;  %28270 = vmatmul.mubr.f32.gmra.mrb[14].mxu1 %v35169_v57 }
 0xf8e   : > { %28272 = vmatprep.mubr.msk.f32.mxu1 %vm30324_vm6, %v38626_v49 }
 0xf90   : > { %v20917_v26 = vpop.f32.mrb[166].mxu1 }
 0xf91   : > { %v20918_v6 = vadd.f32 %v20917_v26, %v20820_v58  ;;  %v28095_v43 = vpop.f32.mrb[167].mxu1  ;;  %28273 = vmatmul.mubr.f32.gmra.mrb[16].mxu1 %v35655_v21 }
 0xf92   : > { %28275 = vmatprep.mubr.msk.f32.mxu1 %vm30324_vm6, %v38626_v49 }
 0xf94   : > { %v20924_v42 = vpop.f32.mrb[168].mxu1 }
 0xf95   : > { %v20925_v62 = vadd.f32 %v20924_v42, %v20826_v54  ;;  %v28098_v11 = vpop.f32.mrb[169].mxu1  ;;  %28276 = vmatmul.mubr.f32.gmra.mrb[18].mxu1 %v22000_v56 }
 0xf96   : > { %28280 = vmatprep.mubr.msk.f32.mxu1 %vm30324_vm6, %v38626_v49 }
 0xf98   : > { %v20931_v57 = vpop.f32.mrb[170].mxu1 }
 0xf99   : > { %v20932_v13 = vadd.f32 %v20931_v57, %v20832_v9  ;;  %v28101_v36 = vpop.f32.mrb[171].mxu1  ;;  %28281 = vmatmul.mubr.f32.vlgmr.msra.gmra.mrb[20].mxu1 %v35095_v59 }
 0xf9a   : > { %28283 = vmatprep.mubr.msk.f32.mxu1 %vm30324_vm6, %v38626_v49  ;;  %28296 = vmatpush3.msra.mxu1 %v36244_v18 }
 0xf9b   : > { %28312 = vmatprep.subr.mxu1 %v38626_v49 }
 0xf9c   : > { %v20938_v21 = vpop.f32.mrb[172].mxu1 }
 0xf9d   : > { %v20939_v29 = vadd.f32 %v20938_v21, %v20838_v45  ;;  %v28104_v27 = vpop.f32.mrb[173].mxu1  ;;  %28284 = vmatmul.mubr.f32.gmra.mrb[22].mxu1 %v35115_v14 }
 0xf9e   : > { %28286 = vmatprep.mubr.msk.f32.mxu1 %vm30324_vm6, %v38626_v49 }
 0xfa0   : > { %v20945_v8 = vpop.f32.mrb[174].mxu1 }
 0xfa1   : > { %v20946_v15 = vadd.f32 %v20945_v8, %v20844_v1  ;;  %v28107_v28 = vpop.f32.mrb[175].mxu1  ;;  %28287 = vmatmul.mubr.f32.gmra.mrb[24].mxu1 %v35128_v63 }
 0xfa2   : > { %28289 = vmatprep.mubr.msk.f32.mxu1 %vm30324_vm6, %v38626_v49 }
 0xfa4   : > { %v21019_v34 = vpop.f32.mrb[176].mxu1 }
 0xfa5   : > { %v21020_v16 = vadd.f32 %v21019_v34, %v20918_v6  ;;  %v28112_v25 = vpop.f32.mrb[177].mxu1  ;;  %28290 = vmatmul.mubr.f32.gmra.mrb[26].mxu1 %v35631_v4 }
 0xfa6   : > { %28292 = vmatprep.mubr.msk.f32.mxu1 %vm30324_vm6, %v38626_v49 }
 0xfa8   : > { %v21027_v12 = vpop.f32.mrb[178].mxu1 }
 0xfa9   : > { %v21028_v0 = vadd.f32 %v21027_v12, %v20925_v62  ;;  %v28115_v58 = vpop.f32.mrb[179].mxu1  ;;  %28293 = vmatmul.mubr.f32.gmra.mrb[28].mxu1 %v36260_v33 }
 0xfaa   : > { %28297 = vmatprep.mubr.msk.f32.mxu1 %vm30324_vm6, %v38626_v49 }
 0xfac   : > { %v21035_v52 = vpop.f32.mrb[180].mxu1 }
 0xfad   : > { %v21036_v32 = vadd.f32 %v21035_v52, %v20932_v13  ;;  %v28118_v31 = vpop.f32.mrb[181].mxu1  ;;  %28298 = vmatmul.mubr.f32.vlgmr.msra.gmra.mrb[30].mxu1 %v35112_v40 }
 0xfae   : > { %28300 = vmatprep.mubr.msk.f32.mxu1 %vm30324_vm6, %v38626_v49  ;;  %28313 = vmatpush3.msra.mxu1 %v36233_v10 }
 0xfaf   : > { %28329 = vmatprep.subr.mxu1 %v38626_v49 }
 0xfb0   : > { %v21043_v54 = vpop.f32.mrb[182].mxu1 }
 0xfb1   : > { %v21044_v60 = vadd.f32 %v21043_v54, %v20939_v29  ;;  %v28121_v22 = vpop.f32.mrb[183].mxu1  ;;  %28301 = vmatmul.mubr.f32.gmra.mrb[32].mxu1 %v35125_v47 }
 0xfb2   : > { %28303 = vmatprep.mubr.msk.f32.mxu1 %vm30324_vm6, %v38626_v49 }
 0xfb4   : > { %v21051_v38 = vpop.f32.mrb[184].mxu1 }
 0xfb5   : > { %v21052_v61 = vadd.f32 %v21051_v38, %v20946_v15  ;;  %v28124_v9 = vpop.f32.mrb[185].mxu1  ;;  %28304 = vmatmul.mubr.f32.gmra.mrb[34].mxu1 %v35139_v46 }
 0xfb6   : > { %28306 = vmatprep.mubr.msk.f32.mxu1 %vm30324_vm6, %v38626_v49 }
 0xfb8   : > { %v21125_v40 = vpop.f32.mrb[186].mxu1 }
 0xfb9   : > { %v21126_v20 = vadd.f32 %v21125_v40, %v21020_v16  ;;  %v28129_v23 = vpop.f32.mrb[187].mxu1  ;;  %28307 = vmatmul.mubr.f32.gmra.mrb[36].mxu1 %v35638_v3 }
 0xfba   : > { %28309 = vmatprep.mubr.msk.f32.mxu1 %vm30324_vm6, %v38626_v49 }
 0xfbc   : > { %v21131_v47 = vpop.f32.mrb[188].mxu1 }
 0xfbd   : > { %v21132_v45 = vadd.f32 %v21131_v47, %v21028_v0  ;;  %v28132_v2 = vpop.f32.mrb[189].mxu1  ;;  %28310 = vmatmul.mubr.f32.gmra.mrb[38].mxu1 %v36267_v41  ;;  %v38652_v41 = vmov 0.0|0.0  }
 0xfbe   : > { %28314 = vmatprep.mubr.msk.f32.mxu1 %vm30324_vm6, %v38626_v49 }
 0xfc0   : > { %v21137_v46 = vpop.f32.mrb[190].mxu1 }
 0xfc1   : > { %v21138_v35 = vadd.f32 %v21137_v46, %v21036_v32  ;;  %v28135_v17 = vpop.f32.mrb[191].mxu1  ;;  %28315 = vmatmul.mubr.f32.vlgmr.msra.gmra.mrb[40].mxu1 %v35133_v55 }
 0xfc2   : > { %28317 = vmatprep.mubr.msk.f32.mxu1 %vm30324_vm6, %v38626_v49  ;;  %28330 = vmatpush3.msra.mxu1 %v22009_v44 }
 0xfc3   : > { %28346 = vmatprep.subr.mxu1 %v38626_v49 }
 0xfc4   : > { %v21143_v3 = vpop.f32.mrb[192].mxu1 }
 0xfc5   : > { %v21144_v1 = vadd.f32 %v21143_v3, %v21044_v60  ;;  %v28138_v39 = vpop.f32.mrb[193].mxu1  ;;  %28318 = vmatmul.mubr.f32.gmra.mrb[42].mxu1 %v35146_v24 }
 0xfc6   : > { %28320 = vmatprep.mubr.msk.f32.mxu1 %vm30324_vm6, %v38626_v49 }
 0xfc8   : > { %v21149_v7 = vpop.f32.mrb[194].mxu1 }
 0xfc9   : > { %v21150_v26 = vadd.f32 %v21149_v7, %v21052_v61  ;;  %v28141_v6 = vpop.f32.mrb[195].mxu1  ;;  %28321 = vmatmul.mubr.f32.gmra.mrb[44].mxu1 %v35157_v48 }
 0xfca   : > { %28323 = vmatprep.mubr.msk.f32.mxu1 %vm30324_vm6, %v38626_v49 }
 0xfcc   : > { %v21221_v55 = vpop.f32.mrb[196].mxu1 }
 0xfcd   : > { %v21222_v18 = vadd.f32 %v21221_v55, %v21126_v20  ;;  %v28146_v44 = vpop.f32.mrb[197].mxu1  ;;  %28324 = vmatmul.mubr.f32.gmra.mrb[46].mxu1 %v35645_v5 }
 0xfce   : > { %28326 = vmatprep.mubr.msk.f32.mxu1 %vm30324_vm6, %v38626_v49 }
 0xfcf   : > { %v36335_v24 = vadd.f32 %v21222_v18, %v36195_v19 }
 0xfd0   : > { %v21227_v43 = vpop.f32.mrb[198].mxu1 }
 0xfd1   : > { %v21228_v56 = vadd.f32 %v21227_v43, %v21132_v45  ;;  %v28149_v42 = vpop.f32.mrb[199].mxu1  ;;  %28327 = vmatmul.mubr.f32.gmra.mrb[48].mxu1 %v21998_v37 }
 0xfd2   : > { %28331 = vmatprep.mubr.msk.f32.mxu1 %vm30324_vm6, %v38626_v49 }
 0xfd3   : > { %v36342_v48 = vadd.f32 %v21228_v56, %v36202_v53 }
 0xfd4   : > { %v21233_v62 = vpop.f32.mrb[200].mxu1 }
 0xfd5   : > { %v21234_v5 = vadd.f32 %v21233_v62, %v21138_v35  ;;  %v28152_v11 = vpop.f32.mrb[201].mxu1  ;;  %28332 = vmatmul.mubr.f32.vlgmr.msra.gmra.mrb[50].mxu1 %v35095_v59 }
 0xfd6   : > { %28334 = vmatprep.mubr.msk.f32.mxu1 %vm30324_vm6, %v38626_v49  ;;  %28347 = vmatpush3.msra.mxu1 %v36233_v10 }
 0xfd7   : > { %v36349_v19 = vadd.f32 %v21234_v5, %v36209_v50  ;;  %28663 = vmatprep.subr.bf16.mxu1 %v38652_v41 }
 0xfd8   : > { %v21239_v37 = vpop.f32.mrb[202].mxu1 }
 0xfd9   : > { %v21240_v57 = vadd.f32 %v21239_v37, %v21144_v1  ;;  %v28155_v13 = vpop.f32.mrb[203].mxu1  ;;  %28335 = vmatmul.mubr.f32.gmra.mrb[52].mxu1 %v35115_v14 }
 0xfda   : > { %28337 = vmatprep.mubr.msk.f32.mxu1 %vm30324_vm6, %v38626_v49 }
 0xfdb   : > { %v36356_v53 = vadd.f32 %v21240_v57, %v36216_v51 }
 0xfdc   : > { %v21245_v36 = vpop.f32.mrb[204].mxu1 }
 0xfdd   : > { %v21246_v21 = vadd.f32 %v21245_v36, %v21150_v26  ;;  %v28158_v29 = vpop.f32.mrb[205].mxu1  ;;  %28338 = vmatmul.mubr.f32.gmra.mrb[54].mxu1 %v35128_v63 }
 0xfde   : > { %28340 = vmatprep.mubr.msk.f32.mxu1 %vm30324_vm6, %v38626_v49 }
 0xfdf   : > { %v36362_v50 = vadd.f32 %v21246_v21, %v36222_v30 }
 0xfe0   : > { %v21334_v10 = vpop.f32.mrb[206].mxu1 }
 0xfe1   : > { %v28163_v27 = vpop.f32.mrb[207].mxu1  ;;  %28341 = vmatmul.mubr.f32.gmra.mrb[56].mxu1 %v35631_v4 }
 0xfe2   : > { %28343 = vmatprep.mubr.msk.f32.mxu1 %vm30324_vm6, %v38626_v49 }
 0xfe4   : > { %v21344_v51 = vpop.f32.mrb[208].mxu1 }
 0xfe5   : > { %v28166_v8 = vpop.f32.mrb[209].mxu1  ;;  %28344 = vmatmul.mubr.f32.gmra.mrb[58].mxu1 %v36260_v33 }
 0xfe6   : > { %28348 = vmatprep.mubr.msk.f32.mxu1 %vm30324_vm6, %v38626_v49 }
 0xfe8   : > { %v21354_v15 = vpop.f32.mrb[210].mxu1 }
 0xfe9   : > { %v28169_v28 = vpop.f32.mrb[211].mxu1  ;;  %28349 = vmatmul.mubr.f32.vlgmr.msra.gmra.mrb[60].mxu1 %v35095_v59 }
 0xfea   : > { %28351 = vmatprep.mubr.msk.f32.mxu1 %vm30324_vm6, %v38626_v49 }
 0xfec   : > { %v21364_v30 = vpop.f32.mrb[212].mxu1 }
 0xfed   : > { %v28172_v34 = vpop.f32.mrb[213].mxu1  ;;  %28352 = vmatmul.mubr.f32.gmra.mrb[62].mxu1 %v35115_v14 }
 0xfee   : > { %28354 = vmatprep.mubr.msk.f32.mxu1 %vm30324_vm6, %v38626_v49 }
 0xff0   : > { %v21374_v16 = vpop.f32.mrb[214].mxu1 }
 0xff1   : > { %v28175_v25 = vpop.f32.mrb[215].mxu1  ;;  %28355 = vmatmul.mubr.f32.gmra.mrb[64].mxu1 %v35128_v63 }
 0xff2   : > { %28357 = vmatprep.mubr.msk.f32.mxu1 %vm30324_vm6, %v38626_v49 }
 0xff4   : > { %v21450_v12 = vpop.f32.mrb[216].mxu1 }
 0xff5   : > { %v21451_v0 = vadd.f32 %v21450_v12, %v21334_v10  ;;  %v28180_v59 = vpop.f32.mrb[217].mxu1  ;;  %28358 = vmatmul.mubr.f32.gmra.mrb[66].mxu1 %v35631_v4 }
 0xff6   : > { %28360 = vmatprep.mubr.msk.f32.mxu1 %vm30324_vm6, %v38626_v49 }
 0xff8   : > { %v21456_v58 = vpop.f32.mrb[218].mxu1 }
 0xff9   : > { %v21457_v14 = vadd.f32 %v21456_v58, %v21344_v51  ;;  %v28183_v52 = vpop.f32.mrb[219].mxu1  ;;  %28361 = vmatmul.mubr.f32.gmra.mrb[68].mxu1 %v36260_v33 }
 0xffa   : > { %28371 = vmatprep.mubr.msk.f32.mxu1 %vm30324_vm6, %v38626_v49 }
 0xffc   : > { %v21462_v63 = vpop.f32.mrb[220].mxu1 }
 0xffd   : > { %v21463_v32 = vadd.f32 %v21462_v63, %v21354_v15  ;;  %v28186_v31 = vpop.f32.mrb[221].mxu1 }
0x1000   : > { %v21468_v54 = vpop.f32.mrb[222].mxu1 }
0x1001   : > { %v21469_v60 = vadd.f32 %v21468_v54, %v21364_v30  ;;  %v28189_v22 = vpop.f32.mrb[223].mxu1 }
0x1004   : > { %v21474_v38 = vpop.f32.mrb[224].mxu1 }
0x1005   : > { %v21475_v61 = vadd.f32 %v21474_v38, %v21374_v16  ;;  %v28192_v4 = vpop.f32.mrb[225].mxu1 }
0x1008   : > { %v21548_v9 = vpop.f32.mrb[226].mxu1 }
0x1009   : > { %v21549_v40 = vadd.f32 %v21548_v9, %v21451_v0  ;;  %v28197_v20 = vpop.f32.mrb[227].mxu1 }
0x100c   : > { %v21555_v23 = vpop.f32.mrb[228].mxu1 }
0x100d   : > { %v21556_v47 = vadd.f32 %v21555_v23, %v21457_v14  ;;  %v28200_v45 = vpop.f32.mrb[229].mxu1 }
0x1010   : > { %v21562_v2 = vpop.f32.mrb[230].mxu1 }
0x1011   : > { %v21563_v33 = vadd.f32 %v21562_v2, %v21463_v32  ;;  %v28203_v46 = vpop.f32.mrb[231].mxu1 }
0x1014   : > { %v21569_v35 = vpop.f32.mrb[232].mxu1 }
0x1015   : > { %v21570_v17 = vadd.f32 %v21569_v35, %v21469_v60  ;;  %v28206_v3 = vpop.f32.mrb[233].mxu1 }
0x1018   : > { %v21576_v1 = vpop.f32.mrb[234].mxu1 }
0x1019   : > { %v21577_v39 = vadd.f32 %v21576_v1, %v21475_v61  ;;  %v28209_v7 = vpop.f32.mrb[235].mxu1 }
0x101c   : > { %v21650_v26 = vpop.f32.mrb[236].mxu1 }
0x101d   : > { %v21651_v6 = vadd.f32 %v21650_v26, %v21549_v40  ;;  %v28214_v55 = vpop.f32.mrb[237].mxu1 }
0x1020   : > { %v21658_v18 = vpop.f32.mrb[238].mxu1 }
0x1021   : > { %v21659_v44 = vadd.f32 %v21658_v18, %v21556_v47  ;;  %v28217_v43 = vpop.f32.mrb[239].mxu1 }
0x1024   : > { %v21666_v56 = vpop.f32.mrb[240].mxu1 }
0x1025   : > { %v21667_v42 = vadd.f32 %v21666_v56, %v21563_v33  ;;  %v28220_v62 = vpop.f32.mrb[241].mxu1 }
0x1028   : > { %v21674_v5 = vpop.f32.mrb[242].mxu1 }
0x1029   : > { %v21675_v11 = vadd.f32 %v21674_v5, %v21570_v17  ;;  %v28223_v37 = vpop.f32.mrb[243].mxu1 }
0x102c   : > { %v21682_v57 = vpop.f32.mrb[244].mxu1 }
0x102d   : > { %v21683_v13 = vadd.f32 %v21682_v57, %v21577_v39  ;;  %v28226_v36 = vpop.f32.mrb[245].mxu1 }
0x1030   : > { %v21756_v21 = vpop.f32.mrb[246].mxu1 }
0x1031   : > { %v21757_v29 = vadd.f32 %v21756_v21, %v21651_v6  ;;  %v28231_v10 = vpop.f32.mrb[247].mxu1 }
0x1034   : > { %v21762_v27 = vpop.f32.mrb[248].mxu1 }
0x1035   : > { %v21763_v51 = vadd.f32 %v21762_v27, %v21659_v44  ;;  %v28234_v8 = vpop.f32.mrb[249].mxu1 }
0x1038   : > { %v21768_v15 = vpop.f32.mrb[250].mxu1 }
0x1039   : > { %v21769_v28 = vadd.f32 %v21768_v15, %v21667_v42  ;;  %v28237_v30 = vpop.f32.mrb[251].mxu1 }
0x103c   : > { %v21774_v34 = vpop.f32.mrb[252].mxu1 }
0x103d   : > { %v21775_v16 = vadd.f32 %v21774_v34, %v21675_v11  ;;  %v28240_v25 = vpop.f32.mrb[253].mxu1 }
0x1040   : > { %v21780_v12 = vpop.f32.mrb[254].mxu1 }
0x1041   : > { %v21781_v0 = vadd.f32 %v21780_v12, %v21683_v13  ;;  %v28243_v59 = vpop.f32.mrb[255].mxu1 }
0x1044   : > { %v21852_v58 = vpop.f32.mrb[0].mxu1 }
0x1045   : > { %v21853_v14 = vadd.f32 %v21852_v58, %v21757_v29  ;;  %v28248_v52 = vpop.f32.mrb[1].mxu1 }
0x1047   : > { %v36386_v63 = vadd.f32 %v21853_v14, %v36335_v24 }
0x1048   : > { %v21858_v32 = vpop.f32.mrb[2].mxu1 }
0x1049   : > { %v21859_v31 = vadd.f32 %v21858_v32, %v21763_v51  ;;  %v28251_v54 = vpop.f32.mrb[3].mxu1 }
0x104b   : > { %v36389_v60 = vadd.f32 %v21859_v31, %v36342_v48 }
0x104c   : > { %v21864_v22 = vpop.f32.mrb[4].mxu1 }
0x104d   : > { %v21865_v38 = vadd.f32 %v21864_v22, %v21769_v28  ;;  %v28254_v61 = vpop.f32.mrb[5].mxu1 }
0x104f   : > { %v36392_v4 = vadd.f32 %v21865_v38, %v36349_v19 }
0x1050   : > { %v21870_v9 = vpop.f32.mrb[6].mxu1 }
0x1051   : > { %v21871_v40 = vadd.f32 %v21870_v9, %v21775_v16  ;;  %v28257_v20 = vpop.f32.mrb[7].mxu1 }
0x1053   : > { %v36395_v23 = vadd.f32 %v21871_v40, %v36356_v53 }
0x1054   : > { %v21876_v24 = vpop.f32.mrb[8].mxu1 }
0x1055   : > { %v21877_v47 = vadd.f32 %v21876_v24, %v21781_v0  ;;  %v28260_v45 = vpop.f32.mrb[9].mxu1 }
0x1057   : > { %v36398_v2 = vadd.f32 %v21877_v47, %v36362_v50 }
0x1058   : > { %v21962_v48 = vpop.f32.mrb[10].mxu1 }
0x1059   : > { %v28265_v33 = vpop.f32.mrb[11].mxu1 }
0x105c   : > { %v21972_v46 = vpop.f32.mrb[12].mxu1 }
0x105d   : > { %v28268_v35 = vpop.f32.mrb[13].mxu1 }
0x1060   : > { %v21982_v17 = vpop.f32.mrb[14].mxu1 }
0x1061   : > { %v28271_v3 = vpop.f32.mrb[15].mxu1 }
0x1064   : > { %v21992_v19 = vpop.f32.mrb[16].mxu1 }
0x1065   : > { %v28274_v1 = vpop.f32.mrb[17].mxu1 }
0x1068   : > { %v22002_v39 = vpop.f32.mrb[18].mxu1 }
0x1069   : > { %v28277_v7 = vpop.f32.mrb[19].mxu1 }
0x106c   : > { %v22078_v26 = vpop.f32.mrb[20].mxu1 }
0x106d   : > { %v22079_v6 = vadd.f32 %v22078_v26, %v21962_v48  ;;  %v28282_v53 = vpop.f32.mrb[21].mxu1 }
0x1070   : > { %v22084_v55 = vpop.f32.mrb[22].mxu1 }
0x1071   : > { %v22085_v18 = vadd.f32 %v22084_v55, %v21972_v46  ;;  %v28285_v44 = vpop.f32.mrb[23].mxu1 }
0x1074   : > { %v22090_v43 = vpop.f32.mrb[24].mxu1 }
0x1075   : > { %v22091_v56 = vadd.f32 %v22090_v43, %v21982_v17  ;;  %v28288_v50 = vpop.f32.mrb[25].mxu1  ;;  %v23145_v43 = vld [vmem:[%s36462_s5] ss:$0 sm:$0xff] }
0x1078   : > { %v22096_v42 = vpop.f32.mrb[26].mxu1 }
0x1079   : > { %v22097_v62 = vadd.f32 %v22096_v42, %v21992_v19  ;;  %v28291_v5 = vpop.f32.mrb[27].mxu1 }
0x107c   : > { %v22102_v11 = vpop.f32.mrb[28].mxu1 }
0x107d   : > { %v22103_v37 = vadd.f32 %v22102_v11, %v22002_v39  ;;  %v28294_v57 = vpop.f32.mrb[29].mxu1 }
0x1080   : > { %v22176_v13 = vpop.f32.mrb[30].mxu1 }
0x1081   : > { %v22177_v36 = vadd.f32 %v22176_v13, %v22079_v6  ;;  %v28299_v21 = vpop.f32.mrb[31].mxu1 }
0x1084   : > { %v22183_v29 = vpop.f32.mrb[32].mxu1 }
0x1085   : > { %v22184_v10 = vadd.f32 %v22183_v29, %v22085_v18  ;;  %v28302_v27 = vpop.f32.mrb[33].mxu1 }
0x1088   : > { %v22190_v51 = vpop.f32.mrb[34].mxu1 }
0x1089   : > { %v22191_v8 = vadd.f32 %v22190_v51, %v22091_v56  ;;  %v28305_v15 = vpop.f32.mrb[35].mxu1 }
0x108c   : > { %v22197_v28 = vpop.f32.mrb[36].mxu1 }
0x108d   : > { %v22198_v30 = vadd.f32 %v22197_v28, %v22097_v62  ;;  %v28308_v34 = vpop.f32.mrb[37].mxu1 }
0x1090   : > { %v22204_v16 = vpop.f32.mrb[38].mxu1 }
0x1091   : > { %v22205_v25 = vadd.f32 %v22204_v16, %v22103_v37  ;;  %v28311_v12 = vpop.f32.mrb[39].mxu1 }
0x1094   : > { %v22278_v0 = vpop.f32.mrb[40].mxu1 }
0x1095   : > { %v22279_v59 = vadd.f32 %v22278_v0, %v22177_v36  ;;  %v28316_v58 = vpop.f32.mrb[41].mxu1 }
0x1096   : > { %v22572_v58 = vld [vmem:[%s36463_s6] sm:$0xf] }
0x1098   : > { %v22286_v14 = vpop.f32.mrb[42].mxu1 }
0x1099   : > { %v22287_v52 = vadd.f32 %v22286_v14, %v22184_v10  ;;  %v28319_v32 = vpop.f32.mrb[43].mxu1 }
0x109c   : > { %v22294_v31 = vpop.f32.mrb[44].mxu1 }
0x109d   : > { %v22295_v54 = vadd.f32 %v22294_v31, %v22191_v8  ;;  %v28322_v22 = vpop.f32.mrb[45].mxu1  ;;  %v22575_v31 = vsel %vm22573_vm10, %v22572_v58, 0 }
0x10a0   : > { %v22302_v38 = vpop.f32.mrb[46].mxu1 }
0x10a1   : > { %v22303_v61 = vadd.f32 %v22302_v38, %v22198_v30  ;;  %v28325_v9 = vpop.f32.mrb[47].mxu1 }
0x10a2   : > { %v36415_v9 = vand.u32 4294901760, %v22575_v31 }
0x10a4   : > { %v22310_v40 = vpop.f32.mrb[48].mxu1 }
0x10a5   : > { %v22311_v20 = vadd.f32 %v22310_v40, %v22205_v25  ;;  %v28328_v24 = vpop.f32.mrb[49].mxu1 }
0x10a8   : > { %v22384_v47 = vpop.f32.mrb[50].mxu1 }
0x10a9   : > { %v22385_v45 = vadd.f32 %v22384_v47, %v22279_v59  ;;  %v28333_v48 = vpop.f32.mrb[51].mxu1 }
0x10ac   : > { %v22390_v33 = vpop.f32.mrb[52].mxu1 }
0x10ad   : > { %v22391_v46 = vadd.f32 %v22390_v33, %v22287_v52  ;;  %v28336_v35 = vpop.f32.mrb[53].mxu1 }
0x10b0   : > { %v22396_v17 = vpop.f32.mrb[54].mxu1 }
0x10b1   : > { %v22397_v3 = vadd.f32 %v22396_v17, %v22295_v54  ;;  %v28339_v19 = vpop.f32.mrb[55].mxu1 }
0x10b4   : > { %v22402_v1 = vpop.f32.mrb[56].mxu1 }
0x10b5   : > { %v22403_v39 = vadd.f32 %v22402_v1, %v22303_v61  ;;  %v28342_v7 = vpop.f32.mrb[57].mxu1 }
0x10b8   : > { %v22408_v26 = vpop.f32.mrb[58].mxu1 }
0x10b9   : > { %v22409_v6 = vadd.f32 %v22408_v26, %v22311_v20  ;;  %v28345_v53 = vpop.f32.mrb[59].mxu1 }
0x10bc   : > { %v22480_v55 = vpop.f32.mrb[60].mxu1 }
0x10bd   : > { %v22481_v18 = vadd.f32 %v22480_v55, %v22385_v45  ;;  %v28350_v44 = vpop.f32.mrb[61].mxu1 }
0x10bf   : > { %v22508_v56 = vadd.f32 %v22481_v18, %v36386_v63 }
0x10c0   : > { %v22486_v50 = vpop.f32.mrb[62].mxu1 }
0x10c1   : > { %v22520_v42 = vadd.f32 %v23145_v43, %v22508_v56  ;;  %v22487_v62 = vadd.f32 %v22486_v50, %v22391_v46  ;;  %v28353_v5 = vpop.f32.mrb[63].mxu1 }
0x10c3   : > { %v22509_v11 = vadd.f32 %v22487_v62, %v36389_v60  ;;  %30274 = vtanh.f32 %v22520_v42 }
0x10c4   : > { %v22492_v37 = vpop.f32.mrb[64].mxu1 }
0x10c5   : > { %v22521_v57 = vadd.f32 %v23145_v43, %v22509_v11  ;;  %v22493_v13 = vadd.f32 %v22492_v37, %v22397_v3  ;;  %v28356_v36 = vpop.f32.mrb[65].mxu1  ;;  %v36420_v3 = vsub.f32 %v22575_v31, %v36415_v9 }
0x10c7   : > { %30276 = vtanh.f32 %v22521_v57  ;;  %v22510_v21 = vadd.f32 %v22493_v13, %v36392_v4  ;;  %v22651_v44 = vand.u32 4294901760, %v36420_v3 }
0x10c8   : > { %v22498_v29 = vpop.f32.mrb[66].mxu1 }
0x10c9   : > { %v22522_v10 = vadd.f32 %v23145_v43, %v22510_v21  ;;  %v22499_v27 = vadd.f32 %v22498_v29, %v22403_v39  ;;  %v28359_v51 = vpop.f32.mrb[67].mxu1  ;;  %v22652_v57 = vsub.f32 %v36420_v3, %v22651_v44 }
0x10cb   : > { %30278 = vtanh.f32 %v22522_v10  ;;  %v22511_v63 = vadd.f32 %v22499_v27, %v36395_v23 }
0x10cc   : > { %v22504_v8 = vpop.f32.mrb[68].mxu1 }
0x10cd   : > { %v22523_v15 = vadd.f32 %v23145_v43, %v22511_v63  ;;  %v22505_v28 = vadd.f32 %v22504_v8, %v22409_v6  ;;  %v28362_v30 = vpop.f32.mrb[69].mxu1  ;;  %v30275_v60 = vpop.eup %30274 }
0x10ce   : > { %v22534_v12 = vrot.slane %v30275_v60, 1  ;;  %v22549_v0 = vrot.slane %v30275_v60, 7 }
0x10cf   : > { %30280 = vtanh.f32 %v22523_v15  ;;  %v22512_v34 = vadd.f32 %v22505_v28, %v36398_v2  ;;  %v22653_v15 = vand.u32 4294901760, %v22652_v57 }
0x10d1   : > { %v30277_v16 = vpop.eup %30276  ;;  %v22524_v25 = vadd.f32 %v23145_v43, %v22512_v34 }
0x10d2   : > { %v22535_v4 = vrot.slane %v30277_v16, 1  ;;  %v22550_v59 = vrot.slane %v30277_v16, 7 }
0x10d3   : > { %30282 = vtanh.f32 %v22524_v25 }
0x10d4   : > { %v22536_v23 = vsel %vm340_vm3, %v22534_v12, %v22535_v4  ;;  %v22551_v14 = vsel %vm18707_vm8, %v22549_v0, %v22550_v59 }
0x10d5   : > { %v30279_v52 = vpop.eup %30278  ;;  %v22545_v32 = vadd.f32 %v30275_v60, %v22536_v23 }
0x10d6   : > { %v22537_v2 = vrot.slane %v30279_v52, 1  ;;  %v22552_v54 = vrot.slane %v30279_v52, 7 }
0x10d7   : > { %v22560_v22 = vadd.f32 %v22551_v14, %v22545_v32 }
0x10d8   : > { %v22538_v38 = vsel %vm340_vm3, %v22535_v4, %v22537_v2  ;;  %v22553_v61 = vsel %vm18707_vm8, %v22550_v59, %v22552_v54 }
0x10d9   : > { %v30281_v40 = vpop.eup %30280  ;;  %v22546_v20 = vadd.f32 %v30277_v16, %v22538_v38  ;;  %v22564_v24 = vadd.f32 %v30277_v16, %v22560_v22 }
0x10da   : > { %v22539_v47 = vrot.slane %v30281_v40, 1  ;;  %v22554_v45 = vrot.slane %v30281_v40, 7 }
0x10db   : > { %v22561_v48 = vadd.f32 %v22553_v61, %v22546_v20  ;;  %v22568_v33 = vmul.f32 0.25, %v22564_v24 }
0x10dc   : > { %v22540_v46 = vsel %vm340_vm3, %v22537_v2, %v22539_v47  ;;  %v22548_v35 = vadd.f32 %v30281_v40, %v22539_v47  ;;  %v22555_v17 = vsel %vm18707_vm8, %v22552_v54, %v22554_v45 }
0x10dd   : > { %v22565_v19 = vadd.f32 %v30279_v52, %v22561_v48  ;;  %v22581_v1 = vand.u32 4294901760, %v22568_v33  ;;  %v22547_v39 = vadd.f32 %v30279_v52, %v22540_v46  ;;  %v30283_v26 = vpop.eup %30282 }
0x10de   : > { %v22563_v7 = vadd.f32 %v22554_v45, %v22548_v35 }
0x10df   : > { %v22569_v6 = vmul.f32 0.25, %v22565_v19  ;;  %v22661_v53 = vsub.f32 %v22568_v33, %v22581_v1  ;;  %v22562_v55 = vadd.f32 %v22555_v17, %v22547_v39 }
0x10e0   : > { %v22567_v18 = vadd.f32 %v30283_v26, %v22563_v7 }
0x10e1   : > { %v22584_v43 = vand.u32 4294901760, %v22569_v6  ;;  %v22566_v56 = vadd.f32 %v30281_v40, %v22562_v55  ;;  %v22662_v50 = vand.u32 4294901760, %v22661_v53 }
0x10e2   : > { %v22571_v42 = vmul.f32 0.25, %v22567_v18 }
0x10e3   : > { %v28664_v62 = vpack.c.bf16 %v22584_v43, %v22581_v1  ;;  %v22668_v5 = vsub.f32 %v22569_v6, %v22584_v43  ;;  %v22570_v11 = vmul.f32 0.25, %v22566_v56  ;;  %v22663_v13 = vsub.f32 %v22661_v53, %v22662_v50 }
0x10e4   : > { %v22578_v37 = vsel %vm18707_vm8, %v22571_v42, 0 }
0x10e5   : > { %28665 = vmatpush3.bf16.msra.mxu1 %v28664_v62  ;;  %v22587_v36 = vand.u32 4294901760, %v22570_v11  ;;  %v22590_v21 = vand.u32 4294901760, %v22578_v37  ;;  %v22669_v29 = vand.u32 4294901760, %v22668_v5  ;;  %v28676_v10 = vpack.c.bf16 %v22668_v5, %v22661_v53 }
0x10e6   : > { %28666 = vmatprep.subr.bf16.mxu1 %v38652_v41  ;;  %v22664_v28 = vand.u32 4294901760, %v22663_v13 }
0x10e7   : > { %v28667_v27 = vpack.c.bf16 %v22590_v21, %v22587_v36  ;;  %v22675_v51 = vsub.f32 %v22570_v11, %v22587_v36  ;;  %v22682_v63 = vsub.f32 %v22578_v37, %v22590_v21  ;;  %v22670_v8 = vsub.f32 %v22668_v5, %v22669_v29 }
0x10e8   : > { %v28688_v30 = vpack.c.bf16 %v22669_v29, %v22662_v50 }
0x10e9   : > { %28668 = vmatpush3.bf16.msra.mxu1 %v28667_v27  ;;  %v22671_v60 = vand.u32 4294901760, %v22670_v8  ;;  %v22676_v34 = vand.u32 4294901760, %v22675_v51  ;;  %v22683_v16 = vand.u32 4294901760, %v22682_v63  ;;  %v28679_v25 = vpack.c.bf16 %v22682_v63, %v22675_v51 }
0x10ea   : > { %28669 = vmatprep.subr.bf16.mxu1 %v38652_v41 }
0x10eb   : > { %v28670_v12 = vpack.c.bf16 %v22671_v60, %v22664_v28  ;;  %v22677_v4 = vsub.f32 %v22675_v51, %v22676_v34  ;;  %v22684_v0 = vsub.f32 %v22682_v63, %v22683_v16  ;;  %v28691_v59 = vpack.c.bf16 %v22683_v16, %v22676_v34 }
0x10ec   : > { %28372 = vmatmul.mubr.f32.vlgmr.msra.gmra.mrb[70].mxu1 %v22653_v15 }
0x10ed   : > { %28671 = vmatpush3.bf16.msra.mxu1 %v28670_v12  ;;  %v22678_v58 = vand.u32 4294901760, %v22677_v4  ;;  %v22685_v23 = vand.u32 4294901760, %v22684_v0  ;;  %28382 = vmatprep.mubr.msk.f32.mxu1 %vm30324_vm6, %v38626_v49 }
0x10ee   : > { %28672 = vmatprep.subr.bf16.mxu1 %v38652_v41 }
0x10ef   : > { %v28673_v14 = vpack.c.bf16 %v22685_v23, %v22678_v58 }
0x10f1   : > { %28674 = vmatpush3.bf16.msra.mxu1 %v28673_v14 }
0x10f2   : > { %28675 = vmatprep.subr.bf16.mxu1 %v38652_v41 }
0x10f4   : > { %28383 = vmatmul.mubr.f32.vlgmr.msra.gmra.mrb[70].mxu1 %v36415_v9 }
0x10f5   : > { %28677 = vmatpush3.bf16.msra.mxu1 %v28676_v10  ;;  %28393 = vmatprep.mubr.msk.f32.mxu1 %vm30324_vm6, %v38626_v49 }
0x10f6   : > { %28678 = vmatprep.subr.bf16.mxu1 %v38652_v41 }
0x10f9   : > { %28680 = vmatpush3.bf16.msra.mxu1 %v28679_v25 }
0x10fa   : > { %28681 = vmatprep.subr.bf16.mxu1 %v38652_v41 }
0x10fc   : > { %28394 = vmatmul.mubr.f32.vlgmr.msra.gmra.mrb[70].mxu1 %v36420_v3 }
0x10fd   : > { %28683 = vmatpush3.bf16.msra.mxu1 %v28664_v62  ;;  %28404 = vmatprep.mubr.msk.f32.mxu1 %vm30324_vm6, %v38626_v49 }
0x10fe   : > { %28684 = vmatprep.subr.bf16.mxu1 %v38652_v41 }
0x1101   : > { %28686 = vmatpush3.bf16.msra.mxu1 %v28667_v27 }
0x1102   : > { %28687 = vmatprep.subr.bf16.mxu1 %v38652_v41 }
0x1104   : > { %28405 = vmatmul.mubr.f32.vlgmr.msra.gmra.mrb[70].mxu1 %v22651_v44 }
0x1105   : > { %28689 = vmatpush3.bf16.msra.mxu1 %v28688_v30  ;;  %28415 = vmatprep.mubr.msk.f32.mxu1 %vm30324_vm6, %v38626_v49 }
0x1106   : > { %28690 = vmatprep.subr.bf16.mxu1 %v38652_v41 }
0x1109   : > { %28692 = vmatpush3.bf16.msra.mxu1 %v28691_v59 }
0x110a   : > { %28693 = vmatprep.subr.bf16.mxu1 %v38652_v41 }
0x110c   : > { %28416 = vmatmul.mubr.f32.vlgmr.msra.gmra.mrb[70].mxu1 %v36415_v9 }
0x110d   : > { %28695 = vmatpush3.bf16.msra.mxu1 %v28664_v62  ;;  %28426 = vmatprep.mubr.msk.f32.mxu1 %vm30324_vm6, %v38626_v49 }
0x110e   : > { %28696 = vmatprep.subr.bf16.mxu1 %v38652_v41 }
0x1111   : > { %28698 = vmatpush3.bf16.msra.mxu1 %v28667_v27 }
0x1114   : > { %28427 = vmatmul.mubr.f32.vlgmr.msra.gmra.mrb[70].mxu1 %v36415_v9 }
0x11e7   : > { %v23061_v52 = vpop.f32.mrb[70].mxu1 }
0x11e8   : > { %23066 = vst.msk [vmem:[%s276_s17] sm:$0xf] %vm23065_vm11, %v23061_v52  ;;  %v28428_v32 = vpop.f32.mrb[71].mxu1 }
0x11e9 PF: > { %s17_s24 = sadd.s32 1, %s30320_s24  }
0x11ea   : > { %p14_p4 = scmp.ge.s32.totalorder %s17_s24, 4  }
0x11ec   :  { %16 = sbr.rel (!%p14_p4) target bundleno = 1 (0x1), region = 94 }

</bundles_post_ra>
